<compile_context>
chip_gen: v6e
topology: v6e:2x2x1
jax: 0.10.0
libtpu: 0.0.40
codegen_flags: <defaults>
</compile_context>

<pallas_src>
import functools

import jax
import jax.numpy as jnp
from jax.experimental import pallas as pl
from jax.experimental.pallas import tpu as pltpu

CP = 128                         # lane-padded channel width (TPU lane axis)
_VMEM_LIMIT = 32 * 1024 * 1024   # safe on v5e/v6e (128 MiB) and v7x (64 MiB)


# ----------------------------- small helpers --------------------------------

def _compiler_params():
    return pltpu.CompilerParams(
        dimension_semantics=("parallel",),      # batch axis -> megacore / 2 TCs
        vmem_limit_bytes=_VMEM_LIMIT,
    )


def _cost(flops, bytes_accessed):
    return pl.CostEstimate(flops=int(flops), transcendentals=0,
                           bytes_accessed=int(bytes_accessed))


def _nbytes(*arrs):
    return sum(int(a.size) * a.dtype.itemsize for a in arrs)


def _accum_conv3x3(acc_ref, get_slice, w_ref, H, W, *, init):
    """acc (H*W, CP) fp32 (+)= sum_{kh,kw} slice(kh,kw) @ w[kh*3+kw].

    Each `get_slice(kh, kw)` is an (H, W, CP) shifted window read from a
    halo-padded VMEM block; 9 lane-dense MXU matmuls, fp32 accumulation."""
    first = True
    for kh in range(3):
        for kw in range(3):
            xs = get_slice(kh, kw).reshape(H * W, CP).astype(jnp.bfloat16)
            part = jnp.dot(xs, w_ref[kh * 3 + kw],
                           preferred_element_type=jnp.float32)
            if init and first:
                acc_ref[...] = part          # skip the zero-fill pass
            else:
                acc_ref[...] += part
            first = False


# ------------------------------ Pallas kernels -------------------------------

def _enc_kernel(x_ref, w1_ref, b1_ref, w2_ref, b2_ref, aw_ref, ab_ref,
                e1p_ref, e2_ref, lab_ref,
                acc1_ref, row_ref, p1p_ref, acc2_ref, *, H, W):
    """Fused encoder: stage-1 3x3 conv + bias + ReLU, 2x2 max-pool (kept in
    VMEM scratch, never touches HBM), stage-2 3x3 conv + bias + ReLU, and the
    aux head (global-average-pool + linear, classes=1 lane-padded)."""
    Hh, Wh = H // 2, W // 2

    # ---- encoder stage 1: 3x3 conv (9 shifted MXU matmuls) + bias + ReLU ----
    _accum_conv3x3(acc1_ref,
                   lambda kh, kw: x_ref[0, kh:kh + H, kw:kw + W, :],
                   w1_ref, H, W, init=True)
    y1 = jnp.maximum(acc1_ref[...] + b1_ref[...], 0.0)          # (H*W, CP) fp32

    # full-resolution skip activation with zeroed 1-pixel halo (decoder input)
    e1p_ref[...] = jnp.zeros_like(e1p_ref)
    e1p_ref[0, 1:H + 1, 1:W + 1, :] = y1.reshape(H, W, CP)

    # ---- fused 2x2 max-pool: row pairs via (layout no-op) reshape + max,
    # column pairs via stride-2 sublane loads from VMEM scratch --------------
    row_ref[...] = jnp.max(y1.reshape(Hh, 2, W, CP), axis=1)     # (Hh, W, CP)
    pool = jnp.maximum(row_ref[:, pl.ds(0, Wh, stride=2), :],
                       row_ref[:, pl.ds(1, Wh, stride=2), :])    # (Hh, Wh, CP)
    p1p_ref[...] = jnp.zeros_like(p1p_ref)                       # zero halo
    p1p_ref[1:Hh + 1, 1:Wh + 1, :] = pool                        # stays in VMEM

    # ---- encoder stage 2: 3x3 conv + bias + ReLU ----------------------------
    _accum_conv3x3(acc2_ref,
                   lambda kh, kw: p1p_ref[kh:kh + Hh, kw:kw + Wh, :],
                   w2_ref, Hh, Wh, init=True)
    y2 = jnp.maximum(acc2_ref[...] + b2_ref[...], 0.0)           # (Hh*Wh, CP)
    e2_ref[0] = y2.reshape(Hh, Wh, CP)

    # ---- aux head: mean(y2) @ W + b == mean(y2 @ W) + b ---------------------
    # TODO(synk): Dropout(p=0.3) before the aux linear is identity at inference.
    t = jnp.dot(y2.astype(jnp.bfloat16), aw_ref[...],
                preferred_element_type=jnp.float32)              # (Hh*Wh, CP)
    lab_ref[0] = (jnp.sum(t, axis=0, keepdims=True) * (1.0 / (Hh * Wh))
                  + ab_ref[...])


def _dec_kernel(u_ref, s_ref, wu_ref, ws_ref, b_ref, sw_ref, sb_ref,
                o_ref, acc_ref, *, H, W):
    """Fused decoder: 3x3 conv over [upsampled-e2 ; e1-skip] (split weights ==
    conv over channel concat) + bias + ReLU + 1x1 segmentation head."""
    _accum_conv3x3(acc_ref,
                   lambda kh, kw: u_ref[0, kh:kh + H, kw:kw + W, :],
                   wu_ref, H, W, init=True)
    _accum_conv3x3(acc_ref,
                   lambda kh, kw: s_ref[0, kh:kh + H, kw:kw + W, :],
                   ws_ref, H, W, init=False)
    d1 = jnp.maximum(acc_ref[...] + b_ref[...], 0.0)             # (H*W, CP)
    m = jnp.dot(d1.astype(jnp.bfloat16), sw_ref[...],
                preferred_element_type=jnp.float32) + sb_ref[...]
    o_ref[0] = m.reshape(H, W, CP)


# ------------------------------ call wrappers --------------------------------
# NOTE: at these toy shapes a whole image fits one VMEM block; for large images
# the next step would be an additional H-tile grid axis with haloed blocks.

def _enc_call(xp, w1, b1, w2, b2, aw, ab, *, H, W):
    B = xp.shape[0]
    Hh, Wh = H // 2, W // 2
    kern = functools.partial(_enc_kernel, H=H, W=W)
    out_bytes = B * CP * 4 * ((H + 2) * (W + 2) + Hh * Wh + 1)
    flops = 2 * B * CP * CP * (9 * H * W + 9 * Hh * Wh + Hh * Wh)
    return pl.pallas_call(
        kern,
        out_shape=[jax.ShapeDtypeStruct((B, H + 2, W + 2, CP), jnp.float32),
                   jax.ShapeDtypeStruct((B, Hh, Wh, CP), jnp.float32),
                   jax.ShapeDtypeStruct((B, 1, CP), jnp.float32)],
        grid_spec=pltpu.PrefetchScalarGridSpec(
            num_scalar_prefetch=0,
            grid=(B,),
            in_specs=[
                pl.BlockSpec((1, H + 2, W + 2, CP), lambda bi: (bi, 0, 0, 0)),
                pl.BlockSpec((9, CP, CP), lambda bi: (0, 0, 0)),
                pl.BlockSpec((1, CP), lambda bi: (0, 0)),
                pl.BlockSpec((9, CP, CP), lambda bi: (0, 0, 0)),
                pl.BlockSpec((1, CP), lambda bi: (0, 0)),
                pl.BlockSpec((CP, CP), lambda bi: (0, 0)),
                pl.BlockSpec((1, CP), lambda bi: (0, 0)),
            ],
            out_specs=[
                pl.BlockSpec((1, H + 2, W + 2, CP), lambda bi: (bi, 0, 0, 0)),
                pl.BlockSpec((1, Hh, Wh, CP), lambda bi: (bi, 0, 0, 0)),
                pl.BlockSpec((1, 1, CP), lambda bi: (bi, 0, 0)),
            ],
            scratch_shapes=[
                pltpu.VMEM((H * W, CP), jnp.float32),        # stage-1 acc
                pltpu.VMEM((Hh, W, CP), jnp.float32),        # row-pair max
                pltpu.VMEM((Hh + 2, Wh + 2, CP), jnp.float32),  # pooled, haloed
                pltpu.VMEM((Hh * Wh, CP), jnp.float32),      # stage-2 acc
            ],
        ),
        compiler_params=_compiler_params(),
        cost_estimate=_cost(flops, _nbytes(xp, w1, b1, w2, b2, aw, ab) + out_bytes),
    )(xp, w1, b1, w2, b2, aw, ab)


def _dec_call(u2p, e1p, wu, ws, b, sw, sb, *, H, W):
    B = u2p.shape[0]
    kern = functools.partial(_dec_kernel, H=H, W=W)
    out_bytes = B * H * W * CP * 4
    return pl.pallas_call(
        kern,
        out_shape=jax.ShapeDtypeStruct((B, H, W, CP), jnp.float32),
        grid_spec=pltpu.PrefetchScalarGridSpec(
            num_scalar_prefetch=0,
            grid=(B,),
            in_specs=[
                pl.BlockSpec((1, H + 2, W + 2, CP), lambda bi: (bi, 0, 0, 0)),
                pl.BlockSpec((1, H + 2, W + 2, CP), lambda bi: (bi, 0, 0, 0)),
                pl.BlockSpec((9, CP, CP), lambda bi: (0, 0, 0)),
                pl.BlockSpec((9, CP, CP), lambda bi: (0, 0, 0)),
                pl.BlockSpec((1, CP), lambda bi: (0, 0)),
                pl.BlockSpec((CP, CP), lambda bi: (0, 0)),
                pl.BlockSpec((1, CP), lambda bi: (0, 0)),
            ],
            out_specs=pl.BlockSpec((1, H, W, CP), lambda bi: (bi, 0, 0, 0)),
            scratch_shapes=[pltpu.VMEM((H * W, CP), jnp.float32)],
        ),
        compiler_params=_compiler_params(),
        cost_estimate=_cost(2 * B * H * W * CP * CP * 19,
                            _nbytes(u2p, e1p, wu, ws, b, sw, sb) + out_bytes),
    )(u2p, e1p, wu, ws, b, sw, sb)


# ---------------------------------- model ------------------------------------

def init_params(key, in_channels, n_class, c1=8, c2=16):
    """Tiny deterministic Unet-style parameters, stored lane-padded to CP=128.

    Weights are zero-padded (padded channels contribute exactly 0) and cast to
    bfloat16 (MXU operand dtype); biases stay fp32."""
    ks = jax.random.split(key, 6)
    s = 0.1

    def pad_w(w):   # (..., cin, cout) -> (..., CP, CP) bf16
        pad = [(0, 0)] * (w.ndim - 2) + [(0, CP - w.shape[-2]),
                                         (0, CP - w.shape[-1])]
        return jnp.pad(w, pad).astype(jnp.bfloat16)

    def zero_b():
        return jnp.zeros((1, CP), jnp.float32)

    return {
        "enc1_w": pad_w(s * jax.random.normal(ks[0], (9, in_channels, c1), jnp.float32)),
        "enc1_b": zero_b(),
        "enc2_w": pad_w(s * jax.random.normal(ks[1], (9, c1, c2), jnp.float32)),
        "enc2_b": zero_b(),
        # decoder conv over concat([upsampled e2, e1]) == split-weight sum
        "dec_w_u": pad_w(s * jax.random.normal(ks[2], (9, c2, c1), jnp.float32)),
        "dec_w_s": pad_w(s * jax.random.normal(ks[3], (9, c1, c1), jnp.float32)),
        "dec_b": zero_b(),
        "seg_w": pad_w(s * jax.random.normal(ks[4], (c1, n_class), jnp.float32)),
        "seg_b": zero_b(),
        "aux_w": pad_w(s * jax.random.normal(ks[5], (c2, 1), jnp.float32)),
        "aux_b": zero_b(),
    }


def seg_model_forward(params, x_nchw, *, n_class=1):
    """x_nchw: (B, Cin, H, W) -> (mask (B, n_class, H, W), label (B, 1)).

    Compute layout is NHWC with channels zero-padded to the 128-lane axis.
    H and W must be even (2x2 max-pool), as in the original toy config."""
    B, Cin, H, W = x_nchw.shape
    assert H % 2 == 0 and W % 2 == 0, "even spatial dims required (2x2 pool)"

    x = jnp.transpose(x_nchw, (0, 2, 3, 1)).astype(jnp.float32)   # NCHW -> NHWC
    # 1-pixel conv halo + lane padding of the network input (tiny XLA glue).
    xp = jnp.pad(x, ((0, 0), (1, 1), (1, 1), (0, CP - Cin)))

    # fused encoder: conv+ReLU, max-pool (VMEM-resident), conv+ReLU, aux head.
    e1p, e2, lab = _enc_call(xp, params["enc1_w"], params["enc1_b"],
                             params["enc2_w"], params["enc2_b"],
                             params["aux_w"], params["aux_b"], H=H, W=W)

    # TODO(synk): nearest-2x upsample + halo pad of e2 remains XLA glue; it
    # could be folded into the decoder kernel via parity-decomposed weights.
    u2 = jnp.repeat(jnp.repeat(e2, 2, axis=1), 2, axis=2)
    u2p = jnp.pad(u2, ((0, 0), (1, 1), (1, 1), (0, 0)))

    # decoder: conv over [upsampled e2 ; e1 skip] + ReLU + 1x1 seg head, fused.
    mask_p = _dec_call(u2p, e1p, params["dec_w_u"], params["dec_w_s"],
                       params["dec_b"], params["seg_w"], params["seg_b"],
                       H=H, W=W)

    mask = jnp.transpose(mask_p[..., :n_class], (0, 3, 1, 2))     # NHWC -> NCHW
    label = lab[:, 0, :1]                                         # (B, 1)
    return mask, label


# ---------------------------------- main --------------------------------------

if __name__ == "__main__":
    B, Cin, H, W = 2, 4, 16, 16
    n_class = 1

    key = jax.random.PRNGKey(0)
    k_x, k_p = jax.random.split(key)
    x = jax.random.normal(k_x, (B, Cin, H, W), jnp.float32)
    params = init_params(k_p, Cin, n_class)

    fwd = jax.jit(seg_model_forward)
    mask, label = fwd(params, x)
    jax.block_until_ready((mask, label))

    assert mask.shape == (B, n_class, H, W), mask.shape
    assert label.shape == (B, 1), label.shape
    print("KERNEL_OK")
</pallas_src>

<mosaic_0001>
module attributes {stable_mosaic.version = 11 : i64} {
  func.func @_enc_kernel(%arg0: i32, %arg1: memref<1x18x18x128xf32, #tpu.memory_space<vmem>>, %arg2: memref<9x128x128xbf16, #tpu.memory_space<vmem>>, %arg3: memref<1x128xf32, #tpu.memory_space<vmem>>, %arg4: memref<9x128x128xbf16, #tpu.memory_space<vmem>>, %arg5: memref<1x128xf32, #tpu.memory_space<vmem>>, %arg6: memref<128x128xbf16, #tpu.memory_space<vmem>>, %arg7: memref<1x128xf32, #tpu.memory_space<vmem>>, %arg8: memref<1x18x18x128xf32, #tpu.memory_space<vmem>>, %arg9: memref<1x8x8x128xf32, #tpu.memory_space<vmem>>, %arg10: memref<1x1x128xf32, #tpu.memory_space<vmem>>, %arg11: memref<256x128xf32, #tpu.memory_space<vmem>>, %arg12: memref<8x16x128xf32, #tpu.memory_space<vmem>>, %arg13: memref<10x10x128xf32, #tpu.memory_space<vmem>>, %arg14: memref<64x128xf32, #tpu.memory_space<vmem>>) attributes {dimension_semantics = [#tpu.dimension_semantics<parallel>], iteration_bounds = array<i64: 2>, scalar_prefetch = 0 : i64, scratch_operands = 4 : i64, tpu.core_type = #tpu.core_type<tc>, window_params = [{transform_indices = @transform_0, window_bounds = array<i64: 1, 18, 18, 128>}, {pipeline_mode = #tpu.pipeline_mode<synchronous>, transform_indices = @transform_1, window_bounds = array<i64: 9, 128, 128>}, {pipeline_mode = #tpu.pipeline_mode<synchronous>, transform_indices = @transform_2, window_bounds = array<i64: 1, 128>}, {pipeline_mode = #tpu.pipeline_mode<synchronous>, transform_indices = @transform_3, window_bounds = array<i64: 9, 128, 128>}, {pipeline_mode = #tpu.pipeline_mode<synchronous>, transform_indices = @transform_4, window_bounds = array<i64: 1, 128>}, {pipeline_mode = #tpu.pipeline_mode<synchronous>, transform_indices = @transform_5, window_bounds = array<i64: 128, 128>}, {pipeline_mode = #tpu.pipeline_mode<synchronous>, transform_indices = @transform_6, window_bounds = array<i64: 1, 128>}, {transform_indices = @transform_7, window_bounds = array<i64: 1, 18, 18, 128>}, {transform_indices = @transform_8, window_bounds = array<i64: 1, 8, 8, 128>}, {transform_indices = @transform_9, window_bounds = array<i64: 1, 1, 128>}]} {
    %c0 = arith.constant 0 : index
    %c0_0 = arith.constant 0 : index
    %c0_1 = arith.constant 0 : index
    %c0_2 = arith.constant 0 : index
    %0 = vector.load %arg1[%c0, %c0_0, %c0_1, %c0_2] : memref<1x18x18x128xf32, #tpu.memory_space<vmem>>, vector<1x16x16x128xf32>
    %1 = vector.shape_cast %0 : vector<1x16x16x128xf32> to vector<16x16x128xf32>
    %2 = vector.shape_cast %1 : vector<16x16x128xf32> to vector<256x128xf32>
    %3 = arith.truncf %2 : vector<256x128xf32> to vector<256x128xbf16>
    %c0_3 = arith.constant 0 : index
    %c0_4 = arith.constant 0 : index
    %c0_5 = arith.constant 0 : index
    %4 = vector.load %arg2[%c0_3, %c0_4, %c0_5] : memref<9x128x128xbf16, #tpu.memory_space<vmem>>, vector<1x128x128xbf16>
    %5 = vector.shape_cast %4 : vector<1x128x128xbf16> to vector<128x128xbf16>
    %cst = arith.constant dense<0.000000e+00> : vector<256x128xf32>
    %6 = tpu.matmul %3, %5, %cst {dimension_numbers = #tpu.dot_dimension_numbers<[1], [0], [0], [1], [0, 0, 1, 1], [], []>} : vector<256x128xbf16>, vector<128x128xbf16>, vector<256x128xf32> -> vector<256x128xf32>
    %c0_6 = arith.constant 0 : index
    %c0_7 = arith.constant 0 : index
    %7 = vector.load %arg11[%c0_6, %c0_7] : memref<256x128xf32, #tpu.memory_space<vmem>>, vector<256x128xf32>
    tpu.vector_store %arg11[%c0_6, %c0_7], %6 {strides = array<i32>} : memref<256x128xf32, #tpu.memory_space<vmem>>, vector<256x128xf32>,
    %c0_8 = arith.constant 0 : index
    %c0_9 = arith.constant 0 : index
    %c1 = arith.constant 1 : index
    %c0_10 = arith.constant 0 : index
    %8 = vector.load %arg1[%c0_8, %c0_9, %c1, %c0_10] : memref<1x18x18x128xf32, #tpu.memory_space<vmem>>, vector<1x16x16x128xf32>
    %9 = vector.shape_cast %8 : vector<1x16x16x128xf32> to vector<16x16x128xf32>
    %10 = vector.shape_cast %9 : vector<16x16x128xf32> to vector<256x128xf32>
    %11 = arith.truncf %10 : vector<256x128xf32> to vector<256x128xbf16>
    %c1_11 = arith.constant 1 : index
    %c0_12 = arith.constant 0 : index
    %c0_13 = arith.constant 0 : index
    %12 = vector.load %arg2[%c1_11, %c0_12, %c0_13] : memref<9x128x128xbf16, #tpu.memory_space<vmem>>, vector<1x128x128xbf16>
    %13 = vector.shape_cast %12 : vector<1x128x128xbf16> to vector<128x128xbf16>
    %cst_14 = arith.constant dense<0.000000e+00> : vector<256x128xf32>
    %14 = tpu.matmul %11, %13, %cst_14 {dimension_numbers = #tpu.dot_dimension_numbers<[1], [0], [0], [1], [0, 0, 1, 1], [], []>} : vector<256x128xbf16>, vector<128x128xbf16>, vector<256x128xf32> -> vector<256x128xf32>
    %c0_15 = arith.constant 0 : index
    %c0_16 = arith.constant 0 : index
    %15 = vector.load %arg11[%c0_15, %c0_16] : memref<256x128xf32, #tpu.memory_space<vmem>>, vector<256x128xf32>
    %16 = arith.addf %15, %14 : vector<256x128xf32>
    %c0_17 = arith.constant 0 : index
    %c0_18 = arith.constant 0 : index
    %17 = vector.load %arg11[%c0_17, %c0_18] : memref<256x128xf32, #tpu.memory_space<vmem>>, vector<256x128xf32>
    tpu.vector_store %arg11[%c0_17, %c0_18], %16 {strides = array<i32>} : memref<256x128xf32, #tpu.memory_space<vmem>>, vector<256x128xf32>,
    %c0_19 = arith.constant 0 : index
    %c0_20 = arith.constant 0 : index
    %c2 = arith.constant 2 : index
    %c0_21 = arith.constant 0 : index
    %18 = vector.load %arg1[%c0_19, %c0_20, %c2, %c0_21] : memref<1x18x18x128xf32, #tpu.memory_space<vmem>>, vector<1x16x16x128xf32>
    %19 = vector.shape_cast %18 : vector<1x16x16x128xf32> to vector<16x16x128xf32>
    %20 = vector.shape_cast %19 : vector<16x16x128xf32> to vector<256x128xf32>
    %21 = arith.truncf %20 : vector<256x128xf32> to vector<256x128xbf16>
    %c2_22 = arith.constant 2 : index
    %c0_23 = arith.constant 0 : index
    %c0_24 = arith.constant 0 : index
    %22 = vector.load %arg2[%c2_22, %c0_23, %c0_24] : memref<9x128x128xbf16, #tpu.memory_space<vmem>>, vector<1x128x128xbf16>
    %23 = vector.shape_cast %22 : vector<1x128x128xbf16> to vector<128x128xbf16>
    %cst_25 = arith.constant dense<0.000000e+00> : vector<256x128xf32>
    %24 = tpu.matmul %21, %23, %cst_25 {dimension_numbers = #tpu.dot_dimension_numbers<[1], [0], [0], [1], [0, 0, 1, 1], [], []>} : vector<256x128xbf16>, vector<128x128xbf16>, vector<256x128xf32> -> vector<256x128xf32>
    %c0_26 = arith.constant 0 : index
    %c0_27 = arith.constant 0 : index
    %25 = vector.load %arg11[%c0_26, %c0_27] : memref<256x128xf32, #tpu.memory_space<vmem>>, vector<256x128xf32>
    %26 = arith.addf %25, %24 : vector<256x128xf32>
    %c0_28 = arith.constant 0 : index
    %c0_29 = arith.constant 0 : index
    %27 = vector.load %arg11[%c0_28, %c0_29] : memref<256x128xf32, #tpu.memory_space<vmem>>, vector<256x128xf32>
    tpu.vector_store %arg11[%c0_28, %c0_29], %26 {strides = array<i32>} : memref<256x128xf32, #tpu.memory_space<vmem>>, vector<256x128xf32>,
    %c0_30 = arith.constant 0 : index
    %c1_31 = arith.constant 1 : index
    %c0_32 = arith.constant 0 : index
    %c0_33 = arith.constant 0 : index
    %28 = vector.load %arg1[%c0_30, %c1_31, %c0_32, %c0_33] : memref<1x18x18x128xf32, #tpu.memory_space<vmem>>, vector<1x16x16x128xf32>
    %29 = vector.shape_cast %28 : vector<1x16x16x128xf32> to vector<16x16x128xf32>
    %30 = vector.shape_cast %29 : vector<16x16x128xf32> to vector<256x128xf32>
    %31 = arith.truncf %30 : vector<256x128xf32> to vector<256x128xbf16>
    %c3 = arith.constant 3 : index
    %c0_34 = arith.constant 0 : index
    %c0_35 = arith.constant 0 : index
    %32 = vector.load %arg2[%c3, %c0_34, %c0_35] : memref<9x128x128xbf16, #tpu.memory_space<vmem>>, vector<1x128x128xbf16>
    %33 = vector.shape_cast %32 : vector<1x128x128xbf16> to vector<128x128xbf16>
    %cst_36 = arith.constant dense<0.000000e+00> : vector<256x128xf32>
    %34 = tpu.matmul %31, %33, %cst_36 {dimension_numbers = #tpu.dot_dimension_numbers<[1], [0], [0], [1], [0, 0, 1, 1], [], []>} : vector<256x128xbf16>, vector<128x128xbf16>, vector<256x128xf32> -> vector<256x128xf32>
    %c0_37 = arith.constant 0 : index
    %c0_38 = arith.constant 0 : index
    %35 = vector.load %arg11[%c0_37, %c0_38] : memref<256x128xf32, #tpu.memory_space<vmem>>, vector<256x128xf32>
    %36 = arith.addf %35, %34 : vector<256x128xf32>
    %c0_39 = arith.constant 0 : index
    %c0_40 = arith.constant 0 : index
    %37 = vector.load %arg11[%c0_39, %c0_40] : memref<256x128xf32, #tpu.memory_space<vmem>>, vector<256x128xf32>
    tpu.vector_store %arg11[%c0_39, %c0_40], %36 {strides = array<i32>} : memref<256x128xf32, #tpu.memory_space<vmem>>, vector<256x128xf32>,
    %c0_41 = arith.constant 0 : index
    %c1_42 = arith.constant 1 : index
    %c1_43 = arith.constant 1 : index
    %c0_44 = arith.constant 0 : index
    %38 = vector.load %arg1[%c0_41, %c1_42, %c1_43, %c0_44] : memref<1x18x18x128xf32, #tpu.memory_space<vmem>>, vector<1x16x16x128xf32>
    %39 = vector.shape_cast %38 : vector<1x16x16x128xf32> to vector<16x16x128xf32>
    %40 = vector.shape_cast %39 : vector<16x16x128xf32> to vector<256x128xf32>
    %41 = arith.truncf %40 : vector<256x128xf32> to vector<256x128xbf16>
    %c4 = arith.constant 4 : index
    %c0_45 = arith.constant 0 : index
    %c0_46 = arith.constant 0 : index
    %42 = vector.load %arg2[%c4, %c0_45, %c0_46] : memref<9x128x128xbf16, #tpu.memory_space<vmem>>, vector<1x128x128xbf16>
    %43 = vector.shape_cast %42 : vector<1x128x128xbf16> to vector<128x128xbf16>
    %cst_47 = arith.constant dense<0.000000e+00> : vector<256x128xf32>
    %44 = tpu.matmul %41, %43, %cst_47 {dimension_numbers = #tpu.dot_dimension_numbers<[1], [0], [0], [1], [0, 0, 1, 1], [], []>} : vector<256x128xbf16>, vector<128x128xbf16>, vector<256x128xf32> -> vector<256x128xf32>
    %c0_48 = arith.constant 0 : index
    %c0_49 = arith.constant 0 : index
    %45 = vector.load %arg11[%c0_48, %c0_49] : memref<256x128xf32, #tpu.memory_space<vmem>>, vector<256x128xf32>
    %46 = arith.addf %45, %44 : vector<256x128xf32>
    %c0_50 = arith.constant 0 : index
    %c0_51 = arith.constant 0 : index
    %47 = vector.load %arg11[%c0_50, %c0_51] : memref<256x128xf32, #tpu.memory_space<vmem>>, vector<256x128xf32>
    tpu.vector_store %arg11[%c0_50, %c0_51], %46 {strides = array<i32>} : memref<256x128xf32, #tpu.memory_space<vmem>>, vector<256x128xf32>,
    %c0_52 = arith.constant 0 : index
    %c1_53 = arith.constant 1 : index
    %c2_54 = arith.constant 2 : index
    %c0_55 = arith.constant 0 : index
    %48 = vector.load %arg1[%c0_52, %c1_53, %c2_54, %c0_55] : memref<1x18x18x128xf32, #tpu.memory_space<vmem>>, vector<1x16x16x128xf32>
    %49 = vector.shape_cast %48 : vector<1x16x16x128xf32> to vector<16x16x128xf32>
    %50 = vector.shape_cast %49 : vector<16x16x128xf32> to vector<256x128xf32>
    %51 = arith.truncf %50 : vector<256x128xf32> to vector<256x128xbf16>
    %c5 = arith.constant 5 : index
    %c0_56 = arith.constant 0 : index
    %c0_57 = arith.constant 0 : index
    %52 = vector.load %arg2[%c5, %c0_56, %c0_57] : memref<9x128x128xbf16, #tpu.memory_space<vmem>>, vector<1x128x128xbf16>
    %53 = vector.shape_cast %52 : vector<1x128x128xbf16> to vector<128x128xbf16>
    %cst_58 = arith.constant dense<0.000000e+00> : vector<256x128xf32>
    %54 = tpu.matmul %51, %53, %cst_58 {dimension_numbers = #tpu.dot_dimension_numbers<[1], [0], [0], [1], [0, 0, 1, 1], [], []>} : vector<256x128xbf16>, vector<128x128xbf16>, vector<256x128xf32> -> vector<256x128xf32>
    %c0_59 = arith.constant 0 : index
    %c0_60 = arith.constant 0 : index
    %55 = vector.load %arg11[%c0_59, %c0_60] : memref<256x128xf32, #tpu.memory_space<vmem>>, vector<256x128xf32>
    %56 = arith.addf %55, %54 : vector<256x128xf32>
    %c0_61 = arith.constant 0 : index
    %c0_62 = arith.constant 0 : index
    %57 = vector.load %arg11[%c0_61, %c0_62] : memref<256x128xf32, #tpu.memory_space<vmem>>, vector<256x128xf32>
    tpu.vector_store %arg11[%c0_61, %c0_62], %56 {strides = array<i32>} : memref<256x128xf32, #tpu.memory_space<vmem>>, vector<256x128xf32>,
    %c0_63 = arith.constant 0 : index
    %c2_64 = arith.constant 2 : index
    %c0_65 = arith.constant 0 : index
    %c0_66 = arith.constant 0 : index
    %58 = vector.load %arg1[%c0_63, %c2_64, %c0_65, %c0_66] : memref<1x18x18x128xf32, #tpu.memory_space<vmem>>, vector<1x16x16x128xf32>
    %59 = vector.shape_cast %58 : vector<1x16x16x128xf32> to vector<16x16x128xf32>
    %60 = vector.shape_cast %59 : vector<16x16x128xf32> to vector<256x128xf32>
    %61 = arith.truncf %60 : vector<256x128xf32> to vector<256x128xbf16>
    %c6 = arith.constant 6 : index
    %c0_67 = arith.constant 0 : index
    %c0_68 = arith.constant 0 : index
    %62 = vector.load %arg2[%c6, %c0_67, %c0_68] : memref<9x128x128xbf16, #tpu.memory_space<vmem>>, vector<1x128x128xbf16>
    %63 = vector.shape_cast %62 : vector<1x128x128xbf16> to vector<128x128xbf16>
    %cst_69 = arith.constant dense<0.000000e+00> : vector<256x128xf32>
    %64 = tpu.matmul %61, %63, %cst_69 {dimension_numbers = #tpu.dot_dimension_numbers<[1], [0], [0], [1], [0, 0, 1, 1], [], []>} : vector<256x128xbf16>, vector<128x128xbf16>, vector<256x128xf32> -> vector<256x128xf32>
    %c0_70 = arith.constant 0 : index
    %c0_71 = arith.constant 0 : index
    %65 = vector.load %arg11[%c0_70, %c0_71] : memref<256x128xf32, #tpu.memory_space<vmem>>, vector<256x128xf32>
    %66 = arith.addf %65, %64 : vector<256x128xf32>
    %c0_72 = arith.constant 0 : index
    %c0_73 = arith.constant 0 : index
    %67 = vector.load %arg11[%c0_72, %c0_73] : memref<256x128xf32, #tpu.memory_space<vmem>>, vector<256x128xf32>
    tpu.vector_store %arg11[%c0_72, %c0_73], %66 {strides = array<i32>} : memref<256x128xf32, #tpu.memory_space<vmem>>, vector<256x128xf32>,
    %c0_74 = arith.constant 0 : index
    %c2_75 = arith.constant 2 : index
    %c1_76 = arith.constant 1 : index
    %c0_77 = arith.constant 0 : index
    %68 = vector.load %arg1[%c0_74, %c2_75, %c1_76, %c0_77] : memref<1x18x18x128xf32, #tpu.memory_space<vmem>>, vector<1x16x16x128xf32>
    %69 = vector.shape_cast %68 : vector<1x16x16x128xf32> to vector<16x16x128xf32>
    %70 = vector.shape_cast %69 : vector<16x16x128xf32> to vector<256x128xf32>
    %71 = arith.truncf %70 : vector<256x128xf32> to vector<256x128xbf16>
    %c7 = arith.constant 7 : index
    %c0_78 = arith.constant 0 : index
    %c0_79 = arith.constant 0 : index
    %72 = vector.load %arg2[%c7, %c0_78, %c0_79] : memref<9x128x128xbf16, #tpu.memory_space<vmem>>, vector<1x128x128xbf16>
    %73 = vector.shape_cast %72 : vector<1x128x128xbf16> to vector<128x128xbf16>
    %cst_80 = arith.constant dense<0.000000e+00> : vector<256x128xf32>
    %74 = tpu.matmul %71, %73, %cst_80 {dimension_numbers = #tpu.dot_dimension_numbers<[1], [0], [0], [1], [0, 0, 1, 1], [], []>} : vector<256x128xbf16>, vector<128x128xbf16>, vector<256x128xf32> -> vector<256x128xf32>
    %c0_81 = arith.constant 0 : index
    %c0_82 = arith.constant 0 : index
    %75 = vector.load %arg11[%c0_81, %c0_82] : memref<256x128xf32, #tpu.memory_space<vmem>>, vector<256x128xf32>
    %76 = arith.addf %75, %74 : vector<256x128xf32>
    %c0_83 = arith.constant 0 : index
    %c0_84 = arith.constant 0 : index
    %77 = vector.load %arg11[%c0_83, %c0_84] : memref<256x128xf32, #tpu.memory_space<vmem>>, vector<256x128xf32>
    tpu.vector_store %arg11[%c0_83, %c0_84], %76 {strides = array<i32>} : memref<256x128xf32, #tpu.memory_space<vmem>>, vector<256x128xf32>,
    %c0_85 = arith.constant 0 : index
    %c2_86 = arith.constant 2 : index
    %c2_87 = arith.constant 2 : index
    %c0_88 = arith.constant 0 : index
    %78 = vector.load %arg1[%c0_85, %c2_86, %c2_87, %c0_88] : memref<1x18x18x128xf32, #tpu.memory_space<vmem>>, vector<1x16x16x128xf32>
    %79 = vector.shape_cast %78 : vector<1x16x16x128xf32> to vector<16x16x128xf32>
    %80 = vector.shape_cast %79 : vector<16x16x128xf32> to vector<256x128xf32>
    %81 = arith.truncf %80 : vector<256x128xf32> to vector<256x128xbf16>
    %c8 = arith.constant 8 : index
    %c0_89 = arith.constant 0 : index
    %c0_90 = arith.constant 0 : index
    %82 = vector.load %arg2[%c8, %c0_89, %c0_90] : memref<9x128x128xbf16, #tpu.memory_space<vmem>>, vector<1x128x128xbf16>
    %83 = vector.shape_cast %82 : vector<1x128x128xbf16> to vector<128x128xbf16>
    %cst_91 = arith.constant dense<0.000000e+00> : vector<256x128xf32>
    %84 = tpu.matmul %81, %83, %cst_91 {dimension_numbers = #tpu.dot_dimension_numbers<[1], [0], [0], [1], [0, 0, 1, 1], [], []>} : vector<256x128xbf16>, vector<128x128xbf16>, vector<256x128xf32> -> vector<256x128xf32>
    %c0_92 = arith.constant 0 : index
    %c0_93 = arith.constant 0 : index
    %85 = vector.load %arg11[%c0_92, %c0_93] : memref<256x128xf32, #tpu.memory_space<vmem>>, vector<256x128xf32>
    %86 = arith.addf %85, %84 : vector<256x128xf32>
    %c0_94 = arith.constant 0 : index
    %c0_95 = arith.constant 0 : index
    %87 = vector.load %arg11[%c0_94, %c0_95] : memref<256x128xf32, #tpu.memory_space<vmem>>, vector<256x128xf32>
    tpu.vector_store %arg11[%c0_94, %c0_95], %86 {strides = array<i32>} : memref<256x128xf32, #tpu.memory_space<vmem>>, vector<256x128xf32>,
    %c0_96 = arith.constant 0 : index
    %c0_97 = arith.constant 0 : index
    %88 = vector.load %arg11[%c0_96, %c0_97] : memref<256x128xf32, #tpu.memory_space<vmem>>, vector<256x128xf32>
    %c0_98 = arith.constant 0 : index
    %c0_99 = arith.constant 0 : index
    %89 = vector.load %arg3[%c0_98, %c0_99] : memref<1x128xf32, #tpu.memory_space<vmem>>, vector<1x128xf32>
    %90 = vector.broadcast %89 : vector<1x128xf32> to vector<256x128xf32>
    %91 = arith.addf %88, %90 : vector<256x128xf32>
    %cst_100 = arith.constant 0.000000e+00 : f32
    %92 = vector.broadcast %cst_100 : f32 to vector<256x128xf32>
    %93 = arith.maximumf %91, %92 : vector<256x128xf32>
    %cst_101 = arith.constant 0.000000e+00 : f32
    %94 = vector.broadcast %cst_101 : f32 to vector<1x18x18x128xf32>
    %c0_102 = arith.constant 0 : index
    %c0_103 = arith.constant 0 : index
    %c0_104 = arith.constant 0 : index
    %c0_105 = arith.constant 0 : index
    %95 = vector.load %arg8[%c0_102, %c0_103, %c0_104, %c0_105] : memref<1x18x18x128xf32, #tpu.memory_space<vmem>>, vector<1x18x18x128xf32>
    tpu.vector_store %arg8[%c0_102, %c0_103, %c0_104, %c0_105], %94 {strides = array<i32>} : memref<1x18x18x128xf32, #tpu.memory_space<vmem>>, vector<1x18x18x128xf32>,
    %96 = vector.shape_cast %93 : vector<256x128xf32> to vector<16x16x128xf32>
    %c0_106 = arith.constant 0 : index
    %c1_107 = arith.constant 1 : index
    %c1_108 = arith.constant 1 : index
    %c0_109 = arith.constant 0 : index
    %97 = vector.load %arg8[%c0_106, %c1_107, %c1_108, %c0_109] : memref<1x18x18x128xf32, #tpu.memory_space<vmem>>, vector<1x16x16x128xf32>
    %98 = vector.shape_cast %97 : vector<1x16x16x128xf32> to vector<16x16x128xf32>
    %99 = vector.shape_cast %96 : vector<16x16x128xf32> to vector<1x16x16x128xf32>
    tpu.vector_store %arg8[%c0_106, %c1_107, %c1_108, %c0_109], %99 {strides = array<i32>} : memref<1x18x18x128xf32, #tpu.memory_space<vmem>>, vector<1x16x16x128xf32>,
    %100 = vector.shape_cast %93 : vector<256x128xf32> to vector<8x2x16x128xf32>
    %cst_110 = arith.constant dense<0xFF800000> : vector<8x16x128xf32>
    %101 = vector.multi_reduction <maximumf>, %100, %cst_110 [1] : vector<8x2x16x128xf32> to vector<8x16x128xf32>
    %c0_111 = arith.constant 0 : index
    %c0_112 = arith.constant 0 : index
    %c0_113 = arith.constant 0 : index
    %102 = vector.load %arg12[%c0_111, %c0_112, %c0_113] : memref<8x16x128xf32, #tpu.memory_space<vmem>>, vector<8x16x128xf32>
    tpu.vector_store %arg12[%c0_111, %c0_112, %c0_113], %101 {strides = array<i32>} : memref<8x16x128xf32, #tpu.memory_space<vmem>>, vector<8x16x128xf32>,
    %c0_114 = arith.constant 0 : index
    %c0_115 = arith.constant 0 : index
    %c0_116 = arith.constant 0 : index
    %103 = tpu.strided_load %arg12[%c0_114, %c0_115, %c0_116] {strides = array<i32: 1, 2, 1>} : memref<8x16x128xf32, #tpu.memory_space<vmem>>, vector<8x8x128xf32>
    %c0_117 = arith.constant 0 : index
    %c1_118 = arith.constant 1 : index
    %c0_119 = arith.constant 0 : index
    %104 = tpu.strided_load %arg12[%c0_117, %c1_118, %c0_119] {strides = array<i32: 1, 2, 1>} : memref<8x16x128xf32, #tpu.memory_space<vmem>>, vector<8x8x128xf32>
    %105 = arith.maximumf %103, %104 : vector<8x8x128xf32>
    %cst_120 = arith.constant 0.000000e+00 : f32
    %106 = vector.broadcast %cst_120 : f32 to vector<10x10x128xf32>
    %c0_121 = arith.constant 0 : index
    %c0_122 = arith.constant 0 : index
    %c0_123 = arith.constant 0 : index
    %107 = vector.load %arg13[%c0_121, %c0_122, %c0_123] : memref<10x10x128xf32, #tpu.memory_space<vmem>>, vector<10x10x128xf32>
    tpu.vector_store %arg13[%c0_121, %c0_122, %c0_123], %106 {strides = array<i32>} : memref<10x10x128xf32, #tpu.memory_space<vmem>>, vector<10x10x128xf32>,
    %c1_124 = arith.constant 1 : index
    %c1_125 = arith.constant 1 : index
    %c0_126 = arith.constant 0 : index
    %108 = vector.load %arg13[%c1_124, %c1_125, %c0_126] : memref<10x10x128xf32, #tpu.memory_space<vmem>>, vector<8x8x128xf32>
    tpu.vector_store %arg13[%c1_124, %c1_125, %c0_126], %105 {strides = array<i32>} : memref<10x10x128xf32, #tpu.memory_space<vmem>>, vector<8x8x128xf32>,
    %c0_127 = arith.constant 0 : index
    %c0_128 = arith.constant 0 : index
    %c0_129 = arith.constant 0 : index
    %109 = vector.load %arg13[%c0_127, %c0_128, %c0_129] : memref<10x10x128xf32, #tpu.memory_space<vmem>>, vector<8x8x128xf32>
    %110 = vector.shape_cast %109 : vector<8x8x128xf32> to vector<64x128xf32>
    %111 = arith.truncf %110 : vector<64x128xf32> to vector<64x128xbf16>
    %c0_130 = arith.constant 0 : index
    %c0_131 = arith.constant 0 : index
    %c0_132 = arith.constant 0 : index
    %112 = vector.load %arg4[%c0_130, %c0_131, %c0_132] : memref<9x128x128xbf16, #tpu.memory_space<vmem>>, vector<1x128x128xbf16>
    %113 = vector.shape_cast %112 : vector<1x128x128xbf16> to vector<128x128xbf16>
    %cst_133 = arith.constant dense<0.000000e+00> : vector<64x128xf32>
    %114 = tpu.matmul %111, %113, %cst_133 {dimension_numbers = #tpu.dot_dimension_numbers<[1], [0], [0], [1], [0, 0, 1, 1], [], []>} : vector<64x128xbf16>, vector<128x128xbf16>, vector<64x128xf32> -> vector<64x128xf32>
    %c0_134 = arith.constant 0 : index
    %c0_135 = arith.constant 0 : index
    %115 = vector.load %arg14[%c0_134, %c0_135] : memref<64x128xf32, #tpu.memory_space<vmem>>, vector<64x128xf32>
    tpu.vector_store %arg14[%c0_134, %c0_135], %114 {strides = array<i32>} : memref<64x128xf32, #tpu.memory_space<vmem>>, vector<64x128xf32>,
    %c0_136 = arith.constant 0 : index
    %c1_137 = arith.constant 1 : index
    %c0_138 = arith.constant 0 : index
    %116 = vector.load %arg13[%c0_136, %c1_137, %c0_138] : memref<10x10x128xf32, #tpu.memory_space<vmem>>, vector<8x8x128xf32>
    %117 = vector.shape_cast %116 : vector<8x8x128xf32> to vector<64x128xf32>
    %118 = arith.truncf %117 : vector<64x128xf32> to vector<64x128xbf16>
    %c1_139 = arith.constant 1 : index
    %c0_140 = arith.constant 0 : index
    %c0_141 = arith.constant 0 : index
    %119 = vector.load %arg4[%c1_139, %c0_140, %c0_141] : memref<9x128x128xbf16, #tpu.memory_space<vmem>>, vector<1x128x128xbf16>
    %120 = vector.shape_cast %119 : vector<1x128x128xbf16> to vector<128x128xbf16>
    %cst_142 = arith.constant dense<0.000000e+00> : vector<64x128xf32>
    %121 = tpu.matmul %118, %120, %cst_142 {dimension_numbers = #tpu.dot_dimension_numbers<[1], [0], [0], [1], [0, 0, 1, 1], [], []>} : vector<64x128xbf16>, vector<128x128xbf16>, vector<64x128xf32> -> vector<64x128xf32>
    %c0_143 = arith.constant 0 : index
    %c0_144 = arith.constant 0 : index
    %122 = vector.load %arg14[%c0_143, %c0_144] : memref<64x128xf32, #tpu.memory_space<vmem>>, vector<64x128xf32>
    %123 = arith.addf %122, %121 : vector<64x128xf32>
    %c0_145 = arith.constant 0 : index
    %c0_146 = arith.constant 0 : index
    %124 = vector.load %arg14[%c0_145, %c0_146] : memref<64x128xf32, #tpu.memory_space<vmem>>, vector<64x128xf32>
    tpu.vector_store %arg14[%c0_145, %c0_146], %123 {strides = array<i32>} : memref<64x128xf32, #tpu.memory_space<vmem>>, vector<64x128xf32>,
    %c0_147 = arith.constant 0 : index
    %c2_148 = arith.constant 2 : index
    %c0_149 = arith.constant 0 : index
    %125 = vector.load %arg13[%c0_147, %c2_148, %c0_149] : memref<10x10x128xf32, #tpu.memory_space<vmem>>, vector<8x8x128xf32>
    %126 = vector.shape_cast %125 : vector<8x8x128xf32> to vector<64x128xf32>
    %127 = arith.truncf %126 : vector<64x128xf32> to vector<64x128xbf16>
    %c2_150 = arith.constant 2 : index
    %c0_151 = arith.constant 0 : index
    %c0_152 = arith.constant 0 : index
    %128 = vector.load %arg4[%c2_150, %c0_151, %c0_152] : memref<9x128x128xbf16, #tpu.memory_space<vmem>>, vector<1x128x128xbf16>
    %129 = vector.shape_cast %128 : vector<1x128x128xbf16> to vector<128x128xbf16>
    %cst_153 = arith.constant dense<0.000000e+00> : vector<64x128xf32>
    %130 = tpu.matmul %127, %129, %cst_153 {dimension_numbers = #tpu.dot_dimension_numbers<[1], [0], [0], [1], [0, 0, 1, 1], [], []>} : vector<64x128xbf16>, vector<128x128xbf16>, vector<64x128xf32> -> vector<64x128xf32>
    %c0_154 = arith.constant 0 : index
    %c0_155 = arith.constant 0 : index
    %131 = vector.load %arg14[%c0_154, %c0_155] : memref<64x128xf32, #tpu.memory_space<vmem>>, vector<64x128xf32>
    %132 = arith.addf %131, %130 : vector<64x128xf32>
    %c0_156 = arith.constant 0 : index
    %c0_157 = arith.constant 0 : index
    %133 = vector.load %arg14[%c0_156, %c0_157] : memref<64x128xf32, #tpu.memory_space<vmem>>, vector<64x128xf32>
    tpu.vector_store %arg14[%c0_156, %c0_157], %132 {strides = array<i32>} : memref<64x128xf32, #tpu.memory_space<vmem>>, vector<64x128xf32>,
    %c1_158 = arith.constant 1 : index
    %c0_159 = arith.constant 0 : index
    %c0_160 = arith.constant 0 : index
    %134 = vector.load %arg13[%c1_158, %c0_159, %c0_160] : memref<10x10x128xf32, #tpu.memory_space<vmem>>, vector<8x8x128xf32>
    %135 = vector.shape_cast %134 : vector<8x8x128xf32> to vector<64x128xf32>
    %136 = arith.truncf %135 : vector<64x128xf32> to vector<64x128xbf16>
    %c3_161 = arith.constant 3 : index
    %c0_162 = arith.constant 0 : index
    %c0_163 = arith.constant 0 : index
    %137 = vector.load %arg4[%c3_161, %c0_162, %c0_163] : memref<9x128x128xbf16, #tpu.memory_space<vmem>>, vector<1x128x128xbf16>
    %138 = vector.shape_cast %137 : vector<1x128x128xbf16> to vector<128x128xbf16>
    %cst_164 = arith.constant dense<0.000000e+00> : vector<64x128xf32>
    %139 = tpu.matmul %136, %138, %cst_164 {dimension_numbers = #tpu.dot_dimension_numbers<[1], [0], [0], [1], [0, 0, 1, 1], [], []>} : vector<64x128xbf16>, vector<128x128xbf16>, vector<64x128xf32> -> vector<64x128xf32>
    %c0_165 = arith.constant 0 : index
    %c0_166 = arith.constant 0 : index
    %140 = vector.load %arg14[%c0_165, %c0_166] : memref<64x128xf32, #tpu.memory_space<vmem>>, vector<64x128xf32>
    %141 = arith.addf %140, %139 : vector<64x128xf32>
    %c0_167 = arith.constant 0 : index
    %c0_168 = arith.constant 0 : index
    %142 = vector.load %arg14[%c0_167, %c0_168] : memref<64x128xf32, #tpu.memory_space<vmem>>, vector<64x128xf32>
    tpu.vector_store %arg14[%c0_167, %c0_168], %141 {strides = array<i32>} : memref<64x128xf32, #tpu.memory_space<vmem>>, vector<64x128xf32>,
    %c1_169 = arith.constant 1 : index
    %c1_170 = arith.constant 1 : index
    %c0_171 = arith.constant 0 : index
    %143 = vector.load %arg13[%c1_169, %c1_170, %c0_171] : memref<10x10x128xf32, #tpu.memory_space<vmem>>, vector<8x8x128xf32>
    %144 = vector.shape_cast %143 : vector<8x8x128xf32> to vector<64x128xf32>
    %145 = arith.truncf %144 : vector<64x128xf32> to vector<64x128xbf16>
    %c4_172 = arith.constant 4 : index
    %c0_173 = arith.constant 0 : index
    %c0_174 = arith.constant 0 : index
    %146 = vector.load %arg4[%c4_172, %c0_173, %c0_174] : memref<9x128x128xbf16, #tpu.memory_space<vmem>>, vector<1x128x128xbf16>
    %147 = vector.shape_cast %146 : vector<1x128x128xbf16> to vector<128x128xbf16>
    %cst_175 = arith.constant dense<0.000000e+00> : vector<64x128xf32>
    %148 = tpu.matmul %145, %147, %cst_175 {dimension_numbers = #tpu.dot_dimension_numbers<[1], [0], [0], [1], [0, 0, 1, 1], [], []>} : vector<64x128xbf16>, vector<128x128xbf16>, vector<64x128xf32> -> vector<64x128xf32>
    %c0_176 = arith.constant 0 : index
    %c0_177 = arith.constant 0 : index
    %149 = vector.load %arg14[%c0_176, %c0_177] : memref<64x128xf32, #tpu.memory_space<vmem>>, vector<64x128xf32>
    %150 = arith.addf %149, %148 : vector<64x128xf32>
    %c0_178 = arith.constant 0 : index
    %c0_179 = arith.constant 0 : index
    %151 = vector.load %arg14[%c0_178, %c0_179] : memref<64x128xf32, #tpu.memory_space<vmem>>, vector<64x128xf32>
    tpu.vector_store %arg14[%c0_178, %c0_179], %150 {strides = array<i32>} : memref<64x128xf32, #tpu.memory_space<vmem>>, vector<64x128xf32>,
    %c1_180 = arith.constant 1 : index
    %c2_181 = arith.constant 2 : index
    %c0_182 = arith.constant 0 : index
    %152 = vector.load %arg13[%c1_180, %c2_181, %c0_182] : memref<10x10x128xf32, #tpu.memory_space<vmem>>, vector<8x8x128xf32>
    %153 = vector.shape_cast %152 : vector<8x8x128xf32> to vector<64x128xf32>
    %154 = arith.truncf %153 : vector<64x128xf32> to vector<64x128xbf16>
    %c5_183 = arith.constant 5 : index
    %c0_184 = arith.constant 0 : index
    %c0_185 = arith.constant 0 : index
    %155 = vector.load %arg4[%c5_183, %c0_184, %c0_185] : memref<9x128x128xbf16, #tpu.memory_space<vmem>>, vector<1x128x128xbf16>
    %156 = vector.shape_cast %155 : vector<1x128x128xbf16> to vector<128x128xbf16>
    %cst_186 = arith.constant dense<0.000000e+00> : vector<64x128xf32>
    %157 = tpu.matmul %154, %156, %cst_186 {dimension_numbers = #tpu.dot_dimension_numbers<[1], [0], [0], [1], [0, 0, 1, 1], [], []>} : vector<64x128xbf16>, vector<128x128xbf16>, vector<64x128xf32> -> vector<64x128xf32>
    %c0_187 = arith.constant 0 : index
    %c0_188 = arith.constant 0 : index
    %158 = vector.load %arg14[%c0_187, %c0_188] : memref<64x128xf32, #tpu.memory_space<vmem>>, vector<64x128xf32>
    %159 = arith.addf %158, %157 : vector<64x128xf32>
    %c0_189 = arith.constant 0 : index
    %c0_190 = arith.constant 0 : index
    %160 = vector.load %arg14[%c0_189, %c0_190] : memref<64x128xf32, #tpu.memory_space<vmem>>, vector<64x128xf32>
    tpu.vector_store %arg14[%c0_189, %c0_190], %159 {strides = array<i32>} : memref<64x128xf32, #tpu.memory_space<vmem>>, vector<64x128xf32>,
    %c2_191 = arith.constant 2 : index
    %c0_192 = arith.constant 0 : index
    %c0_193 = arith.constant 0 : index
    %161 = vector.load %arg13[%c2_191, %c0_192, %c0_193] : memref<10x10x128xf32, #tpu.memory_space<vmem>>, vector<8x8x128xf32>
    %162 = vector.shape_cast %161 : vector<8x8x128xf32> to vector<64x128xf32>
    %163 = arith.truncf %162 : vector<64x128xf32> to vector<64x128xbf16>
    %c6_194 = arith.constant 6 : index
    %c0_195 = arith.constant 0 : index
    %c0_196 = arith.constant 0 : index
    %164 = vector.load %arg4[%c6_194, %c0_195, %c0_196] : memref<9x128x128xbf16, #tpu.memory_space<vmem>>, vector<1x128x128xbf16>
    %165 = vector.shape_cast %164 : vector<1x128x128xbf16> to vector<128x128xbf16>
    %cst_197 = arith.constant dense<0.000000e+00> : vector<64x128xf32>
    %166 = tpu.matmul %163, %165, %cst_197 {dimension_numbers = #tpu.dot_dimension_numbers<[1], [0], [0], [1], [0, 0, 1, 1], [], []>} : vector<64x128xbf16>, vector<128x128xbf16>, vector<64x128xf32> -> vector<64x128xf32>
    %c0_198 = arith.constant 0 : index
    %c0_199 = arith.constant 0 : index
    %167 = vector.load %arg14[%c0_198, %c0_199] : memref<64x128xf32, #tpu.memory_space<vmem>>, vector<64x128xf32>
    %168 = arith.addf %167, %166 : vector<64x128xf32>
    %c0_200 = arith.constant 0 : index
    %c0_201 = arith.constant 0 : index
    %169 = vector.load %arg14[%c0_200, %c0_201] : memref<64x128xf32, #tpu.memory_space<vmem>>, vector<64x128xf32>
    tpu.vector_store %arg14[%c0_200, %c0_201], %168 {strides = array<i32>} : memref<64x128xf32, #tpu.memory_space<vmem>>, vector<64x128xf32>,
    %c2_202 = arith.constant 2 : index
    %c1_203 = arith.constant 1 : index
    %c0_204 = arith.constant 0 : index
    %170 = vector.load %arg13[%c2_202, %c1_203, %c0_204] : memref<10x10x128xf32, #tpu.memory_space<vmem>>, vector<8x8x128xf32>
    %171 = vector.shape_cast %170 : vector<8x8x128xf32> to vector<64x128xf32>
    %172 = arith.truncf %171 : vector<64x128xf32> to vector<64x128xbf16>
    %c7_205 = arith.constant 7 : index
    %c0_206 = arith.constant 0 : index
    %c0_207 = arith.constant 0 : index
    %173 = vector.load %arg4[%c7_205, %c0_206, %c0_207] : memref<9x128x128xbf16, #tpu.memory_space<vmem>>, vector<1x128x128xbf16>
    %174 = vector.shape_cast %173 : vector<1x128x128xbf16> to vector<128x128xbf16>
    %cst_208 = arith.constant dense<0.000000e+00> : vector<64x128xf32>
    %175 = tpu.matmul %172, %174, %cst_208 {dimension_numbers = #tpu.dot_dimension_numbers<[1], [0], [0], [1], [0, 0, 1, 1], [], []>} : vector<64x128xbf16>, vector<128x128xbf16>, vector<64x128xf32> -> vector<64x128xf32>
    %c0_209 = arith.constant 0 : index
    %c0_210 = arith.constant 0 : index
    %176 = vector.load %arg14[%c0_209, %c0_210] : memref<64x128xf32, #tpu.memory_space<vmem>>, vector<64x128xf32>
    %177 = arith.addf %176, %175 : vector<64x128xf32>
    %c0_211 = arith.constant 0 : index
    %c0_212 = arith.constant 0 : index
    %178 = vector.load %arg14[%c0_211, %c0_212] : memref<64x128xf32, #tpu.memory_space<vmem>>, vector<64x128xf32>
    tpu.vector_store %arg14[%c0_211, %c0_212], %177 {strides = array<i32>} : memref<64x128xf32, #tpu.memory_space<vmem>>, vector<64x128xf32>,
    %c2_213 = arith.constant 2 : index
    %c2_214 = arith.constant 2 : index
    %c0_215 = arith.constant 0 : index
    %179 = vector.load %arg13[%c2_213, %c2_214, %c0_215] : memref<10x10x128xf32, #tpu.memory_space<vmem>>, vector<8x8x128xf32>
    %180 = vector.shape_cast %179 : vector<8x8x128xf32> to vector<64x128xf32>
    %181 = arith.truncf %180 : vector<64x128xf32> to vector<64x128xbf16>
    %c8_216 = arith.constant 8 : index
    %c0_217 = arith.constant 0 : index
    %c0_218 = arith.constant 0 : index
    %182 = vector.load %arg4[%c8_216, %c0_217, %c0_218] : memref<9x128x128xbf16, #tpu.memory_space<vmem>>, vector<1x128x128xbf16>
    %183 = vector.shape_cast %182 : vector<1x128x128xbf16> to vector<128x128xbf16>
    %cst_219 = arith.constant dense<0.000000e+00> : vector<64x128xf32>
    %184 = tpu.matmul %181, %183, %cst_219 {dimension_numbers = #tpu.dot_dimension_numbers<[1], [0], [0], [1], [0, 0, 1, 1], [], []>} : vector<64x128xbf16>, vector<128x128xbf16>, vector<64x128xf32> -> vector<64x128xf32>
    %c0_220 = arith.constant 0 : index
    %c0_221 = arith.constant 0 : index
    %185 = vector.load %arg14[%c0_220, %c0_221] : memref<64x128xf32, #tpu.memory_space<vmem>>, vector<64x128xf32>
    %186 = arith.addf %185, %184 : vector<64x128xf32>
    %c0_222 = arith.constant 0 : index
    %c0_223 = arith.constant 0 : index
    %187 = vector.load %arg14[%c0_222, %c0_223] : memref<64x128xf32, #tpu.memory_space<vmem>>, vector<64x128xf32>
    tpu.vector_store %arg14[%c0_222, %c0_223], %186 {strides = array<i32>} : memref<64x128xf32, #tpu.memory_space<vmem>>, vector<64x128xf32>,
    %c0_224 = arith.constant 0 : index
    %c0_225 = arith.constant 0 : index
    %188 = vector.load %arg14[%c0_224, %c0_225] : memref<64x128xf32, #tpu.memory_space<vmem>>, vector<64x128xf32>
    %c0_226 = arith.constant 0 : index
    %c0_227 = arith.constant 0 : index
    %189 = vector.load %arg5[%c0_226, %c0_227] : memref<1x128xf32, #tpu.memory_space<vmem>>, vector<1x128xf32>
    %190 = vector.broadcast %189 : vector<1x128xf32> to vector<64x128xf32>
    %191 = arith.addf %188, %190 : vector<64x128xf32>
    %cst_228 = arith.constant 0.000000e+00 : f32
    %192 = vector.broadcast %cst_228 : f32 to vector<64x128xf32>
    %193 = arith.maximumf %191, %192 : vector<64x128xf32>
    %194 = vector.shape_cast %193 : vector<64x128xf32> to vector<8x8x128xf32>
    %c0_229 = arith.constant 0 : index
    %c0_230 = arith.constant 0 : index
    %c0_231 = arith.constant 0 : index
    %c0_232 = arith.constant 0 : index
    %195 = vector.load %arg9[%c0_229, %c0_230, %c0_231, %c0_232] : memref<1x8x8x128xf32, #tpu.memory_space<vmem>>, vector<1x8x8x128xf32>
    %196 = vector.shape_cast %195 : vector<1x8x8x128xf32> to vector<8x8x128xf32>
    %197 = vector.shape_cast %194 : vector<8x8x128xf32> to vector<1x8x8x128xf32>
    tpu.vector_store %arg9[%c0_229, %c0_230, %c0_231, %c0_232], %197 {strides = array<i32>} : memref<1x8x8x128xf32, #tpu.memory_space<vmem>>, vector<1x8x8x128xf32>,
    %198 = arith.truncf %193 : vector<64x128xf32> to vector<64x128xbf16>
    %c0_233 = arith.constant 0 : index
    %c0_234 = arith.constant 0 : index
    %199 = vector.load %arg6[%c0_233, %c0_234] : memref<128x128xbf16, #tpu.memory_space<vmem>>, vector<128x128xbf16>
    %cst_235 = arith.constant dense<0.000000e+00> : vector<64x128xf32>
    %200 = tpu.matmul %198, %199, %cst_235 {dimension_numbers = #tpu.dot_dimension_numbers<[1], [0], [0], [1], [0, 0, 1, 1], [], []>} : vector<64x128xbf16>, vector<128x128xbf16>, vector<64x128xf32> -> vector<64x128xf32>
    %cst_236 = arith.constant dense<0.000000e+00> : vector<128xf32>
    %201 = vector.multi_reduction <add>, %200, %cst_236 [0] : vector<64x128xf32> to vector<128xf32>
    %202 = vector.shape_cast %201 : vector<128xf32> to vector<1x128xf32>
    %cst_237 = arith.constant 1.562500e-02 : f32
    %203 = vector.broadcast %cst_237 : f32 to vector<1x128xf32>
    %204 = arith.mulf %202, %203 : vector<1x128xf32>
    %c0_238 = arith.constant 0 : index
    %c0_239 = arith.constant 0 : index
    %205 = vector.load %arg7[%c0_238, %c0_239] : memref<1x128xf32, #tpu.memory_space<vmem>>, vector<1x128xf32>
    %206 = arith.addf %204, %205 : vector<1x128xf32>
    %c0_240 = arith.constant 0 : index
    %c0_241 = arith.constant 0 : index
    %c0_242 = arith.constant 0 : index
    %207 = vector.load %arg10[%c0_240, %c0_241, %c0_242] : memref<1x1x128xf32, #tpu.memory_space<vmem>>, vector<1x1x128xf32>
    %208 = vector.shape_cast %207 : vector<1x1x128xf32> to vector<1x128xf32>
    %209 = vector.shape_cast %206 : vector<1x128xf32> to vector<1x1x128xf32>
    tpu.vector_store %arg10[%c0_240, %c0_241, %c0_242], %209 {strides = array<i32>} : memref<1x1x128xf32, #tpu.memory_space<vmem>>, vector<1x1x128xf32>,
    return
  }
  func.func @transform_0(%arg0: i32) -> (i32, i32, i32, i32) {
    %c0_i32 = arith.constant 0 : i32
    %c0_i32_0 = arith.constant 0 : i32
    %c0_i32_1 = arith.constant 0 : i32
    %c0_i32_2 = arith.constant 0 : i32
    return %arg0, %c0_i32, %c0_i32_0, %c0_i32_1 : i32, i32, i32, i32
  }
  func.func @transform_1(%arg0: i32) -> (i32, i32, i32) {
    %c0_i32 = arith.constant 0 : i32
    %c0_i32_0 = arith.constant 0 : i32
    %c0_i32_1 = arith.constant 0 : i32
    %c0_i32_2 = arith.constant 0 : i32
    return %c0_i32, %c0_i32_0, %c0_i32_1 : i32, i32, i32
  }
  func.func @transform_2(%arg0: i32) -> (i32, i32) {
    %c0_i32 = arith.constant 0 : i32
    %c0_i32_0 = arith.constant 0 : i32
    %c0_i32_1 = arith.constant 0 : i32
    return %c0_i32, %c0_i32_0 : i32, i32
  }
  func.func @transform_3(%arg0: i32) -> (i32, i32, i32) {
    %c0_i32 = arith.constant 0 : i32
    %c0_i32_0 = arith.constant 0 : i32
    %c0_i32_1 = arith.constant 0 : i32
    %c0_i32_2 = arith.constant 0 : i32
    return %c0_i32, %c0_i32_0, %c0_i32_1 : i32, i32, i32
  }
  func.func @transform_4(%arg0: i32) -> (i32, i32) {
    %c0_i32 = arith.constant 0 : i32
    %c0_i32_0 = arith.constant 0 : i32
    %c0_i32_1 = arith.constant 0 : i32
    return %c0_i32, %c0_i32_0 : i32, i32
  }
  func.func @transform_5(%arg0: i32) -> (i32, i32) {
    %c0_i32 = arith.constant 0 : i32
    %c0_i32_0 = arith.constant 0 : i32
    %c0_i32_1 = arith.constant 0 : i32
    return %c0_i32, %c0_i32_0 : i32, i32
  }
  func.func @transform_6(%arg0: i32) -> (i32, i32) {
    %c0_i32 = arith.constant 0 : i32
    %c0_i32_0 = arith.constant 0 : i32
    %c0_i32_1 = arith.constant 0 : i32
    return %c0_i32, %c0_i32_0 : i32, i32
  }
  func.func @transform_7(%arg0: i32) -> (i32, i32, i32, i32) {
    %c0_i32 = arith.constant 0 : i32
    %c0_i32_0 = arith.constant 0 : i32
    %c0_i32_1 = arith.constant 0 : i32
    %c0_i32_2 = arith.constant 0 : i32
    return %arg0, %c0_i32, %c0_i32_0, %c0_i32_1 : i32, i32, i32, i32
  }
  func.func @transform_8(%arg0: i32) -> (i32, i32, i32, i32) {
    %c0_i32 = arith.constant 0 : i32
    %c0_i32_0 = arith.constant 0 : i32
    %c0_i32_1 = arith.constant 0 : i32
    %c0_i32_2 = arith.constant 0 : i32
    return %arg0, %c0_i32, %c0_i32_0, %c0_i32_1 : i32, i32, i32, i32
  }
  func.func @transform_9(%arg0: i32) -> (i32, i32, i32) {
    %c0_i32 = arith.constant 0 : i32
    %c0_i32_0 = arith.constant 0 : i32
    %c0_i32_1 = arith.constant 0 : i32
    return %arg0, %c0_i32, %c0_i32_0 : i32, i32, i32
  }
}

module attributes {stable_mosaic.version = 11 : i64} {
  func.func @_dec_kernel(%arg0: i32, %arg1: memref<1x18x18x128xf32, #tpu.memory_space<vmem>>, %arg2: memref<1x18x18x128xf32, #tpu.memory_space<vmem>>, %arg3: memref<9x128x128xbf16, #tpu.memory_space<vmem>>, %arg4: memref<9x128x128xbf16, #tpu.memory_space<vmem>>, %arg5: memref<1x128xf32, #tpu.memory_space<vmem>>, %arg6: memref<128x128xbf16, #tpu.memory_space<vmem>>, %arg7: memref<1x128xf32, #tpu.memory_space<vmem>>, %arg8: memref<1x16x16x128xf32, #tpu.memory_space<vmem>>, %arg9: memref<256x128xf32, #tpu.memory_space<vmem>>) attributes {dimension_semantics = [#tpu.dimension_semantics<parallel>], iteration_bounds = array<i64: 2>, scalar_prefetch = 0 : i64, scratch_operands = 1 : i64, tpu.core_type = #tpu.core_type<tc>, window_params = [{transform_indices = @transform_0, window_bounds = array<i64: 1, 18, 18, 128>}, {transform_indices = @transform_1, window_bounds = array<i64: 1, 18, 18, 128>}, {pipeline_mode = #tpu.pipeline_mode<synchronous>, transform_indices = @transform_2, window_bounds = array<i64: 9, 128, 128>}, {pipeline_mode = #tpu.pipeline_mode<synchronous>, transform_indices = @transform_3, window_bounds = array<i64: 9, 128, 128>}, {pipeline_mode = #tpu.pipeline_mode<synchronous>, transform_indices = @transform_4, window_bounds = array<i64: 1, 128>}, {pipeline_mode = #tpu.pipeline_mode<synchronous>, transform_indices = @transform_5, window_bounds = array<i64: 128, 128>}, {pipeline_mode = #tpu.pipeline_mode<synchronous>, transform_indices = @transform_6, window_bounds = array<i64: 1, 128>}, {transform_indices = @transform_7, window_bounds = array<i64: 1, 16, 16, 128>}]} {
    %c0 = arith.constant 0 : index
    %c0_0 = arith.constant 0 : index
    %c0_1 = arith.constant 0 : index
    %c0_2 = arith.constant 0 : index
    %0 = vector.load %arg1[%c0, %c0_0, %c0_1, %c0_2] : memref<1x18x18x128xf32, #tpu.memory_space<vmem>>, vector<1x16x16x128xf32>
    %1 = vector.shape_cast %0 : vector<1x16x16x128xf32> to vector<16x16x128xf32>
    %2 = vector.shape_cast %1 : vector<16x16x128xf32> to vector<256x128xf32>
    %3 = arith.truncf %2 : vector<256x128xf32> to vector<256x128xbf16>
    %c0_3 = arith.constant 0 : index
    %c0_4 = arith.constant 0 : index
    %c0_5 = arith.constant 0 : index
    %4 = vector.load %arg3[%c0_3, %c0_4, %c0_5] : memref<9x128x128xbf16, #tpu.memory_space<vmem>>, vector<1x128x128xbf16>
    %5 = vector.shape_cast %4 : vector<1x128x128xbf16> to vector<128x128xbf16>
    %cst = arith.constant dense<0.000000e+00> : vector<256x128xf32>
    %6 = tpu.matmul %3, %5, %cst {dimension_numbers = #tpu.dot_dimension_numbers<[1], [0], [0], [1], [0, 0, 1, 1], [], []>} : vector<256x128xbf16>, vector<128x128xbf16>, vector<256x128xf32> -> vector<256x128xf32>
    %c0_6 = arith.constant 0 : index
    %c0_7 = arith.constant 0 : index
    %7 = vector.load %arg9[%c0_6, %c0_7] : memref<256x128xf32, #tpu.memory_space<vmem>>, vector<256x128xf32>
    tpu.vector_store %arg9[%c0_6, %c0_7], %6 {strides = array<i32>} : memref<256x128xf32, #tpu.memory_space<vmem>>, vector<256x128xf32>,
    %c0_8 = arith.constant 0 : index
    %c0_9 = arith.constant 0 : index
    %c1 = arith.constant 1 : index
    %c0_10 = arith.constant 0 : index
    %8 = vector.load %arg1[%c0_8, %c0_9, %c1, %c0_10] : memref<1x18x18x128xf32, #tpu.memory_space<vmem>>, vector<1x16x16x128xf32>
    %9 = vector.shape_cast %8 : vector<1x16x16x128xf32> to vector<16x16x128xf32>
    %10 = vector.shape_cast %9 : vector<16x16x128xf32> to vector<256x128xf32>
    %11 = arith.truncf %10 : vector<256x128xf32> to vector<256x128xbf16>
    %c1_11 = arith.constant 1 : index
    %c0_12 = arith.constant 0 : index
    %c0_13 = arith.constant 0 : index
    %12 = vector.load %arg3[%c1_11, %c0_12, %c0_13] : memref<9x128x128xbf16, #tpu.memory_space<vmem>>, vector<1x128x128xbf16>
    %13 = vector.shape_cast %12 : vector<1x128x128xbf16> to vector<128x128xbf16>
    %cst_14 = arith.constant dense<0.000000e+00> : vector<256x128xf32>
    %14 = tpu.matmul %11, %13, %cst_14 {dimension_numbers = #tpu.dot_dimension_numbers<[1], [0], [0], [1], [0, 0, 1, 1], [], []>} : vector<256x128xbf16>, vector<128x128xbf16>, vector<256x128xf32> -> vector<256x128xf32>
    %c0_15 = arith.constant 0 : index
    %c0_16 = arith.constant 0 : index
    %15 = vector.load %arg9[%c0_15, %c0_16] : memref<256x128xf32, #tpu.memory_space<vmem>>, vector<256x128xf32>
    %16 = arith.addf %15, %14 : vector<256x128xf32>
    %c0_17 = arith.constant 0 : index
    %c0_18 = arith.constant 0 : index
    %17 = vector.load %arg9[%c0_17, %c0_18] : memref<256x128xf32, #tpu.memory_space<vmem>>, vector<256x128xf32>
    tpu.vector_store %arg9[%c0_17, %c0_18], %16 {strides = array<i32>} : memref<256x128xf32, #tpu.memory_space<vmem>>, vector<256x128xf32>,
    %c0_19 = arith.constant 0 : index
    %c0_20 = arith.constant 0 : index
    %c2 = arith.constant 2 : index
    %c0_21 = arith.constant 0 : index
    %18 = vector.load %arg1[%c0_19, %c0_20, %c2, %c0_21] : memref<1x18x18x128xf32, #tpu.memory_space<vmem>>, vector<1x16x16x128xf32>
    %19 = vector.shape_cast %18 : vector<1x16x16x128xf32> to vector<16x16x128xf32>
    %20 = vector.shape_cast %19 : vector<16x16x128xf32> to vector<256x128xf32>
    %21 = arith.truncf %20 : vector<256x128xf32> to vector<256x128xbf16>
    %c2_22 = arith.constant 2 : index
    %c0_23 = arith.constant 0 : index
    %c0_24 = arith.constant 0 : index
    %22 = vector.load %arg3[%c2_22, %c0_23, %c0_24] : memref<9x128x128xbf16, #tpu.memory_space<vmem>>, vector<1x128x128xbf16>
    %23 = vector.shape_cast %22 : vector<1x128x128xbf16> to vector<128x128xbf16>
    %cst_25 = arith.constant dense<0.000000e+00> : vector<256x128xf32>
    %24 = tpu.matmul %21, %23, %cst_25 {dimension_numbers = #tpu.dot_dimension_numbers<[1], [0], [0], [1], [0, 0, 1, 1], [], []>} : vector<256x128xbf16>, vector<128x128xbf16>, vector<256x128xf32> -> vector<256x128xf32>
    %c0_26 = arith.constant 0 : index
    %c0_27 = arith.constant 0 : index
    %25 = vector.load %arg9[%c0_26, %c0_27] : memref<256x128xf32, #tpu.memory_space<vmem>>, vector<256x128xf32>
    %26 = arith.addf %25, %24 : vector<256x128xf32>
    %c0_28 = arith.constant 0 : index
    %c0_29 = arith.constant 0 : index
    %27 = vector.load %arg9[%c0_28, %c0_29] : memref<256x128xf32, #tpu.memory_space<vmem>>, vector<256x128xf32>
    tpu.vector_store %arg9[%c0_28, %c0_29], %26 {strides = array<i32>} : memref<256x128xf32, #tpu.memory_space<vmem>>, vector<256x128xf32>,
    %c0_30 = arith.constant 0 : index
    %c1_31 = arith.constant 1 : index
    %c0_32 = arith.constant 0 : index
    %c0_33 = arith.constant 0 : index
    %28 = vector.load %arg1[%c0_30, %c1_31, %c0_32, %c0_33] : memref<1x18x18x128xf32, #tpu.memory_space<vmem>>, vector<1x16x16x128xf32>
    %29 = vector.shape_cast %28 : vector<1x16x16x128xf32> to vector<16x16x128xf32>
    %30 = vector.shape_cast %29 : vector<16x16x128xf32> to vector<256x128xf32>
    %31 = arith.truncf %30 : vector<256x128xf32> to vector<256x128xbf16>
    %c3 = arith.constant 3 : index
    %c0_34 = arith.constant 0 : index
    %c0_35 = arith.constant 0 : index
    %32 = vector.load %arg3[%c3, %c0_34, %c0_35] : memref<9x128x128xbf16, #tpu.memory_space<vmem>>, vector<1x128x128xbf16>
    %33 = vector.shape_cast %32 : vector<1x128x128xbf16> to vector<128x128xbf16>
    %cst_36 = arith.constant dense<0.000000e+00> : vector<256x128xf32>
    %34 = tpu.matmul %31, %33, %cst_36 {dimension_numbers = #tpu.dot_dimension_numbers<[1], [0], [0], [1], [0, 0, 1, 1], [], []>} : vector<256x128xbf16>, vector<128x128xbf16>, vector<256x128xf32> -> vector<256x128xf32>
    %c0_37 = arith.constant 0 : index
    %c0_38 = arith.constant 0 : index
    %35 = vector.load %arg9[%c0_37, %c0_38] : memref<256x128xf32, #tpu.memory_space<vmem>>, vector<256x128xf32>
    %36 = arith.addf %35, %34 : vector<256x128xf32>
    %c0_39 = arith.constant 0 : index
    %c0_40 = arith.constant 0 : index
    %37 = vector.load %arg9[%c0_39, %c0_40] : memref<256x128xf32, #tpu.memory_space<vmem>>, vector<256x128xf32>
    tpu.vector_store %arg9[%c0_39, %c0_40], %36 {strides = array<i32>} : memref<256x128xf32, #tpu.memory_space<vmem>>, vector<256x128xf32>,
    %c0_41 = arith.constant 0 : index
    %c1_42 = arith.constant 1 : index
    %c1_43 = arith.constant 1 : index
    %c0_44 = arith.constant 0 : index
    %38 = vector.load %arg1[%c0_41, %c1_42, %c1_43, %c0_44] : memref<1x18x18x128xf32, #tpu.memory_space<vmem>>, vector<1x16x16x128xf32>
    %39 = vector.shape_cast %38 : vector<1x16x16x128xf32> to vector<16x16x128xf32>
    %40 = vector.shape_cast %39 : vector<16x16x128xf32> to vector<256x128xf32>
    %41 = arith.truncf %40 : vector<256x128xf32> to vector<256x128xbf16>
    %c4 = arith.constant 4 : index
    %c0_45 = arith.constant 0 : index
    %c0_46 = arith.constant 0 : index
    %42 = vector.load %arg3[%c4, %c0_45, %c0_46] : memref<9x128x128xbf16, #tpu.memory_space<vmem>>, vector<1x128x128xbf16>
    %43 = vector.shape_cast %42 : vector<1x128x128xbf16> to vector<128x128xbf16>
    %cst_47 = arith.constant dense<0.000000e+00> : vector<256x128xf32>
    %44 = tpu.matmul %41, %43, %cst_47 {dimension_numbers = #tpu.dot_dimension_numbers<[1], [0], [0], [1], [0, 0, 1, 1], [], []>} : vector<256x128xbf16>, vector<128x128xbf16>, vector<256x128xf32> -> vector<256x128xf32>
    %c0_48 = arith.constant 0 : index
    %c0_49 = arith.constant 0 : index
    %45 = vector.load %arg9[%c0_48, %c0_49] : memref<256x128xf32, #tpu.memory_space<vmem>>, vector<256x128xf32>
    %46 = arith.addf %45, %44 : vector<256x128xf32>
    %c0_50 = arith.constant 0 : index
    %c0_51 = arith.constant 0 : index
    %47 = vector.load %arg9[%c0_50, %c0_51] : memref<256x128xf32, #tpu.memory_space<vmem>>, vector<256x128xf32>
    tpu.vector_store %arg9[%c0_50, %c0_51], %46 {strides = array<i32>} : memref<256x128xf32, #tpu.memory_space<vmem>>, vector<256x128xf32>,
    %c0_52 = arith.constant 0 : index
    %c1_53 = arith.constant 1 : index
    %c2_54 = arith.constant 2 : index
    %c0_55 = arith.constant 0 : index
    %48 = vector.load %arg1[%c0_52, %c1_53, %c2_54, %c0_55] : memref<1x18x18x128xf32, #tpu.memory_space<vmem>>, vector<1x16x16x128xf32>
    %49 = vector.shape_cast %48 : vector<1x16x16x128xf32> to vector<16x16x128xf32>
    %50 = vector.shape_cast %49 : vector<16x16x128xf32> to vector<256x128xf32>
    %51 = arith.truncf %50 : vector<256x128xf32> to vector<256x128xbf16>
    %c5 = arith.constant 5 : index
    %c0_56 = arith.constant 0 : index
    %c0_57 = arith.constant 0 : index
    %52 = vector.load %arg3[%c5, %c0_56, %c0_57] : memref<9x128x128xbf16, #tpu.memory_space<vmem>>, vector<1x128x128xbf16>
    %53 = vector.shape_cast %52 : vector<1x128x128xbf16> to vector<128x128xbf16>
    %cst_58 = arith.constant dense<0.000000e+00> : vector<256x128xf32>
    %54 = tpu.matmul %51, %53, %cst_58 {dimension_numbers = #tpu.dot_dimension_numbers<[1], [0], [0], [1], [0, 0, 1, 1], [], []>} : vector<256x128xbf16>, vector<128x128xbf16>, vector<256x128xf32> -> vector<256x128xf32>
    %c0_59 = arith.constant 0 : index
    %c0_60 = arith.constant 0 : index
    %55 = vector.load %arg9[%c0_59, %c0_60] : memref<256x128xf32, #tpu.memory_space<vmem>>, vector<256x128xf32>
    %56 = arith.addf %55, %54 : vector<256x128xf32>
    %c0_61 = arith.constant 0 : index
    %c0_62 = arith.constant 0 : index
    %57 = vector.load %arg9[%c0_61, %c0_62] : memref<256x128xf32, #tpu.memory_space<vmem>>, vector<256x128xf32>
    tpu.vector_store %arg9[%c0_61, %c0_62], %56 {strides = array<i32>} : memref<256x128xf32, #tpu.memory_space<vmem>>, vector<256x128xf32>,
    %c0_63 = arith.constant 0 : index
    %c2_64 = arith.constant 2 : index
    %c0_65 = arith.constant 0 : index
    %c0_66 = arith.constant 0 : index
    %58 = vector.load %arg1[%c0_63, %c2_64, %c0_65, %c0_66] : memref<1x18x18x128xf32, #tpu.memory_space<vmem>>, vector<1x16x16x128xf32>
    %59 = vector.shape_cast %58 : vector<1x16x16x128xf32> to vector<16x16x128xf32>
    %60 = vector.shape_cast %59 : vector<16x16x128xf32> to vector<256x128xf32>
    %61 = arith.truncf %60 : vector<256x128xf32> to vector<256x128xbf16>
    %c6 = arith.constant 6 : index
    %c0_67 = arith.constant 0 : index
    %c0_68 = arith.constant 0 : index
    %62 = vector.load %arg3[%c6, %c0_67, %c0_68] : memref<9x128x128xbf16, #tpu.memory_space<vmem>>, vector<1x128x128xbf16>
    %63 = vector.shape_cast %62 : vector<1x128x128xbf16> to vector<128x128xbf16>
    %cst_69 = arith.constant dense<0.000000e+00> : vector<256x128xf32>
    %64 = tpu.matmul %61, %63, %cst_69 {dimension_numbers = #tpu.dot_dimension_numbers<[1], [0], [0], [1], [0, 0, 1, 1], [], []>} : vector<256x128xbf16>, vector<128x128xbf16>, vector<256x128xf32> -> vector<256x128xf32>
    %c0_70 = arith.constant 0 : index
    %c0_71 = arith.constant 0 : index
    %65 = vector.load %arg9[%c0_70, %c0_71] : memref<256x128xf32, #tpu.memory_space<vmem>>, vector<256x128xf32>
    %66 = arith.addf %65, %64 : vector<256x128xf32>
    %c0_72 = arith.constant 0 : index
    %c0_73 = arith.constant 0 : index
    %67 = vector.load %arg9[%c0_72, %c0_73] : memref<256x128xf32, #tpu.memory_space<vmem>>, vector<256x128xf32>
    tpu.vector_store %arg9[%c0_72, %c0_73], %66 {strides = array<i32>} : memref<256x128xf32, #tpu.memory_space<vmem>>, vector<256x128xf32>,
    %c0_74 = arith.constant 0 : index
    %c2_75 = arith.constant 2 : index
    %c1_76 = arith.constant 1 : index
    %c0_77 = arith.constant 0 : index
    %68 = vector.load %arg1[%c0_74, %c2_75, %c1_76, %c0_77] : memref<1x18x18x128xf32, #tpu.memory_space<vmem>>, vector<1x16x16x128xf32>
    %69 = vector.shape_cast %68 : vector<1x16x16x128xf32> to vector<16x16x128xf32>
    %70 = vector.shape_cast %69 : vector<16x16x128xf32> to vector<256x128xf32>
    %71 = arith.truncf %70 : vector<256x128xf32> to vector<256x128xbf16>
    %c7 = arith.constant 7 : index
    %c0_78 = arith.constant 0 : index
    %c0_79 = arith.constant 0 : index
    %72 = vector.load %arg3[%c7, %c0_78, %c0_79] : memref<9x128x128xbf16, #tpu.memory_space<vmem>>, vector<1x128x128xbf16>
    %73 = vector.shape_cast %72 : vector<1x128x128xbf16> to vector<128x128xbf16>
    %cst_80 = arith.constant dense<0.000000e+00> : vector<256x128xf32>
    %74 = tpu.matmul %71, %73, %cst_80 {dimension_numbers = #tpu.dot_dimension_numbers<[1], [0], [0], [1], [0, 0, 1, 1], [], []>} : vector<256x128xbf16>, vector<128x128xbf16>, vector<256x128xf32> -> vector<256x128xf32>
    %c0_81 = arith.constant 0 : index
    %c0_82 = arith.constant 0 : index
    %75 = vector.load %arg9[%c0_81, %c0_82] : memref<256x128xf32, #tpu.memory_space<vmem>>, vector<256x128xf32>
    %76 = arith.addf %75, %74 : vector<256x128xf32>
    %c0_83 = arith.constant 0 : index
    %c0_84 = arith.constant 0 : index
    %77 = vector.load %arg9[%c0_83, %c0_84] : memref<256x128xf32, #tpu.memory_space<vmem>>, vector<256x128xf32>
    tpu.vector_store %arg9[%c0_83, %c0_84], %76 {strides = array<i32>} : memref<256x128xf32, #tpu.memory_space<vmem>>, vector<256x128xf32>,
    %c0_85 = arith.constant 0 : index
    %c2_86 = arith.constant 2 : index
    %c2_87 = arith.constant 2 : index
    %c0_88 = arith.constant 0 : index
    %78 = vector.load %arg1[%c0_85, %c2_86, %c2_87, %c0_88] : memref<1x18x18x128xf32, #tpu.memory_space<vmem>>, vector<1x16x16x128xf32>
    %79 = vector.shape_cast %78 : vector<1x16x16x128xf32> to vector<16x16x128xf32>
    %80 = vector.shape_cast %79 : vector<16x16x128xf32> to vector<256x128xf32>
    %81 = arith.truncf %80 : vector<256x128xf32> to vector<256x128xbf16>
    %c8 = arith.constant 8 : index
    %c0_89 = arith.constant 0 : index
    %c0_90 = arith.constant 0 : index
    %82 = vector.load %arg3[%c8, %c0_89, %c0_90] : memref<9x128x128xbf16, #tpu.memory_space<vmem>>, vector<1x128x128xbf16>
    %83 = vector.shape_cast %82 : vector<1x128x128xbf16> to vector<128x128xbf16>
    %cst_91 = arith.constant dense<0.000000e+00> : vector<256x128xf32>
    %84 = tpu.matmul %81, %83, %cst_91 {dimension_numbers = #tpu.dot_dimension_numbers<[1], [0], [0], [1], [0, 0, 1, 1], [], []>} : vector<256x128xbf16>, vector<128x128xbf16>, vector<256x128xf32> -> vector<256x128xf32>
    %c0_92 = arith.constant 0 : index
    %c0_93 = arith.constant 0 : index
    %85 = vector.load %arg9[%c0_92, %c0_93] : memref<256x128xf32, #tpu.memory_space<vmem>>, vector<256x128xf32>
    %86 = arith.addf %85, %84 : vector<256x128xf32>
    %c0_94 = arith.constant 0 : index
    %c0_95 = arith.constant 0 : index
    %87 = vector.load %arg9[%c0_94, %c0_95] : memref<256x128xf32, #tpu.memory_space<vmem>>, vector<256x128xf32>
    tpu.vector_store %arg9[%c0_94, %c0_95], %86 {strides = array<i32>} : memref<256x128xf32, #tpu.memory_space<vmem>>, vector<256x128xf32>,
    %c0_96 = arith.constant 0 : index
    %c0_97 = arith.constant 0 : index
    %c0_98 = arith.constant 0 : index
    %c0_99 = arith.constant 0 : index
    %88 = vector.load %arg2[%c0_96, %c0_97, %c0_98, %c0_99] : memref<1x18x18x128xf32, #tpu.memory_space<vmem>>, vector<1x16x16x128xf32>
    %89 = vector.shape_cast %88 : vector<1x16x16x128xf32> to vector<16x16x128xf32>
    %90 = vector.shape_cast %89 : vector<16x16x128xf32> to vector<256x128xf32>
    %91 = arith.truncf %90 : vector<256x128xf32> to vector<256x128xbf16>
    %c0_100 = arith.constant 0 : index
    %c0_101 = arith.constant 0 : index
    %c0_102 = arith.constant 0 : index
    %92 = vector.load %arg4[%c0_100, %c0_101, %c0_102] : memref<9x128x128xbf16, #tpu.memory_space<vmem>>, vector<1x128x128xbf16>
    %93 = vector.shape_cast %92 : vector<1x128x128xbf16> to vector<128x128xbf16>
    %cst_103 = arith.constant dense<0.000000e+00> : vector<256x128xf32>
    %94 = tpu.matmul %91, %93, %cst_103 {dimension_numbers = #tpu.dot_dimension_numbers<[1], [0], [0], [1], [0, 0, 1, 1], [], []>} : vector<256x128xbf16>, vector<128x128xbf16>, vector<256x128xf32> -> vector<256x128xf32>
    %c0_104 = arith.constant 0 : index
    %c0_105 = arith.constant 0 : index
    %95 = vector.load %arg9[%c0_104, %c0_105] : memref<256x128xf32, #tpu.memory_space<vmem>>, vector<256x128xf32>
    %96 = arith.addf %95, %94 : vector<256x128xf32>
    %c0_106 = arith.constant 0 : index
    %c0_107 = arith.constant 0 : index
    %97 = vector.load %arg9[%c0_106, %c0_107] : memref<256x128xf32, #tpu.memory_space<vmem>>, vector<256x128xf32>
    tpu.vector_store %arg9[%c0_106, %c0_107], %96 {strides = array<i32>} : memref<256x128xf32, #tpu.memory_space<vmem>>, vector<256x128xf32>,
    %c0_108 = arith.constant 0 : index
    %c0_109 = arith.constant 0 : index
    %c1_110 = arith.constant 1 : index
    %c0_111 = arith.constant 0 : index
    %98 = vector.load %arg2[%c0_108, %c0_109, %c1_110, %c0_111] : memref<1x18x18x128xf32, #tpu.memory_space<vmem>>, vector<1x16x16x128xf32>
    %99 = vector.shape_cast %98 : vector<1x16x16x128xf32> to vector<16x16x128xf32>
    %100 = vector.shape_cast %99 : vector<16x16x128xf32> to vector<256x128xf32>
    %101 = arith.truncf %100 : vector<256x128xf32> to vector<256x128xbf16>
    %c1_112 = arith.constant 1 : index
    %c0_113 = arith.constant 0 : index
    %c0_114 = arith.constant 0 : index
    %102 = vector.load %arg4[%c1_112, %c0_113, %c0_114] : memref<9x128x128xbf16, #tpu.memory_space<vmem>>, vector<1x128x128xbf16>
    %103 = vector.shape_cast %102 : vector<1x128x128xbf16> to vector<128x128xbf16>
    %cst_115 = arith.constant dense<0.000000e+00> : vector<256x128xf32>
    %104 = tpu.matmul %101, %103, %cst_115 {dimension_numbers = #tpu.dot_dimension_numbers<[1], [0], [0], [1], [0, 0, 1, 1], [], []>} : vector<256x128xbf16>, vector<128x128xbf16>, vector<256x128xf32> -> vector<256x128xf32>
    %c0_116 = arith.constant 0 : index
    %c0_117 = arith.constant 0 : index
    %105 = vector.load %arg9[%c0_116, %c0_117] : memref<256x128xf32, #tpu.memory_space<vmem>>, vector<256x128xf32>
    %106 = arith.addf %105, %104 : vector<256x128xf32>
    %c0_118 = arith.constant 0 : index
    %c0_119 = arith.constant 0 : index
    %107 = vector.load %arg9[%c0_118, %c0_119] : memref<256x128xf32, #tpu.memory_space<vmem>>, vector<256x128xf32>
    tpu.vector_store %arg9[%c0_118, %c0_119], %106 {strides = array<i32>} : memref<256x128xf32, #tpu.memory_space<vmem>>, vector<256x128xf32>,
    %c0_120 = arith.constant 0 : index
    %c0_121 = arith.constant 0 : index
    %c2_122 = arith.constant 2 : index
    %c0_123 = arith.constant 0 : index
    %108 = vector.load %arg2[%c0_120, %c0_121, %c2_122, %c0_123] : memref<1x18x18x128xf32, #tpu.memory_space<vmem>>, vector<1x16x16x128xf32>
    %109 = vector.shape_cast %108 : vector<1x16x16x128xf32> to vector<16x16x128xf32>
    %110 = vector.shape_cast %109 : vector<16x16x128xf32> to vector<256x128xf32>
    %111 = arith.truncf %110 : vector<256x128xf32> to vector<256x128xbf16>
    %c2_124 = arith.constant 2 : index
    %c0_125 = arith.constant 0 : index
    %c0_126 = arith.constant 0 : index
    %112 = vector.load %arg4[%c2_124, %c0_125, %c0_126] : memref<9x128x128xbf16, #tpu.memory_space<vmem>>, vector<1x128x128xbf16>
    %113 = vector.shape_cast %112 : vector<1x128x128xbf16> to vector<128x128xbf16>
    %cst_127 = arith.constant dense<0.000000e+00> : vector<256x128xf32>
    %114 = tpu.matmul %111, %113, %cst_127 {dimension_numbers = #tpu.dot_dimension_numbers<[1], [0], [0], [1], [0, 0, 1, 1], [], []>} : vector<256x128xbf16>, vector<128x128xbf16>, vector<256x128xf32> -> vector<256x128xf32>
    %c0_128 = arith.constant 0 : index
    %c0_129 = arith.constant 0 : index
    %115 = vector.load %arg9[%c0_128, %c0_129] : memref<256x128xf32, #tpu.memory_space<vmem>>, vector<256x128xf32>
    %116 = arith.addf %115, %114 : vector<256x128xf32>
    %c0_130 = arith.constant 0 : index
    %c0_131 = arith.constant 0 : index
    %117 = vector.load %arg9[%c0_130, %c0_131] : memref<256x128xf32, #tpu.memory_space<vmem>>, vector<256x128xf32>
    tpu.vector_store %arg9[%c0_130, %c0_131], %116 {strides = array<i32>} : memref<256x128xf32, #tpu.memory_space<vmem>>, vector<256x128xf32>,
    %c0_132 = arith.constant 0 : index
    %c1_133 = arith.constant 1 : index
    %c0_134 = arith.constant 0 : index
    %c0_135 = arith.constant 0 : index
    %118 = vector.load %arg2[%c0_132, %c1_133, %c0_134, %c0_135] : memref<1x18x18x128xf32, #tpu.memory_space<vmem>>, vector<1x16x16x128xf32>
    %119 = vector.shape_cast %118 : vector<1x16x16x128xf32> to vector<16x16x128xf32>
    %120 = vector.shape_cast %119 : vector<16x16x128xf32> to vector<256x128xf32>
    %121 = arith.truncf %120 : vector<256x128xf32> to vector<256x128xbf16>
    %c3_136 = arith.constant 3 : index
    %c0_137 = arith.constant 0 : index
    %c0_138 = arith.constant 0 : index
    %122 = vector.load %arg4[%c3_136, %c0_137, %c0_138] : memref<9x128x128xbf16, #tpu.memory_space<vmem>>, vector<1x128x128xbf16>
    %123 = vector.shape_cast %122 : vector<1x128x128xbf16> to vector<128x128xbf16>
    %cst_139 = arith.constant dense<0.000000e+00> : vector<256x128xf32>
    %124 = tpu.matmul %121, %123, %cst_139 {dimension_numbers = #tpu.dot_dimension_numbers<[1], [0], [0], [1], [0, 0, 1, 1], [], []>} : vector<256x128xbf16>, vector<128x128xbf16>, vector<256x128xf32> -> vector<256x128xf32>
    %c0_140 = arith.constant 0 : index
    %c0_141 = arith.constant 0 : index
    %125 = vector.load %arg9[%c0_140, %c0_141] : memref<256x128xf32, #tpu.memory_space<vmem>>, vector<256x128xf32>
    %126 = arith.addf %125, %124 : vector<256x128xf32>
    %c0_142 = arith.constant 0 : index
    %c0_143 = arith.constant 0 : index
    %127 = vector.load %arg9[%c0_142, %c0_143] : memref<256x128xf32, #tpu.memory_space<vmem>>, vector<256x128xf32>
    tpu.vector_store %arg9[%c0_142, %c0_143], %126 {strides = array<i32>} : memref<256x128xf32, #tpu.memory_space<vmem>>, vector<256x128xf32>,
    %c0_144 = arith.constant 0 : index
    %c1_145 = arith.constant 1 : index
    %c1_146 = arith.constant 1 : index
    %c0_147 = arith.constant 0 : index
    %128 = vector.load %arg2[%c0_144, %c1_145, %c1_146, %c0_147] : memref<1x18x18x128xf32, #tpu.memory_space<vmem>>, vector<1x16x16x128xf32>
    %129 = vector.shape_cast %128 : vector<1x16x16x128xf32> to vector<16x16x128xf32>
    %130 = vector.shape_cast %129 : vector<16x16x128xf32> to vector<256x128xf32>
    %131 = arith.truncf %130 : vector<256x128xf32> to vector<256x128xbf16>
    %c4_148 = arith.constant 4 : index
    %c0_149 = arith.constant 0 : index
    %c0_150 = arith.constant 0 : index
    %132 = vector.load %arg4[%c4_148, %c0_149, %c0_150] : memref<9x128x128xbf16, #tpu.memory_space<vmem>>, vector<1x128x128xbf16>
    %133 = vector.shape_cast %132 : vector<1x128x128xbf16> to vector<128x128xbf16>
    %cst_151 = arith.constant dense<0.000000e+00> : vector<256x128xf32>
    %134 = tpu.matmul %131, %133, %cst_151 {dimension_numbers = #tpu.dot_dimension_numbers<[1], [0], [0], [1], [0, 0, 1, 1], [], []>} : vector<256x128xbf16>, vector<128x128xbf16>, vector<256x128xf32> -> vector<256x128xf32>
    %c0_152 = arith.constant 0 : index
    %c0_153 = arith.constant 0 : index
    %135 = vector.load %arg9[%c0_152, %c0_153] : memref<256x128xf32, #tpu.memory_space<vmem>>, vector<256x128xf32>
    %136 = arith.addf %135, %134 : vector<256x128xf32>
    %c0_154 = arith.constant 0 : index
    %c0_155 = arith.constant 0 : index
    %137 = vector.load %arg9[%c0_154, %c0_155] : memref<256x128xf32, #tpu.memory_space<vmem>>, vector<256x128xf32>
    tpu.vector_store %arg9[%c0_154, %c0_155], %136 {strides = array<i32>} : memref<256x128xf32, #tpu.memory_space<vmem>>, vector<256x128xf32>,
    %c0_156 = arith.constant 0 : index
    %c1_157 = arith.constant 1 : index
    %c2_158 = arith.constant 2 : index
    %c0_159 = arith.constant 0 : index
    %138 = vector.load %arg2[%c0_156, %c1_157, %c2_158, %c0_159] : memref<1x18x18x128xf32, #tpu.memory_space<vmem>>, vector<1x16x16x128xf32>
    %139 = vector.shape_cast %138 : vector<1x16x16x128xf32> to vector<16x16x128xf32>
    %140 = vector.shape_cast %139 : vector<16x16x128xf32> to vector<256x128xf32>
    %141 = arith.truncf %140 : vector<256x128xf32> to vector<256x128xbf16>
    %c5_160 = arith.constant 5 : index
    %c0_161 = arith.constant 0 : index
    %c0_162 = arith.constant 0 : index
    %142 = vector.load %arg4[%c5_160, %c0_161, %c0_162] : memref<9x128x128xbf16, #tpu.memory_space<vmem>>, vector<1x128x128xbf16>
    %143 = vector.shape_cast %142 : vector<1x128x128xbf16> to vector<128x128xbf16>
    %cst_163 = arith.constant dense<0.000000e+00> : vector<256x128xf32>
    %144 = tpu.matmul %141, %143, %cst_163 {dimension_numbers = #tpu.dot_dimension_numbers<[1], [0], [0], [1], [0, 0, 1, 1], [], []>} : vector<256x128xbf16>, vector<128x128xbf16>, vector<256x128xf32> -> vector<256x128xf32>
    %c0_164 = arith.constant 0 : index
    %c0_165 = arith.constant 0 : index
    %145 = vector.load %arg9[%c0_164, %c0_165] : memref<256x128xf32, #tpu.memory_space<vmem>>, vector<256x128xf32>
    %146 = arith.addf %145, %144 : vector<256x128xf32>
    %c0_166 = arith.constant 0 : index
    %c0_167 = arith.constant 0 : index
    %147 = vector.load %arg9[%c0_166, %c0_167] : memref<256x128xf32, #tpu.memory_space<vmem>>, vector<256x128xf32>
    tpu.vector_store %arg9[%c0_166, %c0_167], %146 {strides = array<i32>} : memref<256x128xf32, #tpu.memory_space<vmem>>, vector<256x128xf32>,
    %c0_168 = arith.constant 0 : index
    %c2_169 = arith.constant 2 : index
    %c0_170 = arith.constant 0 : index
    %c0_171 = arith.constant 0 : index
    %148 = vector.load %arg2[%c0_168, %c2_169, %c0_170, %c0_171] : memref<1x18x18x128xf32, #tpu.memory_space<vmem>>, vector<1x16x16x128xf32>
    %149 = vector.shape_cast %148 : vector<1x16x16x128xf32> to vector<16x16x128xf32>
    %150 = vector.shape_cast %149 : vector<16x16x128xf32> to vector<256x128xf32>
    %151 = arith.truncf %150 : vector<256x128xf32> to vector<256x128xbf16>
    %c6_172 = arith.constant 6 : index
    %c0_173 = arith.constant 0 : index
    %c0_174 = arith.constant 0 : index
    %152 = vector.load %arg4[%c6_172, %c0_173, %c0_174] : memref<9x128x128xbf16, #tpu.memory_space<vmem>>, vector<1x128x128xbf16>
    %153 = vector.shape_cast %152 : vector<1x128x128xbf16> to vector<128x128xbf16>
    %cst_175 = arith.constant dense<0.000000e+00> : vector<256x128xf32>
    %154 = tpu.matmul %151, %153, %cst_175 {dimension_numbers = #tpu.dot_dimension_numbers<[1], [0], [0], [1], [0, 0, 1, 1], [], []>} : vector<256x128xbf16>, vector<128x128xbf16>, vector<256x128xf32> -> vector<256x128xf32>
    %c0_176 = arith.constant 0 : index
    %c0_177 = arith.constant 0 : index
    %155 = vector.load %arg9[%c0_176, %c0_177] : memref<256x128xf32, #tpu.memory_space<vmem>>, vector<256x128xf32>
    %156 = arith.addf %155, %154 : vector<256x128xf32>
    %c0_178 = arith.constant 0 : index
    %c0_179 = arith.constant 0 : index
    %157 = vector.load %arg9[%c0_178, %c0_179] : memref<256x128xf32, #tpu.memory_space<vmem>>, vector<256x128xf32>
    tpu.vector_store %arg9[%c0_178, %c0_179], %156 {strides = array<i32>} : memref<256x128xf32, #tpu.memory_space<vmem>>, vector<256x128xf32>,
    %c0_180 = arith.constant 0 : index
    %c2_181 = arith.constant 2 : index
    %c1_182 = arith.constant 1 : index
    %c0_183 = arith.constant 0 : index
    %158 = vector.load %arg2[%c0_180, %c2_181, %c1_182, %c0_183] : memref<1x18x18x128xf32, #tpu.memory_space<vmem>>, vector<1x16x16x128xf32>
    %159 = vector.shape_cast %158 : vector<1x16x16x128xf32> to vector<16x16x128xf32>
    %160 = vector.shape_cast %159 : vector<16x16x128xf32> to vector<256x128xf32>
    %161 = arith.truncf %160 : vector<256x128xf32> to vector<256x128xbf16>
    %c7_184 = arith.constant 7 : index
    %c0_185 = arith.constant 0 : index
    %c0_186 = arith.constant 0 : index
    %162 = vector.load %arg4[%c7_184, %c0_185, %c0_186] : memref<9x128x128xbf16, #tpu.memory_space<vmem>>, vector<1x128x128xbf16>
    %163 = vector.shape_cast %162 : vector<1x128x128xbf16> to vector<128x128xbf16>
    %cst_187 = arith.constant dense<0.000000e+00> : vector<256x128xf32>
    %164 = tpu.matmul %161, %163, %cst_187 {dimension_numbers = #tpu.dot_dimension_numbers<[1], [0], [0], [1], [0, 0, 1, 1], [], []>} : vector<256x128xbf16>, vector<128x128xbf16>, vector<256x128xf32> -> vector<256x128xf32>
    %c0_188 = arith.constant 0 : index
    %c0_189 = arith.constant 0 : index
    %165 = vector.load %arg9[%c0_188, %c0_189] : memref<256x128xf32, #tpu.memory_space<vmem>>, vector<256x128xf32>
    %166 = arith.addf %165, %164 : vector<256x128xf32>
    %c0_190 = arith.constant 0 : index
    %c0_191 = arith.constant 0 : index
    %167 = vector.load %arg9[%c0_190, %c0_191] : memref<256x128xf32, #tpu.memory_space<vmem>>, vector<256x128xf32>
    tpu.vector_store %arg9[%c0_190, %c0_191], %166 {strides = array<i32>} : memref<256x128xf32, #tpu.memory_space<vmem>>, vector<256x128xf32>,
    %c0_192 = arith.constant 0 : index
    %c2_193 = arith.constant 2 : index
    %c2_194 = arith.constant 2 : index
    %c0_195 = arith.constant 0 : index
    %168 = vector.load %arg2[%c0_192, %c2_193, %c2_194, %c0_195] : memref<1x18x18x128xf32, #tpu.memory_space<vmem>>, vector<1x16x16x128xf32>
    %169 = vector.shape_cast %168 : vector<1x16x16x128xf32> to vector<16x16x128xf32>
    %170 = vector.shape_cast %169 : vector<16x16x128xf32> to vector<256x128xf32>
    %171 = arith.truncf %170 : vector<256x128xf32> to vector<256x128xbf16>
    %c8_196 = arith.constant 8 : index
    %c0_197 = arith.constant 0 : index
    %c0_198 = arith.constant 0 : index
    %172 = vector.load %arg4[%c8_196, %c0_197, %c0_198] : memref<9x128x128xbf16, #tpu.memory_space<vmem>>, vector<1x128x128xbf16>
    %173 = vector.shape_cast %172 : vector<1x128x128xbf16> to vector<128x128xbf16>
    %cst_199 = arith.constant dense<0.000000e+00> : vector<256x128xf32>
    %174 = tpu.matmul %171, %173, %cst_199 {dimension_numbers = #tpu.dot_dimension_numbers<[1], [0], [0], [1], [0, 0, 1, 1], [], []>} : vector<256x128xbf16>, vector<128x128xbf16>, vector<256x128xf32> -> vector<256x128xf32>
    %c0_200 = arith.constant 0 : index
    %c0_201 = arith.constant 0 : index
    %175 = vector.load %arg9[%c0_200, %c0_201] : memref<256x128xf32, #tpu.memory_space<vmem>>, vector<256x128xf32>
    %176 = arith.addf %175, %174 : vector<256x128xf32>
    %c0_202 = arith.constant 0 : index
    %c0_203 = arith.constant 0 : index
    %177 = vector.load %arg9[%c0_202, %c0_203] : memref<256x128xf32, #tpu.memory_space<vmem>>, vector<256x128xf32>
    tpu.vector_store %arg9[%c0_202, %c0_203], %176 {strides = array<i32>} : memref<256x128xf32, #tpu.memory_space<vmem>>, vector<256x128xf32>,
    %c0_204 = arith.constant 0 : index
    %c0_205 = arith.constant 0 : index
    %178 = vector.load %arg9[%c0_204, %c0_205] : memref<256x128xf32, #tpu.memory_space<vmem>>, vector<256x128xf32>
    %c0_206 = arith.constant 0 : index
    %c0_207 = arith.constant 0 : index
    %179 = vector.load %arg5[%c0_206, %c0_207] : memref<1x128xf32, #tpu.memory_space<vmem>>, vector<1x128xf32>
    %180 = vector.broadcast %179 : vector<1x128xf32> to vector<256x128xf32>
    %181 = arith.addf %178, %180 : vector<256x128xf32>
    %cst_208 = arith.constant 0.000000e+00 : f32
    %182 = vector.broadcast %cst_208 : f32 to vector<256x128xf32>
    %183 = arith.maximumf %181, %182 : vector<256x128xf32>
    %184 = arith.truncf %183 : vector<256x128xf32> to vector<256x128xbf16>
    %c0_209 = arith.constant 0 : index
    %c0_210 = arith.constant 0 : index
    %185 = vector.load %arg6[%c0_209, %c0_210] : memref<128x128xbf16, #tpu.memory_space<vmem>>, vector<128x128xbf16>
    %cst_211 = arith.constant dense<0.000000e+00> : vector<256x128xf32>
    %186 = tpu.matmul %184, %185, %cst_211 {dimension_numbers = #tpu.dot_dimension_numbers<[1], [0], [0], [1], [0, 0, 1, 1], [], []>} : vector<256x128xbf16>, vector<128x128xbf16>, vector<256x128xf32> -> vector<256x128xf32>
    %c0_212 = arith.constant 0 : index
    %c0_213 = arith.constant 0 : index
    %187 = vector.load %arg7[%c0_212, %c0_213] : memref<1x128xf32, #tpu.memory_space<vmem>>, vector<1x128xf32>
    %188 = vector.broadcast %187 : vector<1x128xf32> to vector<256x128xf32>
    %189 = arith.addf %186, %188 : vector<256x128xf32>
    %190 = vector.shape_cast %189 : vector<256x128xf32> to vector<16x16x128xf32>
    %c0_214 = arith.constant 0 : index
    %c0_215 = arith.constant 0 : index
    %c0_216 = arith.constant 0 : index
    %c0_217 = arith.constant 0 : index
    %191 = vector.load %arg8[%c0_214, %c0_215, %c0_216, %c0_217] : memref<1x16x16x128xf32, #tpu.memory_space<vmem>>, vector<1x16x16x128xf32>
    %192 = vector.shape_cast %191 : vector<1x16x16x128xf32> to vector<16x16x128xf32>
    %193 = vector.shape_cast %190 : vector<16x16x128xf32> to vector<1x16x16x128xf32>
    tpu.vector_store %arg8[%c0_214, %c0_215, %c0_216, %c0_217], %193 {strides = array<i32>} : memref<1x16x16x128xf32, #tpu.memory_space<vmem>>, vector<1x16x16x128xf32>,
    return
  }
  func.func @transform_0(%arg0: i32) -> (i32, i32, i32, i32) {
    %c0_i32 = arith.constant 0 : i32
    %c0_i32_0 = arith.constant 0 : i32
    %c0_i32_1 = arith.constant 0 : i32
    %c0_i32_2 = arith.constant 0 : i32
    return %arg0, %c0_i32, %c0_i32_0, %c0_i32_1 : i32, i32, i32, i32
  }
  func.func @transform_1(%arg0: i32) -> (i32, i32, i32, i32) {
    %c0_i32 = arith.constant 0 : i32
    %c0_i32_0 = arith.constant 0 : i32
    %c0_i32_1 = arith.constant 0 : i32
    %c0_i32_2 = arith.constant 0 : i32
    return %arg0, %c0_i32, %c0_i32_0, %c0_i32_1 : i32, i32, i32, i32
  }
  func.func @transform_2(%arg0: i32) -> (i32, i32, i32) {
    %c0_i32 = arith.constant 0 : i32
    %c0_i32_0 = arith.constant 0 : i32
    %c0_i32_1 = arith.constant 0 : i32
    %c0_i32_2 = arith.constant 0 : i32
    return %c0_i32, %c0_i32_0, %c0_i32_1 : i32, i32, i32
  }
  func.func @transform_3(%arg0: i32) -> (i32, i32, i32) {
    %c0_i32 = arith.constant 0 : i32
    %c0_i32_0 = arith.constant 0 : i32
    %c0_i32_1 = arith.constant 0 : i32
    %c0_i32_2 = arith.constant 0 : i32
    return %c0_i32, %c0_i32_0, %c0_i32_1 : i32, i32, i32
  }
  func.func @transform_4(%arg0: i32) -> (i32, i32) {
    %c0_i32 = arith.constant 0 : i32
    %c0_i32_0 = arith.constant 0 : i32
    %c0_i32_1 = arith.constant 0 : i32
    return %c0_i32, %c0_i32_0 : i32, i32
  }
  func.func @transform_5(%arg0: i32) -> (i32, i32) {
    %c0_i32 = arith.constant 0 : i32
    %c0_i32_0 = arith.constant 0 : i32
    %c0_i32_1 = arith.constant 0 : i32
    return %c0_i32, %c0_i32_0 : i32, i32
  }
  func.func @transform_6(%arg0: i32) -> (i32, i32) {
    %c0_i32 = arith.constant 0 : i32
    %c0_i32_0 = arith.constant 0 : i32
    %c0_i32_1 = arith.constant 0 : i32
    return %c0_i32, %c0_i32_0 : i32, i32
  }
  func.func @transform_7(%arg0: i32) -> (i32, i32, i32, i32) {
    %c0_i32 = arith.constant 0 : i32
    %c0_i32_0 = arith.constant 0 : i32
    %c0_i32_1 = arith.constant 0 : i32
    %c0_i32_2 = arith.constant 0 : i32
    return %arg0, %c0_i32, %c0_i32_0, %c0_i32_1 : i32, i32, i32, i32
  }
}

</mosaic_0001>

<bundles_post_ra>
// kernel: seg_model_forward.2
= control target key start
LH: loop header
LB: loop body
LE: loop exit
PB: predicated region body
PF: predicated region fallthrough
CT: control target
= control target key end

     0   :  { %s7568_s30 = smov 0   ;;  %s9434_s0 = inlined_call_operand.vmem [shape: f32[2,18,18,128], index: 0, kind: input, shape index: {}]   ;;  %s9435_s1 = inlined_call_operand.vmem [shape: bf16[9,128,128], index: 1, kind: input, shape index: {}]   ;;  %s9436_s2 = inlined_call_operand.vmem [shape: f32[1,128], index: 2, kind: input, shape index: {}]   ;;  %s9437_s3 = inlined_call_operand.vmem [shape: bf16[9,128,128], index: 3, kind: input, shape index: {}]   ;;  %s9438_s4 = inlined_call_operand.vmem [shape: f32[1,128], index: 4, kind: input, shape index: {}]   ;;  %s9439_s5 = inlined_call_operand.vmem [shape: bf16[128,128], index: 5, kind: input, shape index: {}]   ;;  %s9440_s6 = inlined_call_operand.vmem [shape: f32[1,128], index: 6, kind: input, shape index: {}]   ;;  %s9441_s7 = inlined_call_operand.vmem [shape: f32[2,18,18,128], index: 7, kind: output, shape index: {0}]   ;;  %s9442_s8 = inlined_call_operand.vmem [shape: f32[2,8,8,128], index: 8, kind: output, shape index: {1}]   ;;  %s9443_s9 = inlined_call_operand.vmem [shape: f32[2,1,128], index: 9, kind: output, shape index: {2}]  }
   0x1 LB: > { %s5692_s10 = sadd.s32 4294967295, %s7515_s30   ;;  %p5696_p0 = scmp.ge.s32.totalorder %s7515_s30, 1  ;;  %s7515_s30 = sphi %s7568_s30, %s20_s30  }
   0x2   : > { %p292_p1 = scmp.lt.s32.totalorder %s7515_s30, 3 }
   0x4   : > { %p293_p2 = pnand %p5696_p0, %p292_p1 }
   0x6   : > { %296 = sbr.rel (%p293_p2) target bundleno = 1133 (0x46d), region = 48 }
   0xb   : > { %v7356_v0 = vld [vmem:[%s9435_s1 + $0x38] sm:$0xff]   ;;  %p336_p3 = scmp.lt.s32.totalorder %s5692_s10, 1  ;;  %v7358_v2 = vld [vmem:[%s9435_s1 + $0x30] sm:$0xff]   ;;  %v7360_v4 = vld [vmem:[%s9435_s1 + $0x28] sm:$0xff]  }
   0xc   : > { %v7357_v1 = vld [vmem:[%s9435_s1 + $0x78] sm:$0xff]   ;;  %6674 = vmatprep.subr.bf16.mxu0 %v7356_v0  ;;  %v7359_v3 = vld [vmem:[%s9435_s1 + $0x70] sm:$0xff]   ;;  %v7361_v5 = vld [vmem:[%s9435_s1 + $0x68] sm:$0xff]  }
   0xd   : > { %6722 = vmatprep.subr.bf16.mxu1 %v7357_v1  ;;  %6675 = vmatpush3.bf16.msra.mxu0 %v7356_v0  ;;  %s9593_s10 = smov (!%p336_p3, %s5692_s10), 1  ;;  %v7362_v6 = vld [vmem:[%s9435_s1 + $0x20] sm:$0xff]   ;;  %v7364_v8 = vld [vmem:[%s9435_s1 + $0x18] sm:$0xff]   ;;  %v7366_v10 = vld [vmem:[%s9435_s1 + $0x10] sm:$0xff]  }
   0xe   : > { %6723 = vmatpush3.bf16.msra.mxu1 %v7357_v1  ;;  %6676 = vmatprep.subr.bf16.mxu0 %v7358_v2  ;;  %v7363_v7 = vld [vmem:[%s9435_s1 + $0x60] sm:$0xff]   ;;  %s7346_s27 = smul.u32 432, %s9593_s10  ;;  %v7365_v9 = vld [vmem:[%s9435_s1 + $0x58] sm:$0xff]   ;;  %v7367_v14 = vld [vmem:[%s9435_s1 + $0x50] sm:$0xff]   ;;  %s6337_s21 = sshll.u32 %s9593_s10, 6 }
   0xf   : > { %6724 = vmatprep.subr.bf16.mxu1 %v7359_v3  ;;  %v7368_v18 = vld [vmem:[%s9435_s1 + $0x8] sm:$0xff]   ;;  %v7370_v20 = vld [vmem:[%s9435_s1] sm:$0xff]   ;;  %v7372_v26 = vld [vmem:[%s9435_s1 + $0xb8] sm:$0xff]   ;;  %s353_s29 = scalar_lea.vmem %s9443_s9, %s9593_s10 }
  0x10   : > { %s7614_s15 = scalar_lea.vmem %s9434_s0, %s7346_s27  ;;  %v7369_v19 = vld [vmem:[%s9435_s1 + $0x48] sm:$0xff]   ;;  %v7371_v21 = vld [vmem:[%s9435_s1 + $0x40] sm:$0xff]   ;;  %v7373_v37 = vld [vmem:[%s9435_s1 + $0xb0] sm:$0xff]   ;;  %s8392_s24 = scalar_lea.vmem %s9441_s7, %s7346_s27 }
  0x11   : > { %6677 = vmatpush3.bf16.msra.mxu0 %v7358_v2  ;;  %v355_v11 = vld [vmem:[%s7614_s15] sm:$0xff]  ;;  %v356_v12 = vld [vmem:[%s7614_s15 + $0x8] sm:$0xff]  ;;  %v357_v22 = vld [vmem:[%s7614_s15 + $0x18] sm:$0xff]  ;;  %s9403_s27 = scalar_lea.vmem %s9442_s8, %s6337_s21 }
  0x12   : > { %6725 = vmatpush3.bf16.msra.mxu1 %v7359_v3  ;;  %6678 = vmatprep.subr.bf16.mxu0 %v7360_v4  ;;  %v660_v13 = vld [vmem:[%s7614_s15 + $0x1] sm:$0xff]  ;;  %v387_v15 = vpack.c.bf16 %v356_v12, %v355_v11  ;;  %v661_v16 = vld [vmem:[%s7614_s15 + $0x9] sm:$0xff]  ;;  %v662_v24 = vld [vmem:[%s7614_s15 + $0x19] sm:$0xff] }
  0x13   : > { %6726 = vmatprep.subr.bf16.mxu1 %v7361_v5  ;;  %v692_v17 = vpack.c.bf16 %v661_v16, %v660_v13  ;;  %v358_v23 = vld [vmem:[%s7614_s15 + $0x20] sm:$0xff]  ;;  %v359_v27 = vld [vmem:[%s7614_s15 + $0x30] sm:$0xff]  ;;  %v360_v28 = vld [vmem:[%s7614_s15 + $0x38] sm:$0xff] }
  0x14   : > { %6690 = vmatprep.mubr.bf16.mxu0 %v387_v15  ;;  %v663_v25 = vld [vmem:[%s7614_s15 + $0x21] sm:$0xff]  ;;  %v664_v29 = vld [vmem:[%s7614_s15 + $0x31] sm:$0xff]  ;;  %v665_v30 = vld [vmem:[%s7614_s15 + $0x39] sm:$0xff]  ;;  %v7649_v31 = vpack.c.bf16 %v358_v23, %v357_v22  ;;  %v7653_v33 = vpack.c.bf16 %v360_v28, %v359_v27 }
  0x15   : > { %6679 = vmatpush3.bf16.msra.mxu0 %v7360_v4  ;;  %6738 = vmatprep.mubr.bf16.mxu1 %v692_v17  ;;  %v7651_v32 = vpack.c.bf16 %v663_v25, %v662_v24  ;;  %v7655_v34 = vpack.c.bf16 %v665_v30, %v664_v29  ;;  %v361_v35 = vld [vmem:[%s7614_s15 + $0x48] sm:$0xff]  ;;  %v362_v36 = vld [vmem:[%s7614_s15 + $0x50] sm:$0xff]  ;;  %v363_v40 = vld [vmem:[%s7614_s15 + $0x60] sm:$0xff] }
  0x16   : > { %6727 = vmatpush3.bf16.msra.mxu1 %v7361_v5  ;;  %6680 = vmatprep.subr.bf16.mxu0 %v7362_v6  ;;  %v666_v38 = vld [vmem:[%s7614_s15 + $0x49] sm:$0xff]  ;;  %v667_v39 = vld [vmem:[%s7614_s15 + $0x51] sm:$0xff]  ;;  %v668_v45 = vld [vmem:[%s7614_s15 + $0x61] sm:$0xff]  ;;  %v7681_v47 = vpack.c.bf16 %v362_v36, %v361_v35 }
  0x17   : > { %6728 = vmatprep.subr.bf16.mxu1 %v7363_v7  ;;  %v7377_v41 = vld [vmem:[%s9435_s1 + $0xf8] sm:$0xff]   ;;  %v364_v42 = vld [vmem:[%s7614_s15 + $0x68] sm:$0xff]  ;;  %v7378_v44 = vld [vmem:[%s9435_s1 + $0xf0] sm:$0xff]   ;;  %v7683_v48 = vpack.c.bf16 %v667_v39, %v666_v38 }
  0x18   : > { %v7374_v43 = vld [vmem:[%s9435_s1 + $0xa8] sm:$0xff]   ;;  %v7685_v49 = vpack.c.bf16 %v364_v42, %v363_v40  ;;  %v7375_v51 = vld [vmem:[%s9435_s1 + $0xa0] sm:$0xff]   ;;  %v365_v52 = vld [vmem:[%s7614_s15 + $0x78] sm:$0xff] }
  0x19   : > { %6681 = vmatpush3.bf16.msra.mxu0 %v7362_v6  ;;  %v669_v46 = vld [vmem:[%s7614_s15 + $0x69] sm:$0xff]  ;;  %v366_v54 = vld [vmem:[%s7614_s15 + $0x80] sm:$0xff]  ;;  %v368_v58 = vld [vmem:[%s7614_s15 + $0x98] sm:$0xff] }
  0x1a   : > { %6729 = vmatpush3.bf16.msra.mxu1 %v7363_v7  ;;  %6682 = vmatprep.subr.bf16.mxu0 %v7364_v8  ;;  %v7687_v50 = vpack.c.bf16 %v669_v46, %v668_v45  ;;  %v7380_v53 = vld [vmem:[%s9435_s1 + $0xe8] sm:$0xff]   ;;  %v670_v55 = vld [vmem:[%s7614_s15 + $0x79] sm:$0xff]  ;;  %v367_v57 = vld [vmem:[%s7614_s15 + $0x90] sm:$0xff]  ;;  %v7713_v63 = vpack.c.bf16 %v366_v54, %v365_v52 }
  0x1b   : > { %6730 = vmatprep.subr.bf16.mxu1 %v7365_v9  ;;  %v671_v56 = vld [vmem:[%s7614_s15 + $0x81] sm:$0xff]  ;;  %v672_v60 = vld [vmem:[%s7614_s15 + $0x91] sm:$0xff]  ;;  %v673_v61 = vld [vmem:[%s7614_s15 + $0x99] sm:$0xff]  ;;  %v7717_v1 = vpack.c.bf16 %v368_v58, %v367_v57 }
  0x1c   : > { %v7381_v59 = vld [vmem:[%s9435_s1 + $0xe0] sm:$0xff]   ;;  %v7376_v62 = vld [vmem:[%s9435_s1 + $0x98] sm:$0xff]   ;;  %v7715_v0 = vpack.c.bf16 %v671_v56, %v670_v55  ;;  %v7719_v2 = vpack.c.bf16 %v673_v61, %v672_v60  ;;  %v369_v3 = vld [vmem:[%s7614_s15 + $0xa8] sm:$0xff] }
  0x1d   : > { %6683 = vmatpush3.bf16.msra.mxu0 %v7364_v8  ;;  %v370_v4 = vld [vmem:[%s7614_s15 + $0xb0] sm:$0xff]  ;;  %v7383_v6 = vld [vmem:[%s9435_s1 + $0xd8] sm:$0xff]   ;;  %v372_v11 = vld [vmem:[%s7614_s15 + $0xc8] sm:$0xff] }
  0x1e   : > { %6731 = vmatpush3.bf16.msra.mxu1 %v7365_v9  ;;  %6684 = vmatprep.subr.bf16.mxu0 %v7366_v10  ;;  %v7379_v5 = vld [vmem:[%s9435_s1 + $0x90] sm:$0xff]   ;;  %v371_v9 = vld [vmem:[%s7614_s15 + $0xc0] sm:$0xff]  ;;  %v7745_v15 = vpack.c.bf16 %v370_v4, %v369_v3  ;;  %v376_v27 = vld [vmem:[%s7614_s15 + $0xf8] sm:$0xff] }
  0x1f   : > { %6732 = vmatprep.subr.bf16.mxu1 %v7367_v14  ;;  %v674_v7 = vld [vmem:[%s7614_s15 + $0xa9] sm:$0xff]  ;;  %v675_v8 = vld [vmem:[%s7614_s15 + $0xb1] sm:$0xff]  ;;  %v676_v12 = vld [vmem:[%s7614_s15 + $0xc1] sm:$0xff]  ;;  %v7749_v17 = vpack.c.bf16 %v372_v11, %v371_v9 }
  0x20   : > { %v677_v13 = vld [vmem:[%s7614_s15 + $0xc9] sm:$0xff]  ;;  %v7747_v16 = vpack.c.bf16 %v675_v8, %v674_v7  ;;  %v374_v22 = vld [vmem:[%s7614_s15 + $0xe0] sm:$0xff]  ;;  %v680_v28 = vld [vmem:[%s7614_s15 + $0xf1] sm:$0xff] }
  0x21   : > { %6685 = vmatpush3.bf16.msra.mxu0 %v7366_v10  ;;  %v7384_v10 = vld [vmem:[%s9435_s1 + $0xd0] sm:$0xff]   ;;  %v678_v23 = vld [vmem:[%s7614_s15 + $0xd9] sm:$0xff]  ;;  %v679_v24 = vld [vmem:[%s7614_s15 + $0xe1] sm:$0xff] }
  0x22   : > { %6733 = vmatpush3.bf16.msra.mxu1 %v7367_v14  ;;  %6686 = vmatprep.subr.bf16.mxu0 %v7368_v18  ;;  %v7382_v14 = vld [vmem:[%s9435_s1 + $0x88] sm:$0xff]   ;;  %v7387_v25 = vld [vmem:[%s9435_s1 + $0xc0] sm:$0xff]   ;;  %v7777_v30 = vld [vmem:[%s9435_s1 + $0x138] sm:$0xff]   ;;  %v7781_v36 = vpack.c.bf16 %v679_v24, %v678_v23 }
  0x23   : > { %6734 = vmatprep.subr.bf16.mxu1 %v7369_v19  ;;  %v681_v29 = vld [vmem:[%s7614_s15 + $0xf9] sm:$0xff]  ;;  %v377_v39 = vld [vmem:[%s7614_s15 + $0x108] sm:$0xff]  ;;  %v378_v40 = vld [vmem:[%s7614_s15 + $0x110] sm:$0xff] }
  0x24   : > { %v7785_v38 = vpack.c.bf16 %v681_v29, %v680_v28  ;;  %v682_v42 = vld [vmem:[%s7614_s15 + $0x109] sm:$0xff]  ;;  %v684_v46 = vld [vmem:[%s7614_s15 + $0x121] sm:$0xff]  ;;  %v7806_v52 = vpack.c.bf16 %v378_v40, %v377_v39  ;;  %v381_v56 = vld [vmem:[%s7614_s15 + $0x138] sm:$0xff] }
  0x25   : > { %6687 = vmatpush3.bf16.msra.mxu0 %v7368_v18  ;;  %v7751_v18 = vpack.c.bf16 %v677_v13, %v676_v12  ;;  %v380_v45 = vld [vmem:[%s7614_s15 + $0x128] sm:$0xff]  ;;  %v382_v57 = vld [vmem:[%s7614_s15 + $0x140] sm:$0xff]  ;;  %v383_v60 = vld [vmem:[%s7614_s15 + $0x150] sm:$0xff] }
  0x26   : > { %6735 = vmatpush3.bf16.msra.mxu1 %v7369_v19  ;;  %6688 = vmatprep.subr.bf16.mxu0 %v7370_v20  ;;  %v7385_v19 = vld [vmem:[%s9435_s1 + $0x80] sm:$0xff]   ;;  %v384_v61 = vld [vmem:[%s7614_s15 + $0x158] sm:$0xff]  ;;  %v7826_v4 = vpack.c.bf16 %v382_v57, %v381_v56  ;;  %v385_v8 = vld [vmem:[%s7614_s15 + $0x168] sm:$0xff] }
  0x27   : > { %6736 = vmatprep.subr.bf16.mxu1 %v7371_v21  ;;  %v686_v58 = vld [vmem:[%s7614_s15 + $0x139] sm:$0xff]  ;;  %v386_v9 = vld [vmem:[%s7614_s15 + $0x170] sm:$0xff]  ;;  %v1030_v12 = vld [vmem:[%s7614_s15 + $0x2] sm:$0xff] }
  0x28   : > { %v689_v3 = vld [vmem:[%s7614_s15 + $0x159] sm:$0xff]  ;;  %v691_v11 = vld [vmem:[%s7614_s15 + $0x171] sm:$0xff]  ;;  %v1038_v39 = vld [vmem:[%s7614_s15 + $0x62] sm:$0xff] }
  0x29   : > { %6689 = vmatpush3.bf16.msra.mxu0 %v7370_v20  ;;  %v373_v20 = vld [vmem:[%s7614_s15 + $0xd8] sm:$0xff]  ;;  %v1031_v13 = vld [vmem:[%s7614_s15 + $0xa] sm:$0xff] }
  0x2a   : > { %6737 = vmatpush3.bf16.msra.mxu1 %v7371_v21  ;;  %6770 = vmatprep.subr.bf16.mxu0 %v7372_v26  ;;  %v7386_v21 = vld [vmem:[%s9435_s1 + $0xc8] sm:$0xff]   ;;  %v7779_v35 = vpack.c.bf16 %v374_v22, %v373_v20  ;;  %v1062_v20 = vpack.c.bf16 %v1031_v13, %v1030_v12  ;;  %v1034_v23 = vld [vmem:[%s7614_s15 + $0x32] sm:$0xff]  ;;  %v1035_v24 = vld [vmem:[%s7614_s15 + $0x3a] sm:$0xff] }
  0x2b   : > { %6818 = vmatprep.subr.bf16.mxu1 %v7377_v41  ;;  %v1033_v22 = vld [vmem:[%s7614_s15 + $0x22] sm:$0xff]  ;;  %v1036_v28 = vld [vmem:[%s7614_s15 + $0x4a] sm:$0xff]  ;;  %v7392_v56 = vld [vmem:[%s9435_s1 + $0x118] sm:$0xff]  }
  0x2c   : > { %6691 = vmatmul.mubr.bf16.vlgmr.msra.gmra.mxu0 %v7649_v31  ;;  %v7394_v29 = vld [vmem:[%s9435_s1 + $0x170] sm:$0xff]   ;;  %v7399_v57 = vld [vmem:[%s9435_s1 + $0x158] sm:$0xff]   ;;  %v1049_v12 = vld [vmem:[%s7614_s15 + $0xe2] sm:$0xff] }
  0x2d   : > { %6739 = vmatmul.mubr.bf16.vlgmr.msra.gmra.mxu1 %v7651_v32  ;;  %6771 = vmatpush3.bf16.msra.mxu0 %v7372_v26  ;;  %v375_v26 = vld [vmem:[%s7614_s15 + $0xf0] sm:$0xff] }
  0x2e   : > { %6694 = vmatprep.mubr.bf16.mxu0 %v7653_v33  ;;  %6742 = vmatprep.mubr.bf16.mxu1 %v7655_v34  ;;  %v1039_v40 = vld [vmem:[%s7614_s15 + $0x6a] sm:$0xff]  ;;  %v1050_v13 = vld [vmem:[%s7614_s15 + $0xf2] sm:$0xff] }
  0x2f   : > { %6772 = vmatprep.subr.bf16.mxu0 %v7373_v37  ;;  %6819 = vmatpush3.bf16.msra.mxu1 %v7377_v41  ;;  %v7793_v41 = vld [vmem:[%s9435_s1 + $0x178] sm:$0xff]  }
  0x30   : > { %6820 = vmatprep.subr.bf16.mxu1 %v7378_v44 }
  0x31   : > { %6773 = vmatpush3.bf16.msra.mxu0 %v7373_v37  ;;  %v7783_v37 = vpack.c.bf16 %v376_v27, %v375_v26  ;;  %v7857_v26 = vpack.c.bf16 %v1035_v24, %v1034_v23  ;;  %v7389_v27 = vld [vmem:[%s9435_s1 + $0x130] sm:$0xff]   ;;  %v7409_v23 = vld [vmem:[%s9435_s1 + $0x1f8] sm:$0xff]  }
  0x32   : > { %6774 = vmatprep.subr.bf16.mxu0 %v7374_v43 }
  0x33   : > { %6821 = vmatpush3.bf16.msra.mxu1 %v7378_v44  ;;  %v379_v44 = vld [vmem:[%s7614_s15 + $0x120] sm:$0xff] }
  0x34   : > { %6695 = vmatmul.mubr.bf16.gmra.mxu0 %v7681_v47  ;;  %6822 = vmatprep.subr.bf16.mxu1 %v7380_v53  ;;  %v7810_v54 = vpack.c.bf16 %v380_v45, %v379_v44  ;;  %v1040_v44 = vld [vmem:[%s7614_s15 + $0x7a] sm:$0xff]  ;;  %v1041_v45 = vld [vmem:[%s7614_s15 + $0x82] sm:$0xff] }
  0x35   : > { %6743 = vmatmul.mubr.bf16.gmra.mxu1 %v7683_v48  ;;  %6698 = vmatprep.mubr.bf16.mxu0 %v7685_v49 }
  0x36   : > { %6746 = vmatprep.mubr.bf16.mxu1 %v7687_v50  ;;  %6775 = vmatpush3.bf16.msra.mxu0 %v7374_v43  ;;  %v683_v43 = vld [vmem:[%s7614_s15 + $0x111] sm:$0xff] }
  0x37   : > { %6776 = vmatprep.subr.bf16.mxu0 %v7375_v51  ;;  %6823 = vmatpush3.bf16.msra.mxu1 %v7380_v53  ;;  %v7808_v53 = vpack.c.bf16 %v683_v43, %v682_v42  ;;  %v7390_v42 = vld [vmem:[%s9435_s1 + $0x128] sm:$0xff]   ;;  %v7883_v43 = vpack.c.bf16 %v1039_v40, %v1038_v39  ;;  %v1056_v40 = vld [vmem:[%s7614_s15 + $0x13a] sm:$0xff] }
  0x38   : > { %6824 = vmatprep.subr.bf16.mxu1 %v7381_v59 }
  0x3a   : > { %6777 = vmatpush3.bf16.msra.mxu0 %v7375_v51  ;;  %v685_v51 = vld [vmem:[%s7614_s15 + $0x129] sm:$0xff] }
  0x3b   : > { %6778 = vmatprep.subr.bf16.mxu0 %v7376_v62  ;;  %6825 = vmatpush3.bf16.msra.mxu1 %v7381_v59  ;;  %v7812_v55 = vpack.c.bf16 %v685_v51, %v684_v46  ;;  %v687_v59 = vld [vmem:[%s7614_s15 + $0x141] sm:$0xff] }
  0x3c   : > { %6699 = vmatmul.mubr.bf16.gmra.mxu0 %v7713_v63  ;;  %6826 = vmatprep.subr.bf16.mxu1 %v7383_v6  ;;  %v7391_v46 = vld [vmem:[%s9435_s1 + $0x120] sm:$0xff]  }
  0x3d   : > { %6747 = vmatmul.mubr.bf16.gmra.mxu1 %v7715_v0  ;;  %6702 = vmatprep.mubr.bf16.mxu0 %v7717_v1  ;;  %v7397_v51 = vld [vmem:[%s9435_s1 + $0x160] sm:$0xff]  }
  0x3e   : > { %6750 = vmatprep.mubr.bf16.mxu1 %v7719_v2  ;;  %6779 = vmatpush3.bf16.msra.mxu0 %v7376_v62  ;;  %v688_v62 = vld [vmem:[%s7614_s15 + $0x151] sm:$0xff] }
  0x3f   : > { %6780 = vmatprep.subr.bf16.mxu0 %v7379_v5  ;;  %6827 = vmatpush3.bf16.msra.mxu1 %v7383_v6  ;;  %v7830_v6 = vpack.c.bf16 %v384_v61, %v383_v60  ;;  %v7832_v7 = vpack.c.bf16 %v689_v3, %v688_v62  ;;  %v1045_v60 = vld [vmem:[%s7614_s15 + $0xb2] sm:$0xff]  ;;  %v1046_v61 = vld [vmem:[%s7614_s15 + $0xc2] sm:$0xff]  ;;  %v1047_v62 = vld [vmem:[%s7614_s15 + $0xca] sm:$0xff] }
  0x40   : > { %6828 = vmatprep.subr.bf16.mxu1 %v7384_v10  ;;  %v7400_v3 = vld [vmem:[%s9435_s1 + $0x150] sm:$0xff]  }
  0x42   : > { %6781 = vmatpush3.bf16.msra.mxu0 %v7379_v5  ;;  %v7828_v5 = vpack.c.bf16 %v687_v59, %v686_v58  ;;  %v7905_v58 = vpack.c.bf16 %v1041_v45, %v1040_v44  ;;  %v1044_v59 = vld [vmem:[%s7614_s15 + $0xaa] sm:$0xff] }
  0x43   : > { %6782 = vmatprep.subr.bf16.mxu0 %v7382_v14  ;;  %6829 = vmatpush3.bf16.msra.mxu1 %v7384_v10  ;;  %v690_v10 = vld [vmem:[%s7614_s15 + $0x169] sm:$0xff] }
  0x44   : > { %6703 = vmatmul.mubr.bf16.gmra.mxu0 %v7745_v15  ;;  %6830 = vmatprep.subr.bf16.mxu1 %v7386_v21  ;;  %v1060_v45 = vld [vmem:[%s7614_s15 + $0x16a] sm:$0xff] }
  0x45   : > { %6751 = vmatmul.mubr.bf16.gmra.mxu1 %v7747_v16  ;;  %6706 = vmatprep.mubr.bf16.mxu0 %v7749_v17 }
  0x46   : > { %6754 = vmatprep.mubr.bf16.mxu1 %v7751_v18  ;;  %6783 = vmatpush3.bf16.msra.mxu0 %v7382_v14  ;;  %v7844_v14 = vpack.c.bf16 %v386_v9, %v385_v8  ;;  %v7398_v8 = vld [vmem:[%s9435_s1 + $0x108] sm:$0xff]  }
  0x47   : > { %6784 = vmatprep.subr.bf16.mxu0 %v7385_v19  ;;  %6831 = vmatpush3.bf16.msra.mxu1 %v7386_v21  ;;  %v1032_v21 = vld [vmem:[%s7614_s15 + $0x1a] sm:$0xff]  ;;  %v7402_v9 = vld [vmem:[%s9435_s1 + $0x148] sm:$0xff]  }
  0x48   : > { %6832 = vmatprep.subr.bf16.mxu1 %v7387_v25 }
  0x4a   : > { %6785 = vmatpush3.bf16.msra.mxu0 %v7385_v19  ;;  %v7846_v19 = vpack.c.bf16 %v691_v11, %v690_v10  ;;  %v7929_v10 = vpack.c.bf16 %v1045_v60, %v1044_v59  ;;  %v1048_v11 = vld [vmem:[%s7614_s15 + $0xda] sm:$0xff]  ;;  %v5927_v60 = vld [vmem:[%s7614_s15 + $0x48] sm:$0xff] }
  0x4b   : > { %6866 = vmatprep.subr.bf16.mxu0 %v7777_v30  ;;  %6833 = vmatpush3.bf16.msra.mxu1 %v7387_v25  ;;  %v7855_v25 = vpack.c.bf16 %v1033_v22, %v1032_v21  ;;  %v7403_v21 = vld [vmem:[%s9435_s1 + $0x140] sm:$0xff]   ;;  %v7404_v22 = vld [vmem:[%s9435_s1 + $0x1b8] sm:$0xff]   ;;  %v7953_v24 = vpack.c.bf16 %v1049_v12, %v1048_v11 }
  0x4c   : > { %6707 = vmatmul.mubr.bf16.gmra.mxu0 %v7779_v35  ;;  %6914 = vmatprep.subr.bf16.mxu1 %v7793_v41 }
  0x4d   : > { %6755 = vmatmul.mubr.bf16.gmra.mxu1 %v7781_v36  ;;  %6710 = vmatprep.mubr.bf16.mxu0 %v7783_v37 }
  0x4e   : > { %6758 = vmatprep.mubr.bf16.mxu1 %v7785_v38 }
  0x54   : > { %6711 = vmatmul.mubr.bf16.gmra.mxu0 %v7806_v52 }
  0x55   : > { %6759 = vmatmul.mubr.bf16.gmra.mxu1 %v7808_v53  ;;  %6714 = vmatprep.mubr.bf16.mxu0 %v7810_v54 }
  0x56   : > { %6762 = vmatprep.mubr.bf16.mxu1 %v7812_v55 }
  0x5c   : > { %6715 = vmatmul.mubr.bf16.gmra.mxu0 %v7826_v4 }
  0x5d   : > { %6763 = vmatmul.mubr.bf16.gmra.mxu1 %v7828_v5  ;;  %6718 = vmatprep.mubr.bf16.mxu0 %v7830_v6 }
  0x5e   : > { %6766 = vmatprep.mubr.bf16.mxu1 %v7832_v7 }
  0x64   : > { %6719 = vmatmul.mubr.bf16.gmra.mxu0 %v7844_v14 }
  0x65   : > { %6767 = vmatmul.mubr.bf16.gmra.mxu1 %v7846_v19  ;;  %6786 = vmatprep.mubr.bf16.mxu0 %v1062_v20  ;;  %v1051_v20 = vld [vmem:[%s7614_s15 + $0xfa] sm:$0xff] }
  0x66   : > { %6834 = vmatprep.mubr.bf16.mxu1 %v7649_v31  ;;  %v1037_v31 = vld [vmem:[%s7614_s15 + $0x52] sm:$0xff] }
  0x6c   : > { %6787 = vmatmul.mubr.bf16.vlgmr.msra.gmra.mxu0 %v7855_v25 }
  0x6d   : > { %6867 = vmatpush3.bf16.msra.mxu0 %v7777_v30  ;;  %6835 = vmatmul.mubr.bf16.vlgmr.msra.gmra.mxu1 %v7653_v33  ;;  %v7396_v33 = vld [vmem:[%s9435_s1 + $0x168] sm:$0xff]   ;;  %v7881_v30 = vpack.c.bf16 %v1037_v31, %v1036_v28 }
  0x6e   : > { %6790 = vmatprep.mubr.bf16.mxu0 %v7857_v26  ;;  %6868 = vmatprep.subr.bf16.mxu0 %v7389_v27  ;;  %v1054_v28 = vld [vmem:[%s7614_s15 + $0x122] sm:$0xff] }
  0x6f   : > { %6838 = vmatprep.mubr.bf16.mxu1 %v7681_v47  ;;  %6915 = vmatpush3.bf16.msra.mxu1 %v7793_v41  ;;  %v1042_v47 = vld [vmem:[%s7614_s15 + $0x92] sm:$0xff]  ;;  %v1043_v41 = vld [vmem:[%s7614_s15 + $0x9a] sm:$0xff] }
  0x70   : > { %6916 = vmatprep.subr.bf16.mxu1 %v7394_v29 }
  0x71   : > { %6869 = vmatpush3.bf16.msra.mxu0 %v7389_v27  ;;  %v1052_v27 = vld [vmem:[%s7614_s15 + $0x10a] sm:$0xff] }
  0x72   : > { %6870 = vmatprep.subr.bf16.mxu0 %v7390_v42 }
  0x73   : > { %6917 = vmatpush3.bf16.msra.mxu1 %v7394_v29  ;;  %v1055_v29 = vld [vmem:[%s7614_s15 + $0x12a] sm:$0xff] }
  0x74   : > { %6791 = vmatmul.mubr.bf16.gmra.mxu0 %v7881_v30  ;;  %6918 = vmatprep.subr.bf16.mxu1 %v7396_v33  ;;  %v7967_v39 = vpack.c.bf16 %v1055_v29, %v1054_v28  ;;  %v5933_v28 = vld [vmem:[%s7614_s15 + $0x90] sm:$0xff]  ;;  %v5934_v29 = vld [vmem:[%s7614_s15 + $0x98] sm:$0xff] }
  0x75   : > { %6839 = vmatmul.mubr.bf16.gmra.mxu1 %v7685_v49  ;;  %6794 = vmatprep.mubr.bf16.mxu0 %v7883_v43  ;;  %v7907_v49 = vpack.c.bf16 %v1043_v41, %v1042_v47  ;;  %v5787_v47 = vld [vmem:[%s7614_s15 + $0x180] sm:$0xff] }
  0x76   : > { %6842 = vmatprep.mubr.bf16.mxu1 %v7713_v63  ;;  %6871 = vmatpush3.bf16.msra.mxu0 %v7390_v42  ;;  %v7395_v63 = vld [vmem:[%s9435_s1 + $0x110] sm:$0xff]   ;;  %v1057_v42 = vld [vmem:[%s7614_s15 + $0x142] sm:$0xff] }
  0x77   : > { %6872 = vmatprep.subr.bf16.mxu0 %v7391_v46  ;;  %6919 = vmatpush3.bf16.msra.mxu1 %v7396_v33  ;;  %v1058_v33 = vld [vmem:[%s7614_s15 + $0x152] sm:$0xff] }
  0x78   : > { %6920 = vmatprep.subr.bf16.mxu1 %v7397_v51 }
  0x7a   : > { %6873 = vmatpush3.bf16.msra.mxu0 %v7391_v46  ;;  %v1061_v46 = vld [vmem:[%s7614_s15 + $0x172] sm:$0xff] }
  0x7b   : > { %6874 = vmatprep.subr.bf16.mxu0 %v7392_v56  ;;  %6921 = vmatpush3.bf16.msra.mxu1 %v7397_v51  ;;  %v7989_v41 = vpack.c.bf16 %v1061_v46, %v1060_v45  ;;  %v7406_v51 = vld [vmem:[%s9435_s1 + $0x1a8] sm:$0xff]   ;;  %v2548_v46 = vpack.c.bf16 %v5934_v29, %v5933_v28 }
  0x7c   : > { %6795 = vmatmul.mubr.bf16.gmra.mxu0 %v7905_v58  ;;  %6922 = vmatprep.subr.bf16.mxu1 %v7399_v57 }
  0x7d   : > { %6843 = vmatmul.mubr.bf16.gmra.mxu1 %v7717_v1  ;;  %6798 = vmatprep.mubr.bf16.mxu0 %v7907_v49  ;;  %v7931_v1 = vpack.c.bf16 %v1047_v62, %v1046_v61  ;;  %v5983_v61 = vld [vmem:[%s7614_s15 + $0x49] sm:$0xff]  ;;  %v5984_v62 = vld [vmem:[%s7614_s15 + $0x51] sm:$0xff] }
  0x7e   : > { %6846 = vmatprep.mubr.bf16.mxu1 %v7745_v15  ;;  %6875 = vmatpush3.bf16.msra.mxu0 %v7392_v56  ;;  %v7401_v15 = vld [vmem:[%s9435_s1 + $0x100] sm:$0xff]   ;;  %v7420_v56 = vld [vmem:[%s9435_s1 + $0x238] sm:$0xff]   ;;  %v2915_v11 = vpack.c.bf16 %v5984_v62, %v5983_v61  ;;  %v7425_v61 = vld [vmem:[%s9435_s1 + $0x210] sm:$0xff]  }
  0x7f   : > { %6876 = vmatprep.subr.bf16.mxu0 %v7395_v63  ;;  %6923 = vmatpush3.bf16.msra.mxu1 %v7399_v57  ;;  %v5981_v57 = vld [vmem:[%s7614_s15 + $0x31] sm:$0xff] }
  0x80   : > { %6924 = vmatprep.subr.bf16.mxu1 %v7400_v3 }
  0x82   : > { %6877 = vmatpush3.bf16.msra.mxu0 %v7395_v63  ;;  %v5928_v63 = vld [vmem:[%s7614_s15 + $0x50] sm:$0xff] }
  0x83   : > { %6878 = vmatprep.subr.bf16.mxu0 %v7398_v8  ;;  %6925 = vmatpush3.bf16.msra.mxu1 %v7400_v3  ;;  %v5929_v3 = vld [vmem:[%s7614_s15 + $0x60] sm:$0xff] }
  0x84   : > { %6799 = vmatmul.mubr.bf16.gmra.mxu0 %v7929_v10  ;;  %6926 = vmatprep.subr.bf16.mxu1 %v7402_v9 }
  0x85   : > { %6847 = vmatmul.mubr.bf16.gmra.mxu1 %v7749_v17  ;;  %6802 = vmatprep.mubr.bf16.mxu0 %v7931_v1  ;;  %v7955_v17 = vpack.c.bf16 %v1051_v20, %v1050_v13 }
  0x86   : > { %6850 = vmatprep.mubr.bf16.mxu1 %v7779_v35  ;;  %6879 = vmatpush3.bf16.msra.mxu0 %v7398_v8  ;;  %v1053_v35 = vld [vmem:[%s7614_s15 + $0x112] sm:$0xff]  ;;  %v5930_v8 = vld [vmem:[%s7614_s15 + $0x68] sm:$0xff] }
  0x87   : > { %6880 = vmatprep.subr.bf16.mxu0 %v7401_v15  ;;  %6927 = vmatpush3.bf16.msra.mxu1 %v7402_v9  ;;  %v7965_v31 = vpack.c.bf16 %v1053_v35, %v1052_v27  ;;  %v2545_v9 = vpack.c.bf16 %v5928_v63, %v5927_v60  ;;  %v2546_v12 = vpack.c.bf16 %v5930_v8, %v5929_v3 }
  0x88   : > { %6928 = vmatprep.subr.bf16.mxu1 %v7403_v21 }
  0x8a   : > { %6881 = vmatpush3.bf16.msra.mxu0 %v7401_v15  ;;  %v7421_v15 = vld [vmem:[%s9435_s1 + $0x230] sm:$0xff]  }
  0x8b   : > { %6929 = vmatpush3.bf16.msra.mxu1 %v7403_v21  ;;  %6962 = vmatprep.subr.bf16.mxu0 %v7404_v22  ;;  %v5931_v21 = vld [vmem:[%s7614_s15 + $0x78] sm:$0xff] }
  0x8c   : > { %6803 = vmatmul.mubr.bf16.gmra.mxu0 %v7953_v24  ;;  %7010 = vmatprep.subr.bf16.mxu1 %v7409_v23 }
  0x8d   : > { %6851 = vmatmul.mubr.bf16.gmra.mxu1 %v7783_v37  ;;  %6806 = vmatprep.mubr.bf16.mxu0 %v7955_v17  ;;  %v1059_v37 = vld [vmem:[%s7614_s15 + $0x15a] sm:$0xff] }
  0x8e   : > { %6854 = vmatprep.mubr.bf16.mxu1 %v7806_v52  ;;  %v7977_v52 = vpack.c.bf16 %v1057_v42, %v1056_v40  ;;  %v7979_v44 = vpack.c.bf16 %v1059_v37, %v1058_v33  ;;  %v5989_v40 = vld [vmem:[%s7614_s15 + $0x91] sm:$0xff]  ;;  %v5990_v42 = vld [vmem:[%s7614_s15 + $0x99] sm:$0xff] }
  0x94   : > { %6807 = vmatmul.mubr.bf16.gmra.mxu0 %v7965_v31 }
  0x95   : > { %6855 = vmatmul.mubr.bf16.gmra.mxu1 %v7810_v54  ;;  %6810 = vmatprep.mubr.bf16.mxu0 %v7967_v39  ;;  %v5788_v54 = vld [vmem:[%s7614_s15 + $0x188] sm:$0xff] }
  0x96   : > { %6858 = vmatprep.mubr.bf16.mxu1 %v7826_v4  ;;  %v7991_v4 = vpack.c.bf16 %v5788_v54, %v5787_v47 }
  0x9c   : > { %6811 = vmatmul.mubr.bf16.gmra.mxu0 %v7977_v52 }
  0x9d   : > { %6859 = vmatmul.mubr.bf16.gmra.mxu1 %v7830_v6  ;;  %6814 = vmatprep.mubr.bf16.mxu0 %v7979_v44  ;;  %v7405_v6 = vld [vmem:[%s9435_s1 + $0x1b0] sm:$0xff]  }
  0x9e   : > { %6862 = vmatprep.mubr.bf16.mxu1 %v7844_v14  ;;  %v7410_v14 = vld [vmem:[%s9435_s1 + $0x1f0] sm:$0xff]  }
  0xa4   : > { %6815 = vmatmul.mubr.bf16.gmra.mxu0 %v7989_v41 }
  0xa5   : > { %6863 = vmatmul.mubr.bf16.gmra.mxu1 %v7991_v4  ;;  %6882 = vmatprep.mubr.bf16.mxu0 %v7651_v32  ;;  %v7412_v32 = vld [vmem:[%s9435_s1 + $0x1e8] sm:$0xff]  }
  0xa6   : > { %6930 = vmatprep.mubr.bf16.mxu1 %v7855_v25  ;;  %v7413_v25 = vld [vmem:[%s9435_s1 + $0x1e0] sm:$0xff]  }
  0xac   : > { %6883 = vmatmul.mubr.bf16.vlgmr.msra.gmra.mxu0 %v7655_v34  ;;  %v7407_v34 = vld [vmem:[%s9435_s1 + $0x1a0] sm:$0xff]  }
  0xad   : > { %6963 = vmatpush3.bf16.msra.mxu0 %v7404_v22  ;;  %6931 = vmatmul.mubr.bf16.vlgmr.msra.gmra.mxu1 %v7857_v26  ;;  %v7415_v26 = vld [vmem:[%s9435_s1 + $0x1d8] sm:$0xff]  }
  0xae   : > { %6886 = vmatprep.mubr.bf16.mxu0 %v7683_v48  ;;  %6964 = vmatprep.subr.bf16.mxu0 %v7405_v6  ;;  %v7408_v48 = vld [vmem:[%s9435_s1 + $0x198] sm:$0xff]  }
  0xaf   : > { %6934 = vmatprep.mubr.bf16.mxu1 %v7881_v30  ;;  %7011 = vmatpush3.bf16.msra.mxu1 %v7409_v23  ;;  %v7414_v30 = vld [vmem:[%s9435_s1 + $0x188] sm:$0xff]   ;;  %v5932_v23 = vld [vmem:[%s7614_s15 + $0x80] sm:$0xff] }
  0xb0   : > { %7012 = vmatprep.subr.bf16.mxu1 %v7410_v14 }
  0xb1   : > { %6965 = vmatpush3.bf16.msra.mxu0 %v7405_v6 }
  0xb2   : > { %6966 = vmatprep.subr.bf16.mxu0 %v7406_v51 }
  0xb3   : > { %7013 = vmatpush3.bf16.msra.mxu1 %v7410_v14  ;;  %v7423_v14 = vld [vmem:[%s9435_s1 + $0x220] sm:$0xff]  }
  0xb4   : > { %6887 = vmatmul.mubr.bf16.gmra.mxu0 %v7687_v50  ;;  %7014 = vmatprep.subr.bf16.mxu1 %v7412_v32  ;;  %v7411_v50 = vld [vmem:[%s9435_s1 + $0x190] sm:$0xff]  }
  0xb5   : > { %6935 = vmatmul.mubr.bf16.gmra.mxu1 %v7883_v43  ;;  %6890 = vmatprep.mubr.bf16.mxu0 %v7715_v0  ;;  %v7416_v0 = vld [vmem:[%s9435_s1 + $0x1d0] sm:$0xff]   ;;  %v7418_v43 = vld [vmem:[%s9435_s1 + $0x1c8] sm:$0xff]  }
  0xb6   : > { %6938 = vmatprep.mubr.bf16.mxu1 %v7905_v58  ;;  %6967 = vmatpush3.bf16.msra.mxu0 %v7406_v51 }
  0xb7   : > { %6968 = vmatprep.subr.bf16.mxu0 %v7407_v34  ;;  %7015 = vmatpush3.bf16.msra.mxu1 %v7412_v32 }
  0xb8   : > { %7016 = vmatprep.subr.bf16.mxu1 %v7413_v25 }
  0xba   : > { %6969 = vmatpush3.bf16.msra.mxu0 %v7407_v34 }
  0xbb   : > { %6970 = vmatprep.subr.bf16.mxu0 %v7408_v48  ;;  %7017 = vmatpush3.bf16.msra.mxu1 %v7413_v25  ;;  %v5935_v25 = vld [vmem:[%s7614_s15 + $0xa8] sm:$0xff] }
  0xbc   : > { %6891 = vmatmul.mubr.bf16.gmra.mxu0 %v7719_v2  ;;  %7018 = vmatprep.subr.bf16.mxu1 %v7415_v26  ;;  %v7417_v2 = vld [vmem:[%s9435_s1 + $0x180] sm:$0xff]  }
  0xbd   : > { %6939 = vmatmul.mubr.bf16.gmra.mxu1 %v7907_v49  ;;  %6894 = vmatprep.mubr.bf16.mxu0 %v7747_v16  ;;  %v7419_v16 = vld [vmem:[%s9435_s1 + $0x1c0] sm:$0xff]  }
  0xbe   : > { %6942 = vmatprep.mubr.bf16.mxu1 %v7929_v10  ;;  %6971 = vmatpush3.bf16.msra.mxu0 %v7408_v48  ;;  %v5985_v10 = vld [vmem:[%s7614_s15 + $0x61] sm:$0xff]  ;;  %v5936_v48 = vld [vmem:[%s7614_s15 + $0xb0] sm:$0xff] }
  0xbf   : > { %6972 = vmatprep.subr.bf16.mxu0 %v7411_v50  ;;  %7019 = vmatpush3.bf16.msra.mxu1 %v7415_v26  ;;  %v5991_v26 = vld [vmem:[%s7614_s15 + $0xa9] sm:$0xff] }
  0xc0   : > { %7020 = vmatprep.subr.bf16.mxu1 %v7416_v0 }
  0xc2   : > { %6973 = vmatpush3.bf16.msra.mxu0 %v7411_v50 }
  0xc3   : > { %6974 = vmatprep.subr.bf16.mxu0 %v7414_v30  ;;  %7021 = vmatpush3.bf16.msra.mxu1 %v7416_v0 }
  0xc4   : > { %6895 = vmatmul.mubr.bf16.gmra.mxu0 %v7751_v18  ;;  %7022 = vmatprep.subr.bf16.mxu1 %v7418_v43  ;;  %v5843_v18 = vld [vmem:[%s7614_s15 + $0x181] sm:$0xff] }
  0xc5   : > { %6943 = vmatmul.mubr.bf16.gmra.mxu1 %v7931_v1  ;;  %6898 = vmatprep.mubr.bf16.mxu0 %v7781_v36  ;;  %v5844_v36 = vld [vmem:[%s7614_s15 + $0x189] sm:$0xff] }
  0xc6   : > { %6946 = vmatprep.mubr.bf16.mxu1 %v7953_v24  ;;  %6975 = vmatpush3.bf16.msra.mxu0 %v7414_v30  ;;  %v8078_v58 = vpack.c.bf16 %v5844_v36, %v5843_v18  ;;  %v5986_v1 = vld [vmem:[%s7614_s15 + $0x69] sm:$0xff]  ;;  %v5987_v24 = vld [vmem:[%s7614_s15 + $0x79] sm:$0xff]  ;;  %v5992_v30 = vld [vmem:[%s7614_s15 + $0xb1] sm:$0xff] }
  0xc7   : > { %6976 = vmatprep.subr.bf16.mxu0 %v7417_v2  ;;  %7023 = vmatpush3.bf16.msra.mxu1 %v7418_v43  ;;  %v2916_v13 = vpack.c.bf16 %v5986_v1, %v5985_v10  ;;  %v5937_v43 = vld [vmem:[%s7614_s15 + $0xc0] sm:$0xff]  ;;  %v5994_v18 = vld [vmem:[%s7614_s15 + $0xc9] sm:$0xff]  ;;  %v7424_v36 = vld [vmem:[%s9435_s1 + $0x218] sm:$0xff]  }
  0xc8   : > { %7024 = vmatprep.subr.bf16.mxu1 %v7419_v16  ;;  %v5940_v10 = vld [vmem:[%s7614_s15 + $0xe0] sm:$0xff] }
  0xc9   : > { %v5995_v1 = vld [vmem:[%s7614_s15 + $0xd9] sm:$0xff] }
  0xca   : > { %6977 = vmatpush3.bf16.msra.mxu0 %v7417_v2  ;;  %v5938_v2 = vld [vmem:[%s7614_s15 + $0xc8] sm:$0xff] }
  0xcb   : > { %7025 = vmatpush3.bf16.msra.mxu1 %v7419_v16  ;;  %7058 = vmatprep.subr.bf16.mxu0 %v7420_v56 }
  0xcc   : > { %6899 = vmatmul.mubr.bf16.gmra.mxu0 %v7785_v38  ;;  %v5899_v38 = vld [vmem:[%s7614_s15 + $0x182] sm:$0xff] }
  0xcd   : > { %6947 = vmatmul.mubr.bf16.gmra.mxu1 %v7955_v17  ;;  %6902 = vmatprep.mubr.bf16.mxu0 %v7808_v53  ;;  %v5900_v53 = vld [vmem:[%s7614_s15 + $0x18a] sm:$0xff]  ;;  %v5988_v17 = vld [vmem:[%s7614_s15 + $0x81] sm:$0xff] }
  0xce   : > { %6950 = vmatprep.mubr.bf16.mxu1 %v7965_v31  ;;  %v7422_v31 = vld [vmem:[%s9435_s1 + $0x228] sm:$0xff]   ;;  %v2917_v45 = vpack.c.bf16 %v5988_v17, %v5987_v24 }
  0xcf   : > { %v7426_v24 = vld [vmem:[%s9435_s1 + $0x208] sm:$0xff]  }
  0xd4   : > { %6903 = vmatmul.mubr.bf16.gmra.mxu0 %v7812_v55  ;;  %v5925_v55 = vld [vmem:[%s7614_s15 + $0x30] sm:$0xff] }
  0xd5   : > { %6951 = vmatmul.mubr.bf16.gmra.mxu1 %v7967_v39  ;;  %6906 = vmatprep.mubr.bf16.mxu0 %v7828_v5  ;;  %v5926_v5 = vld [vmem:[%s7614_s15 + $0x38] sm:$0xff] }
  0xd6   : > { %6954 = vmatprep.mubr.bf16.mxu1 %v7977_v52  ;;  %v2544_v49 = vpack.c.bf16 %v5926_v5, %v5925_v55  ;;  %v2547_v52 = vpack.c.bf16 %v5932_v23, %v5931_v21  ;;  %v2549_v55 = vpack.c.bf16 %v5936_v48, %v5935_v25  ;;  %v5998_v23 = vld [vmem:[%s7614_s15 + $0xf9] sm:$0xff]  ;;  %v6000_v25 = vld [vmem:[%s7614_s15 + $0x111] sm:$0xff] }
  0xd7   : > { %v5945_v48 = vld [vmem:[%s7614_s15 + $0x120] sm:$0xff] }
  0xdc   : > { %6907 = vmatmul.mubr.bf16.gmra.mxu0 %v7832_v7  ;;  %v5982_v7 = vld [vmem:[%s7614_s15 + $0x39] sm:$0xff] }
  0xdd   : > { %6955 = vmatmul.mubr.bf16.gmra.mxu1 %v7979_v44  ;;  %6910 = vmatprep.mubr.bf16.mxu0 %v7846_v19  ;;  %v8080_v19 = vpack.c.bf16 %v5900_v53, %v5899_v38  ;;  %v2914_v59 = vpack.c.bf16 %v5982_v7, %v5981_v57  ;;  %v2919_v57 = vpack.c.bf16 %v5992_v30, %v5991_v26  ;;  %v5946_v26 = vld [vmem:[%s7614_s15 + $0x128] sm:$0xff] }
  0xde   : > { %6958 = vmatprep.mubr.bf16.mxu1 %v7989_v41  ;;  %v2918_v41 = vpack.c.bf16 %v5990_v42, %v5989_v40  ;;  %v2550_v7 = vpack.c.bf16 %v5938_v2, %v5937_v43  ;;  %v6001_v30 = vld [vmem:[%s7614_s15 + $0x121] sm:$0xff]  ;;  %v6002_v43 = vld [vmem:[%s7614_s15 + $0x129] sm:$0xff] }
  0xe4   : > { %6911 = vmatmul.mubr.bf16.gmra.mxu0 %v8078_v58 }
  0xe5   : > { %6959 = vmatmul.mubr.bf16.gmra.mxu1 %v8080_v19  ;;  %6978 = vmatprep.mubr.bf16.mxu0 %v2544_v49 }
  0xe6   : > { %7026 = vmatprep.mubr.bf16.mxu1 %v2914_v59 }
  0xec   : > { %v6692_v20 = vpop.f32.mrf.mxu0  ;;  %6979 = vmatmul.mubr.bf16.vlgmr.msra.gmra.mxu0 %v2545_v9  ;;  %v5939_v9 = vld [vmem:[%s7614_s15 + $0xd8] sm:$0xff] }
  0xed   : > { %v6740_v22 = vpop.f32.mrf.mxu1  ;;  %7059 = vmatpush3.bf16.msra.mxu0 %v7420_v56  ;;  %7027 = vmatmul.mubr.bf16.vlgmr.msra.gmra.mxu1 %v2915_v11  ;;  %v5993_v56 = vld [vmem:[%s7614_s15 + $0xc1] sm:$0xff]  ;;  %v2551_v28 = vpack.c.bf16 %v5940_v10, %v5939_v9 }
  0xee   : > { %v8099_v27 = vadd.f32 %v6740_v22, %v6692_v20  ;;  %v501_v35 = vpop.f32.mrf.mxu0  ;;  %6982 = vmatprep.mubr.bf16.mxu0 %v2546_v12  ;;  %7060 = vmatprep.subr.bf16.mxu0 %v7421_v15  ;;  %v2920_v60 = vpack.c.bf16 %v5994_v18, %v5993_v56  ;;  %v5942_v20 = vld [vmem:[%s7614_s15 + $0xf8] sm:$0xff] }
  0xef   : > { %v807_v39 = vpop.f32.mrf.mxu1  ;;  %7030 = vmatprep.mubr.bf16.mxu1 %v2916_v13  ;;  %v5941_v13 = vld [vmem:[%s7614_s15 + $0xf0] sm:$0xff] }
  0xf0   : > { %v8108_v33 = vadd.f32 %v807_v39, %v501_v35  ;;  %v6693_v37 = vpop.f32.mrf.mxu0  ;;  %v5997_v22 = vld [vmem:[%s7614_s15 + $0xf1] sm:$0xff]  ;;  %v2552_v39 = vpack.c.bf16 %v5942_v20, %v5941_v13 }
  0xf1   : > { %v6741_v44 = vpop.f32.mrf.mxu1  ;;  %7061 = vmatpush3.bf16.msra.mxu0 %v7421_v15  ;;  %v5996_v15 = vld [vmem:[%s7614_s15 + $0xe1] sm:$0xff]  ;;  %v6005_v20 = vld [vmem:[%s7614_s15 + $0x151] sm:$0xff] }
  0xf2   : > { %v8110_v47 = vadd.f32 %v6741_v44, %v6693_v37  ;;  %v504_v54 = vpop.f32.mrf.mxu0  ;;  %7062 = vmatprep.subr.bf16.mxu0 %v7422_v31  ;;  %v2922_v37 = vpack.c.bf16 %v5998_v23, %v5997_v22  ;;  %v7427_v44 = vld [vmem:[%s9435_s1 + $0x200] sm:$0xff]  }
  0xf3   : > { %v810_v6 = vpop.f32.mrf.mxu1 }
  0xf4   : > { %v8115_v51 = vadd.f32 %v810_v6, %v504_v54  ;;  %v6696_v32 = vpop.f32.mrf.mxu0  ;;  %6983 = vmatmul.mubr.bf16.gmra.mxu0 %v2547_v52  ;;  %v5944_v6 = vld [vmem:[%s7614_s15 + $0x110] sm:$0xff] }
  0xf5   : > { %v6744_v34 = vpop.f32.mrf.mxu1  ;;  %7031 = vmatmul.mubr.bf16.gmra.mxu1 %v2917_v45  ;;  %6986 = vmatprep.mubr.bf16.mxu0 %v2548_v46 }
  0xf6   : > { %v8120_v50 = vadd.f32 %v6744_v34, %v6696_v32  ;;  %v517_v0 = vpop.f32.mrf.mxu0  ;;  %7034 = vmatprep.mubr.bf16.mxu1 %v2918_v41  ;;  %7063 = vmatpush3.bf16.msra.mxu0 %v7422_v31  ;;  %v2921_v31 = vpack.c.bf16 %v5996_v15, %v5995_v1  ;;  %v5943_v41 = vld [vmem:[%s7614_s15 + $0x108] sm:$0xff]  ;;  %v5950_v15 = vld [vmem:[%s7614_s15 + $0x158] sm:$0xff] }
  0xf7   : > { %v823_v16 = vpop.f32.mrf.mxu1  ;;  %7064 = vmatprep.subr.bf16.mxu0 %v7423_v14  ;;  %v2553_v56 = vpack.c.bf16 %v5944_v6, %v5943_v41  ;;  %v6004_v1 = vld [vmem:[%s7614_s15 + $0x141] sm:$0xff] }
  0xf8   : > { %v8130_v38 = vadd.f32 %v823_v16, %v517_v0  ;;  %v6697_v53 = vpop.f32.mrf.mxu0 }
  0xf9   : > { %v6745_v5 = vpop.f32.mrf.mxu1 }
  0xfa   : > { %v8132_v49 = vadd.f32 %v6745_v5, %v6697_v53  ;;  %v520_v59 = vpop.f32.mrf.mxu0  ;;  %7065 = vmatpush3.bf16.msra.mxu0 %v7423_v14  ;;  %v5999_v14 = vld [vmem:[%s7614_s15 + $0x109] sm:$0xff]  ;;  %v2554_v53 = vpack.c.bf16 %v5946_v26, %v5945_v48 }
  0xfb   : > { %v826_v63 = vpop.f32.mrf.mxu1  ;;  %7066 = vmatprep.subr.bf16.mxu0 %v7424_v36 }
  0xfc   : > { %v8137_v62 = vadd.f32 %v826_v63, %v520_v59  ;;  %v6700_v3 = vpop.f32.mrf.mxu0  ;;  %6987 = vmatmul.mubr.bf16.gmra.mxu0 %v2549_v55 }
  0xfd   : > { %v6748_v8 = vpop.f32.mrf.mxu1  ;;  %7035 = vmatmul.mubr.bf16.gmra.mxu1 %v2919_v57  ;;  %6990 = vmatprep.mubr.bf16.mxu0 %v2550_v7  ;;  %v2924_v57 = vpack.c.bf16 %v6002_v43, %v6001_v30 }
  0xfe   : > { %v8142_v11 = vadd.f32 %v6748_v8, %v6700_v3  ;;  %v533_v12 = vpop.f32.mrf.mxu0  ;;  %7038 = vmatprep.mubr.bf16.mxu1 %v2920_v60  ;;  %7067 = vmatpush3.bf16.msra.mxu0 %v7424_v36  ;;  %v2923_v36 = vpack.c.bf16 %v6000_v25, %v5999_v14  ;;  %v5948_v3 = vld [vmem:[%s7614_s15 + $0x140] sm:$0xff]  ;;  %v6007_v14 = vld [vmem:[%s7614_s15 + $0x169] sm:$0xff] }
  0xff   : > { %v839_v21 = vpop.f32.mrf.mxu1  ;;  %7068 = vmatprep.subr.bf16.mxu0 %v7425_v61  ;;  %v6003_v8 = vld [vmem:[%s7614_s15 + $0x139] sm:$0xff] }
 0x100   : > { %v8152_v17 = vadd.f32 %v839_v21, %v533_v12  ;;  %v6701_v35 = vpop.f32.mrf.mxu0  ;;  %v5949_v12 = vld [vmem:[%s7614_s15 + $0x150] sm:$0xff]  ;;  %v6006_v21 = vld [vmem:[%s7614_s15 + $0x159] sm:$0xff] }
 0x101   : > { %v6749_v29 = vpop.f32.mrf.mxu1 }
 0x102   : > { %v8154_v40 = vadd.f32 %v6749_v29, %v6701_v35  ;;  %v536_v42 = vpop.f32.mrf.mxu0  ;;  %7069 = vmatpush3.bf16.msra.mxu0 %v7425_v61  ;;  %v5947_v61 = vld [vmem:[%s7614_s15 + $0x138] sm:$0xff]  ;;  %v2556_v29 = vpack.c.bf16 %v5950_v15, %v5949_v12 }
 0x103   : > { %v842_v52 = vpop.f32.mrf.mxu1  ;;  %7070 = vmatprep.subr.bf16.mxu0 %v7426_v24 }
 0x104   : > { %v8159_v45 = vadd.f32 %v842_v52, %v536_v42  ;;  %v6704_v46 = vpop.f32.mrf.mxu0  ;;  %6991 = vmatmul.mubr.bf16.gmra.mxu0 %v2551_v28  ;;  %v2925_v28 = vpack.c.bf16 %v6004_v1, %v6003_v8  ;;  %v2926_v42 = vpack.c.bf16 %v6006_v21, %v6005_v20  ;;  %v6038_v8 = vld [vmem:[%s7614_s15 + $0x3a] sm:$0xff] }
 0x105   : > { %v6752_v54 = vpop.f32.mrf.mxu1  ;;  %7039 = vmatmul.mubr.bf16.gmra.mxu1 %v2921_v31  ;;  %6994 = vmatprep.mubr.bf16.mxu0 %v2552_v39 }
 0x106   : > { %v8164_v32 = vadd.f32 %v6752_v54, %v6704_v46  ;;  %v549_v34 = vpop.f32.mrf.mxu0  ;;  %7042 = vmatprep.mubr.bf16.mxu1 %v2922_v37  ;;  %7071 = vmatpush3.bf16.msra.mxu0 %v7426_v24  ;;  %v2555_v24 = vpack.c.bf16 %v5948_v3, %v5947_v61  ;;  %v5951_v46 = vld [vmem:[%s7614_s15 + $0x168] sm:$0xff]  ;;  %v5952_v54 = vld [vmem:[%s7614_s15 + $0x170] sm:$0xff] }
 0x107   : > { %v855_v0 = vpop.f32.mrf.mxu1  ;;  %7072 = vmatprep.subr.bf16.mxu0 %v7427_v44  ;;  %v6012_v61 = vld [vmem:[%s7614_s15 + $0x1a1] sm:$0xff]  ;;  %v6037_v3 = vld [vmem:[%s7614_s15 + $0x32] sm:$0xff] }
 0x108   : > { %v8171_v2 = vadd.f32 %v855_v0, %v549_v34  ;;  %v6705_v16 = vpop.f32.mrf.mxu0  ;;  %v6008_v34 = vld [vmem:[%s7614_s15 + $0x171] sm:$0xff]  ;;  %v2557_v0 = vpack.c.bf16 %v5952_v54, %v5951_v46  ;;  %v3284_v20 = vpack.c.bf16 %v6038_v8, %v6037_v3  ;;  %v6046_v3 = vld [vmem:[%s7614_s15 + $0x9a] sm:$0xff] }
 0x109   : > { %v6753_v18 = vpop.f32.mrf.mxu1  ;;  %v2927_v43 = vpack.c.bf16 %v6008_v34, %v6007_v14  ;;  %v6042_v46 = vld [vmem:[%s7614_s15 + $0x6a] sm:$0xff] }
 0x10a   : > { %v8173_v55 = vadd.f32 %v6753_v18, %v6705_v16  ;;  %v552_v5 = vpop.f32.mrf.mxu0  ;;  %7073 = vmatpush3.bf16.msra.mxu0 %v7427_v44 }
 0x10b   : > { %v858_v7 = vpop.f32.mrf.mxu1 }
 0x10c   : > { %v8175_v59 = vadd.f32 %v858_v7, %v552_v5  ;;  %v6708_v60 = vpop.f32.mrf.mxu0  ;;  %6995 = vmatmul.mubr.bf16.gmra.mxu0 %v2553_v56  ;;  %v5955_v5 = vld [vmem:[%s7614_s15 + $0x198] sm:$0xff] }
 0x10d   : > { %v6756_v63 = vpop.f32.mrf.mxu1  ;;  %7043 = vmatmul.mubr.bf16.gmra.mxu1 %v2923_v36  ;;  %6998 = vmatprep.mubr.bf16.mxu0 %v2554_v53  ;;  %v6011_v7 = vld [vmem:[%s7614_s15 + $0x199] sm:$0xff] }
 0x10e   : > { %v8180_v9 = vadd.f32 %v6756_v63, %v6708_v60  ;;  %v565_v10 = vpop.f32.mrf.mxu0  ;;  %7046 = vmatprep.mubr.bf16.mxu1 %v2924_v57  ;;  %v5956_v57 = vld [vmem:[%s7614_s15 + $0x1a0] sm:$0xff] }
 0x10f   : > { %v871_v13 = vpop.f32.mrf.mxu1  ;;  %v2559_v15 = vpack.c.bf16 %v5956_v57, %v5955_v5  ;;  %v6043_v57 = vld [vmem:[%s7614_s15 + $0x7a] sm:$0xff] }
 0x110   : > { %v8187_v22 = vadd.f32 %v871_v13, %v565_v10  ;;  %v6709_v23 = vpop.f32.mrf.mxu0  ;;  %v2929_v13 = vpack.c.bf16 %v6012_v61, %v6011_v7  ;;  %v6044_v7 = vld [vmem:[%s7614_s15 + $0x82] sm:$0xff]  ;;  %v6045_v61 = vld [vmem:[%s7614_s15 + $0x92] sm:$0xff] }
 0x111   : > { %v6757_v35 = vpop.f32.mrf.mxu1 }
 0x112   : > { %v8189_v31 = vadd.f32 %v6757_v35, %v6709_v23  ;;  %v8191_v39 = vpop.f32.mrf.mxu0 }
 0x113   : > { %v8193_v37 = vpop.f32.mrf.mxu1 }
 0x114   : > { %v6712_v52 = vpop.f32.mrf.mxu0  ;;  %6999 = vmatmul.mubr.bf16.gmra.mxu0 %v2555_v24 }
 0x115   : > { %v6760_v44 = vpop.f32.mrf.mxu1  ;;  %7047 = vmatmul.mubr.bf16.gmra.mxu1 %v2925_v28  ;;  %7002 = vmatprep.mubr.bf16.mxu0 %v2556_v29  ;;  %v6039_v28 = vld [vmem:[%s7614_s15 + $0x4a] sm:$0xff]  ;;  %v6040_v29 = vld [vmem:[%s7614_s15 + $0x52] sm:$0xff] }
 0x116   : > { %v8197_v41 = vadd.f32 %v6760_v44, %v6712_v52  ;;  %v581_v6 = vpop.f32.mrf.mxu0  ;;  %7050 = vmatprep.mubr.bf16.mxu1 %v2926_v42  ;;  %v6041_v44 = vld [vmem:[%s7614_s15 + $0x62] sm:$0xff]  ;;  %v3285_v34 = vpack.c.bf16 %v6040_v29, %v6039_v28 }
 0x117   : > { %v887_v25 = vpop.f32.mrf.mxu1 }
 0x118   : > { %v8201_v48 = vadd.f32 %v887_v25, %v581_v6  ;;  %v6713_v26 = vpop.f32.mrf.mxu0 }
 0x119   : > { %v6761_v30 = vpop.f32.mrf.mxu1 }
 0x11a   : > { %v8203_v16 = vadd.f32 %v6761_v30, %v6713_v26  ;;  %v8205_v56 = vpop.f32.mrf.mxu0  ;;  %v3286_v26 = vpack.c.bf16 %v6042_v46, %v6041_v44 }
 0x11b   : > { %v8207_v18 = vpop.f32.mrf.mxu1 }
 0x11c   : > { %v6716_v36 = vpop.f32.mrf.mxu0  ;;  %7003 = vmatmul.mubr.bf16.gmra.mxu0 %v2557_v0 }
 0x11d   : > { %v6764_v53 = vpop.f32.mrf.mxu1  ;;  %7051 = vmatmul.mubr.bf16.gmra.mxu1 %v2927_v43  ;;  %7006 = vmatprep.mubr.bf16.mxu0 %v7991_v4 }
 0x11e   : > { %v8213_v60 = vadd.f32 %v6764_v53, %v6716_v36  ;;  %v597_v63 = vpop.f32.mrf.mxu0  ;;  %7054 = vmatprep.mubr.bf16.mxu1 %v8078_v58 }
 0x11f   : > { %v903_v10 = vpop.f32.mrf.mxu1 }
 0x120   : > { %v8219_v1 = vadd.f32 %v903_v10, %v597_v63  ;;  %v6717_v12 = vpop.f32.mrf.mxu0 }
 0x121   : > { %v6765_v4 = vpop.f32.mrf.mxu1 }
 0x122   : > { %v8221_v21 = vadd.f32 %v6765_v4, %v6717_v12  ;;  %v8223_v23 = vpop.f32.mrf.mxu0  ;;  %v3287_v4 = vpack.c.bf16 %v6044_v7, %v6043_v57 }
 0x123   : > { %v8225_v58 = vpop.f32.mrf.mxu1 }
 0x124   : > { %v6720_v24 = vpop.f32.mrf.mxu0  ;;  %7007 = vmatmul.mubr.bf16.gmra.mxu0 %v2559_v15 }
 0x125   : > { %v6768_v35 = vpop.f32.mrf.mxu1  ;;  %7055 = vmatmul.mubr.bf16.gmra.mxu1 %v2929_v13  ;;  %7074 = vmatprep.mubr.bf16.mxu0 %v3284_v20 }
 0x126   : > { %v8229_v42 = vadd.f32 %v6768_v35, %v6720_v24  ;;  %v613_v52 = vpop.f32.mrf.mxu0  ;;  %v3288_v24 = vpack.c.bf16 %v6046_v3, %v6045_v61 }
 0x127   : > { %v919_v54 = vpop.f32.mrf.mxu1 }
 0x128   : > { %v8233_v6 = vadd.f32 %v919_v54, %v613_v52  ;;  %v6721_v14 = vpop.f32.mrf.mxu0  ;;  %v6048_v54 = vld [vmem:[%s7614_s15 + $0xb2] sm:$0xff] }
 0x129   : > { %v6769_v25 = vpop.f32.mrf.mxu1 }
 0x12a   : > { %v8235_v0 = vadd.f32 %v6769_v25, %v6721_v14  ;;  %v8237_v30 = vpop.f32.mrf.mxu0  ;;  %v6050_v25 = vld [vmem:[%s7614_s15 + $0xca] sm:$0xff] }
 0x12b   : > { %v8239_v43 = vpop.f32.mrf.mxu1 }
 0x12c   : > { %v6788_v36 = vpop.f32.mrf.mxu0  ;;  %7075 = vmatmul.mubr.bf16.vlgmr.msra.gmra.mxu0 %v3285_v34  ;;  %v6049_v34 = vld [vmem:[%s7614_s15 + $0xc2] sm:$0xff] }
 0x12d   : > { %v1338_v53 = vadd.f32 %v6788_v36, %v8099_v27  ;;  %v6836_v5 = vpop.f32.mrf.mxu1  ;;  %7078 = vmatprep.mubr.bf16.mxu0 %v3286_v26 }
 0x12e   : > { %v1177_v63 = vpop.f32.mrf.mxu0 }
 0x12f   : > { %v1336_v8 = vadd.f32 %v1177_v63, %v8108_v33  ;;  %v8247_v10 = vadd.f32 %v6836_v5, %v1338_v53  ;;  %v1548_v12 = vpop.f32.mrf.mxu1  ;;  %v3290_v63 = vpack.c.bf16 %v6050_v25, %v6049_v34 }
 0x130   : > { %v6789_v15 = vpop.f32.mrf.mxu0 }
 0x131   : > { %v1339_v13 = vadd.f32 %v6789_v15, %v8110_v47  ;;  %v8250_v27 = vadd.f32 %v1548_v12, %v1336_v8  ;;  %v6837_v20 = vpop.f32.mrf.mxu1  ;;  %v6047_v47 = vld [vmem:[%s7614_s15 + $0xaa] sm:$0xff] }
 0x132   : > { %v1180_v35 = vpop.f32.mrf.mxu0  ;;  %v3289_v5 = vpack.c.bf16 %v6048_v54, %v6047_v47 }
 0x133   : > { %v8253_v28 = vadd.f32 %v1180_v35, %v8115_v51  ;;  %v8255_v33 = vadd.f32 %v6837_v20, %v1339_v13  ;;  %v8257_v29 = vpop.f32.mrf.mxu1  ;;  %v6052_v13 = vld [vmem:[%s7614_s15 + $0xe2] sm:$0xff]  ;;  %v6054_v35 = vld [vmem:[%s7614_s15 + $0xfa] sm:$0xff] }
 0x134   : > { %v6792_v52 = vpop.f32.mrf.mxu0  ;;  %7079 = vmatmul.mubr.bf16.gmra.mxu0 %v3287_v4 }
 0x135   : > { %v1342_v44 = vadd.f32 %v6792_v52, %v8120_v50  ;;  %v6840_v46 = vpop.f32.mrf.mxu1  ;;  %7082 = vmatprep.mubr.bf16.mxu0 %v3288_v24  ;;  %v6053_v24 = vld [vmem:[%s7614_s15 + $0xf2] sm:$0xff] }
 0x136   : > { %v1193_v14 = vpop.f32.mrf.mxu0  ;;  %v3292_v34 = vpack.c.bf16 %v6054_v35, %v6053_v24 }
 0x137   : > { %v1340_v26 = vadd.f32 %v1193_v14, %v8130_v38  ;;  %v8265_v36 = vadd.f32 %v6840_v46, %v1342_v44  ;;  %v1564_v51 = vpop.f32.mrf.mxu1 }
 0x138   : > { %v6793_v53 = vpop.f32.mrf.mxu0 }
 0x139   : > { %v1343_v57 = vadd.f32 %v6793_v53, %v8132_v49  ;;  %v8268_v50 = vadd.f32 %v1564_v51, %v1340_v26  ;;  %v6841_v7 = vpop.f32.mrf.mxu1  ;;  %v6051_v49 = vld [vmem:[%s7614_s15 + $0xda] sm:$0xff] }
 0x13a   : > { %v1196_v61 = vpop.f32.mrf.mxu0  ;;  %v3291_v47 = vpack.c.bf16 %v6052_v13, %v6051_v49 }
 0x13b   : > { %v8271_v3 = vadd.f32 %v1196_v61, %v8137_v62  ;;  %v8273_v38 = vadd.f32 %v6841_v7, %v1343_v57  ;;  %v8275_v8 = vpop.f32.mrf.mxu1  ;;  %v6056_v7 = vld [vmem:[%s7614_s15 + $0x112] sm:$0xff]  ;;  %v6057_v61 = vld [vmem:[%s7614_s15 + $0x122] sm:$0xff] }
 0x13c   : > { %v6796_v12 = vpop.f32.mrf.mxu0  ;;  %7083 = vmatmul.mubr.bf16.gmra.mxu0 %v3289_v5 }
 0x13d   : > { %v1346_v15 = vadd.f32 %v6796_v12, %v8142_v11  ;;  %v6844_v4 = vpop.f32.mrf.mxu1  ;;  %7086 = vmatprep.mubr.bf16.mxu0 %v3290_v63  ;;  %v6058_v12 = vld [vmem:[%s7614_s15 + $0x12a] sm:$0xff] }
 0x13e   : > { %v1209_v20 = vpop.f32.mrf.mxu0  ;;  %v3294_v35 = vpack.c.bf16 %v6058_v12, %v6057_v61 }
 0x13f   : > { %v1344_v52 = vadd.f32 %v1209_v20, %v8152_v17  ;;  %v8283_v44 = vadd.f32 %v6844_v4, %v1346_v15  ;;  %v1580_v62 = vpop.f32.mrf.mxu1 }
 0x140   : > { %v6797_v46 = vpop.f32.mrf.mxu0 }
 0x141   : > { %v1347_v54 = vadd.f32 %v6797_v46, %v8154_v40  ;;  %v8286_v11 = vadd.f32 %v1580_v62, %v1344_v52  ;;  %v6845_v14 = vpop.f32.mrf.mxu1  ;;  %v6055_v40 = vld [vmem:[%s7614_s15 + $0x10a] sm:$0xff] }
 0x142   : > { %v1212_v25 = vpop.f32.mrf.mxu0  ;;  %v3293_v13 = vpack.c.bf16 %v6056_v7, %v6055_v40 }
 0x143   : > { %v8289_v26 = vadd.f32 %v1212_v25, %v8159_v45  ;;  %v8291_v17 = vadd.f32 %v6845_v14, %v1347_v54  ;;  %v8293_v51 = vpop.f32.mrf.mxu1 }
 0x144   : > { %9448 = vst [vmem:[#allocation7_spill] sm:$0xff] %v8293_v51  ;;  %v6800_v53 = vpop.f32.mrf.mxu0  ;;  %7087 = vmatmul.mubr.bf16.gmra.mxu0 %v3291_v47 }
 0x145   : > { %9447 = vst [vmem:[#allocation6_spill] sm:$0xff] %v8289_v26  ;;  %v1350_v5 = vadd.f32 %v6800_v53, %v8164_v32  ;;  %v6848_v57 = vpop.f32.mrf.mxu1  ;;  %7090 = vmatprep.mubr.bf16.mxu0 %v3292_v34  ;;  %v6060_v34 = vld [vmem:[%s7614_s15 + $0x142] sm:$0xff]  ;;  %v6061_v53 = vld [vmem:[%s7614_s15 + $0x152] sm:$0xff] }
 0x146   : > { %v1225_v63 = vpop.f32.mrf.mxu0 }
 0x147   : > { %v1348_v15 = vadd.f32 %v1225_v63, %v8171_v2  ;;  %v8301_v4 = vadd.f32 %v6848_v57, %v1350_v5  ;;  %v1596_v45 = vpop.f32.mrf.mxu1  ;;  %v6062_v5 = vld [vmem:[%s7614_s15 + $0x15a] sm:$0xff] }
 0x148   : > { %v6801_v49 = vpop.f32.mrf.mxu0 }
 0x149   : > { %v1351_v20 = vadd.f32 %v6801_v49, %v8173_v55  ;;  %v8304_v32 = vadd.f32 %v1596_v45, %v1348_v15  ;;  %v6849_v24 = vpop.f32.mrf.mxu1  ;;  %v6059_v55 = vld [vmem:[%s7614_s15 + $0x13a] sm:$0xff]  ;;  %v3296_v15 = vpack.c.bf16 %v6062_v5, %v6061_v53 }
 0x14a   : > { %v1228_v52 = vpop.f32.mrf.mxu0  ;;  %v3295_v63 = vpack.c.bf16 %v6060_v34, %v6059_v55 }
 0x14b   : > { %v8307_v62 = vadd.f32 %v1228_v52, %v8175_v59  ;;  %v8309_v2 = vadd.f32 %v6849_v24, %v1351_v20  ;;  %v8311_v46 = vpop.f32.mrf.mxu1  ;;  %v6064_v52 = vld [vmem:[%s7614_s15 + $0x172] sm:$0xff] }
 0x14c   : > { %9450 = vst [vmem:[#allocation9_spill] sm:$0xff] %v8311_v46  ;;  %v6804_v47 = vpop.f32.mrf.mxu0  ;;  %7091 = vmatmul.mubr.bf16.gmra.mxu0 %v3293_v13 }
 0x14d   : > { %9449 = vst [vmem:[#allocation8_spill] sm:$0xff] %v8307_v62  ;;  %v1354_v54 = vadd.f32 %v6804_v47, %v8180_v9  ;;  %v6852_v14 = vpop.f32.mrf.mxu1  ;;  %7094 = vmatprep.mubr.bf16.mxu0 %v3294_v35  ;;  %v6063_v35 = vld [vmem:[%s7614_s15 + $0x16a] sm:$0xff] }
 0x14e   : > { %v1241_v25 = vpop.f32.mrf.mxu0  ;;  %v3297_v34 = vpack.c.bf16 %v6064_v52, %v6063_v35 }
 0x14f   : > { %v1352_v57 = vadd.f32 %v1241_v25, %v8187_v22  ;;  %v8319_v40 = vadd.f32 %v6852_v14, %v1354_v54  ;;  %v1612_v59 = vpop.f32.mrf.mxu1 }
 0x150   : > { %v6805_v7 = vpop.f32.mrf.mxu0 }
 0x151   : > { %v1355_v61 = vadd.f32 %v6805_v7, %v8189_v31  ;;  %v8322_v12 = vadd.f32 %v1612_v59, %v1352_v57  ;;  %v6853_v9 = vpop.f32.mrf.mxu1 }
 0x152   : > { %v8324_v45 = vpop.f32.mrf.mxu0 }
 0x153   : > { %v8326_v49 = vadd.f32 %v6853_v9, %v1355_v61  ;;  %v8328_v13 = vpop.f32.mrf.mxu1  ;;  %v6067_v61 = vld [vmem:[%s7614_s15 + $0x19a] sm:$0xff]  ;;  %v6068_v9 = vld [vmem:[%s7614_s15 + $0x1a2] sm:$0xff] }
 0x154   : > { %v6808_v22 = vpop.f32.mrf.mxu0  ;;  %7095 = vmatmul.mubr.bf16.gmra.mxu0 %v3295_v63  ;;  %v3299_v35 = vpack.c.bf16 %v6068_v9, %v6067_v61 }
 0x155   : > { %v1358_v20 = vadd.f32 %v6808_v22, %v8197_v41  ;;  %v6856_v24 = vpop.f32.mrf.mxu1  ;;  %7098 = vmatprep.mubr.bf16.mxu0 %v3296_v15 }
 0x156   : > { %v1257_v47 = vpop.f32.mrf.mxu0 }
 0x157   : > { %v1356_v31 = vadd.f32 %v1257_v47, %v8201_v48  ;;  %v8334_v54 = vadd.f32 %v6856_v24, %v1358_v20  ;;  %v1628_v14 = vpop.f32.mrf.mxu1 }
 0x158   : > { %v6809_v55 = vpop.f32.mrf.mxu0 }
 0x159   : > { %v1359_v25 = vadd.f32 %v6809_v55, %v8203_v16  ;;  %v8337_v53 = vadd.f32 %v1628_v14, %v1356_v31  ;;  %v6857_v5 = vpop.f32.mrf.mxu1 }
 0x15a   : > { %v8339_v41 = vpop.f32.mrf.mxu0 }
 0x15b   : > { %v8341_v57 = vadd.f32 %v6857_v5, %v1359_v25  ;;  %v8343_v59 = vpop.f32.mrf.mxu1 }
 0x15c   : > { %v6812_v7 = vpop.f32.mrf.mxu0  ;;  %7099 = vmatmul.mubr.bf16.gmra.mxu0 %v3297_v34 }
 0x15d   : > { %v1362_v48 = vadd.f32 %v6812_v7, %v8213_v60  ;;  %v6860_v63 = vpop.f32.mrf.mxu1  ;;  %7102 = vmatprep.mubr.bf16.mxu0 %v8080_v19 }
 0x15e   : > { %v1273_v15 = vpop.f32.mrf.mxu0 }
 0x15f   : > { %v1360_v16 = vadd.f32 %v1273_v15, %v8219_v1  ;;  %v8350_v22 = vadd.f32 %v6860_v63, %v1362_v48  ;;  %v1644_v20 = vpop.f32.mrf.mxu1  ;;  %v7428_v48 = vld [vmem:[%s9437_s3 + $0x38] sm:$0xff]  }
 0x160   : > { %v6813_v24 = vpop.f32.mrf.mxu0  ;;  %7106 = vmatprep.subr.bf16.mxu1 %v7428_v48 }
 0x161   : > { %v1363_v52 = vadd.f32 %v6813_v24, %v8221_v21  ;;  %v8353_v47 = vadd.f32 %v1644_v20, %v1360_v16  ;;  %v6861_v31 = vpop.f32.mrf.mxu1  ;;  %7107 = vmatpush3.bf16.msra.mxu1 %v7428_v48 }
 0x162   : > { %v8355_v14 = vpop.f32.mrf.mxu0 }
 0x163   : > { %v8357_v60 = vadd.f32 %v6861_v31, %v1363_v52  ;;  %v8359_v19 = vpop.f32.mrf.mxu1 }
 0x164   : > { %v6816_v55 = vpop.f32.mrf.mxu0  ;;  %7103 = vmatmul.mubr.bf16.gmra.mxu0 %v3299_v35 }
 0x165   : > { %v1366_v1 = vadd.f32 %v6816_v55, %v8229_v42  ;;  %v6864_v34 = vpop.f32.mrf.mxu1 }
 0x166   : > { %v1289_v25 = vpop.f32.mrf.mxu0 }
 0x167   : > { %v1364_v5 = vadd.f32 %v1289_v25, %v8233_v6  ;;  %v8363_v7 = vadd.f32 %v6864_v34, %v1366_v1  ;;  %v1660_v21 = vpop.f32.mrf.mxu1  ;;  %v9444_v34 = vmov 0.0  }
 0x168   : > { %v6817_v63 = vpop.f32.mrf.mxu0  ;;  %3731 = vst [vmem:[%s8392_s24 + $0x30] sm:$0xff] %v9444_v34  ;;  %3732 = vst [vmem:[%s8392_s24 + $0x38] sm:$0xff] %v9444_v34 }
 0x169   : > { %v1367_v61 = vadd.f32 %v6817_v63, %v8235_v0  ;;  %v8369_v9 = vadd.f32 %v1660_v21, %v1364_v5  ;;  %v6865_v15 = vpop.f32.mrf.mxu1  ;;  %3725 = vst [vmem:[%s8392_s24] sm:$0xff] %v9444_v34  ;;  %3726 = vst [vmem:[%s8392_s24 + $0x8] sm:$0xff] %v9444_v34 }
 0x16a   : > { %v8371_v42 = vpop.f32.mrf.mxu0  ;;  %3727 = vst [vmem:[%s8392_s24 + $0x10] sm:$0x3] %v9444_v34  ;;  %3728 = vst [vmem:[%s8392_s24 + $0x18] sm:$0xff] %v9444_v34 }
 0x16b   : > { %v8373_v16 = vadd.f32 %v6865_v15, %v1367_v61  ;;  %v8375_v6 = vpop.f32.mrf.mxu1  ;;  %3729 = vst [vmem:[%s8392_s24 + $0x20] sm:$0xff] %v9444_v34  ;;  %3730 = vst [vmem:[%s8392_s24 + $0x28] sm:$0x3] %v9444_v34  ;;  %v7429_v15 = vld [vmem:[%s9437_s3 + $0x30] sm:$0xff]  }
 0x16c   : > { %v6884_v20 = vpop.f32.mrf.mxu0  ;;  %3733 = vst [vmem:[%s8392_s24 + $0x40] sm:$0x3] %v9444_v34  ;;  %3734 = vst [vmem:[%s8392_s24 + $0x48] sm:$0xff] %v9444_v34  ;;  %7108 = vmatprep.subr.bf16.mxu1 %v7429_v15 }
 0x16d   : > { %v8378_v24 = vadd.f32 %v6884_v20, %v8247_v10  ;;  %v8380_v35 = vpop.f32.mrf.mxu1  ;;  %3735 = vst [vmem:[%s8392_s24 + $0x50] sm:$0xff] %v9444_v34  ;;  %3736 = vst [vmem:[%s8392_s24 + $0x58] sm:$0x3] %v9444_v34  ;;  %7109 = vmatpush3.bf16.msra.mxu1 %v7429_v15 }
 0x16e   : > { %v1918_v52 = vpop.f32.mrf.mxu0  ;;  %3737 = vst [vmem:[%s8392_s24 + $0x60] sm:$0xff] %v9444_v34  ;;  %3738 = vst [vmem:[%s8392_s24 + $0x68] sm:$0xff] %v9444_v34 }
 0x16f   : > { %v8383_v0 = vadd.f32 %v1918_v52, %v8250_v27  ;;  %v8385_v31 = vpop.f32.mrf.mxu1  ;;  %3739 = vst [vmem:[%s8392_s24 + $0x70] sm:$0x3] %v9444_v34  ;;  %3740 = vst [vmem:[%s8392_s24 + $0x78] sm:$0xff] %v9444_v34 }
 0x170   : > { %v6885_v10 = vpop.f32.mrf.mxu0  ;;  %3741 = vst [vmem:[%s8392_s24 + $0x80] sm:$0xff] %v9444_v34  ;;  %3742 = vst [vmem:[%s8392_s24 + $0x88] sm:$0x3] %v9444_v34 }
 0x171   : > { %v8395_v27 = vadd.f32 %v6885_v10, %v8255_v33  ;;  %v8397_v55 = vpop.f32.mrf.mxu1  ;;  %3743 = vst [vmem:[%s8392_s24 + $0x90] sm:$0xff] %v9444_v34  ;;  %3744 = vst [vmem:[%s8392_s24 + $0x98] sm:$0xff] %v9444_v34 }
 0x172   : > { %v8399_v1 = vpop.f32.mrf.mxu0  ;;  %3745 = vst [vmem:[%s8392_s24 + $0xa0] sm:$0x3] %v9444_v34  ;;  %3746 = vst [vmem:[%s8392_s24 + $0xa8] sm:$0xff] %v9444_v34 }
 0x173   : > { %3747 = vst [vmem:[%s8392_s24 + $0xb0] sm:$0xff] %v9444_v34  ;;  %3748 = vst [vmem:[%s8392_s24 + $0xb8] sm:$0x3] %v9444_v34  ;;  %v8529_v33 = vpop.f32.mrf.mxu1 }
 0x174   : > { %3749 = vst [vmem:[%s8392_s24 + $0xc0] sm:$0xff] %v9444_v34  ;;  %3750 = vst [vmem:[%s8392_s24 + $0xc8] sm:$0xff] %v9444_v34  ;;  %v6888_v25 = vpop.f32.mrf.mxu0 }
 0x175   : > { %3751 = vst [vmem:[%s8392_s24 + $0xd0] sm:$0x3] %v9444_v34  ;;  %3752 = vst [vmem:[%s8392_s24 + $0xd8] sm:$0xff] %v9444_v34  ;;  %v8532_v5 = vadd.f32 %v6888_v25, %v8265_v36  ;;  %v8534_v21 = vpop.f32.mrf.mxu1 }
 0x176   : > { %3753 = vst [vmem:[%s8392_s24 + $0xe0] sm:$0xff] %v9444_v34  ;;  %3754 = vst [vmem:[%s8392_s24 + $0xe8] sm:$0x3] %v9444_v34  ;;  %v1934_v48 = vpop.f32.mrf.mxu0 }
 0x177   : > { %3755 = vst [vmem:[%s8392_s24 + $0xf0] sm:$0xff] %v9444_v34  ;;  %3756 = vst [vmem:[%s8392_s24 + $0xf8] sm:$0xff] %v9444_v34  ;;  %v8537_v63 = vadd.f32 %v1934_v48, %v8268_v50  ;;  %v8539_v61 = vpop.f32.mrf.mxu1 }
 0x178   : > { %3757 = vst [vmem:[%s8392_s24 + $0x100] sm:$0x3] %v9444_v34  ;;  %3758 = vst [vmem:[%s8392_s24 + $0x108] sm:$0xff] %v9444_v34  ;;  %v6889_v20 = vpop.f32.mrf.mxu0 }
 0x179   : > { %3759 = vst [vmem:[%s8392_s24 + $0x110] sm:$0xff] %v9444_v34  ;;  %3760 = vst [vmem:[%s8392_s24 + $0x118] sm:$0x3] %v9444_v34  ;;  %v8545_v52 = vadd.f32 %v6889_v20, %v8273_v38  ;;  %v8547_v10 = vpop.f32.mrf.mxu1  ;;  %v7432_v38 = vld [vmem:[%s9437_s3 + $0xb8] sm:$0xff]  }
 0x17a   : > { %3761 = vst [vmem:[%s8392_s24 + $0x120] sm:$0xff] %v9444_v34  ;;  %3762 = vst [vmem:[%s8392_s24 + $0x128] sm:$0xff] %v9444_v34  ;;  %v8549_v36 = vpop.f32.mrf.mxu0  ;;  %7154 = vmatprep.subr.bf16.mxu0 %v7432_v38 }
 0x17b   : > { %3763 = vst [vmem:[%s8392_s24 + $0x130] sm:$0x3] %v9444_v34  ;;  %3764 = vst [vmem:[%s8392_s24 + $0x138] sm:$0xff] %v9444_v34  ;;  %v8551_v25 = vpop.f32.mrf.mxu1  ;;  %7155 = vmatpush3.bf16.msra.mxu0 %v7432_v38  ;;  %v7435_v38 = vld [vmem:[%s9437_s3 + $0xa8] sm:$0xff]  }
 0x17c   : > { %3765 = vst [vmem:[%s8392_s24 + $0x140] sm:$0xff] %v9444_v34  ;;  %3766 = vst [vmem:[%s8392_s24 + $0x148] sm:$0x3] %v9444_v34  ;;  %v6892_v50 = vpop.f32.mrf.mxu0 }
 0x17d   : > { %3767 = vst [vmem:[%s8392_s24 + $0x150] sm:$0xff] %v9444_v34  ;;  %3768 = vst [vmem:[%s8392_s24 + $0x158] sm:$0xff] %v9444_v34  ;;  %v8554_v48 = vadd.f32 %v6892_v50, %v8283_v44  ;;  %v7433_v50 = vld [vmem:[%s9437_s3 + $0xb0] sm:$0xff]  }
 0x17e   : > { %3769 = vst [vmem:[%s8392_s24 + $0x160] sm:$0x3] %v9444_v34  ;;  %3770 = vst [vmem:[%s8392_s24 + $0x168] sm:$0xff] %v9444_v34  ;;  %v1950_v46 = vpop.f32.mrf.mxu0  ;;  %7156 = vmatprep.subr.bf16.mxu0 %v7433_v50 }
 0x17f   : > { %3771 = vst [vmem:[%s8392_s24 + $0x170] sm:$0xff] %v9444_v34  ;;  %3772 = vst [vmem:[%s8392_s24 + $0x178] sm:$0x3] %v9444_v34  ;;  %v8562_v20 = vadd.f32 %v1950_v46, %v8286_v11  ;;  %7157 = vmatpush3.bf16.msra.mxu0 %v7433_v50 }
 0x180   : > { %3773 = vst [vmem:[%s8392_s24 + $0x180] sm:$0xff] %v9444_v34  ;;  %3774 = vst [vmem:[%s8392_s24 + $0x188] sm:$0xff] %v9444_v34  ;;  %v6893_v51 = vpop.f32.mrf.mxu0  ;;  %7158 = vmatprep.subr.bf16.mxu0 %v7435_v38 }
 0x181   : > { %3775 = vst [vmem:[%s8392_s24 + $0x190] sm:$0x3] %v9444_v34  ;;  %3776 = vst [vmem:[%s8392_s24 + $0x198] sm:$0xff] %v9444_v34  ;;  %v8567_v15 = vadd.f32 %v6893_v51, %v8291_v17  ;;  %v7430_v17 = vld [vmem:[%s9437_s3 + $0x28] sm:$0xff]  }
 0x182   : > { %3777 = vst [vmem:[%s8392_s24 + $0x1a0] sm:$0xff] %v9444_v34  ;;  %3778 = vst [vmem:[%s8392_s24 + $0x1a8] sm:$0x3] %v9444_v34  ;;  %v8571_v44 = vpop.f32.mrf.mxu0  ;;  %7110 = vmatprep.subr.bf16.mxu1 %v7430_v17 }
 0x183   : > { %3883 = vst [vmem:[#allocation4] sm:$0xff] %v9444_v34  ;;  %3884 = vst [vmem:[#allocation4 + $0x8] sm:$0x3] %v9444_v34  ;;  %7111 = vmatpush3.bf16.msra.mxu1 %v7430_v17  ;;  %7159 = vmatpush3.bf16.msra.mxu0 %v7435_v38  ;;  %v983_v17 = vadd.f32 %v8193_v37, %v8191_v39  ;;  %v7438_v39 = vld [vmem:[%s9437_s3 + $0x98] sm:$0xff]  }
 0x184   : > { %3885 = vst [vmem:[#allocation4 + $0x10] sm:$0xff] %v9444_v34  ;;  %3886 = vst [vmem:[#allocation4 + $0x18] sm:$0x3] %v9444_v34  ;;  %v6896_v11 = vpop.f32.mrf.mxu0 }
 0x185   : > { %3887 = vst [vmem:[#allocation4 + $0x20] sm:$0xff] %v9444_v34  ;;  %3888 = vst [vmem:[#allocation4 + $0x28] sm:$0x3] %v9444_v34  ;;  %v8579_v46 = vadd.f32 %v6896_v11, %v8301_v4  ;;  %v1353_v38 = vadd.f32 %v8324_v45, %v983_v17 }
 0x186   : > { %3889 = vst [vmem:[#allocation4 + $0x30] sm:$0xff] %v9444_v34  ;;  %3890 = vst [vmem:[#allocation4 + $0x38] sm:$0x3] %v9444_v34  ;;  %v1966_v51 = vpop.f32.mrf.mxu0 }
 0x187   : > { %3891 = vst [vmem:[#allocation4 + $0x40] sm:$0xff] %v9444_v34  ;;  %3892 = vst [vmem:[#allocation4 + $0x48] sm:$0x3] %v9444_v34 }
 0x188   : > { %3893 = vst [vmem:[#allocation4 + $0x50] sm:$0xff] %v9444_v34  ;;  %3894 = vst [vmem:[#allocation4 + $0x58] sm:$0x3] %v9444_v34  ;;  %v6897_v4 = vpop.f32.mrf.mxu0 }
 0x189   : > { %3895 = vst [vmem:[#allocation4 + $0x60] sm:$0xff] %v9444_v34  ;;  %3896 = vst [vmem:[#allocation4 + $0x68] sm:$0x3] %v9444_v34  ;;  %v8595_v11 = vadd.f32 %v6897_v4, %v8309_v2 }
 0x18a   : > { %3897 = vst [vmem:[#allocation4 + $0x70] sm:$0xff] %v9444_v34  ;;  %3898 = vst [vmem:[#allocation4 + $0x78] sm:$0x3] %v9444_v34  ;;  %v8599_v50 = vpop.f32.mrf.mxu0 }
 0x18b   : > { %3899 = vst [vmem:[#allocation4 + $0x80] sm:$0xff] %v9444_v34  ;;  %3900 = vst [vmem:[#allocation4 + $0x88] sm:$0x3] %v9444_v34 }
 0x18c   : > { %3901 = vst [vmem:[#allocation4 + $0x90] sm:$0xff] %v9444_v34  ;;  %3902 = vst [vmem:[#allocation4 + $0x98] sm:$0x3] %v9444_v34  ;;  %v8556_v34 = vpop.f32.mrf.mxu1  ;;  %v6900_v2 = vpop.f32.mrf.mxu0 }
 0x18d   : > { %9451 = vst [vmem:[#allocation10_spill] sm:$0xff] %v8556_v34  ;;  %9455 = vst [vmem:[#allocation14_spill] sm:$0xff] %v8579_v46  ;;  %v7431_v46 = vld [vmem:[%s9437_s3 + $0x20] sm:$0xff]   ;;  %v8613_v4 = vadd.f32 %v6900_v2, %v8319_v40 }
 0x18e   : > { %v8564_v62 = vpop.f32.mrf.mxu1  ;;  %9457 = vst [vmem:[#allocation16_spill] sm:$0xff] %v8595_v11  ;;  %9459 = vst [vmem:[#allocation18_spill] sm:$0xff] %v8599_v50  ;;  %7112 = vmatprep.subr.bf16.mxu1 %v7431_v46  ;;  %v1982_v11 = vpop.f32.mrf.mxu0  ;;  %v7434_v50 = vld [vmem:[%s9437_s3 + $0x18] sm:$0xff]  }
 0x18f   : > { %9452 = vst [vmem:[#allocation11_spill] sm:$0xff] %v8564_v62  ;;  %9460 = vst [vmem:[#allocation19_spill] sm:$0xff] %v8613_v4  ;;  %7113 = vmatpush3.bf16.msra.mxu1 %v7431_v46  ;;  %v8624_v37 = vadd.f32 %v1982_v11, %v8322_v12  ;;  %v1724_v46 = vadd.f32 %v8328_v13, %v1353_v38  ;;  %v7437_v12 = vld [vmem:[%s9437_s3 + $0x10] sm:$0xff]  }
 0x190   : > { %v8569_v26 = vpop.f32.mrf.mxu1  ;;  %v6901_v40 = vpop.f32.mrf.mxu0  ;;  %7114 = vmatprep.subr.bf16.mxu1 %v7434_v50  ;;  %v7439_v11 = vld [vmem:[%s9437_s3 + $0x90] sm:$0xff]  }
 0x191   : > { %9453 = vst [vmem:[#allocation12_spill] sm:$0xff] %v8569_v26  ;;  %v8590_v26 = vadd.f32 %v1966_v51, %v8304_v32  ;;  %v7436_v32 = vld [vmem:[%s9437_s3 + $0xa0] sm:$0xff]   ;;  %9462 = vst [vmem:[#allocation21_spill] sm:$0xff] %v8624_v37 }
 0x192   : > { %v8576_v34 = vpop.f32.mrf.mxu1  ;;  %7160 = vmatprep.subr.bf16.mxu0 %v7436_v32  ;;  %v1985_v2 = vpop.f32.mrf.mxu0 }
 0x193   : > { %9454 = vst [vmem:[#allocation13_spill] sm:$0xff] %v8576_v34  ;;  %7161 = vmatpush3.bf16.msra.mxu0 %v7436_v32  ;;  %v8630_v32 = vadd.f32 %v6901_v40, %v8326_v49  ;;  %7115 = vmatpush3.bf16.msra.mxu1 %v7434_v50  ;;  %v8642_v13 = vadd.f32 %v1985_v2, %v1724_v46 }
 0x194   : > { %v8581_v62 = vpop.f32.mrf.mxu1  ;;  %7162 = vmatprep.subr.bf16.mxu0 %v7438_v39  ;;  %v6904_v38 = vpop.f32.mrf.mxu0  ;;  %7116 = vmatprep.subr.bf16.mxu1 %v7437_v12 }
 0x195   : > { %9456 = vst [vmem:[#allocation15_spill] sm:$0xff] %v8581_v62  ;;  %9464 = vst [vmem:[#allocation23_spill] sm:$0xff] %v8630_v32 }
 0x196   : > { %v8592_v34 = vpop.f32.mrf.mxu1  ;;  %9466 = vst [vmem:[#allocation25_spill] sm:$0xff] %v8642_v13 }
 0x197   : > { %7163 = vmatpush3.bf16.msra.mxu0 %v7438_v39  ;;  %v8648_v39 = vadd.f32 %v6904_v38, %v8334_v54  ;;  %7117 = vmatpush3.bf16.msra.mxu1 %v7437_v12  ;;  %v991_v38 = vadd.f32 %v8225_v58, %v8223_v23 }
 0x198   : > { %v8597_v62 = vpop.f32.mrf.mxu1  ;;  %7164 = vmatprep.subr.bf16.mxu0 %v7439_v11 }
 0x199   : > { %9458 = vst [vmem:[#allocation17_spill] sm:$0xff] %v8597_v62  ;;  %9468 = vst [vmem:[#allocation27_spill] sm:$0xff] %v8648_v39 }
 0x19a   : > { %v8609_v51 = vpop.f32.mrf.mxu1 }
 0x19b   : > { %7165 = vmatpush3.bf16.msra.mxu0 %v7439_v11 }
 0x19c   : > { %v8615_v62 = vpop.f32.mrf.mxu1 }
 0x19d   : > { %9461 = vst [vmem:[#allocation20_spill] sm:$0xff] %v8615_v62 }
 0x19e   : > { %v8626_v45 = vpop.f32.mrf.mxu1 }
 0x19f   : > { %9463 = vst [vmem:[#allocation22_spill] sm:$0xff] %v8626_v45  ;;  %v987_v45 = vadd.f32 %v8207_v18, %v8205_v56  ;;  %v7440_v56 = vld [vmem:[%s9437_s3 + $0x8] sm:$0xff]  }
 0x1a0   : > { %v8632_v17 = vpop.f32.mrf.mxu1  ;;  %v7441_v18 = vld [vmem:[%s9437_s3 + $0x88] sm:$0xff]   ;;  %7118 = vmatprep.subr.bf16.mxu1 %v7440_v56 }
 0x1a1   : > { %9465 = vst [vmem:[#allocation24_spill] sm:$0xff] %v8632_v17  ;;  %v1357_v50 = vadd.f32 %v8339_v41, %v987_v45  ;;  %v1998_v17 = vpop.f32.mrf.mxu0  ;;  %7166 = vmatprep.subr.bf16.mxu0 %v7441_v18  ;;  %7119 = vmatpush3.bf16.msra.mxu1 %v7440_v56  ;;  %v1361_v56 = vadd.f32 %v8355_v14, %v991_v38 }
 0x1a2   : > { %v8644_v49 = vpop.f32.mrf.mxu1  ;;  %v8659_v46 = vadd.f32 %v1998_v17, %v8337_v53  ;;  %7167 = vmatpush3.bf16.msra.mxu0 %v7441_v18  ;;  %v7442_v53 = vld [vmem:[%s9437_s3] sm:$0xff]   ;;  %v995_v38 = vadd.f32 %v8239_v43, %v8237_v30  ;;  %v8718_v30 = vld [vmem:[%s9437_s3 + $0x138] sm:$0xff]  }
 0x1a3   : > { %9467 = vst [vmem:[#allocation26_spill] sm:$0xff] %v8644_v49  ;;  %v6905_v54 = vpop.f32.mrf.mxu0  ;;  %v1728_v45 = vadd.f32 %v8343_v59, %v1357_v50  ;;  %v7443_v17 = vld [vmem:[%s9437_s3 + $0x80] sm:$0xff]   ;;  %7120 = vmatprep.subr.bf16.mxu1 %v7442_v53  ;;  %9487 = vst [vmem:[#allocation46_spill] sm:$0xff] %v8718_v30 }
 0x1a4   : > { %v8650_v40 = vpop.f32.mrf.mxu1  ;;  %9470 = vst [vmem:[#allocation29_spill] sm:$0xff] %v8659_v46  ;;  %v8665_v2 = vadd.f32 %v6905_v54, %v8341_v57  ;;  %7168 = vmatprep.subr.bf16.mxu0 %v7443_v17 }
 0x1a5   : > { %9469 = vst [vmem:[#allocation28_spill] sm:$0xff] %v8650_v40  ;;  %v2001_v11 = vpop.f32.mrf.mxu0  ;;  %7121 = vmatpush3.bf16.msra.mxu1 %v7442_v53 }
 0x1a6   : > { %v8661_v41 = vpop.f32.mrf.mxu1  ;;  %9472 = vst [vmem:[#allocation31_spill] sm:$0xff] %v8665_v2  ;;  %v8677_v59 = vadd.f32 %v2001_v11, %v1728_v45  ;;  %7169 = vmatpush3.bf16.msra.mxu0 %v7443_v17  ;;  %v1732_v45 = vadd.f32 %v8359_v19, %v1361_v56 }
 0x1a7   : > { %9471 = vst [vmem:[#allocation30_spill] sm:$0xff] %v8661_v41  ;;  %v6908_v50 = vpop.f32.mrf.mxu0  ;;  %7202 = vmatprep.subr.bf16.mxu0 %v8718_v30 }
 0x1a8   : > { %v8667_v12 = vpop.f32.mrf.mxu1  ;;  %9474 = vst [vmem:[#allocation33_spill] sm:$0xff] %v8677_v59  ;;  %v8683_v18 = vadd.f32 %v6908_v50, %v8350_v22 }
 0x1a9   : > { %9473 = vst [vmem:[#allocation32_spill] sm:$0xff] %v8667_v12  ;;  %v2014_v12 = vpop.f32.mrf.mxu0 }
 0x1aa   : > { %v8679_v57 = vpop.f32.mrf.mxu1  ;;  %9476 = vst [vmem:[#allocation35_spill] sm:$0xff] %v8683_v18  ;;  %v8688_v2 = vadd.f32 %v2014_v12, %v8353_v47  ;;  %v1365_v12 = vadd.f32 %v8371_v42, %v995_v38 }
 0x1ab   : > { %9475 = vst [vmem:[#allocation34_spill] sm:$0xff] %v8679_v57  ;;  %v6909_v58 = vpop.f32.mrf.mxu0 }
 0x1ac   : > { %v8685_v54 = vpop.f32.mrf.mxu1  ;;  %9478 = vst [vmem:[#allocation37_spill] sm:$0xff] %v8688_v2  ;;  %v8694_v11 = vadd.f32 %v6909_v58, %v8357_v60  ;;  %v8713_v60 = vld [vmem:[%s9437_s3 + $0x78] sm:$0xff]   ;;  %v1736_v58 = vadd.f32 %v8375_v6, %v1365_v12 }
 0x1ad   : > { %9477 = vst [vmem:[#allocation36_spill] sm:$0xff] %v8685_v54  ;;  %v2017_v22 = vpop.f32.mrf.mxu0  ;;  %9486 = vst [vmem:[#allocation45_spill] sm:$0xff] %v8713_v60  ;;  %7130 = vmatprep.subr.bf16.mxu1 %v8713_v60 }
 0x1ae   : > { %v8690_v23 = vpop.f32.mrf.mxu1  ;;  %9480 = vst [vmem:[#allocation39_spill] sm:$0xff] %v8694_v11  ;;  %v8700_v53 = vadd.f32 %v2017_v22, %v1732_v45 }
 0x1af   : > { %9479 = vst [vmem:[#allocation38_spill] sm:$0xff] %v8690_v23  ;;  %v6912_v47 = vpop.f32.mrf.mxu0 }
 0x1b0   : > { %v8696_v14 = vpop.f32.mrf.mxu1  ;;  %9482 = vst [vmem:[#allocation41_spill] sm:$0xff] %v8700_v53  ;;  %v8706_v50 = vadd.f32 %v6912_v47, %v8363_v7 }
 0x1b1   : > { %9481 = vst [vmem:[#allocation40_spill] sm:$0xff] %v8696_v14  ;;  %v2030_v43 = vpop.f32.mrf.mxu0 }
 0x1b2   : > { %v8702_v17 = vpop.f32.mrf.mxu1  ;;  %9484 = vst [vmem:[#allocation43_spill] sm:$0xff] %v8706_v50  ;;  %v8721_v56 = vadd.f32 %v2030_v43, %v8369_v9 }
 0x1b3   : > { %9483 = vst [vmem:[#allocation42_spill] sm:$0xff] %v8702_v17  ;;  %v6913_v7 = vpop.f32.mrf.mxu0 }
 0x1b4   : > { %v8708_v19 = vpop.f32.mrf.mxu1  ;;  %9488 = vst [vmem:[#allocation47_spill] sm:$0xff] %v8721_v56  ;;  %v8729_v45 = vadd.f32 %v6913_v7, %v8373_v16 }
 0x1b5   : > { %9485 = vst [vmem:[#allocation44_spill] sm:$0xff] %v8708_v19  ;;  %v2033_v38 = vpop.f32.mrf.mxu0 }
 0x1b6   : > { %v8723_v42 = vpop.f32.mrf.mxu1  ;;  %9490 = vst [vmem:[#allocation49_spill] sm:$0xff] %v8729_v45  ;;  %v8733_v47 = vadd.f32 %v2033_v38, %v1736_v58 }
 0x1b7   : > { %9489 = vst [vmem:[#allocation48_spill] sm:$0xff] %v8723_v42  ;;  %v6980_v9 = vpop.f32.mrf.mxu0 }
 0x1b8   : > { %v8731_v22 = vpop.f32.mrf.mxu1  ;;  %9492 = vst [vmem:[#allocation51_spill] sm:$0xff] %v8733_v47 }
 0x1b9   : > { %9491 = vst [vmem:[#allocation50_spill] sm:$0xff] %v8731_v22  ;;  %v2659_v42 = vpop.f32.mrf.mxu0 }
 0x1ba   : > { %v8735_v19 = vpop.f32.mrf.mxu1 }
 0x1bb   : > { %9493 = vst [vmem:[#allocation52_spill] sm:$0xff] %v8735_v19  ;;  %v6981_v60 = vpop.f32.mrf.mxu0 }
 0x1bc   : > { %v7028_v43 = vpop.f32.mrf.mxu1 }
 0x1bd   : > { %v2662_v30 = vpop.f32.mrf.mxu0 }
 0x1be   : > { %v3029_v56 = vpop.f32.mrf.mxu1 }
 0x1bf   : > { %v6984_v17 = vpop.f32.mrf.mxu0 }
 0x1c0   : > { %v8737_v50 = vpop.f32.mrf.mxu1 }
 0x1c1   : > { %v8741_v16 = vpop.f32.mrf.mxu0 }
 0x1c2   : > { %v8739_v6 = vpop.f32.mrf.mxu1 }
 0x1c3   : > { %v8743_v12 = vpop.f32.mrf.mxu0 }
 0x1c4   : > { %v8745_v7 = vpop.f32.mrf.mxu1 }
 0x1c5   : > { %v8747_v58 = vpop.f32.mrf.mxu0 }
 0x1c6   : > { %v8751_v19 = vpop.f32.mrf.mxu1 }
 0x1c7   : > { %v8749_v38 = vpop.f32.mrf.mxu0 }
 0x1c8   : > { %v8757_v45 = vpop.f32.mrf.mxu1 }
 0x1c9   : > { %v8753_v47 = vpop.f32.mrf.mxu0 }
 0x1ca   : > { %v8763_v11 = vpop.f32.mrf.mxu1 }
 0x1cb   : > { %v8755_v22 = vpop.f32.mrf.mxu0 }
 0x1cc   : > { %v8769_v54 = vpop.f32.mrf.mxu1 }
 0x1cd   : > { %v8759_v53 = vpop.f32.mrf.mxu0 }
 0x1ce   : > { %v8775_v59 = vpop.f32.mrf.mxu1 }
 0x1cf   : > { %v8761_v14 = vpop.f32.mrf.mxu0 }
 0x1d0   : > { %v8781_v40 = vpop.f32.mrf.mxu1 }
 0x1d1   : > { %v8765_v23 = vpop.f32.mrf.mxu0 }
 0x1d2   : > { %v8787_v13 = vpop.f32.mrf.mxu1 }
 0x1d3   : > { %v8767_v2 = vpop.f32.mrf.mxu0 }
 0x1d4   : > { %9494 = vst [vmem:[#allocation53_spill] sm:$0xff] %v8767_v2 }
 0x1d5   : > { %v8771_v18 = vpop.f32.mrf.mxu0 }
 0x1d6   : > { %9495 = vst [vmem:[#allocation54_spill] sm:$0xff] %v8771_v18  ;;  %v8793_v18 = vpop.f32.mrf.mxu1 }
 0x1d7   : > { %v8773_v57 = vpop.f32.mrf.mxu0 }
 0x1d8   : > { %9496 = vst [vmem:[#allocation55_spill] sm:$0xff] %v8773_v57 }
 0x1d9   : > { %v8777_v41 = vpop.f32.mrf.mxu0 }
 0x1da   : > { %9497 = vst [vmem:[#allocation56_spill] sm:$0xff] %v8777_v41  ;;  %v8799_v41 = vpop.f32.mrf.mxu1 }
 0x1db   : > { %v8779_v46 = vpop.f32.mrf.mxu0  ;;  %9505 = vst [vmem:[#allocation64_spill] sm:$0xff] %v8799_v41 }
 0x1dc   : > { %9498 = vst [vmem:[#allocation57_spill] sm:$0xff] %v8779_v46 }
 0x1dd   : > { %v8783_v39 = vpop.f32.mrf.mxu0 }
 0x1de   : > { %9499 = vst [vmem:[#allocation58_spill] sm:$0xff] %v8783_v39  ;;  %v8805_v39 = vpop.f32.mrf.mxu1 }
 0x1df   : > { %v8785_v49 = vpop.f32.mrf.mxu0  ;;  %9508 = vst [vmem:[#allocation67_spill] sm:$0xff] %v8805_v39 }
 0x1e0   : > { %9500 = vst [vmem:[#allocation59_spill] sm:$0xff] %v8785_v49 }
 0x1e1   : > { %v8789_v32 = vpop.f32.mrf.mxu0 }
 0x1e2   : > { %9501 = vst [vmem:[#allocation60_spill] sm:$0xff] %v8789_v32  ;;  %v8815_v32 = vpop.f32.mrf.mxu1 }
 0x1e3   : > { %v8791_v37 = vpop.f32.mrf.mxu0 }
 0x1e4   : > { %9502 = vst [vmem:[#allocation61_spill] sm:$0xff] %v8791_v37  ;;  %v1708_v37 = vadd.f32 %v8257_v29, %v8253_v28  ;;  %v8826_v28 = vpop.f32.mrf.mxu1 }
 0x1e5   : > { %v8795_v57 = vpop.f32.mrf.mxu0 }
 0x1e6   : > { %9503 = vst [vmem:[#allocation62_spill] sm:$0xff] %v8795_v57  ;;  %v2449_v57 = vadd.f32 %v8380_v35, %v8378_v24 }
 0x1e7   : > { %v8797_v62 = vpop.f32.mrf.mxu0 }
 0x1e8   : > { %9504 = vst [vmem:[#allocation63_spill] sm:$0xff] %v8797_v62  ;;  %v2820_v39 = vadd.f32 %v6980_v9, %v2449_v57 }
 0x1e9   : > { %v8801_v46 = vpop.f32.mrf.mxu0 }
 0x1ea   : > { %9506 = vst [vmem:[#allocation65_spill] sm:$0xff] %v8801_v46  ;;  %v2447_v46 = vadd.f32 %v8385_v31, %v8383_v0  ;;  %v3190_v35 = vadd.f32 %v7028_v43, %v2820_v39  ;;  %v1712_v0 = vadd.f32 %v8275_v8, %v8271_v3  ;;  %v2453_v31 = vadd.f32 %v8534_v21, %v8532_v5  ;;  %v9512_v43 = vld [vmem:[#allocation6_spill] sm:$0xff] }
 0x1eb   : > { %v8803_v4 = vpop.f32.mrf.mxu0 }
 0x1ec   : > { %9507 = vst [vmem:[#allocation66_spill] sm:$0xff] %v8803_v4  ;;  %v2078_v4 = vadd.f32 %v8399_v1, %v1708_v37  ;;  %v2824_v3 = vadd.f32 %v6984_v17, %v2453_v31 }
 0x1ed   : > { %v8807_v49 = vpop.f32.mrf.mxu0 }
 0x1ee   : > { %9509 = vst [vmem:[#allocation68_spill] sm:$0xff] %v8807_v49  ;;  %v2818_v49 = vadd.f32 %v2659_v42, %v2447_v46  ;;  %v2448_v24 = vadd.f32 %v8529_v33, %v2078_v4  ;;  %v8840_v46 = vpop.f32.mrf.mxu1  ;;  %v2451_v33 = vadd.f32 %v8539_v61, %v8537_v63  ;;  %v2082_v4 = vadd.f32 %v8549_v36, %v1712_v0 }
 0x1ef   : > { %v8809_v2 = vpop.f32.mrf.mxu0  ;;  %v3194_v17 = vadd.f32 %v8745_v7, %v2824_v3 }
 0x1f0   : > { %9510 = vst [vmem:[#allocation69_spill] sm:$0xff] %v8809_v2  ;;  %v2450_v2 = vadd.f32 %v8397_v55, %v8395_v27  ;;  %v8838_v27 = vld [vmem:[%s9436_s2] ss:$0 sm:$0xff]  ;;  %v3188_v55 = vadd.f32 %v3029_v56, %v2818_v49  ;;  %v2819_v37 = vadd.f32 %v2662_v30, %v2448_v24  ;;  %v2454_v49 = vadd.f32 %v8547_v10, %v8545_v52  ;;  %v8851_v56 = vpop.f32.mrf.mxu1 }
 0x1f1   : > { %v8817_v62 = vpop.f32.mrf.mxu0  ;;  %v9514_v24 = vld [vmem:[#allocation10_spill] sm:$0xff] }
 0x1f2   : > { %9511 = vst [vmem:[#allocation70_spill] sm:$0xff] %v8817_v62  ;;  %v2821_v62 = vadd.f32 %v6981_v60, %v2450_v2  ;;  %v2822_v2 = vadd.f32 %v8741_v16, %v2451_v33  ;;  %v3189_v30 = vadd.f32 %v8739_v6, %v2819_v37  ;;  %v2825_v42 = vadd.f32 %v8743_v12, %v2454_v49  ;;  %v9513_v6 = vld [vmem:[#allocation7_spill] sm:$0xff]  ;;  %v8865_v31 = vpop.f32.mrf.mxu1 }
 0x1f3   : > { %v8822_v41 = vpop.f32.mrf.mxu0  ;;  %v1716_v16 = vadd.f32 %v9513_v6, %v9512_v43 }
 0x1f4   : > { %v3191_v5 = vadd.f32 %v8737_v50, %v2821_v62  ;;  %v2452_v62 = vadd.f32 %v8551_v25, %v2082_v4  ;;  %v3192_v0 = vadd.f32 %v8751_v19, %v2822_v2  ;;  %v8880_v2 = vpop.f32.mrf.mxu1 }
 0x1f5   : > { %v8828_v29 = vpop.f32.mrf.mxu0 }
 0x1f6   : > { %v2823_v25 = vadd.f32 %v8747_v58, %v2452_v62  ;;  %v3195_v58 = vadd.f32 %v8757_v45, %v2825_v42  ;;  %v9519_v42 = vld [vmem:[#allocation9_spill] sm:$0xff] }
 0x1f7   : > { %v7076_v1 = vpop.f32.mrf.mxu0 }
 0x1f8   : > { %v3560_v57 = vadd.f32 %v7076_v1, %v3190_v35  ;;  %v2457_v35 = vadd.f32 %v9514_v24, %v8554_v48  ;;  %v2086_v48 = vadd.f32 %v8571_v44, %v1716_v16  ;;  %v3193_v49 = vadd.f32 %v8763_v11, %v2823_v25  ;;  %v8895_v24 = vpop.f32.mrf.mxu1 }
 0x1f9   : > { %v3399_v8 = vpop.f32.mrf.mxu0 }
 0x1fa   : > { %v3663_v21 = vadd.f32 %v8838_v27, %v3560_v57  ;;  %v3558_v39 = vadd.f32 %v3399_v8, %v3188_v55  ;;  %v9515_v57 = vld [vmem:[#allocation11_spill] sm:$0xff]  ;;  %v2828_v4 = vadd.f32 %v8749_v38, %v2457_v35 }
 0x1fb   : > { %v7077_v60 = vpop.f32.mrf.mxu0  ;;  %v2455_v33 = vadd.f32 %v9515_v57, %v8562_v20 }
 0x1fc   : > { %v3695_v63 = vmax.f32 %v3663_v21, 0.0  ;;  %v3661_v61 = vadd.f32 %v8838_v27, %v3558_v39  ;;  %v3561_v36 = vadd.f32 %v7077_v60, %v3191_v5  ;;  %v9516_v21 = vld [vmem:[#allocation12_spill] sm:$0xff] }
 0x1fd   : > { %v3402_v50 = vpop.f32.mrf.mxu0  ;;  %v2458_v39 = vadd.f32 %v9516_v21, %v8567_v15  ;;  %v2826_v20 = vadd.f32 %v8753_v47, %v2455_v33 }
 0x1fe   : > { %6096 = vst [vmem:[%s8392_s24 + $0x31] sm:$0xff] %v3695_v63  ;;  %v3693_v52 = vmax.f32 %v3661_v61, 0.0  ;;  %v3664_v10 = vadd.f32 %v8838_v27, %v3561_v36  ;;  %v3559_v9 = vadd.f32 %v3402_v50, %v3189_v30  ;;  %v3198_v36 = vadd.f32 %v8769_v54, %v2828_v4  ;;  %v9518_v50 = vld [vmem:[#allocation8_spill] sm:$0xff]  ;;  %v9524_v4 = vld [vmem:[#allocation17_spill] sm:$0xff] }
 0x1ff   : > { %v7080_v7 = vpop.f32.mrf.mxu0  ;;  %v2829_v15 = vadd.f32 %v8755_v22, %v2458_v39  ;;  %v3196_v6 = vadd.f32 %v8775_v59, %v2826_v20 }
 0x200   : > { %6094 = vst [vmem:[%s8392_s24 + $0x19] sm:$0xff] %v3693_v52  ;;  %v3812_v12 = vmax.f32 %v3693_v52, %v3695_v63  ;;  %v3696_v1 = vmax.f32 %v3664_v10, 0.0  ;;  %v3662_v55 = vadd.f32 %v8838_v27, %v3559_v9  ;;  %v3564_v37 = vadd.f32 %v7080_v7, %v3194_v17  ;;  %v9517_v63 = vld [vmem:[#allocation13_spill] sm:$0xff]  ;;  %v9520_v10 = vld [vmem:[#allocation14_spill] sm:$0xff]  ;;  %v9521_v9 = vld [vmem:[#allocation15_spill] sm:$0xff] }
 0x201   : > { %v3415_v19 = vpop.f32.mrf.mxu0  ;;  %v2456_v61 = vadd.f32 %v9517_v63, %v2086_v48  ;;  %v1720_v52 = vadd.f32 %v9519_v42, %v9518_v50  ;;  %v2461_v43 = vadd.f32 %v9521_v9, %v9520_v10  ;;  %v2459_v7 = vadd.f32 %v8592_v34, %v8590_v26  ;;  %v9523_v48 = vld [vmem:[#allocation16_spill] sm:$0xff]  ;;  %v9526_v63 = vld [vmem:[#allocation19_spill] sm:$0xff]  ;;  %v9530_v10 = vld [vmem:[#allocation21_spill] sm:$0xff] }
 0x202   : > { %3828 = vst [vmem:[#allocation3] sm:$0xff] %v3812_v12  ;;  %6097 = vst [vmem:[%s8392_s24 + $0x39] sm:$0xff] %v3696_v1  ;;  %v3694_v3 = vmax.f32 %v3662_v55, 0.0  ;;  %v3667_v8 = vadd.f32 %v8838_v27, %v3564_v37  ;;  %v3562_v5 = vadd.f32 %v3415_v19, %v3192_v0  ;;  %v9522_v12 = vld [vmem:[#allocation18_spill] sm:$0xff]  ;;  %v2462_v19 = vadd.f32 %v9524_v4, %v9523_v48 }
 0x203   : > { %v7081_v44 = vpop.f32.mrf.mxu0  ;;  %v2827_v54 = vadd.f32 %v8759_v53, %v2456_v61  ;;  %v2832_v55 = vadd.f32 %v8761_v14, %v2461_v43  ;;  %v3199_v53 = vadd.f32 %v8781_v40, %v2829_v15  ;;  %v2830_v26 = vadd.f32 %v8765_v23, %v2459_v7  ;;  %v9527_v61 = vld [vmem:[#allocation20_spill] sm:$0xff]  ;;  %v9531_v9 = vld [vmem:[#allocation22_spill] sm:$0xff] }
 0x204   : > { %6095 = vst [vmem:[%s8392_s24 + $0x21] sm:$0xff] %v3694_v3  ;;  %v3813_v38 = vmax.f32 %v3694_v3, %v3696_v1  ;;  %v3699_v45 = vmax.f32 %v3667_v8, 0.0  ;;  %v3665_v60 = vadd.f32 %v8838_v27, %v3562_v5  ;;  %v3565_v30 = vadd.f32 %v7081_v44, %v3195_v58  ;;  %v8910_v3 = vpop.f32.mrf.mxu1 }
 0x205   : > { %v3418_v62 = vpop.f32.mrf.mxu0  ;;  %v2090_v1 = vadd.f32 %v9522_v12, %v1720_v52  ;;  %v3197_v58 = vadd.f32 %v8787_v13, %v2827_v54  ;;  %v3202_v39 = vadd.f32 %v8793_v18, %v2832_v55  ;;  %v2463_v43 = vadd.f32 %v9531_v9, %v9530_v10  ;;  %v9534_v12 = vld [vmem:[#allocation23_spill] sm:$0xff] }
 0x206   : > { %3829 = vst [vmem:[#allocation3 + $0x8] sm:$0xff] %v3813_v38  ;;  %6100 = vst [vmem:[%s8392_s24 + $0x61] sm:$0xff] %v3699_v45  ;;  %v3697_v11 = vmax.f32 %v3665_v60, 0.0  ;;  %v3668_v47 = vadd.f32 %v8838_v27, %v3565_v30  ;;  %v3563_v17 = vadd.f32 %v3418_v62, %v3193_v49  ;;  %v9525_v49 = vld [vmem:[#allocation53_spill] sm:$0xff]  ;;  %v9529_v62 = vld [vmem:[#allocation54_spill] sm:$0xff] }
 0x207   : > { %v7084_v16 = vpop.f32.mrf.mxu0  ;;  %v2460_v21 = vadd.f32 %v8609_v51, %v2090_v1  ;;  %v2833_v20 = vadd.f32 %v9525_v49, %v2462_v19  ;;  %v9528_v51 = vld [vmem:[#allocation64_spill] sm:$0xff]  ;;  %v9545_v10 = vld [vmem:[#allocation59_spill] sm:$0xff] }
 0x208   : > { %6098 = vst [vmem:[%s8392_s24 + $0x49] sm:$0xff] %v3697_v11  ;;  %v3814_v22 = vmax.f32 %v3697_v11, %v3699_v45  ;;  %v3700_v35 = vmax.f32 %v3668_v47, 0.0  ;;  %v3666_v0 = vadd.f32 %v8838_v27, %v3563_v17  ;;  %v3568_v25 = vadd.f32 %v7084_v16, %v3198_v36  ;;  %v8925_v47 = vpop.f32.mrf.mxu1  ;;  %v9535_v1 = vld [vmem:[#allocation24_spill] sm:$0xff] }
 0x209   : > { %v3431_v59 = vpop.f32.mrf.mxu0  ;;  %v2465_v36 = vadd.f32 %v9527_v61, %v9526_v63  ;;  %v3200_v18 = vadd.f32 %v9528_v51, %v2830_v26  ;;  %v2831_v15 = vadd.f32 %v9529_v62, %v2460_v21  ;;  %v2466_v55 = vadd.f32 %v9535_v1, %v9534_v12  ;;  %v9537_v26 = vld [vmem:[#allocation25_spill] sm:$0xff]  ;;  %v9542_v63 = vld [vmem:[#allocation58_spill] sm:$0xff]  ;;  %v9548_v12 = vld [vmem:[#allocation32_spill] sm:$0xff] }
 0x20a   : > { %3830 = vst [vmem:[#allocation3 + $0x10] sm:$0xff] %v3814_v22  ;;  %6101 = vst [vmem:[%s8392_s24 + $0x69] sm:$0xff] %v3700_v35  ;;  %v3698_v37 = vmax.f32 %v3666_v0, 0.0  ;;  %v3671_v57 = vadd.f32 %v8838_v27, %v3568_v25  ;;  %v3566_v33 = vadd.f32 %v3431_v59, %v3196_v6  ;;  %v9532_v6 = vld [vmem:[#allocation55_spill] sm:$0xff] }
 0x20b   : > { %v7085_v34 = vpop.f32.mrf.mxu0  ;;  %v2836_v54 = vadd.f32 %v9532_v6, %v2465_v36  ;;  %v9533_v22 = vld [vmem:[#allocation67_spill] sm:$0xff]  ;;  %v3201_v59 = vadd.f32 %v8815_v32, %v2831_v15  ;;  %v9546_v6 = vmov 0.0  }
 0x20c   : > { %6099 = vst [vmem:[%s8392_s24 + $0x51] sm:$0xff] %v3698_v37  ;;  %v3815_v14 = vmax.f32 %v3698_v37, %v3700_v35  ;;  %v3703_v40 = vmax.f32 %v3671_v57, 0.0  ;;  %v3669_v8 = vadd.f32 %v8838_v27, %v3566_v33  ;;  %v3569_v5 = vadd.f32 %v7085_v34, %v3199_v53  ;;  %v9536_v53 = vld [vmem:[#allocation56_spill] sm:$0xff]  ;;  %v8940_v33 = vpop.f32.mrf.mxu1  ;;  %v9538_v34 = vld [vmem:[#allocation26_spill] sm:$0xff] }
 0x20d   : > { %v3844_v13 = vld [vmem:[#allocation3] ss:$2 sm:$0xff]  ;;  %v3860_v44 = vld [vmem:[#allocation3 + $0x1] ss:$2 sm:$0xff]  ;;  %v3434_v23 = vpop.f32.mrf.mxu0  ;;  %v3203_v35 = vadd.f32 %v9533_v22, %v2833_v20  ;;  %v2834_v37 = vadd.f32 %v9536_v53, %v2463_v43 }
 0x20e   : > { %v8917_v38 = vmax.f32 %v3844_v13, %v3860_v44  ;;  %3831 = vst [vmem:[#allocation3 + $0x18] sm:$0xff] %v3815_v14  ;;  %6104 = vst [vmem:[%s8392_s24 + $0x91] sm:$0xff] %v3703_v40  ;;  %v3701_v45 = vmax.f32 %v3669_v8, 0.0  ;;  %v3672_v60 = vadd.f32 %v8838_v27, %v3569_v5  ;;  %v3567_v30 = vadd.f32 %v3434_v23, %v3197_v58  ;;  %v9539_v8 = vld [vmem:[#allocation57_spill] sm:$0xff]  ;;  %v4227_v23 = vld [vmem:[#allocation4 + $0x2] sm:$0xff]  ;;  %v8960_v62 = vpop.f32.mrf.mxu1 }
 0x20f   : > { %v7088_v11 = vpop.f32.mrf.mxu0  ;;  %v2464_v14 = vadd.f32 %v9538_v34, %v9537_v26  ;;  %v2837_v5 = vadd.f32 %v9539_v8, %v2466_v55  ;;  %v9551_v26 = vld [vmem:[#allocation34_spill] sm:$0xff] }
 0x210   : > { %3904 = vst [vmem:[#allocation4 + $0x11] sm:$0xff] %v8917_v38  ;;  %6102 = vst [vmem:[%s8392_s24 + $0x79] sm:$0xff] %v3701_v45  ;;  %v3816_v17 = vmax.f32 %v3701_v45, %v3703_v40  ;;  %v3704_v50 = vmax.f32 %v3672_v60, 0.0  ;;  %v3670_v42 = vadd.f32 %v8838_v27, %v3567_v30  ;;  %v3572_v52 = vadd.f32 %v7088_v11, %v3202_v39  ;;  %v9540_v45 = vld [vmem:[#allocation27_spill] sm:$0xff]  ;;  %v9541_v60 = vld [vmem:[#allocation28_spill] sm:$0xff] }
 0x211   : > { %v3447_v16 = vpop.f32.mrf.mxu0  ;;  %v3206_v40 = vadd.f32 %v8826_v28, %v2836_v54  ;;  %v2469_v30 = vadd.f32 %v9541_v60, %v9540_v45  ;;  %v3204_v28 = vadd.f32 %v8840_v46, %v2834_v37  ;;  %v2835_v61 = vadd.f32 %v9542_v63, %v2464_v14  ;;  %v9544_v46 = vld [vmem:[#allocation30_spill] sm:$0xff] }
 0x212   : > { %3832 = vst [vmem:[#allocation3 + $0x20] sm:$0xff] %v3816_v17  ;;  %6105 = vst [vmem:[%s8392_s24 + $0x99] sm:$0xff] %v3704_v50  ;;  %v3702_v0 = vmax.f32 %v3670_v42, 0.0  ;;  %v3675_v25 = vadd.f32 %v8838_v27, %v3572_v52  ;;  %v3570_v7 = vadd.f32 %v3447_v16, %v3200_v18  ;;  %v9543_v42 = vld [vmem:[#allocation29_spill] sm:$0xff]  ;;  %v3207_v22 = vadd.f32 %v8851_v56, %v2837_v5 }
 0x213   : > { %v7089_v57 = vpop.f32.mrf.mxu0  ;;  %v2467_v52 = vadd.f32 %v9544_v46, %v9543_v42  ;;  %v2840_v9 = vadd.f32 %v9545_v10, %v2469_v30  ;;  %v3205_v55 = vadd.f32 %v8865_v31, %v2835_v61  ;;  %v9552_v31 = vld [vmem:[#allocation61_spill] sm:$0xff]  ;;  %v9557_v42 = vld [vmem:[#allocation38_spill] sm:$0xff]  ;;  %v9558_v46 = vld [vmem:[#allocation63_spill] sm:$0xff] }
 0x214   : > { %6103 = vst [vmem:[%s8392_s24 + $0x81] sm:$0xff] %v3702_v0  ;;  %v3817_v48 = vmax.f32 %v3702_v0, %v3704_v50  ;;  %v3707_v4 = vmax.f32 %v3675_v25, 0.0  ;;  %v3673_v19 = vadd.f32 %v8838_v27, %v3570_v7  ;;  %v3573_v58 = vadd.f32 %v7089_v57, %v3203_v35  ;;  %v9547_v7 = vld [vmem:[#allocation31_spill] sm:$0xff]  ;;  %v8978_v57 = vpop.f32.mrf.mxu1 }
 0x215   : > { %v3846_v32 = vld [vmem:[#allocation3 + $0x10] ss:$2 sm:$0xff]  ;;  %v3862_v21 = vld [vmem:[#allocation3 + $0x11] ss:$2 sm:$0xff]  ;;  %v3450_v39 = vpop.f32.mrf.mxu0  ;;  %v2470_v1 = vadd.f32 %v9548_v12, %v9547_v7  ;;  %v3210_v14 = vadd.f32 %v8880_v2, %v2840_v9  ;;  %v9555_v2 = vld [vmem:[#allocation62_spill] sm:$0xff] }
 0x216   : > { %v8948_v49 = vmax.f32 %v3846_v32, %v3862_v21  ;;  %3833 = vst [vmem:[#allocation3 + $0x28] sm:$0xff] %v3817_v48  ;;  %6108 = vst [vmem:[%s8392_s24 + $0xc1] sm:$0xff] %v3707_v4  ;;  %v3705_v20 = vmax.f32 %v3673_v19, 0.0  ;;  %v3676_v13 = vadd.f32 %v8838_v27, %v3573_v58  ;;  %v3571_v44 = vadd.f32 %v3450_v39, %v3201_v59  ;;  %v9549_v59 = vld [vmem:[#allocation60_spill] sm:$0xff]  ;;  %v9550_v58 = vld [vmem:[#allocation33_spill] sm:$0xff]  ;;  %v8996_v61 = vpop.f32.mrf.mxu1 }
 0x217   : > { %v7092_v36 = vpop.f32.mrf.mxu0  ;;  %v8956_v51 = vld [vmem:[#allocation4 + $0x10] sm:$0xff]  ;;  %v2838_v53 = vadd.f32 %v9549_v59, %v2467_v52  ;;  %v2468_v34 = vadd.f32 %v9551_v26, %v9550_v58  ;;  %v9561_v7 = vld [vmem:[#allocation65_spill] sm:$0xff]  ;;  %v9564_v58 = vld [vmem:[#allocation66_spill] sm:$0xff] }
 0x218   : > { %v8958_v18 = vld [vmem:[#allocation4 + $0x12] sm:$0xff]  ;;  %3905 = vst [vmem:[#allocation4 + $0x21] sm:$0xff] %v8948_v49  ;;  %6106 = vst [vmem:[%s8392_s24 + $0xa9] sm:$0xff] %v3705_v20  ;;  %v3818_v15 = vmax.f32 %v3705_v20, %v3707_v4  ;;  %v3708_v11 = vmax.f32 %v3676_v13, 0.0  ;;  %v3674_v17 = vadd.f32 %v8838_v27, %v3571_v44  ;;  %v3576_v50 = vadd.f32 %v7092_v36, %v3206_v40  ;;  %v9553_v44 = vld [vmem:[#allocation35_spill] sm:$0xff] }
 0x219   : > { %v3463_v43 = vpop.f32.mrf.mxu0  ;;  %v3920_v54 = vpack.c.bf16 %v8956_v51, %v9546_v6  ;;  %v4235_v16 = vpack.c.bf16 %v8958_v18, %v4227_v23  ;;  %v2841_v40 = vadd.f32 %v9552_v31, %v2470_v1  ;;  %v9554_v23 = vld [vmem:[#allocation36_spill] sm:$0xff]  ;;  %v3208_v60 = vadd.f32 %v8895_v24, %v2838_v53 }
 0x21a   : > { %3834 = vst [vmem:[#allocation3 + $0x30] sm:$0xff] %v3818_v15  ;;  %6109 = vst [vmem:[%s8392_s24 + $0xc9] sm:$0xff] %v3708_v11  ;;  %v3706_v35 = vmax.f32 %v3674_v17, 0.0  ;;  %v3679_v0 = vadd.f32 %v8838_v27, %v3576_v50  ;;  %v3574_v25 = vadd.f32 %v3463_v43, %v3204_v28  ;;  %v2473_v45 = vadd.f32 %v9554_v23, %v9553_v44  ;;  %v9556_v50 = vld [vmem:[#allocation37_spill] sm:$0xff] }
 0x21b   : > { %7122 = vmatprep.mubr.bf16.mxu1 %v3920_v54  ;;  %7170 = vmatprep.mubr.bf16.mxu0 %v4235_v16  ;;  %v7093_v37 = vpop.f32.mrf.mxu0  ;;  %v2839_v30 = vadd.f32 %v9555_v2, %v2468_v34  ;;  %v2471_v24 = vadd.f32 %v9557_v42, %v9556_v50  ;;  %v3211_v43 = vadd.f32 %v8910_v3, %v2841_v40  ;;  %v9570_v42 = vld [vmem:[#allocation69_spill] sm:$0xff] }
 0x21c   : > { %6107 = vst [vmem:[%s8392_s24 + $0xb1] sm:$0xff] %v3706_v35  ;;  %v3819_v56 = vmax.f32 %v3706_v35, %v3708_v11  ;;  %v3711_v48 = vmax.f32 %v3679_v0, 0.0  ;;  %v3677_v4 = vadd.f32 %v8838_v27, %v3574_v25  ;;  %v3577_v19 = vadd.f32 %v7093_v37, %v3207_v22  ;;  %v9559_v22 = vld [vmem:[#allocation39_spill] sm:$0xff]  ;;  %v9560_v35 = vld [vmem:[#allocation40_spill] sm:$0xff] }
 0x21d   : > { %v3848_v8 = vld [vmem:[#allocation3 + $0x20] ss:$2 sm:$0xff]  ;;  %v3864_v5 = vld [vmem:[#allocation3 + $0x21] ss:$2 sm:$0xff]  ;;  %v3466_v32 = vpop.f32.mrf.mxu0  ;;  %v2844_v52 = vadd.f32 %v9558_v46, %v2473_v45  ;;  %v2474_v0 = vadd.f32 %v9560_v35, %v9559_v22  ;;  %v3209_v25 = vadd.f32 %v8925_v47, %v2839_v30  ;;  %v2842_v12 = vadd.f32 %v9561_v7, %v2471_v24 }
 0x21e   : > { %v8986_v21 = vmax.f32 %v3848_v8, %v3864_v5  ;;  %3835 = vst [vmem:[#allocation3 + $0x38] sm:$0xff] %v3819_v56  ;;  %6112 = vst [vmem:[%s8392_s24 + $0xf1] sm:$0xff] %v3711_v48  ;;  %v3709_v39 = vmax.f32 %v3677_v4, 0.0  ;;  %v3680_v20 = vadd.f32 %v8838_v27, %v3577_v19  ;;  %v3575_v13 = vadd.f32 %v3466_v32, %v3205_v55  ;;  %v7056_v55 = vpop.f32.mrf.mxu1  ;;  %v9562_v56 = vld [vmem:[#allocation41_spill] sm:$0xff]  ;;  %v9565_v32 = vld [vmem:[#allocation43_spill] sm:$0xff] }
 0x21f   : > { %v7096_v28 = vpop.f32.mrf.mxu0  ;;  %v8994_v63 = vld [vmem:[#allocation4 + $0x22] sm:$0xff]  ;;  %v3214_v19 = vadd.f32 %v8940_v33, %v2844_v52  ;;  %v2845_v26 = vadd.f32 %v9564_v58, %v2474_v0  ;;  %v9567_v33 = vld [vmem:[#allocation68_spill] sm:$0xff]  ;;  %v9571_v0 = vld [vmem:[#allocation49_spill] sm:$0xff] }
 0x220   : > { %3906 = vst [vmem:[#allocation4 + $0x31] sm:$0xff] %v8986_v21  ;;  %6110 = vst [vmem:[%s8392_s24 + $0xd9] sm:$0xff] %v3709_v39  ;;  %v3820_v36 = vmax.f32 %v3709_v39, %v3711_v48  ;;  %v3712_v15 = vmax.f32 %v3680_v20, 0.0  ;;  %v3678_v11 = vadd.f32 %v8838_v27, %v3575_v13  ;;  %v3580_v17 = vadd.f32 %v7096_v28, %v3210_v14  ;;  %v9563_v48 = vld [vmem:[#allocation42_spill] sm:$0xff]  ;;  %v9566_v39 = vld [vmem:[#allocation44_spill] sm:$0xff]  ;;  %v3141_v2 = vpop.f32.mrf.mxu1 }
 0x221   : > { %v3479_v10 = vpop.f32.mrf.mxu0  ;;  %v4733_v9 = vpack.c.bf16 %v8994_v63, %v8958_v18  ;;  %v2472_v4 = vadd.f32 %v9563_v48, %v9562_v56  ;;  %v2477_v20 = vadd.f32 %v9566_v39, %v9565_v32  ;;  %v3212_v13 = vadd.f32 %v8960_v62, %v2842_v12  ;;  %v9568_v62 = vld [vmem:[#allocation47_spill] sm:$0xff]  ;;  %v7486_v18 = vld [vmem:[%s9437_s3 + $0x150] sm:$0xff]  }
 0x222   : > { %3836 = vst [vmem:[#allocation3 + $0x40] sm:$0xff] %v3820_v36  ;;  %6113 = vst [vmem:[%s8392_s24 + $0xf9] sm:$0xff] %v3712_v15  ;;  %v3710_v6 = vmax.f32 %v3678_v11, 0.0  ;;  %v3683_v54 = vadd.f32 %v8838_v27, %v3580_v17  ;;  %v3578_v16 = vadd.f32 %v3479_v10, %v3208_v60  ;;  %v9034_v11 = vld [vmem:[#allocation4 + $0x20] sm:$0xff]  ;;  %v9569_v17 = vld [vmem:[#allocation48_spill] sm:$0xff] }
 0x223   : > { %v7097_v1 = vpop.f32.mrf.mxu0  ;;  %v2843_v44 = vadd.f32 %v9567_v33, %v2472_v4  ;;  %v2475_v50 = vadd.f32 %v9569_v17, %v9568_v62  ;;  %v2848_v24 = vadd.f32 %v9570_v42, %v2477_v20  ;;  %v9574_v4 = vld [vmem:[#allocation45_spill] sm:$0xff]  ;;  %v9576_v58 = vld [vmem:[#allocation51_spill] sm:$0xff] }
 0x224   : > { %6111 = vst [vmem:[%s8392_s24 + $0xe1] sm:$0xff] %v3710_v6  ;;  %v3821_v59 = vmax.f32 %v3710_v6, %v3712_v15  ;;  %v3715_v53 = vmax.f32 %v3683_v54, 0.0  ;;  %v3681_v3 = vadd.f32 %v8838_v27, %v3578_v16  ;;  %v3581_v37 = vadd.f32 %v7097_v1, %v3211_v43  ;;  %v7446_v43 = vld [vmem:[%s9437_s3 + $0x70] sm:$0xff]   ;;  %v9573_v1 = vld [vmem:[#allocation70_spill] sm:$0xff]  ;;  %v7449_v32 = vld [vmem:[%s9437_s3 + $0x128] sm:$0xff]  }
 0x225   : > { %v3850_v34 = vld [vmem:[#allocation3 + $0x30] ss:$2 sm:$0xff]  ;;  %v3866_v47 = vld [vmem:[#allocation3 + $0x31] ss:$2 sm:$0xff]  ;;  %v3482_v14 = vpop.f32.mrf.mxu0  ;;  %v3215_v54 = vadd.f32 %v8978_v57, %v2845_v26  ;;  %v3213_v12 = vadd.f32 %v8996_v61, %v2843_v44  ;;  %v7448_v61 = vld [vmem:[%s9437_s3 + $0x68] sm:$0xff]  }
 0x226   : > { %v9019_v31 = vmax.f32 %v3850_v34, %v3866_v47  ;;  %3837 = vst [vmem:[#allocation3 + $0x48] sm:$0xff] %v3821_v59  ;;  %6116 = vst [vmem:[%s8392_s24 + $0x121] sm:$0xff] %v3715_v53  ;;  %v3713_v40 = vmax.f32 %v3681_v3, 0.0  ;;  %v3684_v8 = vadd.f32 %v8838_v27, %v3581_v37  ;;  %v3579_v5 = vadd.f32 %v3482_v14, %v3209_v25  ;;  %v7447_v6 = vld [vmem:[%s9437_s3 + $0x130] sm:$0xff]   ;;  %v9572_v25 = vld [vmem:[#allocation50_spill] sm:$0xff]  ;;  %v7057_v3 = vpop.f32.mrf.mxu1 }
 0x227   : > { %v7100_v23 = vpop.f32.mrf.mxu0  ;;  %v9027_v45 = vld [vmem:[#allocation4 + $0x30] sm:$0xff]  ;;  %v2478_v7 = vadd.f32 %v9572_v25, %v9571_v0  ;;  %v2846_v59 = vadd.f32 %v9573_v1, %v2475_v50  ;;  %v3218_v47 = vadd.f32 %v7056_v55, %v2848_v24  ;;  %v7452_v25 = vld [vmem:[%s9437_s3 + $0x58] sm:$0xff]  }
 0x228   : > { %v9029_v60 = vld [vmem:[#allocation4 + $0x32] sm:$0xff]  ;;  %3907 = vst [vmem:[#allocation4 + $0x41] sm:$0xff] %v9019_v31  ;;  %6114 = vst [vmem:[%s8392_s24 + $0x109] sm:$0xff] %v3713_v40  ;;  %v3822_v30 = vmax.f32 %v3713_v40, %v3715_v53  ;;  %v3716_v28 = vmax.f32 %v3684_v8, 0.0  ;;  %v3682_v36 = vadd.f32 %v8838_v27, %v3579_v5  ;;  %v3584_v15 = vadd.f32 %v7100_v23, %v3214_v19  ;;  %v9575_v19 = vld [vmem:[#allocation46_spill] sm:$0xff] }
 0x229   : > { %v3495_v46 = vpop.f32.mrf.mxu0  ;;  %v9041_v52 = vpack.c.bf16 %v9027_v45, %v9034_v11  ;;  %v9045_v10 = vpack.c.bf16 %v9029_v60, %v8994_v63  ;;  %v9577_v26 = vld [vmem:[#allocation52_spill] sm:$0xff]  ;;  %v2849_v14 = vadd.f32 %v8822_v41, %v2478_v7  ;;  %v3216_v33 = vadd.f32 %v3141_v2, %v2846_v59  ;;  %v7451_v2 = vld [vmem:[%s9437_s3 + $0x120] sm:$0xff]   ;;  %v7453_v59 = vld [vmem:[%s9437_s3 + $0x118] sm:$0xff]  }
 0x22a   : > { %3838 = vst [vmem:[#allocation3 + $0x50] sm:$0xff] %v3822_v30  ;;  %6117 = vst [vmem:[%s8392_s24 + $0x129] sm:$0xff] %v3716_v28  ;;  %v3714_v16 = vmax.f32 %v3682_v36, 0.0  ;;  %v3687_v22 = vadd.f32 %v8838_v27, %v3584_v15  ;;  %v3582_v35 = vadd.f32 %v3495_v46, %v3212_v13  ;;  %v2476_v34 = vadd.f32 %v9577_v26, %v9576_v58  ;;  %v3144_v30 = vpop.f32.mrf.mxu1  ;;  %v7487_v63 = vld [vmem:[%s9437_s3 + $0x210] sm:$0xff]  }
 0x22b   : > { %7123 = vmatmul.mubr.bf16.vlgmr.msra.gmra.mxu1 %v9041_v52  ;;  %7171 = vmatmul.mubr.bf16.vlgmr.msra.gmra.mxu0 %v9045_v10  ;;  %v7101_v53 = vpop.f32.mrf.mxu0  ;;  %v3219_v42 = vadd.f32 %v7057_v3, %v2849_v14 }
 0x22c   : > { %6115 = vst [vmem:[%s8392_s24 + $0x111] sm:$0xff] %v3714_v16  ;;  %v3823_v57 = vmax.f32 %v3714_v16, %v3716_v28  ;;  %v3719_v37 = vmax.f32 %v3687_v22, 0.0  ;;  %v3685_v56 = vadd.f32 %v8838_v27, %v3582_v35  ;;  %v3585_v48 = vadd.f32 %v7101_v53, %v3215_v54  ;;  %7131 = vmatpush3.bf16.msra.mxu1 %v9574_v4 }
 0x22d   : > { %7203 = vmatpush3.bf16.msra.mxu0 %v9575_v19  ;;  %v3852_v40 = vld [vmem:[#allocation3 + $0x40] ss:$2 sm:$0xff]  ;;  %v3868_v8 = vld [vmem:[#allocation3 + $0x41] ss:$2 sm:$0xff]  ;;  %v3498_v5 = vpop.f32.mrf.mxu0  ;;  %7132 = vmatprep.subr.bf16.mxu1 %v7446_v43  ;;  %v2847_v41 = vadd.f32 %v8828_v29, %v2476_v34 }
 0x22e   : > { %7204 = vmatprep.subr.bf16.mxu0 %v7447_v6  ;;  %v9075_v39 = vmax.f32 %v3852_v40, %v3868_v8  ;;  %3839 = vst [vmem:[#allocation3 + $0x58] sm:$0xff] %v3823_v57  ;;  %6120 = vst [vmem:[%s8392_s24 + $0x151] sm:$0xff] %v3719_v37  ;;  %v3717_v20 = vmax.f32 %v3685_v56, 0.0  ;;  %v3688_v13 = vadd.f32 %v8838_v27, %v3585_v48  ;;  %v7450_v29 = vld [vmem:[%s9437_s3 + $0x60] sm:$0xff]   ;;  %v7456_v8 = vld [vmem:[%s9437_s3 + $0x48] sm:$0xff]  }
 0x22f   : > { %v3583_v55 = vadd.f32 %v3498_v5, %v3213_v12  ;;  %v7104_v44 = vpop.f32.mrf.mxu0  ;;  %v9080_v23 = vld [vmem:[#allocation4 + $0x42] sm:$0xff] }
 0x230   : > { %3908 = vst [vmem:[#allocation4 + $0x51] sm:$0xff] %v9075_v39  ;;  %6118 = vst [vmem:[%s8392_s24 + $0x139] sm:$0xff] %v3717_v20  ;;  %v3824_v28 = vmax.f32 %v3717_v20, %v3719_v37  ;;  %v3720_v36 = vmax.f32 %v3688_v13, 0.0  ;;  %v3588_v62 = vadd.f32 %v7104_v44, %v3218_v47  ;;  %7133 = vmatpush3.bf16.msra.mxu1 %v7446_v43  ;;  %v9107_v56 = vld [vmem:[#allocation4 + $0x40] sm:$0xff]  ;;  %v7454_v47 = vld [vmem:[%s9437_s3 + $0x50] sm:$0xff]  }
 0x231   : > { %v3686_v15 = vadd.f32 %v8838_v27, %v3583_v55  ;;  %7205 = vmatpush3.bf16.msra.mxu0 %v7447_v6  ;;  %v3511_v17 = vpop.f32.mrf.mxu0  ;;  %7134 = vmatprep.subr.bf16.mxu1 %v7448_v61  ;;  %v4734_v50 = vpack.c.bf16 %v9080_v23, %v9029_v60  ;;  %v3217_v6 = vadd.f32 %v3144_v30, %v2847_v41  ;;  %v7457_v20 = vld [vmem:[%s9437_s3 + $0x108] sm:$0xff]   ;;  %v7458_v41 = vld [vmem:[%s9437_s3 + $0x40] sm:$0xff]   ;;  %v7460_v30 = vld [vmem:[%s9437_s3 + $0xf8] sm:$0xff]  }
 0x232   : > { %7206 = vmatprep.subr.bf16.mxu0 %v7449_v32  ;;  %3840 = vst [vmem:[#allocation3 + $0x60] sm:$0xff] %v3824_v28  ;;  %6121 = vst [vmem:[%s8392_s24 + $0x159] sm:$0xff] %v3720_v36  ;;  %v3691_v46 = vadd.f32 %v8838_v27, %v3588_v62  ;;  %v3586_v43 = vadd.f32 %v3511_v17, %v3216_v33  ;;  %v7459_v44 = vld [vmem:[%s9437_s3 + $0x100] sm:$0xff]  }
 0x233   : > { %v3718_v24 = vmax.f32 %v3686_v15, 0.0  ;;  %v7105_v54 = vpop.f32.mrf.mxu0  ;;  %v7461_v15 = vld [vmem:[%s9437_s3 + $0x1b8] sm:$0xff]   ;;  %v4061_v17 = vld [vmem:[#allocation4 + $0x1] sm:$0xff] }
 0x234   : > { %v3723_v22 = vmax.f32 %v3691_v46, 0.0  ;;  %v3689_v35 = vadd.f32 %v8838_v27, %v3586_v43  ;;  %v3589_v0 = vadd.f32 %v7105_v54, %v3219_v42  ;;  %7135 = vmatpush3.bf16.msra.mxu1 %v7448_v61  ;;  %v4069_v43 = vpack.c.bf16 %v8917_v38, %v4061_v17  ;;  %v5059_v17 = vld [vmem:[#allocation4 + $0x31] sm:$0xff] }
 0x235   : > { %6119 = vst [vmem:[%s8392_s24 + $0x141] sm:$0xff] %v3718_v24  ;;  %v3825_v16 = vmax.f32 %v3718_v24, %v3720_v36  ;;  %7207 = vmatpush3.bf16.msra.mxu0 %v7449_v32  ;;  %v3854_v7 = vld [vmem:[#allocation3 + $0x50] ss:$2 sm:$0xff]  ;;  %v3870_v12 = vld [vmem:[#allocation3 + $0x51] ss:$2 sm:$0xff]  ;;  %v3514_v1 = vpop.f32.mrf.mxu0  ;;  %7136 = vmatprep.subr.bf16.mxu1 %v7450_v29  ;;  %v4070_v54 = vpack.c.bf16 %v8986_v21, %v8948_v49 }
 0x236   : > { %7208 = vmatprep.subr.bf16.mxu0 %v7451_v2  ;;  %v9103_v53 = vmax.f32 %v3854_v7, %v3870_v12  ;;  %6124 = vst [vmem:[%s8392_s24 + $0x181] sm:$0xff] %v3723_v22  ;;  %v3721_v3 = vmax.f32 %v3689_v35, 0.0  ;;  %v3692_v57 = vadd.f32 %v8838_v27, %v3589_v0  ;;  %v3587_v37 = vadd.f32 %v3514_v1, %v3217_v6  ;;  %v7467_v7 = vld [vmem:[%s9437_s3 + $0x1a0] sm:$0xff]   ;;  %v7468_v1 = vld [vmem:[%s9437_s3 + $0xd8] sm:$0xff]  }
 0x237   : > { %3841 = vst [vmem:[#allocation3 + $0x68] sm:$0xff] %v3825_v16  ;;  %v9109_v48 = vld [vmem:[#allocation4 + $0x50] sm:$0xff]  ;;  %v4567_v6 = vpack.c.bf16 %v8948_v49, %v8917_v38  ;;  %v4568_v16 = vpack.c.bf16 %v9019_v31, %v8986_v21  ;;  %v4071_v35 = vpack.c.bf16 %v9075_v39, %v9019_v31  ;;  %v7464_v49 = vld [vmem:[%s9437_s3 + $0xe8] sm:$0xff]   ;;  %v4401_v12 = vpack.c.bf16 %v9034_v11, %v8956_v51 }
 0x238   : > { %v9111_v4 = vld [vmem:[#allocation4 + $0x52] sm:$0xff]  ;;  %3909 = vst [vmem:[#allocation4 + $0x61] sm:$0xff] %v9103_v53  ;;  %6122 = vst [vmem:[%s8392_s24 + $0x169] sm:$0xff] %v3721_v3  ;;  %v3826_v19 = vmax.f32 %v3721_v3, %v3723_v22  ;;  %v3724_v61 = vmax.f32 %v3692_v57, 0.0  ;;  %v3690_v58 = vadd.f32 %v8838_v27, %v3587_v37  ;;  %v9118_v26 = vpack.c.bf16 %v9109_v48, %v9107_v56  ;;  %v7465_v21 = vld [vmem:[%s9437_s3 + $0x1a8] sm:$0xff]  }
 0x239   : > { %7137 = vmatpush3.bf16.msra.mxu1 %v7450_v29  ;;  %7209 = vmatpush3.bf16.msra.mxu0 %v7451_v2  ;;  %v9122_v34 = vpack.c.bf16 %v9111_v4, %v9080_v23  ;;  %v7455_v27 = vld [vmem:[%s9437_s3 + $0x110] sm:$0xff]   ;;  %v4569_v0 = vpack.c.bf16 %v9103_v53, %v9075_v39  ;;  %v7474_v3 = vld [vmem:[%s9437_s3 + $0xc0] sm:$0xff]   ;;  %v7476_v37 = vld [vmem:[%s9437_s3 + $0x178] sm:$0xff]  }
 0x23a   : > { %7138 = vmatprep.subr.bf16.mxu1 %v7452_v25  ;;  %7210 = vmatprep.subr.bf16.mxu0 %v7453_v59  ;;  %3842 = vst [vmem:[#allocation3 + $0x70] sm:$0xff] %v3826_v19  ;;  %6125 = vst [vmem:[%s8392_s24 + $0x189] sm:$0xff] %v3724_v61  ;;  %v3722_v14 = vmax.f32 %v3690_v58, 0.0  ;;  %v7462_v22 = vld [vmem:[%s9437_s3 + $0xf0] sm:$0xff]   ;;  %v7475_v57 = vld [vmem:[%s9437_s3 + $0x180] sm:$0xff]  }
 0x23b   : > { %7126 = vmatprep.mubr.bf16.mxu1 %v9118_v26  ;;  %7174 = vmatprep.mubr.bf16.mxu0 %v9122_v34  ;;  %v7463_v38 = vld [vmem:[%s9437_s3 + $0x1b0] sm:$0xff]   ;;  %v7477_v19 = vld [vmem:[%s9437_s3 + $0x238] sm:$0xff]   ;;  %v5058_v23 = vld [vmem:[#allocation4 + $0x21] sm:$0xff] }
 0x23c   : > { %6123 = vst [vmem:[%s8392_s24 + $0x171] sm:$0xff] %v3722_v14  ;;  %v3827_v40 = vmax.f32 %v3722_v14, %v3724_v61  ;;  %v7470_v51 = vld [vmem:[%s9437_s3 + $0xd0] sm:$0xff]   ;;  %v4402_v61 = vpack.c.bf16 %v9107_v56, %v9027_v45  ;;  %v7480_v45 = vld [vmem:[%s9437_s3 + $0x168] sm:$0xff]   ;;  %v7508_v14 = vld [vmem:[%s8392_s24] sm:$0xff] }
 0x23d   : > { %7139 = vmatpush3.bf16.msra.mxu1 %v7452_v25  ;;  %7211 = vmatpush3.bf16.msra.mxu0 %v7453_v59  ;;  %v7466_v25 = vld [vmem:[%s9437_s3 + $0xe0] sm:$0xff]   ;;  %v7469_v59 = vld [vmem:[%s9437_s3 + $0x198] sm:$0xff]   ;;  %v7471_v11 = vld [vmem:[%s9437_s3 + $0x190] sm:$0xff]  }
 0x23e   : > { %v3856_v5 = vld [vmem:[#allocation3 + $0x60] ss:$2 sm:$0xff]  ;;  %v3872_v32 = vld [vmem:[#allocation3 + $0x61] ss:$2 sm:$0xff]  ;;  %7140 = vmatprep.subr.bf16.mxu1 %v7454_v47  ;;  %7212 = vmatprep.subr.bf16.mxu0 %v7455_v27  ;;  %3843 = vst [vmem:[#allocation3 + $0x78] sm:$0xff] %v3827_v40 }
 0x23f   : > { %v3881_v13 = vmax.f32 %v3856_v5, %v3872_v32  ;;  %v9140_v55 = vld [vmem:[#allocation4 + $0x62] sm:$0xff]  ;;  %v7484_v32 = vld [vmem:[%s9437_s3 + $0x158] sm:$0xff]  }
 0x240   : > { %v4735_v33 = vpack.c.bf16 %v9140_v55, %v9111_v4  ;;  %v9158_v29 = vld [vmem:[#allocation4 + $0x60] sm:$0xff] }
 0x241   : > { %3910 = vst [vmem:[#allocation4 + $0x71] sm:$0xff] %v3881_v13  ;;  %7141 = vmatpush3.bf16.msra.mxu1 %v7454_v47  ;;  %7213 = vmatpush3.bf16.msra.mxu0 %v7455_v27  ;;  %v9199_v31 = vpack.c.bf16 %v3881_v13, %v9103_v53  ;;  %v7473_v53 = vld [vmem:[%s9437_s3 + $0x188] sm:$0xff]   ;;  %v4403_v58 = vpack.c.bf16 %v9158_v29, %v9109_v48  ;;  %v7478_v47 = vld [vmem:[%s9437_s3 + $0x170] sm:$0xff]   ;;  %v7483_v5 = vld [vmem:[%s9437_s3 + $0x220] sm:$0xff]  }
 0x242   : > { %7142 = vmatprep.subr.bf16.mxu1 %v7456_v8  ;;  %7214 = vmatprep.subr.bf16.mxu0 %v7457_v20  ;;  %v7479_v27 = vld [vmem:[%s9437_s3 + $0x230] sm:$0xff]   ;;  %v7481_v48 = vld [vmem:[%s9437_s3 + $0x228] sm:$0xff]   ;;  %v7495_v4 = vld [vmem:[%s9437_s3 + $0x1e0] sm:$0xff]  }
 0x245   : > { %7143 = vmatpush3.bf16.msra.mxu1 %v7456_v8  ;;  %7215 = vmatpush3.bf16.msra.mxu0 %v7457_v20  ;;  %v3858_v28 = vld [vmem:[#allocation3 + $0x70] ss:$2 sm:$0xff]  ;;  %v3874_v36 = vld [vmem:[#allocation3 + $0x71] ss:$2 sm:$0xff]  ;;  %v7482_v8 = vld [vmem:[%s9437_s3 + $0x160] sm:$0xff]  }
 0x246   : > { %7144 = vmatprep.subr.bf16.mxu1 %v7458_v41  ;;  %7216 = vmatprep.subr.bf16.mxu0 %v7459_v44  ;;  %v9156_v62 = vmax.f32 %v3858_v28, %v3874_v36  ;;  %v7485_v20 = vld [vmem:[%s9437_s3 + $0x218] sm:$0xff]   ;;  %v7494_v36 = vld [vmem:[%s9437_s3 + $0x1e8] sm:$0xff]  }
 0x248   : > { %v9160_v2 = vld [vmem:[#allocation4 + $0x70] sm:$0xff]  ;;  %3911 = vst [vmem:[#allocation4 + $0x81] sm:$0xff] %v9156_v62  ;;  %v4570_v39 = vpack.c.bf16 %v9156_v62, %v3881_v13  ;;  %v7490_v13 = vld [vmem:[%s9437_s3 + $0x140] sm:$0xff]  }
 0x249   : > { %v9162_v42 = vld [vmem:[#allocation4 + $0x72] sm:$0xff]  ;;  %v9167_v24 = vpack.c.bf16 %v9160_v2, %v9158_v29  ;;  %7145 = vmatpush3.bf16.msra.mxu1 %v7458_v41  ;;  %7217 = vmatpush3.bf16.msra.mxu0 %v7459_v44  ;;  %v7491_v41 = vld [vmem:[%s9437_s3 + $0x200] sm:$0xff]   ;;  %v7498_v29 = vld [vmem:[%s9437_s3 + $0x1c8] sm:$0xff]  }
 0x24a   : > { %v9171_v46 = vpack.c.bf16 %v9162_v42, %v9140_v55  ;;  %7178 = vmatprep.subr.bf16.mxu1 %v7460_v30  ;;  %7250 = vmatprep.subr.bf16.mxu0 %v7461_v15  ;;  %v7492_v44 = vld [vmem:[%s9437_s3 + $0x1f8] sm:$0xff]  }
 0x24b   : > { %7127 = vmatmul.mubr.bf16.gmra.mxu1 %v9167_v24  ;;  %v7496_v55 = vld [vmem:[%s9437_s3 + $0x1d8] sm:$0xff]  }
 0x24c   : > { %7175 = vmatmul.mubr.bf16.gmra.mxu0 %v9171_v46  ;;  %7146 = vmatprep.mubr.bf16.mxu1 %v4069_v43  ;;  %v5065_v43 = vld [vmem:[#allocation4 + $0x91] sm:$0xff] }
 0x24d   : > { %7218 = vmatprep.mubr.bf16.mxu0 %v4567_v6  ;;  %v5069_v6 = vpack.c.bf16 %v5065_v43, %v9156_v62  ;;  %v7503_v62 = vld [vmem:[%s9439_s5 + $0x20] sm:$0xff]  }
 0x24f   : > { %v4400_v56 = vld [vmem:[#allocation4 + $0x80] sm:$0xff] }
 0x250   : > { %v4903_v40 = vpack.c.bf16 %v7508_v14, %v4400_v56  ;;  %v4732_v28 = vld [vmem:[#allocation4 + $0x82] sm:$0xff] }
 0x251   : > { %v4736_v60 = vpack.c.bf16 %v4732_v28, %v9162_v42  ;;  %v5061_v42 = vld [vmem:[#allocation4 + $0x51] sm:$0xff] }
 0x253   : > { %7147 = vmatmul.mubr.bf16.vlgmr.msra.gmra.mxu1 %v4070_v54  ;;  %v7500_v54 = vld [vmem:[%s9439_s5 + $0x38] sm:$0xff]  }
 0x254   : > { %7219 = vmatmul.mubr.bf16.vlgmr.msra.gmra.mxu0 %v4568_v16  ;;  %7179 = vmatpush3.bf16.msra.mxu1 %v7460_v30  ;;  %v7493_v30 = vld [vmem:[%s9437_s3 + $0x1f0] sm:$0xff]  }
 0x255   : > { %7251 = vmatpush3.bf16.msra.mxu0 %v7461_v15  ;;  %7150 = vmatprep.mubr.bf16.mxu1 %v4071_v35  ;;  %v5231_v15 = vld [vmem:[#allocation4 + $0x92] sm:$0xff] }
 0x256   : > { %7222 = vmatprep.mubr.bf16.mxu0 %v4569_v0  ;;  %7180 = vmatprep.subr.bf16.mxu1 %v7462_v22  ;;  %v7501_v16 = vld [vmem:[%s9439_s5 + $0x30] sm:$0xff]   ;;  %v7506_v0 = vld [vmem:[%s9439_s5 + $0x8] sm:$0xff]  }
 0x257   : > { %7252 = vmatprep.subr.bf16.mxu0 %v7463_v38  ;;  %v7505_v35 = vld [vmem:[%s9439_s5 + $0x10] sm:$0xff]  }
 0x258   : > { %7181 = vmatpush3.bf16.msra.mxu1 %v7462_v22  ;;  %v7502_v22 = vld [vmem:[%s9439_s5 + $0x28] sm:$0xff]  }
 0x259   : > { %7253 = vmatpush3.bf16.msra.mxu0 %v7463_v38  ;;  %7182 = vmatprep.subr.bf16.mxu1 %v7464_v49  ;;  %v7504_v38 = vld [vmem:[%s9439_s5 + $0x18] sm:$0xff]  }
 0x25a   : > { %7254 = vmatprep.subr.bf16.mxu0 %v7465_v21 }
 0x25b   : > { %7151 = vmatmul.mubr.bf16.gmra.mxu1 %v9199_v31 }
 0x25c   : > { %7223 = vmatmul.mubr.bf16.gmra.mxu0 %v4570_v39  ;;  %7183 = vmatpush3.bf16.msra.mxu1 %v7464_v49 }
 0x25d   : > { %7255 = vmatpush3.bf16.msra.mxu0 %v7465_v21  ;;  %7194 = vmatprep.mubr.bf16.mxu1 %v4401_v12 }
 0x25e   : > { %7266 = vmatprep.mubr.bf16.mxu0 %v9041_v52  ;;  %7184 = vmatprep.subr.bf16.mxu1 %v7466_v25  ;;  %v7472_v52 = vld [vmem:[%s9437_s3 + $0xc8] sm:$0xff]  }
 0x25f   : > { %7256 = vmatprep.subr.bf16.mxu0 %v7467_v7 }
 0x260   : > { %7185 = vmatpush3.bf16.msra.mxu1 %v7466_v25 }
 0x261   : > { %7257 = vmatpush3.bf16.msra.mxu0 %v7467_v7  ;;  %7186 = vmatprep.subr.bf16.mxu1 %v7468_v1 }
 0x262   : > { %7258 = vmatprep.subr.bf16.mxu0 %v7469_v59 }
 0x264   : > { %7187 = vmatpush3.bf16.msra.mxu1 %v7468_v1 }
 0x265   : > { %7259 = vmatpush3.bf16.msra.mxu0 %v7469_v59  ;;  %7188 = vmatprep.subr.bf16.mxu1 %v7470_v51 }
 0x266   : > { %7260 = vmatprep.subr.bf16.mxu0 %v7471_v11 }
 0x268   : > { %7189 = vmatpush3.bf16.msra.mxu1 %v7470_v51 }
 0x269   : > { %7261 = vmatpush3.bf16.msra.mxu0 %v7471_v11  ;;  %7190 = vmatprep.subr.bf16.mxu1 %v7472_v52 }
 0x26a   : > { %7262 = vmatprep.subr.bf16.mxu0 %v7473_v53 }
 0x26c   : > { %7191 = vmatpush3.bf16.msra.mxu1 %v7472_v52 }
 0x26d   : > { %7263 = vmatpush3.bf16.msra.mxu0 %v7473_v53  ;;  %7192 = vmatprep.subr.bf16.mxu1 %v7474_v3 }
 0x26e   : > { %7264 = vmatprep.subr.bf16.mxu0 %v7475_v57 }
 0x270   : > { %7193 = vmatpush3.bf16.msra.mxu1 %v7474_v3 }
 0x271   : > { %7265 = vmatpush3.bf16.msra.mxu0 %v7475_v57  ;;  %7226 = vmatprep.subr.bf16.mxu1 %v7476_v37 }
 0x272   : > { %7298 = vmatprep.subr.bf16.mxu0 %v7477_v19 }
 0x273   : > { %7195 = vmatmul.mubr.bf16.vlgmr.msra.gmra.mxu1 %v4402_v61 }
 0x274   : > { %7267 = vmatmul.mubr.bf16.vlgmr.msra.gmra.mxu0 %v9118_v26  ;;  %7198 = vmatprep.mubr.bf16.mxu1 %v4403_v58  ;;  %v4404_v26 = vpack.c.bf16 %v4400_v56, %v9160_v2  ;;  %v7499_v2 = vld [vmem:[%s9437_s3 + $0x1c0] sm:$0xff]  }
 0x275   : > { %7227 = vmatpush3.bf16.msra.mxu1 %v7476_v37  ;;  %7270 = vmatprep.mubr.bf16.mxu0 %v9167_v24  ;;  %v5060_v24 = vld [vmem:[#allocation4 + $0x41] sm:$0xff] }
 0x276   : > { %7299 = vmatpush3.bf16.msra.mxu0 %v7477_v19  ;;  %7228 = vmatprep.subr.bf16.mxu1 %v7478_v47 }
 0x277   : > { %7300 = vmatprep.subr.bf16.mxu0 %v7479_v27 }
 0x279   : > { %7229 = vmatpush3.bf16.msra.mxu1 %v7478_v47 }
 0x27a   : > { %7301 = vmatpush3.bf16.msra.mxu0 %v7479_v27  ;;  %7230 = vmatprep.subr.bf16.mxu1 %v7480_v45 }
 0x27b   : > { %7302 = vmatprep.subr.bf16.mxu0 %v7481_v48  ;;  %7199 = vmatmul.mubr.bf16.gmra.mxu1 %v4404_v26 }
 0x27c   : > { %7271 = vmatmul.mubr.bf16.gmra.mxu0 %v4903_v40  ;;  %7242 = vmatprep.mubr.bf16.mxu1 %v4733_v9  ;;  %v7488_v9 = vld [vmem:[%s9437_s3 + $0x148] sm:$0xff]  }
 0x27d   : > { %7231 = vmatpush3.bf16.msra.mxu1 %v7480_v45  ;;  %7314 = vmatprep.mubr.bf16.mxu0 %v9045_v10  ;;  %v7489_v10 = vld [vmem:[%s9437_s3 + $0x208] sm:$0xff]  }
 0x27e   : > { %7303 = vmatpush3.bf16.msra.mxu0 %v7481_v48  ;;  %7232 = vmatprep.subr.bf16.mxu1 %v7482_v8 }
 0x27f   : > { %7304 = vmatprep.subr.bf16.mxu0 %v7483_v5 }
 0x281   : > { %7233 = vmatpush3.bf16.msra.mxu1 %v7482_v8 }
 0x282   : > { %7305 = vmatpush3.bf16.msra.mxu0 %v7483_v5  ;;  %7234 = vmatprep.subr.bf16.mxu1 %v7484_v32 }
 0x283   : > { %7306 = vmatprep.subr.bf16.mxu0 %v7485_v20 }
 0x285   : > { %7235 = vmatpush3.bf16.msra.mxu1 %v7484_v32 }
 0x286   : > { %7307 = vmatpush3.bf16.msra.mxu0 %v7485_v20  ;;  %7236 = vmatprep.subr.bf16.mxu1 %v7486_v18 }
 0x287   : > { %7308 = vmatprep.subr.bf16.mxu0 %v7487_v63 }
 0x289   : > { %7237 = vmatpush3.bf16.msra.mxu1 %v7486_v18 }
 0x28a   : > { %7309 = vmatpush3.bf16.msra.mxu0 %v7487_v63  ;;  %7238 = vmatprep.subr.bf16.mxu1 %v7488_v9 }
 0x28b   : > { %7310 = vmatprep.subr.bf16.mxu0 %v7489_v10 }
 0x28d   : > { %7239 = vmatpush3.bf16.msra.mxu1 %v7488_v9 }
 0x28e   : > { %7311 = vmatpush3.bf16.msra.mxu0 %v7489_v10  ;;  %7240 = vmatprep.subr.bf16.mxu1 %v7490_v13 }
 0x28f   : > { %7312 = vmatprep.subr.bf16.mxu0 %v7491_v41 }
 0x291   : > { %7241 = vmatpush3.bf16.msra.mxu1 %v7490_v13 }
 0x292   : > { %7313 = vmatpush3.bf16.msra.mxu0 %v7491_v41  ;;  %7274 = vmatprep.subr.bf16.mxu1 %v7492_v44 }
 0x294   : > { %7243 = vmatmul.mubr.bf16.vlgmr.msra.gmra.mxu1 %v4734_v50  ;;  %v5235_v50 = vpack.c.bf16 %v5231_v15, %v4732_v28 }
 0x295   : > { %7315 = vmatmul.mubr.bf16.vlgmr.msra.gmra.mxu0 %v9122_v34  ;;  %7246 = vmatprep.mubr.bf16.mxu1 %v4735_v33  ;;  %v5066_v34 = vpack.c.bf16 %v5059_v17, %v5058_v23  ;;  %v7497_v33 = vld [vmem:[%s9437_s3 + $0x1d0] sm:$0xff]  }
 0x296   : > { %7275 = vmatpush3.bf16.msra.mxu1 %v7492_v44  ;;  %7318 = vmatprep.mubr.bf16.mxu0 %v9171_v46  ;;  %v5067_v46 = vpack.c.bf16 %v5061_v42, %v5060_v24 }
 0x297   : > { %7276 = vmatprep.subr.bf16.mxu1 %v7493_v30 }
 0x29a   : > { %7277 = vmatpush3.bf16.msra.mxu1 %v7493_v30 }
 0x29b   : > { %7278 = vmatprep.subr.bf16.mxu1 %v7494_v36 }
 0x29c   : > { %7247 = vmatmul.mubr.bf16.gmra.mxu1 %v4736_v60 }
 0x29d   : > { %7319 = vmatmul.mubr.bf16.gmra.mxu0 %v5235_v50  ;;  %7290 = vmatprep.mubr.bf16.mxu1 %v5066_v34 }
 0x29e   : > { %7279 = vmatpush3.bf16.msra.mxu1 %v7494_v36 }
 0x29f   : > { %7280 = vmatprep.subr.bf16.mxu1 %v7495_v4 }
 0x2a2   : > { %7281 = vmatpush3.bf16.msra.mxu1 %v7495_v4 }
 0x2a3   : > { %7282 = vmatprep.subr.bf16.mxu1 %v7496_v55 }
 0x2a6   : > { %7283 = vmatpush3.bf16.msra.mxu1 %v7496_v55 }
 0x2a7   : > { %7284 = vmatprep.subr.bf16.mxu1 %v7497_v33 }
 0x2aa   : > { %7285 = vmatpush3.bf16.msra.mxu1 %v7497_v33 }
 0x2ab   : > { %7286 = vmatprep.subr.bf16.mxu1 %v7498_v29 }
 0x2ae   : > { %7287 = vmatpush3.bf16.msra.mxu1 %v7498_v29 }
 0x2af   : > { %7288 = vmatprep.subr.bf16.mxu1 %v7499_v2 }
 0x2b2   : > { %7289 = vmatpush3.bf16.msra.mxu1 %v7499_v2 }
 0x2b3   : > { %7322 = vmatprep.subr.bf16.mxu1 %v7500_v54 }
 0x2b5   : > { %7291 = vmatmul.mubr.bf16.vlgmr.msra.gmra.mxu1 %v5067_v46 }
 0x2b6   : > { %7294 = vmatprep.mubr.bf16.mxu1 %v9199_v31  ;;  %7323 = vmatpush3.bf16.msra.mxu1 %v7500_v54  ;;  %v7507_v31 = vld [vmem:[%s9439_s5] sm:$0xff]  }
 0x2b7   : > { %7324 = vmatprep.subr.bf16.mxu1 %v7501_v16 }
 0x2ba   : > { %7325 = vmatpush3.bf16.msra.mxu1 %v7501_v16 }
 0x2bb   : > { %7326 = vmatprep.subr.bf16.mxu1 %v7502_v22 }
 0x2bd   : > { %7295 = vmatmul.mubr.bf16.gmra.mxu1 %v5069_v6 }
 0x2be   : > { %7327 = vmatpush3.bf16.msra.mxu1 %v7502_v22 }
 0x2bf   : > { %7328 = vmatprep.subr.bf16.mxu1 %v7503_v62 }
 0x2c2   : > { %7329 = vmatpush3.bf16.msra.mxu1 %v7503_v62 }
 0x2c3   : > { %7330 = vmatprep.subr.bf16.mxu1 %v7504_v38 }
 0x2c6   : > { %7331 = vmatpush3.bf16.msra.mxu1 %v7504_v38 }
 0x2c7   : > { %7332 = vmatprep.subr.bf16.mxu1 %v7505_v35 }
 0x2ca   : > { %7333 = vmatpush3.bf16.msra.mxu1 %v7505_v35 }
 0x2cb   : > { %7334 = vmatprep.subr.bf16.mxu1 %v7506_v0 }
 0x2ce   : > { %7335 = vmatpush3.bf16.msra.mxu1 %v7506_v0 }
 0x2cf   : > { %7336 = vmatprep.subr.bf16.mxu1 %v7507_v31 }
 0x2d2   : > { %7337 = vmatpush3.bf16.msra.mxu1 %v7507_v31 }
 0x2eb   : > { %v7124_v49 = vpop.f32.mrf.mxu1  ;;  %v7172_v12 = vpop.f32.mrf.mxu0 }
 0x2ed   : > { %v4022_v21 = vpop.f32.mrf.mxu1  ;;  %v4338_v59 = vpop.f32.mrf.mxu0 }
 0x2ef   : > { %v7125_v39 = vpop.f32.mrf.mxu1  ;;  %v7173_v11 = vpop.f32.mrf.mxu0 }
 0x2f1   : > { %v4025_v25 = vpop.f32.mrf.mxu1  ;;  %v4341_v53 = vpop.f32.mrf.mxu0 }
 0x30b   : > { %v7128_v7 = vpop.f32.mrf.mxu1 }
 0x30c   : > { %v7176_v57 = vpop.f32.mrf.mxu0 }
 0x30d   : > { %v4038_v1 = vpop.f32.mrf.mxu1 }
 0x30e   : > { %v9359_v19 = vpop.f32.mrf.mxu0 }
 0x30f   : > { %v9355_v51 = vpop.f32.mrf.mxu1 }
 0x310   : > { %v9361_v58 = vpop.f32.mrf.mxu0 }
 0x311   : > { %v9357_v52 = vpop.f32.mrf.mxu1 }
 0x312   : > { %v9363_v27 = vpop.f32.mrf.mxu0 }
 0x313   : > { %v7148_v3 = vpop.f32.mrf.mxu1 }
 0x314   : > { %v7220_v56 = vpop.f32.mrf.mxu0  ;;  %v4213_v42 = vadd.f32 %v7148_v3, %v7124_v49 }
 0x315   : > { %v4172_v37 = vpop.f32.mrf.mxu1 }
 0x316   : > { %v4670_v26 = vpop.f32.mrf.mxu0  ;;  %v4211_v24 = vadd.f32 %v4172_v37, %v4022_v21  ;;  %v4379_v54 = vadd.f32 %v7172_v12, %v4213_v42 }
 0x317   : > { %v7149_v61 = vpop.f32.mrf.mxu1 }
 0x318   : > { %v7221_v40 = vpop.f32.mrf.mxu0  ;;  %v4214_v6 = vadd.f32 %v7149_v61, %v7125_v39  ;;  %v4377_v38 = vadd.f32 %v4338_v59, %v4211_v24 }
 0x319   : > { %v4175_v47 = vpop.f32.mrf.mxu1 }
 0x31a   : > { %v4673_v5 = vpop.f32.mrf.mxu0  ;;  %v4212_v22 = vadd.f32 %v4175_v47, %v4025_v25 }
 0x31b   : > { %v7152_v45 = vpop.f32.mrf.mxu1 }
 0x31c   : > { %v7224_v20 = vpop.f32.mrf.mxu0  ;;  %v4217_v35 = vadd.f32 %v7152_v45, %v7128_v7 }
 0x31d   : > { %v4188_v48 = vpop.f32.mrf.mxu1 }
 0x31e   : > { %v9365_v63 = vpop.f32.mrf.mxu0  ;;  %v4383_v49 = vadd.f32 %v7176_v57, %v4217_v35 }
 0x31f   : > { %v7153_v14 = vpop.f32.mrf.mxu1 }
 0x320   : > { %v9367_v10 = vpop.f32.mrf.mxu0  ;;  %v4218_v39 = vadd.f32 %v7153_v14, %v9355_v51 }
 0x321   : > { %v4191_v8 = vpop.f32.mrf.mxu1  ;;  %9578 = vst [vmem:[#allocation6_spill] sm:$0xff] %v9367_v10 }
 0x322   : > { %v9369_v41 = vpop.f32.mrf.mxu0  ;;  %v4216_v25 = vadd.f32 %v4191_v8, %v9357_v52 }
 0x323   : > { %9579 = vst [vmem:[#allocation7_spill] sm:$0xff] %v9369_v41 }
 0x333   : > { %v7196_v32 = vpop.f32.mrf.mxu1 }
 0x334   : > { %v7268_v30 = vpop.f32.mrf.mxu0  ;;  %v4545_v62 = vadd.f32 %v7196_v32, %v4379_v54 }
 0x335   : > { %v4504_v18 = vpop.f32.mrf.mxu1 }
 0x336   : > { %v5003_v36 = vpop.f32.mrf.mxu0  ;;  %v4543_v31 = vadd.f32 %v4504_v18, %v4377_v38 }
 0x337   : > { %v7197_v9 = vpop.f32.mrf.mxu1 }
 0x338   : > { %v9371_v17 = vpop.f32.mrf.mxu0 }
 0x339   : > { %v4507_v13 = vpop.f32.mrf.mxu1 }
 0x33a   : > { %v9373_v23 = vpop.f32.mrf.mxu0 }
 0x33b   : > { %v7200_v44 = vpop.f32.mrf.mxu1  ;;  %9580 = vst [vmem:[#allocation10_spill] sm:$0xff] %v9373_v23  ;;  %v4711_v23 = vadd.f32 %v7220_v56, %v4545_v62  ;;  %v4384_v56 = vadd.f32 %v9361_v58, %v4218_v39 }
 0x33c   : > { %v9375_v34 = vpop.f32.mrf.mxu0  ;;  %v4549_v12 = vadd.f32 %v7200_v44, %v4383_v49 }
 0x33d   : > { %v4520_v28 = vpop.f32.mrf.mxu1  ;;  %9581 = vst [vmem:[#allocation11_spill] sm:$0xff] %v9375_v34  ;;  %v4380_v34 = vadd.f32 %v7173_v11, %v4214_v6 }
 0x33e   : > { %v9377_v55 = vpop.f32.mrf.mxu0  ;;  %v4715_v51 = vadd.f32 %v7224_v20, %v4549_v12 }
 0x33f   : > { %v7201_v15 = vpop.f32.mrf.mxu1  ;;  %9582 = vst [vmem:[#allocation12_spill] sm:$0xff] %v9377_v55  ;;  %v4215_v55 = vadd.f32 %v4188_v48, %v4038_v1  ;;  %v4546_v10 = vadd.f32 %v7197_v9, %v4380_v34  ;;  %v4382_v48 = vadd.f32 %v9363_v27, %v4216_v25  ;;  %v9587_v34 = vld [vmem:[#allocation7_spill] sm:$0xff] }
 0x340   : > { %v9379_v29 = vpop.f32.mrf.mxu0 }
 0x341   : > { %v4523_v60 = vpop.f32.mrf.mxu1  ;;  %9583 = vst [vmem:[#allocation13_spill] sm:$0xff] %v9379_v29  ;;  %v4378_v29 = vadd.f32 %v4341_v53, %v4212_v22  ;;  %v4381_v7 = vadd.f32 %v9359_v19, %v4215_v55  ;;  %v4712_v11 = vadd.f32 %v7221_v40, %v4546_v10  ;;  %v4550_v19 = vadd.f32 %v7201_v15, %v4384_v56 }
 0x342   : > { %v9381_v46 = vpop.f32.mrf.mxu0  ;;  %v4548_v18 = vadd.f32 %v4523_v60, %v4382_v48  ;;  %v9585_v60 = vld [vmem:[#allocation10_spill] sm:$0xff] }
 0x343   : > { %9584 = vst [vmem:[#allocation8_spill] sm:$0xff] %v9381_v46  ;;  %v4544_v3 = vadd.f32 %v4507_v13, %v4378_v29  ;;  %v4709_v46 = vadd.f32 %v4670_v26, %v4543_v31  ;;  %v4547_v1 = vadd.f32 %v4520_v28, %v4381_v7 }
 0x344   : > { %v9588_v55 = vld [vmem:[#allocation11_spill] sm:$0xff] }
 0x345   : > { %v4710_v53 = vadd.f32 %v4673_v5, %v4544_v3  ;;  %v4713_v40 = vadd.f32 %v9365_v63, %v4547_v1  ;;  %v9392_v5 = vld [vmem:[%s9438_s4] ss:$0 sm:$0xff] }
 0x346   : > { %v9589_v54 = vld [vmem:[#allocation12_spill] sm:$0xff] }
 0x348   : > { %v9590_v39 = vld [vmem:[#allocation13_spill] sm:$0xff] }
 0x354   : > { %v7244_v50 = vpop.f32.mrf.mxu1 }
 0x355   : > { %v7316_v16 = vpop.f32.mrf.mxu0  ;;  %v4877_v37 = vadd.f32 %v7244_v50, %v4711_v23  ;;  %v9586_v23 = vld [vmem:[#allocation6_spill] sm:$0xff] }
 0x356   : > { %v4836_v4 = vpop.f32.mrf.mxu1  ;;  %v4716_v50 = vadd.f32 %v9586_v23, %v4550_v19 }
 0x357   : > { %v5335_v41 = vpop.f32.mrf.mxu0  ;;  %v4875_v61 = vadd.f32 %v4836_v4, %v4709_v46  ;;  %v5044_v57 = vadd.f32 %v7268_v30, %v4877_v37  ;;  %v4714_v4 = vadd.f32 %v9587_v34, %v4548_v18 }
 0x358   : > { %v7245_v33 = vpop.f32.mrf.mxu1 }
 0x359   : > { %v7317_v59 = vpop.f32.mrf.mxu0  ;;  %v4878_v45 = vadd.f32 %v7245_v33, %v4712_v11  ;;  %v5042_v32 = vadd.f32 %v5003_v36, %v4875_v61  ;;  %v9591_v11 = vld [vmem:[#allocation8_spill] sm:$0xff] }
 0x35a   : > { %v4839_v2 = vpop.f32.mrf.mxu1 }
 0x35b   : > { %v5338_v26 = vpop.f32.mrf.mxu0  ;;  %v4876_v52 = vadd.f32 %v4839_v2, %v4710_v53  ;;  %v5045_v20 = vadd.f32 %v9371_v17, %v4878_v45 }
 0x35c   : > { %v7248_v43 = vpop.f32.mrf.mxu1 }
 0x35d   : > { %v4881_v9 = vadd.f32 %v7248_v43, %v4715_v51  ;;  %v7320_v13 = vpop.f32.mrf.mxu0  ;;  %v5043_v63 = vadd.f32 %v9585_v60, %v4876_v52 }
 0x35e   : > { %v4852_v0 = vpop.f32.mrf.mxu1 }
 0x35f   : > { %v4879_v44 = vadd.f32 %v4852_v0, %v4713_v40  ;;  %v5048_v33 = vadd.f32 %v9588_v55, %v4881_v9  ;;  %v5351_v24 = vpop.f32.mrf.mxu0 }
 0x360   : > { %v7249_v21 = vpop.f32.mrf.mxu1 }
 0x361   : > { %v4882_v46 = vadd.f32 %v7249_v21, %v4716_v50  ;;  %v7321_v21 = vpop.f32.mrf.mxu0 }
 0x362   : > { %v4855_v47 = vpop.f32.mrf.mxu1 }
 0x363   : > { %v4880_v43 = vadd.f32 %v4855_v47, %v4714_v4  ;;  %v5049_v25 = vadd.f32 %v9590_v39, %v4882_v46 }
 0x365   : > { %v5047_v1 = vadd.f32 %v9591_v11, %v4880_v43 }
 0x375   : > { %v7292_v14 = vpop.f32.mrf.mxu1 }
 0x376   : > { %v5210_v8 = vadd.f32 %v7292_v14, %v5044_v57 }
 0x377   : > { %v5169_v10 = vpop.f32.mrf.mxu1 }
 0x378   : > { %v5376_v58 = vadd.f32 %v7316_v16, %v5210_v8  ;;  %v5208_v27 = vadd.f32 %v5169_v10, %v5042_v32  ;;  %v5046_v16 = vadd.f32 %v9589_v54, %v4879_v44 }
 0x379   : > { %v7293_v30 = vpop.f32.mrf.mxu1 }
 0x37a   : > { %v5407_v28 = vadd.f32 %v9392_v5, %v5376_v58  ;;  %v5374_v36 = vadd.f32 %v5335_v41, %v5208_v27  ;;  %v5211_v15 = vadd.f32 %v7293_v30, %v5045_v20 }
 0x37b   : > { %v5172_v17 = vpop.f32.mrf.mxu1 }
 0x37c   : > { %v5415_v29 = vmax.f32 %v5407_v28, 0.0  ;;  %v5405_v41 = vadd.f32 %v9392_v5, %v5374_v36  ;;  %v5377_v2 = vadd.f32 %v7317_v59, %v5211_v15  ;;  %v5209_v42 = vadd.f32 %v5172_v17, %v5043_v63 }
 0x37d   : > { %v7296_v6 = vpop.f32.mrf.mxu1 }
 0x37e   : > { %5423 = vst [vmem:[%s9403_s27 + $0x10] sm:$0xff] %v5415_v29  ;;  %v5413_v22 = vmax.f32 %v5405_v41, 0.0  ;;  %v5408_v62 = vadd.f32 %v9392_v5, %v5377_v2  ;;  %v5375_v38 = vadd.f32 %v5338_v26, %v5209_v42  ;;  %v5214_v35 = vadd.f32 %v7296_v6, %v5048_v33  ;;  %v5354_v26 = vpop.f32.mrf.mxu0  ;;  %v5576_v2 = vld [vmem:[%s9440_s6] sm:$0x1] }
 0x37f   : > { %v5185_v0 = vpop.f32.mrf.mxu1 }
 0x380   : > { %5421 = vst [vmem:[%s9403_s27] sm:$0xff] %v5413_v22  ;;  %v5416_v31 = vmax.f32 %v5408_v62, 0.0  ;;  %v5406_v49 = vadd.f32 %v9392_v5, %v5375_v38  ;;  %v5380_v3 = vadd.f32 %v7320_v13, %v5214_v35  ;;  %v5212_v37 = vadd.f32 %v5185_v0, %v5046_v16 }
 0x381   : > { %v7297_v12 = vpop.f32.mrf.mxu1 }
 0x382   : > { %5424 = vst [vmem:[%s9403_s27 + $0x18] sm:$0xff] %v5416_v31  ;;  %v5414_v7 = vmax.f32 %v5406_v49, 0.0  ;;  %v5411_v59 = vadd.f32 %v9392_v5, %v5380_v3  ;;  %v5378_v61 = vadd.f32 %v5351_v24, %v5212_v37  ;;  %v5215_v47 = vadd.f32 %v7297_v12, %v5049_v25 }
 0x383   : > { %v5188_v45 = vpop.f32.mrf.mxu1  ;;  %v5430_v51 = vpack.c.bf16 %v5416_v31, %v5415_v29 }
 0x384   : > { %5422 = vst [vmem:[%s9403_s27 + $0x8] sm:$0xff] %v5414_v7  ;;  %v5419_v53 = vmax.f32 %v5411_v59, 0.0  ;;  %v5409_v57 = vadd.f32 %v9392_v5, %v5378_v61  ;;  %v5213_v56 = vadd.f32 %v5188_v45, %v5047_v1  ;;  %v5429_v48 = vpack.c.bf16 %v5414_v7, %v5413_v22 }
 0x385   : > { %v5381_v14 = vadd.f32 %v7321_v21, %v5215_v47 }
 0x386   : > { %5427 = vst [vmem:[%s9403_s27 + $0x30] sm:$0xff] %v5419_v53  ;;  %v5417_v52 = vmax.f32 %v5409_v57, 0.0  ;;  %v5379_v8 = vadd.f32 %v5354_v26, %v5213_v56  ;;  %7338 = vmatprep.mubr.bf16.mxu1 %v5429_v48 }
 0x387   : > { %v5412_v32 = vadd.f32 %v9392_v5, %v5381_v14  ;;  %7339 = vmatmul.mubr.bf16.vlgmr.msra.gmra.mxu1 %v5430_v51 }
 0x388   : > { %5425 = vst [vmem:[%s9403_s27 + $0x20] sm:$0xff] %v5417_v52  ;;  %v5410_v19 = vadd.f32 %v9392_v5, %v5379_v8 }
 0x389   : > { %v5420_v18 = vmax.f32 %v5412_v32, 0.0 }
 0x38a   : > { %v5418_v9 = vmax.f32 %v5410_v19, 0.0 }
 0x38b   : > { %5428 = vst [vmem:[%s9403_s27 + $0x38] sm:$0xff] %v5420_v18  ;;  %v5432_v10 = vpack.c.bf16 %v5420_v18, %v5419_v53 }
 0x38c   : > { %5426 = vst [vmem:[%s9403_s27 + $0x28] sm:$0xff] %v5418_v9  ;;  %v5431_v40 = vpack.c.bf16 %v5418_v9, %v5417_v52 }
 0x38e   : > { %7342 = vmatprep.mubr.bf16.mxu1 %v5431_v40 }
 0x38f   : > { %7343 = vmatmul.mubr.bf16.gmra.mxu1 %v5432_v10 }
 0x447   : > { %v7340_v58 = vpop.f32.mrf.mxu1 }
 0x449   : > { %v5531_v27 = vpop.f32.mrf.mxu1 }
 0x44b   : > { %v7341_v20 = vpop.f32.mrf.mxu1 }
 0x44d   : > { %v5534_v13 = vpop.f32.mrf.mxu1 }
 0x44e   : > { %v5562_v44 = vadd.f32 %v5534_v13, %v5531_v27 }
 0x44f   : > { %v7344_v30 = vpop.f32.mrf.mxu1 }
 0x450   : > { %v5563_v28 = vadd.f32 %v7340_v58, %v5562_v44 }
 0x451   : > { %v5547_v36 = vpop.f32.mrf.mxu1 }
 0x452   : > { %v5564_v15 = vadd.f32 %v7341_v20, %v5563_v28 }
 0x453   : > { %v7345_v60 = vpop.f32.mrf.mxu1 }
 0x454   : > { %v5565_v5 = vadd.f32 %v5564_v15, %v5547_v36 }
 0x455   : > { %v5550_v63 = vpop.f32.mrf.mxu1 }
 0x456   : > { %v5566_v23 = vadd.f32 %v5565_v5, %v5550_v63 }
 0x458   : > { %v5567_v50 = vadd.f32 %v7344_v30, %v5566_v23 }
 0x45a   : > { %v5568_v34 = vadd.f32 %v7345_v60, %v5567_v50 }
 0x45c   : > { %v5569_v4 = vrot.slane %v5568_v34, 4 }
 0x45e   : > { %v5570_v17 = vadd.f32 %v5569_v4, %v5568_v34 }
 0x460   : > { %v5571_v55 = vrot.slane %v5570_v17, 2 }
 0x462   : > { %v5572_v33 = vadd.f32 %v5571_v55, %v5570_v17 }
 0x464   : > { %v5573_v29 = vrot.slane %v5572_v33, 1 }
 0x466   : > { %v5574_v41 = vadd.f32 %v5573_v29, %v5572_v33 }
 0x468   : > { %v5575_v42 = vmul.f32 0.015625, %v5574_v41 }
 0x46a   : > { %v5577_v24 = vadd.f32 %v5576_v2, %v5575_v42 }
 0x46c   : > { %5578 = vst [vmem:[%s353_s29] sm:$0x1] %v5577_v24 }
 0x46d PF: > { %s20_s30 = sadd.s32 1, %s7515_s30  }
 0x46e   : > { %p17_p4 = scmp.ge.s32.totalorder %s20_s30, 4  }
 0x470   :  { %19 = sbr.rel (!%p17_p4) target bundleno = 1 (0x1), region = 138 }

// kernel: seg_model_forward.3
= control target key start
LH: loop header
LB: loop body
LE: loop exit
PB: predicated region body
PF: predicated region fallthrough
CT: control target
= control target key end

     0   :  { %s9747_s24 = smov 0   ;;  %s12142_s0 = inlined_call_operand.vmem [shape: f32[2,18,18,128], index: 0, kind: input, shape index: {}]   ;;  %s12143_s1 = inlined_call_operand.vmem [shape: f32[2,18,18,128], index: 1, kind: input, shape index: {}]   ;;  %s12144_s2 = inlined_call_operand.vmem [shape: bf16[9,128,128], index: 2, kind: input, shape index: {}]   ;;  %s12145_s3 = inlined_call_operand.vmem [shape: bf16[9,128,128], index: 3, kind: input, shape index: {}]   ;;  %s12146_s4 = inlined_call_operand.vmem [shape: f32[1,128], index: 4, kind: input, shape index: {}]   ;;  %s12147_s5 = inlined_call_operand.vmem [shape: bf16[128,128], index: 5, kind: input, shape index: {}]   ;;  %s12148_s6 = inlined_call_operand.vmem [shape: f32[1,128], index: 6, kind: input, shape index: {}]   ;;  %s12149_s7 = inlined_call_operand.vmem [shape: f32[2,16,16,128], index: 7, kind: output, shape index: {}]  }
   0x1 LB: > { %s7348_s25 = sadd.s32 4294967295, %s9705_s24   ;;  %p7352_p0 = scmp.ge.s32.totalorder %s9705_s24, 1  ;;  %s9705_s24 = sphi %s9747_s24, %s17_s24  }
   0x2   : > { %p247_p1 = scmp.lt.s32.totalorder %s9705_s24, 3 }
   0x4   : > { %p248_p2 = pnand %p7352_p0, %p247_p1 }
   0x6   : > { %251 = sbr.rel (%p248_p2) target bundleno = 1054 (0x41e), region = 48 }
   0xb   : > { %v9547_v0 = vld [vmem:[%s12144_s2 + $0x38] sm:$0xff]   ;;  %p284_p3 = scmp.lt.s32.totalorder %s7348_s25, 1  ;;  %v9548_v1 = vld [vmem:[%s12144_s2 + $0x30] sm:$0xff]   ;;  %v9549_v2 = vld [vmem:[%s12144_s2 + $0x28] sm:$0xff]  }
   0xc   : > { %9522 = vmatprep.subr.bf16.mxu1 %v9547_v0  ;;  %8610 = vmatprep.subr.bf16.mxu0 %v9547_v0  ;;  %v9550_v3 = vld [vmem:[%s12144_s2 + $0x20] sm:$0xff]   ;;  %v9551_v10 = vld [vmem:[%s12144_s2 + $0x18] sm:$0xff]   ;;  %v9552_v11 = vld [vmem:[%s12144_s2 + $0x10] sm:$0xff]  }
   0xd   : > { %s12230_s25 = smov (!%p284_p3, %s7348_s25), 1  ;;  %9530 = vmatpush3.bf16.msra.mxu1 %v9547_v0  ;;  %8611 = vmatpush3.bf16.msra.mxu0 %v9547_v0  ;;  %v9553_v12 = vld [vmem:[%s12144_s2 + $0x8] sm:$0xff]   ;;  %v9554_v13 = vld [vmem:[%s12144_s2] sm:$0xff]   ;;  %v9555_v18 = vld [vmem:[%s12144_s2 + $0x78] sm:$0xff]  }
   0xe   : > { %9523 = vmatprep.subr.bf16.mxu1 %v9548_v1  ;;  %8612 = vmatprep.subr.bf16.mxu0 %v9548_v1  ;;  %s9538_s9 = smul.u32 432, %s12230_s25  ;;  %v9556_v19 = vld [vmem:[%s12144_s2 + $0xb8] sm:$0xff]   ;;  %v9557_v26 = vld [vmem:[%s12144_s2 + $0x70] sm:$0xff]   ;;  %v9559_v32 = vld [vmem:[%s12144_s2 + $0x68] sm:$0xff]   ;;  %s8153_s22 = sshll.u32 %s12230_s25, 8 }
   0xf   : > { %v9558_v27 = vld [vmem:[%s12144_s2 + $0xb0] sm:$0xff]   ;;  %v9560_v35 = vld [vmem:[%s12144_s2 + $0xa8] sm:$0xff]   ;;  %v9561_v42 = vld [vmem:[%s12144_s2 + $0x60] sm:$0xff]   ;;  %s12073_s29 = scalar_lea.vmem %s12149_s7, %s8153_s22 }
  0x10   : > { %s9772_s12 = scalar_lea.vmem %s12142_s0, %s9538_s9  ;;  %v9562_v43 = vld [vmem:[%s12144_s2 + $0xa0] sm:$0xff]   ;;  %v9563_v50 = vld [vmem:[%s12144_s2 + $0x58] sm:$0xff]   ;;  %v9565_v58 = vld [vmem:[%s12144_s2 + $0x50] sm:$0xff]   ;;  %s10558_s18 = scalar_lea.vmem %s12143_s1, %s9538_s9 }
  0x11   : > { %9531 = vmatpush3.bf16.msra.mxu1 %v9548_v1  ;;  %8613 = vmatpush3.bf16.msra.mxu0 %v9548_v1  ;;  %v316_v4 = vld [vmem:[%s9772_s12 + $0xc0] sm:$0xff]  ;;  %v317_v5 = vld [vmem:[%s9772_s12 + $0xc8] sm:$0xff]  ;;  %v318_v14 = vld [vmem:[%s9772_s12 + $0xd8] sm:$0xff] }
  0x12   : > { %9524 = vmatprep.subr.bf16.mxu1 %v9549_v2  ;;  %8614 = vmatprep.subr.bf16.mxu0 %v9549_v2  ;;  %v9779_v6 = vpack.c.bf16 %v317_v5, %v316_v4  ;;  %v300_v7 = vld [vmem:[%s9772_s12] sm:$0xff]  ;;  %v301_v8 = vld [vmem:[%s9772_s12 + $0x8] sm:$0xff]  ;;  %v302_v16 = vld [vmem:[%s9772_s12 + $0x18] sm:$0xff] }
  0x13   : > { %v332_v9 = vpack.c.bf16 %v301_v8, %v300_v7  ;;  %v319_v15 = vld [vmem:[%s9772_s12 + $0xe0] sm:$0xff]  ;;  %v320_v20 = vld [vmem:[%s9772_s12 + $0xf0] sm:$0xff]  ;;  %v321_v23 = vld [vmem:[%s9772_s12 + $0xf8] sm:$0xff] }
  0x14   : > { %8642 = vmatprep.mubr.bf16.mxu1 %v9779_v6  ;;  %v303_v17 = vld [vmem:[%s9772_s12 + $0x20] sm:$0xff]  ;;  %v9807_v21 = vpack.c.bf16 %v319_v15, %v318_v14  ;;  %v304_v24 = vld [vmem:[%s9772_s12 + $0x30] sm:$0xff]  ;;  %v305_v25 = vld [vmem:[%s9772_s12 + $0x38] sm:$0xff]  ;;  %v9820_v28 = vpack.c.bf16 %v321_v23, %v320_v20 }
  0x15   : > { %9532 = vmatpush3.bf16.msra.mxu1 %v9549_v2  ;;  %8615 = vmatpush3.bf16.msra.mxu0 %v9549_v2  ;;  %v9809_v22 = vpack.c.bf16 %v303_v17, %v302_v16  ;;  %v9822_v29 = vpack.c.bf16 %v305_v25, %v304_v24  ;;  %v322_v30 = vld [vmem:[%s9772_s12 + $0x108] sm:$0xff]  ;;  %v323_v31 = vld [vmem:[%s9772_s12 + $0x110] sm:$0xff]  ;;  %v324_v36 = vld [vmem:[%s9772_s12 + $0x120] sm:$0xff] }
  0x16   : > { %9525 = vmatprep.subr.bf16.mxu1 %v9550_v3  ;;  %8616 = vmatprep.subr.bf16.mxu0 %v9550_v3  ;;  %v306_v33 = vld [vmem:[%s9772_s12 + $0x48] sm:$0xff]  ;;  %v307_v34 = vld [vmem:[%s9772_s12 + $0x50] sm:$0xff]  ;;  %v9839_v37 = vpack.c.bf16 %v323_v31, %v322_v30  ;;  %v308_v40 = vld [vmem:[%s9772_s12 + $0x60] sm:$0xff] }
  0x17   : > { %8626 = vmatprep.mubr.bf16.mxu0 %v332_v9  ;;  %v9841_v38 = vpack.c.bf16 %v307_v34, %v306_v33  ;;  %v325_v39 = vld [vmem:[%s9772_s12 + $0x128] sm:$0xff]  ;;  %v326_v46 = vld [vmem:[%s9772_s12 + $0x138] sm:$0xff]  ;;  %v327_v47 = vld [vmem:[%s9772_s12 + $0x140] sm:$0xff] }
  0x18   : > { %v309_v41 = vld [vmem:[%s9772_s12 + $0x68] sm:$0xff]  ;;  %v9852_v44 = vpack.c.bf16 %v325_v39, %v324_v36  ;;  %v310_v48 = vld [vmem:[%s9772_s12 + $0x78] sm:$0xff]  ;;  %v311_v49 = vld [vmem:[%s9772_s12 + $0x80] sm:$0xff]  ;;  %v9871_v53 = vpack.c.bf16 %v327_v47, %v326_v46 }
  0x19   : > { %9533 = vmatpush3.bf16.msra.mxu1 %v9550_v3  ;;  %8617 = vmatpush3.bf16.msra.mxu0 %v9550_v3  ;;  %v9854_v45 = vpack.c.bf16 %v309_v41, %v308_v40  ;;  %v9564_v51 = vld [vmem:[%s12144_s2 + $0x98] sm:$0xff]   ;;  %v328_v52 = vld [vmem:[%s9772_s12 + $0x150] sm:$0xff]  ;;  %v9873_v54 = vpack.c.bf16 %v311_v49, %v310_v48  ;;  %v330_v61 = vld [vmem:[%s9772_s12 + $0x168] sm:$0xff] }
  0x1a   : > { %9526 = vmatprep.subr.bf16.mxu1 %v9551_v10  ;;  %8618 = vmatprep.subr.bf16.mxu0 %v9551_v10  ;;  %v329_v55 = vld [vmem:[%s9772_s12 + $0x158] sm:$0xff]  ;;  %v312_v56 = vld [vmem:[%s9772_s12 + $0x90] sm:$0xff]  ;;  %v9567_v0 = vld [vmem:[%s12144_s2 + $0x48] sm:$0xff]  }
  0x1b   : > { %v313_v57 = vld [vmem:[%s9772_s12 + $0x98] sm:$0xff]  ;;  %v9566_v59 = vld [vmem:[%s12144_s2 + $0x90] sm:$0xff]   ;;  %v9884_v60 = vpack.c.bf16 %v329_v55, %v328_v52  ;;  %v314_v1 = vld [vmem:[%s9772_s12 + $0xa8] sm:$0xff] }
  0x1c   : > { %v9887_v62 = vpack.c.bf16 %v313_v57, %v312_v56  ;;  %v331_v63 = vld [vmem:[%s9772_s12 + $0x170] sm:$0xff]  ;;  %v9568_v3 = vld [vmem:[%s12144_s2 + $0x88] sm:$0xff]   ;;  %v607_v14 = vld [vmem:[%s9772_s12 + $0x19] sm:$0xff] }
  0x1d   : > { %9534 = vmatpush3.bf16.msra.mxu1 %v9551_v10  ;;  %8619 = vmatpush3.bf16.msra.mxu0 %v9551_v10  ;;  %v315_v2 = vld [vmem:[%s9772_s12 + $0xb0] sm:$0xff]  ;;  %v605_v4 = vld [vmem:[%s9772_s12 + $0x1] sm:$0xff]  ;;  %v9905_v8 = vpack.c.bf16 %v331_v63, %v330_v61  ;;  %v9571_v17 = vld [vmem:[%s12144_s2 + $0xf8] sm:$0xff]  }
  0x1e   : > { %9527 = vmatprep.subr.bf16.mxu1 %v9552_v11  ;;  %8620 = vmatprep.subr.bf16.mxu0 %v9552_v11  ;;  %v606_v5 = vld [vmem:[%s9772_s12 + $0x9] sm:$0xff]  ;;  %v9907_v9 = vpack.c.bf16 %v315_v2, %v314_v1  ;;  %v608_v15 = vld [vmem:[%s9772_s12 + $0x21] sm:$0xff]  ;;  %v609_v20 = vld [vmem:[%s9772_s12 + $0x31] sm:$0xff] }
  0x1f   : > { %v975_v7 = vld [vmem:[%s9772_s12 + $0x2] sm:$0xff]  ;;  %v976_v10 = vld [vmem:[%s9772_s12 + $0xa] sm:$0xff]  ;;  %v610_v23 = vld [vmem:[%s9772_s12 + $0x39] sm:$0xff] }
  0x20   : > { %v1007_v16 = vpack.c.bf16 %v976_v10, %v975_v7  ;;  %v9576_v24 = vld [vmem:[%s12144_s2 + $0x138] sm:$0xff]   ;;  %v9936_v31 = vpack.c.bf16 %v610_v23, %v609_v20  ;;  %v611_v34 = vld [vmem:[%s9772_s12 + $0x49] sm:$0xff]  ;;  %v613_v40 = vld [vmem:[%s9772_s12 + $0x61] sm:$0xff] }
  0x21   : > { %9535 = vmatpush3.bf16.msra.mxu1 %v9552_v11  ;;  %8621 = vmatpush3.bf16.msra.mxu0 %v9552_v11  ;;  %v9569_v11 = vld [vmem:[%s12144_s2 + $0x40] sm:$0xff]   ;;  %v979_v25 = vld [vmem:[%s9772_s12 + $0x32] sm:$0xff]  ;;  %v981_v36 = vld [vmem:[%s9772_s12 + $0x4a] sm:$0xff] }
  0x22   : > { %9528 = vmatprep.subr.bf16.mxu1 %v9553_v12  ;;  %8622 = vmatprep.subr.bf16.mxu0 %v9553_v12  ;;  %v982_v39 = vld [vmem:[%s9772_s12 + $0x52] sm:$0xff]  ;;  %v983_v46 = vld [vmem:[%s9772_s12 + $0x62] sm:$0xff]  ;;  %v984_v47 = vld [vmem:[%s9772_s12 + $0x6a] sm:$0xff] }
  0x23   : > { %v9577_v41 = vld [vmem:[%s12144_s2 + $0x130] sm:$0xff]   ;;  %v9963_v49 = vpack.c.bf16 %v982_v39, %v981_v36  ;;  %v9579_v52 = vld [vmem:[%s12144_s2 + $0x128] sm:$0xff]   ;;  %v615_v55 = vld [vmem:[%s9772_s12 + $0x79] sm:$0xff] }
  0x24   : > { %v616_v56 = vld [vmem:[%s9772_s12 + $0x81] sm:$0xff]  ;;  %v617_v61 = vld [vmem:[%s9772_s12 + $0x91] sm:$0xff]  ;;  %v618_v63 = vld [vmem:[%s9772_s12 + $0x99] sm:$0xff] }
  0x25   : > { %9536 = vmatpush3.bf16.msra.mxu1 %v9553_v12  ;;  %8623 = vmatpush3.bf16.msra.mxu0 %v9553_v12  ;;  %v9570_v12 = vld [vmem:[%s12144_s2 + $0x80] sm:$0xff]   ;;  %v987_v1 = vld [vmem:[%s9772_s12 + $0x92] sm:$0xff]  ;;  %v9997_v7 = vpack.c.bf16 %v618_v63, %v617_v61  ;;  %v992_v23 = vld [vmem:[%s9772_s12 + $0xca] sm:$0xff] }
  0x26   : > { %9529 = vmatprep.subr.bf16.mxu1 %v9554_v13  ;;  %8624 = vmatprep.subr.bf16.mxu0 %v9554_v13  ;;  %v985_v57 = vld [vmem:[%s9772_s12 + $0x7a] sm:$0xff]  ;;  %v991_v20 = vld [vmem:[%s9772_s12 + $0xc2] sm:$0xff] }
  0x27   : > { %v988_v2 = vld [vmem:[%s9772_s12 + $0x9a] sm:$0xff] }
  0x28   : > { %v9999_v10 = vpack.c.bf16 %v988_v2, %v987_v1  ;;  %v623_v36 = vld [vmem:[%s9772_s12 + $0xd9] sm:$0xff]  ;;  %v624_v39 = vld [vmem:[%s9772_s12 + $0xe1] sm:$0xff]  ;;  %v628_v1 = vld [vmem:[%s9772_s12 + $0x111] sm:$0xff] }
  0x29   : > { %9537 = vmatpush3.bf16.msra.mxu1 %v9554_v13  ;;  %8625 = vmatpush3.bf16.msra.mxu0 %v9554_v13  ;;  %v637_v13 = vpack.c.bf16 %v606_v5, %v605_v4  ;;  %v9993_v4 = vpack.c.bf16 %v616_v56, %v615_v55  ;;  %v996_v55 = vld [vmem:[%s9772_s12 + $0xfa] sm:$0xff]  ;;  %v997_v2 = vld [vmem:[%s9772_s12 + $0x10a] sm:$0xff] }
  0x2a   : > { %8658 = vmatprep.subr.bf16.mxu1 %v9555_v18  ;;  %8706 = vmatprep.subr.bf16.mxu0 %v9556_v19  ;;  %v9587_v56 = vld [vmem:[%s12144_s2 + $0x178] sm:$0xff]  }
  0x2b   : > { %v9592_v63 = vld [vmem:[%s12144_s2 + $0x1b8] sm:$0xff]  }
  0x2c   : > { %8643 = vmatmul.mubr.bf16.vlgmr.msra.gmra.mxu1 %v9807_v21  ;;  %8627 = vmatmul.mubr.bf16.vlgmr.msra.gmra.mxu0 %v9809_v22 }
  0x2d   : > { %8659 = vmatpush3.bf16.msra.mxu1 %v9555_v18  ;;  %8707 = vmatpush3.bf16.msra.mxu0 %v9556_v19  ;;  %v977_v18 = vld [vmem:[%s9772_s12 + $0x1a] sm:$0xff]  ;;  %v978_v19 = vld [vmem:[%s9772_s12 + $0x22] sm:$0xff] }
  0x2e   : > { %8660 = vmatprep.subr.bf16.mxu1 %v9557_v26  ;;  %8708 = vmatprep.subr.bf16.mxu0 %v9558_v27  ;;  %v9934_v30 = vpack.c.bf16 %v978_v19, %v977_v18  ;;  %v622_v18 = vld [vmem:[%s9772_s12 + $0xc9] sm:$0xff] }
  0x2f   : > { %8646 = vmatprep.mubr.bf16.mxu1 %v9820_v28  ;;  %8630 = vmatprep.mubr.bf16.mxu0 %v9822_v29  ;;  %v9583_v19 = vld [vmem:[%s12144_s2 + $0x110] sm:$0xff]  }
  0x31   : > { %8661 = vmatpush3.bf16.msra.mxu1 %v9557_v26  ;;  %8709 = vmatpush3.bf16.msra.mxu0 %v9558_v27  ;;  %v980_v26 = vld [vmem:[%s9772_s12 + $0x3a] sm:$0xff]  ;;  %v9932_v27 = vpack.c.bf16 %v608_v15, %v607_v14  ;;  %v989_v14 = vld [vmem:[%s9772_s12 + $0xaa] sm:$0xff]  ;;  %v990_v15 = vld [vmem:[%s9772_s12 + $0xb2] sm:$0xff] }
  0x32   : > { %8662 = vmatprep.subr.bf16.mxu1 %v9559_v32  ;;  %8710 = vmatprep.subr.bf16.mxu0 %v9560_v35  ;;  %v9941_v33 = vpack.c.bf16 %v980_v26, %v979_v25  ;;  %v10027_v26 = vpack.c.bf16 %v990_v15, %v989_v14  ;;  %v1000_v14 = vld [vmem:[%s9772_s12 + $0x12a] sm:$0xff] }
  0x34   : > { %8647 = vmatmul.mubr.bf16.gmra.mxu1 %v9839_v37  ;;  %8631 = vmatmul.mubr.bf16.gmra.mxu0 %v9841_v38 }
  0x35   : > { %8663 = vmatpush3.bf16.msra.mxu1 %v9559_v32  ;;  %8711 = vmatpush3.bf16.msra.mxu0 %v9560_v35  ;;  %v9572_v32 = vld [vmem:[%s12144_s2 + $0xf0] sm:$0xff]  }
  0x36   : > { %8664 = vmatprep.subr.bf16.mxu1 %v9561_v42  ;;  %8712 = vmatprep.subr.bf16.mxu0 %v9562_v43  ;;  %v612_v35 = vld [vmem:[%s9772_s12 + $0x51] sm:$0xff] }
  0x37   : > { %8650 = vmatprep.mubr.bf16.mxu1 %v9852_v44  ;;  %8634 = vmatprep.mubr.bf16.mxu0 %v9854_v45  ;;  %v9961_v48 = vpack.c.bf16 %v612_v35, %v611_v34  ;;  %v10031_v34 = vpack.c.bf16 %v992_v23, %v991_v20  ;;  %v9585_v35 = vld [vmem:[%s12144_s2 + $0x108] sm:$0xff]   ;;  %v1001_v23 = vld [vmem:[%s9772_s12 + $0x13a] sm:$0xff] }
  0x38   : > { %v632_v20 = vld [vmem:[%s9772_s12 + $0x141] sm:$0xff] }
  0x39   : > { %8665 = vmatpush3.bf16.msra.mxu1 %v9561_v42  ;;  %8713 = vmatpush3.bf16.msra.mxu0 %v9562_v43  ;;  %v614_v42 = vld [vmem:[%s9772_s12 + $0x69] sm:$0xff] }
  0x3a   : > { %8666 = vmatprep.subr.bf16.mxu1 %v9563_v50  ;;  %8714 = vmatprep.subr.bf16.mxu0 %v9564_v51  ;;  %v9573_v43 = vld [vmem:[%s12144_s2 + $0xe8] sm:$0xff]  }
  0x3c   : > { %8651 = vmatmul.mubr.bf16.gmra.mxu1 %v9871_v53  ;;  %8635 = vmatmul.mubr.bf16.gmra.mxu0 %v9873_v54 }
  0x3d   : > { %8667 = vmatpush3.bf16.msra.mxu1 %v9563_v50  ;;  %8715 = vmatpush3.bf16.msra.mxu0 %v9564_v51  ;;  %v9965_v50 = vpack.c.bf16 %v614_v42, %v613_v40  ;;  %v9967_v51 = vpack.c.bf16 %v984_v47, %v983_v46  ;;  %v993_v40 = vld [vmem:[%s9772_s12 + $0xda] sm:$0xff]  ;;  %v994_v42 = vld [vmem:[%s9772_s12 + $0xe2] sm:$0xff] }
  0x3e   : > { %8668 = vmatprep.subr.bf16.mxu1 %v9565_v58  ;;  %8716 = vmatprep.subr.bf16.mxu0 %v9566_v59  ;;  %v9586_v46 = vld [vmem:[%s12144_s2 + $0x100] sm:$0xff]  }
  0x3f   : > { %8654 = vmatprep.mubr.bf16.mxu1 %v9884_v60  ;;  %8638 = vmatprep.mubr.bf16.mxu0 %v9887_v62  ;;  %v626_v47 = vld [vmem:[%s9772_s12 + $0xf9] sm:$0xff] }
  0x41   : > { %8669 = vmatpush3.bf16.msra.mxu1 %v9565_v58  ;;  %8717 = vmatpush3.bf16.msra.mxu0 %v9566_v59  ;;  %v986_v58 = vld [vmem:[%s9772_s12 + $0x82] sm:$0xff] }
  0x42   : > { %8670 = vmatprep.subr.bf16.mxu1 %v9567_v0  ;;  %8718 = vmatprep.subr.bf16.mxu0 %v9568_v3  ;;  %v9574_v59 = vld [vmem:[%s12144_s2 + $0xe0] sm:$0xff]   ;;  %v9995_v5 = vpack.c.bf16 %v986_v58, %v985_v57  ;;  %v10057_v57 = vpack.c.bf16 %v624_v39, %v623_v36  ;;  %v10059_v58 = vpack.c.bf16 %v994_v42, %v993_v40  ;;  %v1003_v39 = vld [vmem:[%s9772_s12 + $0x152] sm:$0xff] }
  0x43   : > { %v634_v36 = vld [vmem:[%s9772_s12 + $0x159] sm:$0xff] }
  0x44   : > { %8655 = vmatmul.mubr.bf16.gmra.mxu1 %v9905_v8  ;;  %8639 = vmatmul.mubr.bf16.gmra.mxu0 %v9907_v9  ;;  %v1004_v40 = vld [vmem:[%s9772_s12 + $0x15a] sm:$0xff] }
  0x45   : > { %8671 = vmatpush3.bf16.msra.mxu1 %v9567_v0  ;;  %8719 = vmatpush3.bf16.msra.mxu0 %v9568_v3  ;;  %v9580_v0 = vld [vmem:[%s12144_s2 + $0x120] sm:$0xff]   ;;  %v9575_v3 = vld [vmem:[%s12144_s2 + $0xd8] sm:$0xff]  }
  0x46   : > { %8672 = vmatprep.subr.bf16.mxu1 %v9569_v11  ;;  %8720 = vmatprep.subr.bf16.mxu0 %v9570_v12 }
  0x47   : > { %8674 = vmatprep.mubr.bf16.mxu1 %v637_v13  ;;  %8722 = vmatprep.mubr.bf16.mxu0 %v1007_v16  ;;  %v620_v13 = vld [vmem:[%s9772_s12 + $0xb1] sm:$0xff] }
  0x48   : > { %v9578_v16 = vld [vmem:[%s12144_s2 + $0xd0] sm:$0xff]  }
  0x49   : > { %8673 = vmatpush3.bf16.msra.mxu1 %v9569_v11  ;;  %8721 = vmatpush3.bf16.msra.mxu0 %v9570_v12  ;;  %v9582_v11 = vld [vmem:[%s12144_s2 + $0x118] sm:$0xff]   ;;  %v619_v12 = vld [vmem:[%s9772_s12 + $0xa9] sm:$0xff] }
  0x4a   : > { %8754 = vmatprep.subr.bf16.mxu1 %v9571_v17  ;;  %8802 = vmatprep.subr.bf16.mxu0 %v9576_v24  ;;  %v10025_v25 = vpack.c.bf16 %v620_v13, %v619_v12  ;;  %v630_v12 = vld [vmem:[%s9772_s12 + $0x129] sm:$0xff] }
  0x4b   : > { %v999_v13 = vld [vmem:[%s9772_s12 + $0x122] sm:$0xff] }
  0x4c   : > { %8675 = vmatmul.mubr.bf16.vlgmr.msra.gmra.mxu1 %v9932_v27  ;;  %8723 = vmatmul.mubr.bf16.vlgmr.msra.gmra.mxu0 %v9934_v30 }
  0x4d   : > { %8755 = vmatpush3.bf16.msra.mxu1 %v9571_v17  ;;  %8678 = vmatprep.mubr.bf16.mxu1 %v9936_v31  ;;  %v621_v17 = vld [vmem:[%s9772_s12 + $0xc1] sm:$0xff] }
  0x4e   : > { %8756 = vmatprep.subr.bf16.mxu1 %v9572_v32  ;;  %8726 = vmatprep.mubr.bf16.mxu0 %v9941_v33 }
  0x4f   : > { %8803 = vmatpush3.bf16.msra.mxu0 %v9576_v24  ;;  %v9581_v24 = vld [vmem:[%s12144_s2 + $0xc8] sm:$0xff]  }
  0x50   : > { %8804 = vmatprep.subr.bf16.mxu0 %v9577_v41 }
  0x51   : > { %8757 = vmatpush3.bf16.msra.mxu1 %v9572_v32  ;;  %v10029_v32 = vpack.c.bf16 %v622_v18, %v621_v17  ;;  %v10086_v18 = vpack.c.bf16 %v1000_v14, %v999_v13  ;;  %v7583_v14 = vld [vmem:[%s9772_s12 + $0x48] sm:$0xff] }
  0x52   : > { %8758 = vmatprep.subr.bf16.mxu1 %v9573_v43 }
  0x53   : > { %8805 = vmatpush3.bf16.msra.mxu0 %v9577_v41  ;;  %v9584_v41 = vld [vmem:[%s12144_s2 + $0xc0] sm:$0xff]  }
  0x54   : > { %8679 = vmatmul.mubr.bf16.gmra.mxu1 %v9961_v48  ;;  %8727 = vmatmul.mubr.bf16.gmra.mxu0 %v9963_v49 }
  0x55   : > { %8682 = vmatprep.mubr.bf16.mxu1 %v9965_v50  ;;  %8730 = vmatprep.mubr.bf16.mxu0 %v9967_v51 }
  0x56   : > { %8759 = vmatpush3.bf16.msra.mxu1 %v9573_v43  ;;  %8806 = vmatprep.subr.bf16.mxu0 %v9579_v52  ;;  %v625_v43 = vld [vmem:[%s9772_s12 + $0xf1] sm:$0xff] }
  0x57   : > { %8760 = vmatprep.subr.bf16.mxu1 %v9574_v59  ;;  %8807 = vmatpush3.bf16.msra.mxu0 %v9579_v52  ;;  %v995_v52 = vld [vmem:[%s9772_s12 + $0xf2] sm:$0xff] }
  0x58   : > { %8808 = vmatprep.subr.bf16.mxu0 %v9580_v0  ;;  %v10063_v61 = vpack.c.bf16 %v996_v55, %v995_v52  ;;  %v636_v52 = vld [vmem:[%s9772_s12 + $0x171] sm:$0xff] }
  0x59   : > { %v1005_v55 = vld [vmem:[%s9772_s12 + $0x16a] sm:$0xff] }
  0x5a   : > { %8761 = vmatpush3.bf16.msra.mxu1 %v9574_v59  ;;  %v10061_v59 = vpack.c.bf16 %v626_v47, %v625_v43  ;;  %v635_v47 = vld [vmem:[%s9772_s12 + $0x169] sm:$0xff] }
  0x5b   : > { %8762 = vmatprep.subr.bf16.mxu1 %v9575_v3  ;;  %8809 = vmatpush3.bf16.msra.mxu0 %v9580_v0  ;;  %v627_v0 = vld [vmem:[%s9772_s12 + $0x109] sm:$0xff] }
  0x5c   : > { %8683 = vmatmul.mubr.bf16.gmra.mxu1 %v9993_v4  ;;  %8731 = vmatmul.mubr.bf16.gmra.mxu0 %v9995_v5  ;;  %v10080_v15 = vpack.c.bf16 %v628_v1, %v627_v0  ;;  %v1006_v0 = vld [vmem:[%s9772_s12 + $0x172] sm:$0xff]  ;;  %v10116_v1 = vpack.c.bf16 %v636_v52, %v635_v47  ;;  %v7599_v47 = vld [vmem:[%s9772_s12 + $0x108] sm:$0xff] }
  0x5d   : > { %8686 = vmatprep.mubr.bf16.mxu1 %v9997_v7  ;;  %8734 = vmatprep.mubr.bf16.mxu0 %v9999_v10  ;;  %v7600_v52 = vld [vmem:[%s9772_s12 + $0x110] sm:$0xff] }
  0x5e   : > { %8763 = vmatpush3.bf16.msra.mxu1 %v9575_v3  ;;  %8810 = vmatprep.subr.bf16.mxu0 %v9582_v11  ;;  %v998_v3 = vld [vmem:[%s9772_s12 + $0x112] sm:$0xff] }
  0x5f   : > { %8764 = vmatprep.subr.bf16.mxu1 %v9578_v16  ;;  %8811 = vmatpush3.bf16.msra.mxu0 %v9582_v11  ;;  %v629_v11 = vld [vmem:[%s9772_s12 + $0x121] sm:$0xff] }
  0x60   : > { %8812 = vmatprep.subr.bf16.mxu0 %v9583_v19  ;;  %v10084_v17 = vpack.c.bf16 %v630_v12, %v629_v11  ;;  %v9593_v11 = vld [vmem:[%s12144_s2 + $0x1b0] sm:$0xff]   ;;  %v9603_v12 = vld [vmem:[%s12144_s2 + $0x1f8] sm:$0xff]  }
  0x62   : > { %8765 = vmatpush3.bf16.msra.mxu1 %v9578_v16  ;;  %v10082_v16 = vpack.c.bf16 %v998_v3, %v997_v2  ;;  %v10118_v2 = vpack.c.bf16 %v1006_v0, %v1005_v55  ;;  %v9588_v3 = vld [vmem:[%s12144_s2 + $0x170] sm:$0xff]   ;;  %v7601_v55 = vld [vmem:[%s9772_s12 + $0x120] sm:$0xff]  ;;  %v7602_v0 = vld [vmem:[%s9772_s12 + $0x128] sm:$0xff] }
  0x63   : > { %8766 = vmatprep.subr.bf16.mxu1 %v9581_v24  ;;  %8813 = vmatpush3.bf16.msra.mxu0 %v9583_v19  ;;  %v631_v19 = vld [vmem:[%s9772_s12 + $0x139] sm:$0xff] }
  0x64   : > { %8687 = vmatmul.mubr.bf16.gmra.mxu1 %v10025_v25  ;;  %8735 = vmatmul.mubr.bf16.gmra.mxu0 %v10027_v26 }
  0x65   : > { %8690 = vmatprep.mubr.bf16.mxu1 %v10029_v32  ;;  %8738 = vmatprep.mubr.bf16.mxu0 %v10031_v34 }
  0x66   : > { %8767 = vmatpush3.bf16.msra.mxu1 %v9581_v24  ;;  %8814 = vmatprep.subr.bf16.mxu0 %v9585_v35  ;;  %v1002_v24 = vld [vmem:[%s9772_s12 + $0x142] sm:$0xff] }
  0x67   : > { %8768 = vmatprep.subr.bf16.mxu1 %v9584_v41  ;;  %8815 = vmatpush3.bf16.msra.mxu0 %v9585_v35  ;;  %v633_v35 = vld [vmem:[%s9772_s12 + $0x151] sm:$0xff]  ;;  %v10102_v42 = vpack.c.bf16 %v1002_v24, %v1001_v23 }
  0x68   : > { %8816 = vmatprep.subr.bf16.mxu0 %v9586_v46  ;;  %v10104_v43 = vpack.c.bf16 %v634_v36, %v633_v35  ;;  %v9615_v23 = vld [vmem:[%s12144_s2 + $0x210] sm:$0xff]   ;;  %v7595_v24 = vld [vmem:[%s9772_s12 + $0xd8] sm:$0xff]  ;;  %v7596_v35 = vld [vmem:[%s9772_s12 + $0xe0] sm:$0xff] }
  0x69   : > { %v7597_v36 = vld [vmem:[%s9772_s12 + $0xf0] sm:$0xff] }
  0x6a   : > { %8769 = vmatpush3.bf16.msra.mxu1 %v9584_v41  ;;  %v10100_v41 = vpack.c.bf16 %v632_v20, %v631_v19  ;;  %v7593_v19 = vld [vmem:[%s9772_s12 + $0xc0] sm:$0xff]  ;;  %v7594_v20 = vld [vmem:[%s9772_s12 + $0xc8] sm:$0xff] }
  0x6b   : > { %8817 = vmatpush3.bf16.msra.mxu0 %v9586_v46  ;;  %8850 = vmatprep.subr.bf16.mxu1 %v9587_v56  ;;  %v10106_v46 = vpack.c.bf16 %v1004_v40, %v1003_v39  ;;  %v7598_v39 = vld [vmem:[%s9772_s12 + $0xf8] sm:$0xff]  ;;  %v9617_v40 = vld [vmem:[%s12144_s2 + $0x208] sm:$0xff]  }
  0x6c   : > { %8691 = vmatmul.mubr.bf16.gmra.mxu1 %v10057_v57  ;;  %8739 = vmatmul.mubr.bf16.gmra.mxu0 %v10059_v58 }
  0x6d   : > { %8694 = vmatprep.mubr.bf16.mxu1 %v10061_v59  ;;  %8742 = vmatprep.mubr.bf16.mxu0 %v10063_v61 }
  0x6e   : > { %8898 = vmatprep.subr.bf16.mxu0 %v9592_v63 }
  0x74   : > { %8695 = vmatmul.mubr.bf16.gmra.mxu1 %v10080_v15  ;;  %8743 = vmatmul.mubr.bf16.gmra.mxu0 %v10082_v16 }
  0x75   : > { %8698 = vmatprep.mubr.bf16.mxu1 %v10084_v17  ;;  %8746 = vmatprep.mubr.bf16.mxu0 %v10086_v18 }
  0x7c   : > { %8699 = vmatmul.mubr.bf16.gmra.mxu1 %v10100_v41  ;;  %8747 = vmatmul.mubr.bf16.gmra.mxu0 %v10102_v42 }
  0x7d   : > { %8702 = vmatprep.mubr.bf16.mxu1 %v10104_v43  ;;  %8750 = vmatprep.mubr.bf16.mxu0 %v10106_v46 }
  0x84   : > { %8703 = vmatmul.mubr.bf16.gmra.mxu1 %v10116_v1  ;;  %8751 = vmatmul.mubr.bf16.gmra.mxu0 %v10118_v2 }
  0x85   : > { %8770 = vmatprep.mubr.bf16.mxu1 %v9809_v22  ;;  %8818 = vmatprep.mubr.bf16.mxu0 %v9932_v27  ;;  %v9589_v22 = vld [vmem:[%s12144_s2 + $0x168] sm:$0xff]   ;;  %v9590_v27 = vld [vmem:[%s12144_s2 + $0x160] sm:$0xff]  }
  0x8c   : > { %8771 = vmatmul.mubr.bf16.vlgmr.msra.gmra.mxu1 %v9822_v29  ;;  %8819 = vmatmul.mubr.bf16.vlgmr.msra.gmra.mxu0 %v9936_v31  ;;  %v9595_v29 = vld [vmem:[%s12144_s2 + $0x1a8] sm:$0xff]   ;;  %v9591_v31 = vld [vmem:[%s12144_s2 + $0x158] sm:$0xff]  }
  0x8d   : > { %8851 = vmatpush3.bf16.msra.mxu1 %v9587_v56  ;;  %8774 = vmatprep.mubr.bf16.mxu1 %v9841_v38  ;;  %v9596_v38 = vld [vmem:[%s12144_s2 + $0x1a0] sm:$0xff]   ;;  %v9597_v56 = vld [vmem:[%s12144_s2 + $0x148] sm:$0xff]  }
  0x8e   : > { %8852 = vmatprep.subr.bf16.mxu1 %v9588_v3  ;;  %8822 = vmatprep.mubr.bf16.mxu0 %v9961_v48  ;;  %v9598_v48 = vld [vmem:[%s12144_s2 + $0x198] sm:$0xff]  }
  0x8f   : > { %8899 = vmatpush3.bf16.msra.mxu0 %v9592_v63  ;;  %v9601_v63 = vld [vmem:[%s12144_s2 + $0x188] sm:$0xff]  }
  0x90   : > { %8900 = vmatprep.subr.bf16.mxu0 %v9593_v11 }
  0x91   : > { %8853 = vmatpush3.bf16.msra.mxu1 %v9588_v3  ;;  %v10284_v3 = vld [vmem:[%s12145_s3 + $0x78] sm:$0xff]  }
  0x92   : > { %8854 = vmatprep.subr.bf16.mxu1 %v9589_v22 }
  0x93   : > { %8901 = vmatpush3.bf16.msra.mxu0 %v9593_v11 }
  0x94   : > { %8775 = vmatmul.mubr.bf16.gmra.mxu1 %v9854_v45  ;;  %8823 = vmatmul.mubr.bf16.gmra.mxu0 %v9965_v50  ;;  %v9594_v50 = vld [vmem:[%s12144_s2 + $0x150] sm:$0xff]  }
  0x95   : > { %8778 = vmatprep.mubr.bf16.mxu1 %v9873_v54  ;;  %8826 = vmatprep.mubr.bf16.mxu0 %v9993_v4  ;;  %v9599_v4 = vld [vmem:[%s12144_s2 + $0x190] sm:$0xff]  }
  0x96   : > { %8855 = vmatpush3.bf16.msra.mxu1 %v9589_v22  ;;  %8902 = vmatprep.subr.bf16.mxu0 %v9595_v29 }
  0x97   : > { %8856 = vmatprep.subr.bf16.mxu1 %v9590_v27  ;;  %8903 = vmatpush3.bf16.msra.mxu0 %v9595_v29  ;;  %v7603_v29 = vld [vmem:[%s9772_s12 + $0x138] sm:$0xff] }
  0x98   : > { %8904 = vmatprep.subr.bf16.mxu0 %v9596_v38 }
  0x9a   : > { %8857 = vmatpush3.bf16.msra.mxu1 %v9590_v27  ;;  %v7604_v27 = vld [vmem:[%s9772_s12 + $0x140] sm:$0xff] }
  0x9b   : > { %8858 = vmatprep.subr.bf16.mxu1 %v9591_v31  ;;  %8905 = vmatpush3.bf16.msra.mxu0 %v9596_v38 }
  0x9c   : > { %8779 = vmatmul.mubr.bf16.gmra.mxu1 %v9887_v62  ;;  %8827 = vmatmul.mubr.bf16.gmra.mxu0 %v9997_v7  ;;  %v9600_v7 = vld [vmem:[%s12144_s2 + $0x140] sm:$0xff]  }
  0x9d   : > { %8782 = vmatprep.mubr.bf16.mxu1 %v9907_v9  ;;  %8830 = vmatprep.mubr.bf16.mxu0 %v10025_v25  ;;  %v9602_v25 = vld [vmem:[%s12144_s2 + $0x180] sm:$0xff]  }
  0x9e   : > { %8859 = vmatpush3.bf16.msra.mxu1 %v9591_v31  ;;  %8906 = vmatprep.subr.bf16.mxu0 %v9598_v48 }
  0x9f   : > { %8860 = vmatprep.subr.bf16.mxu1 %v9594_v50  ;;  %8907 = vmatpush3.bf16.msra.mxu0 %v9598_v48  ;;  %v7605_v48 = vld [vmem:[%s9772_s12 + $0x150] sm:$0xff] }
  0xa0   : > { %8908 = vmatprep.subr.bf16.mxu0 %v9599_v4 }
  0xa2   : > { %8861 = vmatpush3.bf16.msra.mxu1 %v9594_v50  ;;  %v7606_v50 = vld [vmem:[%s9772_s12 + $0x158] sm:$0xff] }
  0xa3   : > { %8862 = vmatprep.subr.bf16.mxu1 %v9597_v56  ;;  %8909 = vmatpush3.bf16.msra.mxu0 %v9599_v4 }
  0xa4   : > { %8783 = vmatmul.mubr.bf16.gmra.mxu1 %v9779_v6  ;;  %8831 = vmatmul.mubr.bf16.gmra.mxu0 %v10029_v32  ;;  %v9608_v6 = vld [vmem:[%s12144_s2 + $0x238] sm:$0xff]   ;;  %v7444_v32 = vld [vmem:[%s9772_s12 + $0x188] sm:$0xff] }
  0xa5   : > { %8786 = vmatprep.mubr.bf16.mxu1 %v9807_v21  ;;  %8834 = vmatprep.mubr.bf16.mxu0 %v10057_v57  ;;  %v7443_v21 = vld [vmem:[%s9772_s12 + $0x180] sm:$0xff]  ;;  %v7500_v57 = vld [vmem:[%s9772_s12 + $0x189] sm:$0xff] }
  0xa6   : > { %8863 = vmatpush3.bf16.msra.mxu1 %v9597_v56  ;;  %8910 = vmatprep.subr.bf16.mxu0 %v9601_v63  ;;  %v2500_v56 = vpack.c.bf16 %v7604_v27, %v7603_v29 }
  0xa7   : > { %8864 = vmatprep.subr.bf16.mxu1 %v9600_v7  ;;  %8911 = vmatpush3.bf16.msra.mxu0 %v9601_v63  ;;  %v2501_v63 = vpack.c.bf16 %v7606_v50, %v7605_v48  ;;  %v9620_v48 = vld [vmem:[%s12145_s3 + $0x30] sm:$0xff]  }
  0xa8   : > { %8912 = vmatprep.subr.bf16.mxu0 %v9602_v25 }
  0xaa   : > { %8865 = vmatpush3.bf16.msra.mxu1 %v9600_v7 }
  0xab   : > { %8913 = vmatpush3.bf16.msra.mxu0 %v9602_v25  ;;  %8946 = vmatprep.subr.bf16.mxu1 %v9603_v12 }
  0xac   : > { %8787 = vmatmul.mubr.bf16.gmra.mxu1 %v9820_v28  ;;  %8835 = vmatmul.mubr.bf16.gmra.mxu0 %v10061_v59  ;;  %v7499_v28 = vld [vmem:[%s9772_s12 + $0x181] sm:$0xff]  ;;  %v10206_v59 = vpack.c.bf16 %v7444_v32, %v7443_v21  ;;  %v7608_v21 = vld [vmem:[%s9772_s12 + $0x170] sm:$0xff] }
  0xad   : > { %8790 = vmatprep.mubr.bf16.mxu1 %v9839_v37  ;;  %8838 = vmatprep.mubr.bf16.mxu0 %v10080_v15  ;;  %v7581_v37 = vld [vmem:[%s9772_s12 + $0x30] sm:$0xff] }
  0xae   : > { %8994 = vmatprep.subr.bf16.mxu0 %v9608_v6 }
  0xb4   : > { %8791 = vmatmul.mubr.bf16.gmra.mxu1 %v9852_v44  ;;  %8839 = vmatmul.mubr.bf16.gmra.mxu0 %v10084_v17  ;;  %v7582_v44 = vld [vmem:[%s9772_s12 + $0x38] sm:$0xff]  ;;  %v9609_v17 = vld [vmem:[%s12144_s2 + $0x230] sm:$0xff]  }
  0xb5   : > { %8794 = vmatprep.mubr.bf16.mxu1 %v9871_v53  ;;  %8842 = vmatprep.mubr.bf16.mxu0 %v10100_v41  ;;  %v1763_v53 = vpack.c.bf16 %v7500_v57, %v7499_v28  ;;  %v2489_v13 = vpack.c.bf16 %v7582_v44, %v7581_v37  ;;  %v9616_v41 = vld [vmem:[%s12144_s2 + $0x1c0] sm:$0xff]  }
  0xbc   : > { %8795 = vmatmul.mubr.bf16.gmra.mxu1 %v9884_v60  ;;  %8843 = vmatmul.mubr.bf16.gmra.mxu0 %v10104_v43  ;;  %v7584_v60 = vld [vmem:[%s9772_s12 + $0x50] sm:$0xff]  ;;  %v9618_v43 = vld [vmem:[%s12144_s2 + $0x200] sm:$0xff]  }
  0xbd   : > { %8798 = vmatprep.mubr.bf16.mxu1 %v9905_v8  ;;  %8846 = vmatprep.mubr.bf16.mxu0 %v10116_v1  ;;  %v2490_v15 = vpack.c.bf16 %v7584_v60, %v7583_v14  ;;  %v9604_v8 = vld [vmem:[%s12144_s2 + $0x1f0] sm:$0xff]   ;;  %v2498_v1 = vpack.c.bf16 %v7600_v52, %v7599_v47  ;;  %v7555_v14 = vld [vmem:[%s9772_s12 + $0x182] sm:$0xff] }
  0xbe   : > { %v7556_v60 = vld [vmem:[%s9772_s12 + $0x18a] sm:$0xff] }
  0xbf   : > { %v7698_v47 = vld [vmem:[%s9772_s12 + $0x6a] sm:$0xff] }
  0xc4   : > { %8799 = vmatmul.mubr.bf16.gmra.mxu1 %v10206_v59  ;;  %8847 = vmatmul.mubr.bf16.gmra.mxu0 %v1763_v53 }
  0xc5   : > { %8866 = vmatprep.mubr.bf16.mxu1 %v9934_v30  ;;  %8914 = vmatprep.mubr.bf16.mxu0 %v2489_v13  ;;  %v9605_v30 = vld [vmem:[%s12144_s2 + $0x1e8] sm:$0xff]  }
  0xcc   : > { %8867 = vmatmul.mubr.bf16.vlgmr.msra.gmra.mxu1 %v9941_v33  ;;  %8915 = vmatmul.mubr.bf16.vlgmr.msra.gmra.mxu0 %v2490_v15  ;;  %v9611_v33 = vld [vmem:[%s12144_s2 + $0x228] sm:$0xff]   ;;  %v7611_v15 = vld [vmem:[%s9772_s12 + $0x198] sm:$0xff] }
  0xcd   : > { %8947 = vmatpush3.bf16.msra.mxu1 %v9603_v12  ;;  %8870 = vmatprep.mubr.bf16.mxu1 %v9963_v49  ;;  %v9606_v49 = vld [vmem:[%s12144_s2 + $0x1e0] sm:$0xff]  }
  0xce   : > { %8948 = vmatprep.subr.bf16.mxu1 %v9604_v8  ;;  %8918 = vmatprep.mubr.bf16.mxu0 %v9854_v45  ;;  %v9612_v45 = vld [vmem:[%s12144_s2 + $0x220] sm:$0xff]  }
  0xcf   : > { %8995 = vmatpush3.bf16.msra.mxu0 %v9608_v6  ;;  %v7607_v6 = vld [vmem:[%s9772_s12 + $0x168] sm:$0xff] }
  0xd0   : > { %8996 = vmatprep.subr.bf16.mxu0 %v9609_v17  ;;  %v2502_v37 = vpack.c.bf16 %v7608_v21, %v7607_v6  ;;  %v7644_v21 = vld [vmem:[%s9772_s12 + $0x81] sm:$0xff] }
  0xd1   : > { %8949 = vmatpush3.bf16.msra.mxu1 %v9604_v8  ;;  %v7612_v8 = vld [vmem:[%s9772_s12 + $0x1a0] sm:$0xff] }
  0xd2   : > { %8950 = vmatprep.subr.bf16.mxu1 %v9605_v30 }
  0xd3   : > { %8997 = vmatpush3.bf16.msra.mxu0 %v9609_v17  ;;  %v7637_v17 = vld [vmem:[%s9772_s12 + $0x31] sm:$0xff] }
  0xd4   : > { %8871 = vmatmul.mubr.bf16.gmra.mxu1 %v9967_v51  ;;  %8919 = vmatmul.mubr.bf16.gmra.mxu0 %v9873_v54  ;;  %v9607_v51 = vld [vmem:[%s12144_s2 + $0x1d8] sm:$0xff]   ;;  %v2495_v54 = vpack.c.bf16 %v7594_v20, %v7593_v19 }
  0xd5   : > { %8874 = vmatprep.mubr.bf16.mxu1 %v9995_v5  ;;  %8922 = vmatprep.mubr.bf16.mxu0 %v9887_v62  ;;  %v9614_v62 = vld [vmem:[%s12144_s2 + $0x218] sm:$0xff]   ;;  %v9610_v5 = vld [vmem:[%s12144_s2 + $0x1d0] sm:$0xff]  }
  0xd6   : > { %8951 = vmatpush3.bf16.msra.mxu1 %v9605_v30  ;;  %8998 = vmatprep.subr.bf16.mxu0 %v9611_v33 }
  0xd7   : > { %8952 = vmatprep.subr.bf16.mxu1 %v9606_v49  ;;  %8999 = vmatpush3.bf16.msra.mxu0 %v9611_v33 }
  0xd8   : > { %9000 = vmatprep.subr.bf16.mxu0 %v9612_v45 }
  0xda   : > { %8953 = vmatpush3.bf16.msra.mxu1 %v9606_v49  ;;  %v7638_v49 = vld [vmem:[%s9772_s12 + $0x39] sm:$0xff] }
  0xdb   : > { %8954 = vmatprep.subr.bf16.mxu1 %v9607_v51  ;;  %9001 = vmatpush3.bf16.msra.mxu0 %v9612_v45  ;;  %v7693_v45 = vld [vmem:[%s9772_s12 + $0x32] sm:$0xff] }
  0xdc   : > { %8875 = vmatmul.mubr.bf16.gmra.mxu1 %v9999_v10  ;;  %8923 = vmatmul.mubr.bf16.gmra.mxu0 %v9907_v9  ;;  %v9613_v10 = vld [vmem:[%s12144_s2 + $0x1c8] sm:$0xff]   ;;  %v2496_v9 = vpack.c.bf16 %v7596_v35, %v7595_v24 }
  0xdd   : > { %8878 = vmatprep.mubr.bf16.mxu1 %v10027_v26  ;;  %8926 = vmatprep.mubr.bf16.mxu0 %v2495_v54  ;;  %v2497_v26 = vpack.c.bf16 %v7598_v39, %v7597_v36  ;;  %v7639_v35 = vld [vmem:[%s9772_s12 + $0x49] sm:$0xff]  ;;  %v7640_v36 = vld [vmem:[%s9772_s12 + $0x51] sm:$0xff] }
  0xde   : > { %8955 = vmatpush3.bf16.msra.mxu1 %v9607_v51  ;;  %9002 = vmatprep.subr.bf16.mxu0 %v9614_v62  ;;  %v2859_v51 = vpack.c.bf16 %v7638_v49, %v7637_v17  ;;  %v7695_v39 = vld [vmem:[%s9772_s12 + $0x4a] sm:$0xff]  ;;  %v7646_v17 = vld [vmem:[%s9772_s12 + $0x99] sm:$0xff] }
  0xdf   : > { %8956 = vmatprep.subr.bf16.mxu1 %v9610_v5  ;;  %9003 = vmatpush3.bf16.msra.mxu0 %v9614_v62 }
  0xe0   : > { %9004 = vmatprep.subr.bf16.mxu0 %v9615_v23 }
  0xe2   : > { %8957 = vmatpush3.bf16.msra.mxu1 %v9610_v5 }
  0xe3   : > { %8958 = vmatprep.subr.bf16.mxu1 %v9613_v10  ;;  %9005 = vmatpush3.bf16.msra.mxu0 %v9615_v23 }
  0xe4   : > { %8879 = vmatmul.mubr.bf16.gmra.mxu1 %v10031_v34  ;;  %8927 = vmatmul.mubr.bf16.gmra.mxu0 %v2496_v9  ;;  %v10279_v34 = vld [vmem:[%s12145_s3 + $0x38] sm:$0xff]  }
  0xe5   : > { %8882 = vmatprep.mubr.bf16.mxu1 %v10059_v58  ;;  %8930 = vmatprep.mubr.bf16.mxu0 %v2497_v26  ;;  %v2499_v58 = vpack.c.bf16 %v7602_v0, %v7601_v55  ;;  %v2860_v0 = vpack.c.bf16 %v7640_v36, %v7639_v35 }
  0xe6   : > { %8959 = vmatpush3.bf16.msra.mxu1 %v9613_v10  ;;  %9006 = vmatprep.subr.bf16.mxu0 %v9617_v40  ;;  %v7696_v10 = vld [vmem:[%s9772_s12 + $0x52] sm:$0xff] }
  0xe7   : > { %8960 = vmatprep.subr.bf16.mxu1 %v9616_v41  ;;  %9007 = vmatpush3.bf16.msra.mxu0 %v9617_v40  ;;  %v7641_v40 = vld [vmem:[%s9772_s12 + $0x61] sm:$0xff] }
  0xe8   : > { %9008 = vmatprep.subr.bf16.mxu0 %v9618_v43 }
  0xea   : > { %8961 = vmatpush3.bf16.msra.mxu1 %v9616_v41  ;;  %v7642_v41 = vld [vmem:[%s9772_s12 + $0x69] sm:$0xff] }
  0xeb   : > { %9009 = vmatpush3.bf16.msra.mxu0 %v9618_v43  ;;  %9042 = vmatprep.subr.bf16.mxu1 %v10279_v34  ;;  %v7697_v43 = vld [vmem:[%s9772_s12 + $0x62] sm:$0xff] }
  0xec   : > { %v10287_v11 = vpop.f32.mrf.mxu1  ;;  %8883 = vmatmul.mubr.bf16.gmra.mxu1 %v10063_v61  ;;  %v10290_v22 = vpop.f32.mrf.mxu0  ;;  %8931 = vmatmul.mubr.bf16.gmra.mxu0 %v2498_v1  ;;  %v3230_v1 = vpack.c.bf16 %v7696_v10, %v7695_v39  ;;  %v3231_v50 = vpack.c.bf16 %v7698_v47, %v7697_v43 }
  0xed   : > { %8886 = vmatprep.mubr.bf16.mxu1 %v10082_v16  ;;  %8934 = vmatprep.mubr.bf16.mxu0 %v2499_v58  ;;  %v2861_v58 = vpack.c.bf16 %v7642_v41, %v7641_v40 }
  0xee   : > { %v10295_v38 = vpop.f32.mrf.mxu1  ;;  %v10297_v31 = vpop.f32.mrf.mxu0  ;;  %9090 = vmatprep.subr.bf16.mxu0 %v10284_v3 }
  0xf0   : > { %v10302_v4 = vpop.f32.mrf.mxu1  ;;  %v10304_v61 = vpop.f32.mrf.mxu0 }
  0xf2   : > { %v10306_v16 = vpop.f32.mrf.mxu1  ;;  %v10308_v7 = vpop.f32.mrf.mxu0 }
  0xf4   : > { %v10310_v25 = vpop.f32.mrf.mxu1  ;;  %8887 = vmatmul.mubr.bf16.gmra.mxu1 %v10086_v18  ;;  %v10313_v12 = vpop.f32.mrf.mxu0  ;;  %8935 = vmatmul.mubr.bf16.gmra.mxu0 %v2500_v56  ;;  %v7643_v56 = vld [vmem:[%s9772_s12 + $0x79] sm:$0xff] }
  0xf5   : > { %8890 = vmatprep.mubr.bf16.mxu1 %v10102_v42  ;;  %8938 = vmatprep.mubr.bf16.mxu0 %v2501_v63  ;;  %v2862_v36 = vpack.c.bf16 %v7644_v21, %v7643_v56  ;;  %v7648_v56 = vld [vmem:[%s9772_s12 + $0xb1] sm:$0xff] }
  0xf6   : > { %v10318_v32 = vpop.f32.mrf.mxu1  ;;  %v10320_v28 = vpop.f32.mrf.mxu0  ;;  %v7703_v21 = vld [vmem:[%s9772_s12 + $0xaa] sm:$0xff] }
  0xf8   : > { %v10322_v57 = vpop.f32.mrf.mxu1  ;;  %v10324_v18 = vpop.f32.mrf.mxu0 }
  0xfa   : > { %v10326_v44 = vpop.f32.mrf.mxu1  ;;  %v10328_v42 = vpop.f32.mrf.mxu0 }
  0xfc   : > { %v10330_v53 = vpop.f32.mrf.mxu1  ;;  %8891 = vmatmul.mubr.bf16.gmra.mxu1 %v10106_v46  ;;  %v10333_v13 = vpop.f32.mrf.mxu0  ;;  %8939 = vmatmul.mubr.bf16.gmra.mxu0 %v2502_v37  ;;  %v7694_v46 = vld [vmem:[%s9772_s12 + $0x3a] sm:$0xff] }
  0xfd   : > { %8894 = vmatprep.mubr.bf16.mxu1 %v10118_v2  ;;  %8942 = vmatprep.mubr.bf16.mxu0 %v10206_v59  ;;  %v10353_v2 = vpack.c.bf16 %v7556_v60, %v7555_v14  ;;  %v2504_v59 = vpack.c.bf16 %v7612_v8, %v7611_v15  ;;  %v3229_v54 = vpack.c.bf16 %v7694_v46, %v7693_v45  ;;  %v7699_v37 = vld [vmem:[%s9772_s12 + $0x7a] sm:$0xff]  ;;  %v9625_v14 = vld [vmem:[%s12145_s3 + $0x70] sm:$0xff]   ;;  %v7700_v15 = vld [vmem:[%s9772_s12 + $0x82] sm:$0xff] }
  0xfe   : > { %v10342_v30 = vpop.f32.mrf.mxu1  ;;  %v10344_v33 = vpop.f32.mrf.mxu0  ;;  %v7645_v8 = vld [vmem:[%s9772_s12 + $0x91] sm:$0xff]  ;;  %v9621_v46 = vld [vmem:[%s12145_s3 + $0x28] sm:$0xff]   ;;  %v3232_v39 = vpack.c.bf16 %v7700_v15, %v7699_v37 }
  0xff   : > { %v2863_v41 = vpack.c.bf16 %v7646_v17, %v7645_v8  ;;  %v7704_v37 = vld [vmem:[%s9772_s12 + $0xb2] sm:$0xff]  ;;  %v7650_v8 = vld [vmem:[%s9772_s12 + $0xc9] sm:$0xff] }
 0x100   : > { %v10349_v19 = vpop.f32.mrf.mxu1  ;;  %v10351_v20 = vpop.f32.mrf.mxu0  ;;  %v7705_v17 = vld [vmem:[%s9772_s12 + $0xc2] sm:$0xff] }
 0x102   : > { %v10355_v62 = vpop.f32.mrf.mxu1  ;;  %v10357_v5 = vpop.f32.mrf.mxu0 }
 0x104   : > { %v10359_v23 = vpop.f32.mrf.mxu1  ;;  %8895 = vmatmul.mubr.bf16.gmra.mxu1 %v10353_v2  ;;  %v10362_v24 = vpop.f32.mrf.mxu0  ;;  %8943 = vmatmul.mubr.bf16.gmra.mxu0 %v2504_v59  ;;  %v7701_v59 = vld [vmem:[%s9772_s12 + $0x92] sm:$0xff] }
 0x105   : > { %8962 = vmatprep.mubr.bf16.mxu1 %v2859_v51  ;;  %9010 = vmatprep.mubr.bf16.mxu0 %v3229_v54  ;;  %v7702_v51 = vld [vmem:[%s9772_s12 + $0x9a] sm:$0xff] }
 0x106   : > { %v10368_v9 = vpop.f32.mrf.mxu1  ;;  %v10370_v26 = vpop.f32.mrf.mxu0  ;;  %v3233_v43 = vpack.c.bf16 %v7702_v51, %v7701_v59 }
 0x108   : > { %v10376_v52 = vpop.f32.mrf.mxu1  ;;  %v10378_v55 = vpop.f32.mrf.mxu0 }
 0x10a   : > { %v10380_v29 = vpop.f32.mrf.mxu1  ;;  %v10382_v27 = vpop.f32.mrf.mxu0 }
 0x10c   : > { %v8676_v63 = vpop.f32.mrf.mxu1  ;;  %8963 = vmatmul.mubr.bf16.vlgmr.msra.gmra.mxu1 %v2860_v0  ;;  %v8724_v6 = vpop.f32.mrf.mxu0  ;;  %9011 = vmatmul.mubr.bf16.vlgmr.msra.gmra.mxu0 %v3230_v1 }
 0x10d   : > { %v913_v60 = vadd.f32 %v8676_v63, %v10290_v22  ;;  %9043 = vmatpush3.bf16.msra.mxu1 %v10279_v34  ;;  %8966 = vmatprep.mubr.bf16.mxu1 %v2861_v58 }
 0x10e   : > { %v752_v49 = vpop.f32.mrf.mxu1  ;;  %v1122_v45 = vpop.f32.mrf.mxu0  ;;  %9044 = vmatprep.subr.bf16.mxu1 %v9620_v48  ;;  %9014 = vmatprep.mubr.bf16.mxu0 %v3231_v50  ;;  %v7647_v50 = vld [vmem:[%s9772_s12 + $0xa9] sm:$0xff] }
 0x10f   : > { %v911_v54 = vadd.f32 %v752_v49, %v10297_v31  ;;  %v10404_v35 = vadd.f32 %v8724_v6, %v913_v60  ;;  %9091 = vmatpush3.bf16.msra.mxu0 %v10284_v3  ;;  %v9627_v3 = vld [vmem:[%s12145_s3 + $0x68] sm:$0xff]  }
 0x110   : > { %v8677_v34 = vpop.f32.mrf.mxu1  ;;  %v8725_v22 = vpop.f32.mrf.mxu0  ;;  %9092 = vmatprep.subr.bf16.mxu0 %v9625_v14  ;;  %v7706_v49 = vld [vmem:[%s9772_s12 + $0xca] sm:$0xff] }
 0x111   : > { %v914_v10 = vadd.f32 %v8677_v34, %v10304_v61  ;;  %v10408_v40 = vadd.f32 %v1122_v45, %v911_v54  ;;  %9045 = vmatpush3.bf16.msra.mxu1 %v9620_v48  ;;  %v9622_v61 = vld [vmem:[%s12145_s3 + $0x20] sm:$0xff]   ;;  %v2864_v34 = vpack.c.bf16 %v7648_v56, %v7647_v50 }
 0x112   : > { %v755_v47 = vpop.f32.mrf.mxu1  ;;  %v1125_v31 = vpop.f32.mrf.mxu0  ;;  %9046 = vmatprep.subr.bf16.mxu1 %v9621_v46  ;;  %v7707_v56 = vld [vmem:[%s9772_s12 + $0xda] sm:$0xff] }
 0x113   : > { %v912_v0 = vadd.f32 %v755_v47, %v10308_v7  ;;  %v10414_v1 = vadd.f32 %v8725_v22, %v914_v10  ;;  %9093 = vmatpush3.bf16.msra.mxu0 %v9625_v14  ;;  %v9628_v7 = vld [vmem:[%s12145_s3 + $0x60] sm:$0xff]   ;;  %v3234_v22 = vpack.c.bf16 %v7704_v37, %v7703_v21 }
 0x114   : > { %v8680_v58 = vpop.f32.mrf.mxu1  ;;  %8967 = vmatmul.mubr.bf16.gmra.mxu1 %v2862_v36  ;;  %v8728_v48 = vpop.f32.mrf.mxu0  ;;  %9015 = vmatmul.mubr.bf16.gmra.mxu0 %v3232_v39  ;;  %v7649_v14 = vld [vmem:[%s9772_s12 + $0xc1] sm:$0xff] }
 0x115   : > { %v917_v63 = vadd.f32 %v8680_v58, %v10313_v12  ;;  %v10425_v6 = vadd.f32 %v1125_v31, %v912_v0  ;;  %8970 = vmatprep.mubr.bf16.mxu1 %v2863_v41  ;;  %9018 = vmatprep.mubr.bf16.mxu0 %v3233_v43  ;;  %v9623_v12 = vld [vmem:[%s12145_s3 + $0x18] sm:$0xff]   ;;  %v2865_v39 = vpack.c.bf16 %v7650_v8, %v7649_v14  ;;  %v9631_v58 = vld [vmem:[%s12145_s3 + $0x50] sm:$0xff]  }
 0x116   : > { %v768_v60 = vpop.f32.mrf.mxu1  ;;  %v1138_v15 = vpop.f32.mrf.mxu0  ;;  %9047 = vmatpush3.bf16.msra.mxu1 %v9621_v46  ;;  %9094 = vmatprep.subr.bf16.mxu0 %v9627_v3  ;;  %v9630_v43 = vld [vmem:[%s12145_s3 + $0x58] sm:$0xff]  }
 0x117   : > { %v915_v45 = vadd.f32 %v768_v60, %v10320_v28  ;;  %v10434_v59 = vadd.f32 %v8728_v48, %v917_v63  ;;  %9048 = vmatprep.subr.bf16.mxu1 %v9622_v61  ;;  %9095 = vmatpush3.bf16.msra.mxu0 %v9627_v3  ;;  %v3235_v28 = vpack.c.bf16 %v7706_v49, %v7705_v17  ;;  %v7653_v63 = vld [vmem:[%s9772_s12 + $0xf1] sm:$0xff]  ;;  %v7654_v14 = vld [vmem:[%s9772_s12 + $0xf9] sm:$0xff] }
 0x118   : > { %v8681_v51 = vpop.f32.mrf.mxu1  ;;  %v8729_v54 = vpop.f32.mrf.mxu0  ;;  %9096 = vmatprep.subr.bf16.mxu0 %v9628_v7  ;;  %v7709_v60 = vld [vmem:[%s9772_s12 + $0xf2] sm:$0xff] }
 0x119   : > { %v918_v46 = vadd.f32 %v8681_v51, %v10324_v18  ;;  %v10440_v36 = vadd.f32 %v1138_v15, %v915_v45  ;;  %v9626_v18 = vld [vmem:[%s12145_s3 + $0x10] sm:$0xff]   ;;  %v7710_v15 = vld [vmem:[%s9772_s12 + $0xfa] sm:$0xff] }
 0x11a   : > { %v771_v10 = vpop.f32.mrf.mxu1  ;;  %v1141_v41 = vpop.f32.mrf.mxu0  ;;  %9049 = vmatpush3.bf16.msra.mxu1 %v9622_v61  ;;  %v7651_v61 = vld [vmem:[%s9772_s12 + $0xd9] sm:$0xff] }
 0x11b   : > { %v916_v47 = vadd.f32 %v771_v10, %v10328_v42  ;;  %v10446_v31 = vadd.f32 %v8729_v54, %v918_v46  ;;  %9050 = vmatprep.subr.bf16.mxu1 %v9623_v12  ;;  %9097 = vmatpush3.bf16.msra.mxu0 %v9628_v7  ;;  %v7652_v42 = vld [vmem:[%s9772_s12 + $0xe1] sm:$0xff] }
 0x11c   : > { %v8684_v3 = vpop.f32.mrf.mxu1  ;;  %8971 = vmatmul.mubr.bf16.gmra.mxu1 %v2864_v34  ;;  %v8732_v0 = vpop.f32.mrf.mxu0  ;;  %9019 = vmatmul.mubr.bf16.gmra.mxu0 %v3234_v22  ;;  %v7708_v7 = vld [vmem:[%s9772_s12 + $0xe2] sm:$0xff]  ;;  %v2866_v51 = vpack.c.bf16 %v7652_v42, %v7651_v61  ;;  %v7711_v42 = vld [vmem:[%s9772_s12 + $0x10a] sm:$0xff] }
 0x11d   : > { %v921_v48 = vadd.f32 %v8684_v3, %v10333_v13  ;;  %v10457_v50 = vadd.f32 %v1141_v41, %v916_v47  ;;  %8974 = vmatprep.mubr.bf16.mxu1 %v2865_v39  ;;  %9022 = vmatprep.mubr.bf16.mxu0 %v3235_v28  ;;  %v9629_v13 = vld [vmem:[%s12145_s3 + $0x8] sm:$0xff]   ;;  %v3236_v54 = vpack.c.bf16 %v7708_v7, %v7707_v56  ;;  %v9634_v3 = vld [vmem:[%s12145_s3 + $0x40] sm:$0xff]  }
 0x11e   : > { %v784_v21 = vpop.f32.mrf.mxu1  ;;  %v1154_v37 = vpop.f32.mrf.mxu0  ;;  %9051 = vmatpush3.bf16.msra.mxu1 %v9623_v12  ;;  %9098 = vmatprep.subr.bf16.mxu0 %v9630_v43  ;;  %v2867_v12 = vpack.c.bf16 %v7654_v14, %v7653_v63  ;;  %v9633_v28 = vld [vmem:[%s12145_s3 + $0x48] sm:$0xff]  }
 0x11f   : > { %v919_v8 = vadd.f32 %v784_v21, %v10344_v33  ;;  %v10466_v17 = vadd.f32 %v8732_v0, %v921_v48  ;;  %9052 = vmatprep.subr.bf16.mxu1 %v9626_v18  ;;  %9099 = vmatpush3.bf16.msra.mxu0 %v9630_v43  ;;  %v3237_v33 = vpack.c.bf16 %v7710_v15, %v7709_v60  ;;  %v7657_v48 = vld [vmem:[%s9772_s12 + $0x121] sm:$0xff]  ;;  %v7658_v63 = vld [vmem:[%s9772_s12 + $0x129] sm:$0xff] }
 0x120   : > { %v8685_v49 = vpop.f32.mrf.mxu1  ;;  %v8733_v45 = vpop.f32.mrf.mxu0  ;;  %9100 = vmatprep.subr.bf16.mxu0 %v9631_v58  ;;  %v7713_v21 = vld [vmem:[%s9772_s12 + $0x122] sm:$0xff] }
 0x121   : > { %v922_v34 = vadd.f32 %v8685_v49, %v10351_v20  ;;  %v10472_v22 = vadd.f32 %v1154_v37, %v919_v8  ;;  %v9632_v20 = vld [vmem:[%s12145_s3] sm:$0xff]   ;;  %v7714_v37 = vld [vmem:[%s9772_s12 + $0x12a] sm:$0xff] }
 0x122   : > { %v787_v46 = vpop.f32.mrf.mxu1  ;;  %v1157_v39 = vpop.f32.mrf.mxu0  ;;  %9053 = vmatpush3.bf16.msra.mxu1 %v9626_v18  ;;  %v7655_v18 = vld [vmem:[%s9772_s12 + $0x109] sm:$0xff] }
 0x123   : > { %v920_v10 = vadd.f32 %v787_v46, %v10357_v5  ;;  %v10478_v41 = vadd.f32 %v8733_v45, %v922_v34  ;;  %9054 = vmatprep.subr.bf16.mxu1 %v9629_v13  ;;  %9101 = vmatpush3.bf16.msra.mxu0 %v9631_v58  ;;  %v7656_v5 = vld [vmem:[%s9772_s12 + $0x111] sm:$0xff] }
 0x124   : > { %v8688_v43 = vpop.f32.mrf.mxu1  ;;  %8975 = vmatmul.mubr.bf16.gmra.mxu1 %v2866_v51  ;;  %v8736_v47 = vpop.f32.mrf.mxu0  ;;  %9023 = vmatmul.mubr.bf16.gmra.mxu0 %v3236_v54  ;;  %v7712_v58 = vld [vmem:[%s9772_s12 + $0x112] sm:$0xff]  ;;  %v2868_v49 = vpack.c.bf16 %v7656_v5, %v7655_v18  ;;  %v3239_v54 = vpack.c.bf16 %v7714_v37, %v7713_v21  ;;  %v7716_v18 = vld [vmem:[%s9772_s12 + $0x142] sm:$0xff] }
 0x125   : > { %v925_v0 = vadd.f32 %v8688_v43, %v10362_v24  ;;  %v10489_v61 = vadd.f32 %v1157_v39, %v920_v10  ;;  %8978 = vmatprep.mubr.bf16.mxu1 %v2867_v12  ;;  %9026 = vmatprep.mubr.bf16.mxu0 %v3237_v33  ;;  %v10503_v24 = vld [vmem:[%s12145_s3 + $0xb8] sm:$0xff]   ;;  %v3238_v45 = vpack.c.bf16 %v7712_v58, %v7711_v42 }
 0x126   : > { %v800_v56 = vpop.f32.mrf.mxu1  ;;  %v1170_v7 = vpop.f32.mrf.mxu0  ;;  %9055 = vmatpush3.bf16.msra.mxu1 %v9629_v13  ;;  %9102 = vmatprep.subr.bf16.mxu0 %v9633_v28  ;;  %v10511_v33 = vld [vmem:[%s12145_s3 + $0xf8] sm:$0xff]  }
 0x127   : > { %v923_v14 = vadd.f32 %v800_v56, %v10370_v26  ;;  %v10498_v60 = vadd.f32 %v8736_v47, %v925_v0  ;;  %9056 = vmatprep.subr.bf16.mxu1 %v9632_v20  ;;  %9103 = vmatpush3.bf16.msra.mxu0 %v9633_v28  ;;  %v2869_v26 = vpack.c.bf16 %v7658_v63, %v7657_v48  ;;  %v7659_v10 = vld [vmem:[%s9772_s12 + $0x139] sm:$0xff]  ;;  %v7661_v5 = vld [vmem:[%s9772_s12 + $0x151] sm:$0xff] }
 0x128   : > { %v8689_v15 = vpop.f32.mrf.mxu1  ;;  %v8737_v8 = vpop.f32.mrf.mxu0  ;;  %9104 = vmatprep.subr.bf16.mxu0 %v9634_v3  ;;  %v7662_v42 = vld [vmem:[%s9772_s12 + $0x159] sm:$0xff] }
 0x129   : > { %v926_v51 = vadd.f32 %v8689_v15, %v10378_v55  ;;  %v10506_v13 = vadd.f32 %v1170_v7, %v923_v14  ;;  %v7717_v58 = vld [vmem:[%s9772_s12 + $0x152] sm:$0xff]  ;;  %v7718_v48 = vld [vmem:[%s9772_s12 + $0x15a] sm:$0xff] }
 0x12a   : > { %v803_v34 = vpop.f32.mrf.mxu1  ;;  %v1173_v12 = vpop.f32.mrf.mxu0  ;;  %9057 = vmatpush3.bf16.msra.mxu1 %v9632_v20  ;;  %v7660_v20 = vld [vmem:[%s9772_s12 + $0x141] sm:$0xff] }
 0x12b   : > { %v924_v46 = vadd.f32 %v803_v34, %v10382_v27  ;;  %v10514_v55 = vadd.f32 %v8737_v8, %v926_v51  ;;  %9105 = vmatpush3.bf16.msra.mxu0 %v9634_v3  ;;  %9138 = vmatprep.subr.bf16.mxu1 %v10503_v24  ;;  %v7715_v27 = vld [vmem:[%s9772_s12 + $0x13a] sm:$0xff]  ;;  %v2870_v21 = vpack.c.bf16 %v7660_v20, %v7659_v10  ;;  %v7720_v10 = vld [vmem:[%s9772_s12 + $0x172] sm:$0xff] }
 0x12c   : > { %v8692_v39 = vpop.f32.mrf.mxu1  ;;  %8979 = vmatmul.mubr.bf16.gmra.mxu1 %v2868_v49  ;;  %v8740_v28 = vpop.f32.mrf.mxu0  ;;  %9027 = vmatmul.mubr.bf16.gmra.mxu0 %v3238_v45  ;;  %v3240_v37 = vpack.c.bf16 %v7716_v18, %v7715_v27  ;;  %v2871_v8 = vpack.c.bf16 %v7662_v42, %v7661_v5  ;;  %v3241_v49 = vpack.c.bf16 %v7718_v48, %v7717_v58  ;;  %v7666_v27 = vld [vmem:[%s9772_s12 + $0x189] sm:$0xff] }
 0x12d   : > { %v929_v43 = vadd.f32 %v8692_v39, %v10287_v11  ;;  %v10520_v47 = vadd.f32 %v1173_v12, %v924_v46  ;;  %8982 = vmatprep.mubr.bf16.mxu1 %v2869_v26  ;;  %9030 = vmatprep.mubr.bf16.mxu0 %v3239_v54  ;;  %v7664_v39 = vld [vmem:[%s9772_s12 + $0x171] sm:$0xff] }
 0x12e   : > { %v816_v3 = vpop.f32.mrf.mxu1  ;;  %v1186_v0 = vpop.f32.mrf.mxu0  ;;  %9186 = vmatprep.subr.bf16.mxu0 %v10511_v33 }
 0x12f   : > { %v927_v56 = vadd.f32 %v816_v3, %v10295_v38  ;;  %v10530_v7 = vadd.f32 %v8740_v28, %v929_v43  ;;  %v7719_v28 = vld [vmem:[%s9772_s12 + $0x16a] sm:$0xff]  ;;  %v7665_v43 = vld [vmem:[%s9772_s12 + $0x181] sm:$0xff] }
 0x130   : > { %v8693_v63 = vpop.f32.mrf.mxu1  ;;  %v8741_v11 = vpop.f32.mrf.mxu0  ;;  %v3242_v42 = vpack.c.bf16 %v7720_v10, %v7719_v28 }
 0x131   : > { %v930_v14 = vadd.f32 %v8693_v63, %v10302_v4  ;;  %v10533_v15 = vadd.f32 %v1186_v0, %v927_v56  ;;  %v7663_v4 = vld [vmem:[%s9772_s12 + $0x169] sm:$0xff]  ;;  %v2873_v56 = vpack.c.bf16 %v7666_v27, %v7665_v43 }
 0x132   : > { %v819_v45 = vpop.f32.mrf.mxu1  ;;  %v1189_v51 = vpop.f32.mrf.mxu0 }
 0x133   : > { %v928_v38 = vadd.f32 %v819_v45, %v10306_v16  ;;  %v10536_v26 = vadd.f32 %v8741_v11, %v930_v14  ;;  %v7667_v14 = vld [vmem:[%s9772_s12 + $0x199] sm:$0xff] }
 0x134   : > { %v8696_v54 = vpop.f32.mrf.mxu1  ;;  %8983 = vmatmul.mubr.bf16.gmra.mxu1 %v2870_v21  ;;  %v8744_v34 = vpop.f32.mrf.mxu0  ;;  %9031 = vmatmul.mubr.bf16.gmra.mxu0 %v3240_v37 }
 0x135   : > { %v933_v12 = vadd.f32 %v8696_v54, %v10310_v25  ;;  %v10540_v46 = vadd.f32 %v1189_v51, %v928_v38  ;;  %8986 = vmatprep.mubr.bf16.mxu1 %v2871_v8  ;;  %9034 = vmatprep.mubr.bf16.mxu0 %v3241_v49  ;;  %v2872_v25 = vpack.c.bf16 %v7664_v39, %v7663_v4  ;;  %v7668_v8 = vld [vmem:[%s9772_s12 + $0x1a1] sm:$0xff]  ;;  %v3937_v39 = vld [vmem:[%s10558_s18 + $0x9] sm:$0xff] }
 0x136   : > { %v832_v16 = vpop.f32.mrf.mxu1  ;;  %v1202_v20 = vpop.f32.mrf.mxu0  ;;  %v7723_v51 = vld [vmem:[%s9772_s12 + $0x19a] sm:$0xff]  ;;  %v3568_v4 = vld [vmem:[%s10558_s18 + $0x8] sm:$0xff] }
 0x137   : > { %v931_v18 = vadd.f32 %v832_v16, %v10318_v32  ;;  %v10548_v5 = vadd.f32 %v8744_v34, %v933_v12  ;;  %v3567_v38 = vld [vmem:[%s10558_s18] sm:$0xff] }
 0x138   : > { %v8697_v3 = vpop.f32.mrf.mxu1  ;;  %v8745_v0 = vpop.f32.mrf.mxu0  ;;  %v3936_v12 = vld [vmem:[%s10558_s18 + $0x1] sm:$0xff] }
 0x139   : > { %v934_v58 = vadd.f32 %v8697_v3, %v10322_v57  ;;  %v10551_v48 = vadd.f32 %v1202_v20, %v931_v18  ;;  %v2874_v20 = vpack.c.bf16 %v7668_v8, %v7667_v14  ;;  %v3599_v18 = vpack.c.bf16 %v3568_v4, %v3567_v38  ;;  %v3571_v8 = vld [vmem:[%s10558_s18 + $0x30] sm:$0xff] }
 0x13a   : > { %v835_v63 = vpop.f32.mrf.mxu1  ;;  %v1205_v11 = vpop.f32.mrf.mxu0  ;;  %v3968_v3 = vpack.c.bf16 %v3937_v39, %v3936_v12  ;;  %v3940_v38 = vld [vmem:[%s10558_s18 + $0x31] sm:$0xff] }
 0x13b   : > { %v932_v32 = vadd.f32 %v835_v63, %v10326_v44  ;;  %v10561_v21 = vadd.f32 %v8745_v0, %v934_v58  ;;  %v7724_v44 = vld [vmem:[%s9772_s12 + $0x1a2] sm:$0xff] }
 0x13c   : > { %v8700_v57 = vpop.f32.mrf.mxu1  ;;  %8987 = vmatmul.mubr.bf16.gmra.mxu1 %v2872_v25  ;;  %v8748_v37 = vpop.f32.mrf.mxu0  ;;  %9035 = vmatmul.mubr.bf16.gmra.mxu0 %v3242_v42  ;;  %v3244_v43 = vpack.c.bf16 %v7724_v44, %v7723_v51 }
 0x13d   : > { %v937_v49 = vadd.f32 %v8700_v57, %v10330_v53  ;;  %v10566_v45 = vadd.f32 %v1205_v11, %v932_v32  ;;  %8990 = vmatprep.mubr.bf16.mxu1 %v2873_v56  ;;  %9038 = vmatprep.mubr.bf16.mxu0 %v10353_v2  ;;  %v3570_v32 = vld [vmem:[%s10558_s18 + $0x20] sm:$0xff] }
 0x13e   : > { %v848_v54 = vpop.f32.mrf.mxu1  ;;  %v1218_v34 = vpop.f32.mrf.mxu0  ;;  %v3938_v57 = vld [vmem:[%s10558_s18 + $0x19] sm:$0xff] }
 0x13f   : > { %v935_v28 = vadd.f32 %v848_v54, %v10342_v30  ;;  %v10576_v10 = vadd.f32 %v8748_v37, %v937_v49  ;;  %v3572_v49 = vld [vmem:[%s10558_s18 + $0x38] sm:$0xff] }
 0x140   : > { %v8701_v16 = vpop.f32.mrf.mxu1  ;;  %v8749_v53 = vpop.f32.mrf.mxu0  ;;  %v3941_v54 = vld [vmem:[%s10558_s18 + $0x39] sm:$0xff] }
 0x141   : > { %v938_v27 = vadd.f32 %v8701_v16, %v10349_v19  ;;  %v10579_v2 = vadd.f32 %v1218_v34, %v935_v28  ;;  %v3569_v19 = vld [vmem:[%s10558_s18 + $0x18] sm:$0xff]  ;;  %v10603_v16 = vpack.c.bf16 %v3572_v49, %v3571_v8  ;;  %v3945_v8 = vld [vmem:[%s10558_s18 + $0x69] sm:$0xff] }
 0x142   : > { %v851_v0 = vpop.f32.mrf.mxu1  ;;  %v1221_v25 = vpop.f32.mrf.mxu0  ;;  %v10598_v4 = vpack.c.bf16 %v3570_v32, %v3569_v19  ;;  %v3943_v19 = vld [vmem:[%s10558_s18 + $0x51] sm:$0xff]  ;;  %v3576_v32 = vld [vmem:[%s10558_s18 + $0x68] sm:$0xff] }
 0x143   : > { %v936_v30 = vadd.f32 %v851_v0, %v10355_v62  ;;  %v10582_v42 = vadd.f32 %v8749_v53, %v938_v27  ;;  %v3939_v62 = vld [vmem:[%s10558_s18 + $0x21] sm:$0xff] }
 0x144   : > { %v8704_v58 = vpop.f32.mrf.mxu1  ;;  %8991 = vmatmul.mubr.bf16.gmra.mxu1 %v2874_v20  ;;  %v8752_v56 = vpop.f32.mrf.mxu0  ;;  %9039 = vmatmul.mubr.bf16.gmra.mxu0 %v3244_v43  ;;  %v3969_v12 = vpack.c.bf16 %v3939_v62, %v3938_v57  ;;  %v9636_v20 = vld [vmem:[%s12145_s3 + $0xb0] sm:$0xff]   ;;  %v3970_v43 = vpack.c.bf16 %v3941_v54, %v3940_v38 }
 0x145   : > { %v941_v63 = vadd.f32 %v8704_v58, %v10359_v23  ;;  %v10586_v11 = vadd.f32 %v1221_v25, %v936_v30  ;;  %9058 = vmatprep.mubr.bf16.mxu1 %v3599_v18  ;;  %9106 = vmatprep.mubr.bf16.mxu0 %v3968_v3  ;;  %v3573_v3 = vld [vmem:[%s10558_s18 + $0x48] sm:$0xff]  ;;  %v3574_v25 = vld [vmem:[%s10558_s18 + $0x50] sm:$0xff] }
 0x146   : > { %v864_v37 = vpop.f32.mrf.mxu1  ;;  %v1234_v14 = vpop.f32.mrf.mxu0  ;;  %v3942_v30 = vld [vmem:[%s10558_s18 + $0x49] sm:$0xff]  ;;  %v10635_v38 = vpack.c.bf16 %v3574_v25, %v3573_v3  ;;  %v3577_v3 = vld [vmem:[%s10558_s18 + $0x78] sm:$0xff] }
 0x147   : > { %v939_v51 = vadd.f32 %v864_v37, %v10368_v9  ;;  %v10594_v44 = vadd.f32 %v8752_v56, %v941_v63  ;;  %v9641_v58 = vld [vmem:[%s12145_s3 + $0xf0] sm:$0xff]   ;;  %v3575_v63 = vld [vmem:[%s10558_s18 + $0x60] sm:$0xff]  ;;  %v9637_v37 = vld [vmem:[%s12145_s3 + $0xa8] sm:$0xff]   ;;  %v3971_v54 = vpack.c.bf16 %v3943_v19, %v3942_v30 }
 0x148   : > { %v8705_v34 = vpop.f32.mrf.mxu1  ;;  %v8753_v23 = vpop.f32.mrf.mxu0  ;;  %v3946_v30 = vld [vmem:[%s10558_s18 + $0x79] sm:$0xff] }
 0x149   : > { %v942_v39 = vadd.f32 %v8705_v34, %v10376_v52  ;;  %v10601_v28 = vadd.f32 %v1234_v14, %v939_v51  ;;  %v3944_v14 = vld [vmem:[%s10558_s18 + $0x61] sm:$0xff] }
 0x14a   : > { %v867_v53 = vpop.f32.mrf.mxu1  ;;  %v1237_v9 = vpop.f32.mrf.mxu0 }
 0x14b   : > { %v940_v27 = vadd.f32 %v867_v53, %v10380_v29  ;;  %v10609_v18 = vadd.f32 %v8753_v23, %v942_v39 }
 0x14c   : > { %v8772_v52 = vpop.f32.mrf.mxu1  ;;  %9059 = vmatmul.mubr.bf16.vlgmr.msra.gmra.mxu1 %v10598_v4  ;;  %v8820_v0 = vpop.f32.mrf.mxu0  ;;  %9107 = vmatmul.mubr.bf16.vlgmr.msra.gmra.mxu0 %v3969_v12  ;;  %v10640_v12 = vpack.c.bf16 %v3576_v32, %v3575_v63  ;;  %v3580_v32 = vld [vmem:[%s10558_s18 + $0x98] sm:$0xff] }
 0x14d   : > { %v10618_v56 = vadd.f32 %v1237_v9, %v940_v27  ;;  %v1654_v29 = vadd.f32 %v8772_v52, %v10404_v35  ;;  %9139 = vmatpush3.bf16.msra.mxu1 %v10503_v24  ;;  %9062 = vmatprep.mubr.bf16.mxu1 %v10603_v16  ;;  %v3578_v52 = vld [vmem:[%s10558_s18 + $0x80] sm:$0xff] }
 0x14e   : > { %v1493_v57 = vpop.f32.mrf.mxu1  ;;  %v1863_v62 = vpop.f32.mrf.mxu0  ;;  %9140 = vmatprep.subr.bf16.mxu1 %v9636_v20  ;;  %9110 = vmatprep.mubr.bf16.mxu0 %v3970_v43 }
 0x14f   : > { %v1652_v49 = vadd.f32 %v1493_v57, %v10408_v40  ;;  %v10632_v35 = vadd.f32 %v8820_v0, %v1654_v29  ;;  %9187 = vmatpush3.bf16.msra.mxu0 %v10511_v33  ;;  %v3972_v40 = vpack.c.bf16 %v3945_v8, %v3944_v14  ;;  %v9643_v33 = vld [vmem:[%s12145_s3 + $0xe8] sm:$0xff]   ;;  %v3579_v29 = vld [vmem:[%s10558_s18 + $0x90] sm:$0xff] }
 0x150   : > { %v8773_v24 = vpop.f32.mrf.mxu1  ;;  %v8821_v51 = vpop.f32.mrf.mxu0  ;;  %9188 = vmatprep.subr.bf16.mxu0 %v9641_v58  ;;  %v3948_v57 = vld [vmem:[%s10558_s18 + $0x91] sm:$0xff] }
 0x151   : > { %v1655_v34 = vadd.f32 %v8773_v24, %v10414_v1  ;;  %v10638_v23 = vadd.f32 %v1863_v62, %v1652_v49  ;;  %9141 = vmatpush3.bf16.msra.mxu1 %v9636_v20  ;;  %v9638_v20 = vld [vmem:[%s12145_s3 + $0xa0] sm:$0xff]  }
 0x152   : > { %v1496_v39 = vpop.f32.mrf.mxu1  ;;  %v1866_v53 = vpop.f32.mrf.mxu0  ;;  %9142 = vmatprep.subr.bf16.mxu1 %v9637_v37  ;;  %v3949_v62 = vld [vmem:[%s10558_s18 + $0x99] sm:$0xff] }
 0x153   : > { %v1653_v9 = vadd.f32 %v1496_v39, %v10425_v6  ;;  %v10646_v1 = vadd.f32 %v8821_v51, %v1655_v34  ;;  %9189 = vmatpush3.bf16.msra.mxu0 %v9641_v58  ;;  %v9644_v6 = vld [vmem:[%s12145_s3 + $0xe0] sm:$0xff]   ;;  %v10673_v51 = vpack.c.bf16 %v3578_v52, %v3577_v3  ;;  %v3582_v3 = vld [vmem:[%s10558_s18 + $0xb0] sm:$0xff] }
 0x154   : > { %v8776_v43 = vpop.f32.mrf.mxu1  ;;  %9063 = vmatmul.mubr.bf16.gmra.mxu1 %v10635_v38  ;;  %v8824_v27 = vpop.f32.mrf.mxu0  ;;  %9111 = vmatmul.mubr.bf16.gmra.mxu0 %v3971_v54  ;;  %v3947_v58 = vld [vmem:[%s10558_s18 + $0x81] sm:$0xff]  ;;  %v9647_v52 = vld [vmem:[%s12145_s3 + $0xd0] sm:$0xff]  }
 0x155   : > { %v1658_v0 = vadd.f32 %v8776_v43, %v10434_v59  ;;  %v10658_v25 = vadd.f32 %v1866_v53, %v1653_v9  ;;  %9066 = vmatprep.mubr.bf16.mxu1 %v10640_v12  ;;  %9114 = vmatprep.mubr.bf16.mxu0 %v3972_v40  ;;  %v9639_v59 = vld [vmem:[%s12145_s3 + $0x98] sm:$0xff]   ;;  %v3973_v54 = vpack.c.bf16 %v3947_v58, %v3946_v30 }
 0x156   : > { %v1509_v19 = vpop.f32.mrf.mxu1  ;;  %v1879_v63 = vpop.f32.mrf.mxu0  ;;  %9143 = vmatpush3.bf16.msra.mxu1 %v9637_v37  ;;  %9190 = vmatprep.subr.bf16.mxu0 %v9643_v33  ;;  %v3974_v40 = vpack.c.bf16 %v3949_v62, %v3948_v57  ;;  %v3951_v58 = vld [vmem:[%s10558_s18 + $0xb1] sm:$0xff]  ;;  %v3952_v57 = vld [vmem:[%s10558_s18 + $0xc1] sm:$0xff]  ;;  %v3953_v62 = vld [vmem:[%s10558_s18 + $0xc9] sm:$0xff] }
 0x157   : > { %v1656_v14 = vadd.f32 %v1509_v19, %v10440_v36  ;;  %v10668_v8 = vadd.f32 %v8824_v27, %v1658_v0  ;;  %9144 = vmatprep.subr.bf16.mxu1 %v9638_v20  ;;  %9191 = vmatpush3.bf16.msra.mxu0 %v9643_v33  ;;  %v10678_v36 = vpack.c.bf16 %v3580_v32, %v3579_v29  ;;  %v9646_v33 = vld [vmem:[%s12145_s3 + $0xd8] sm:$0xff]   ;;  %v3583_v29 = vld [vmem:[%s10558_s18 + $0xc0] sm:$0xff]  ;;  %v3584_v32 = vld [vmem:[%s10558_s18 + $0xc8] sm:$0xff] }
 0x158   : > { %v8777_v49 = vpop.f32.mrf.mxu1  ;;  %v8825_v24 = vpop.f32.mrf.mxu0  ;;  %9192 = vmatprep.subr.bf16.mxu0 %v9644_v6 }
 0x159   : > { %v1659_v37 = vadd.f32 %v8777_v49, %v10446_v31  ;;  %v10676_v34 = vadd.f32 %v1879_v63, %v1656_v14  ;;  %v9642_v31 = vld [vmem:[%s12145_s3 + $0x90] sm:$0xff]  }
 0x15a   : > { %v1512_v39 = vpop.f32.mrf.mxu1  ;;  %v1882_v53 = vpop.f32.mrf.mxu0  ;;  %9145 = vmatpush3.bf16.msra.mxu1 %v9638_v20 }
 0x15b   : > { %v1657_v9 = vadd.f32 %v1512_v39, %v10457_v50  ;;  %v10684_v43 = vadd.f32 %v8825_v24, %v1659_v37  ;;  %9146 = vmatprep.subr.bf16.mxu1 %v9639_v59  ;;  %9193 = vmatpush3.bf16.msra.mxu0 %v9644_v6  ;;  %v3581_v50 = vld [vmem:[%s10558_s18 + $0xa8] sm:$0xff] }
 0x15c   : > { %v8780_v27 = vpop.f32.mrf.mxu1  ;;  %9067 = vmatmul.mubr.bf16.gmra.mxu1 %v10673_v51  ;;  %v8828_v20 = vpop.f32.mrf.mxu0  ;;  %9115 = vmatmul.mubr.bf16.gmra.mxu0 %v3973_v54  ;;  %v3950_v6 = vld [vmem:[%s10558_s18 + $0xa9] sm:$0xff]  ;;  %v10711_v37 = vpack.c.bf16 %v3582_v3, %v3581_v50 }
 0x15d   : > { %v1662_v0 = vadd.f32 %v8780_v27, %v10466_v17  ;;  %v10696_v30 = vadd.f32 %v1882_v53, %v1657_v9  ;;  %9070 = vmatprep.mubr.bf16.mxu1 %v10678_v36  ;;  %9118 = vmatprep.mubr.bf16.mxu0 %v3974_v40  ;;  %v9645_v17 = vld [vmem:[%s12145_s3 + $0x88] sm:$0xff]   ;;  %v3975_v40 = vpack.c.bf16 %v3951_v58, %v3950_v6  ;;  %v9650_v6 = vld [vmem:[%s12145_s3 + $0xc0] sm:$0xff]  }
 0x15e   : > { %v1525_v19 = vpop.f32.mrf.mxu1  ;;  %v1895_v63 = vpop.f32.mrf.mxu0  ;;  %9147 = vmatpush3.bf16.msra.mxu1 %v9639_v59  ;;  %9194 = vmatprep.subr.bf16.mxu0 %v9646_v33  ;;  %v3976_v53 = vpack.c.bf16 %v3953_v62, %v3952_v57  ;;  %v3588_v62 = vld [vmem:[%s10558_s18 + $0xf8] sm:$0xff] }
 0x15f   : > { %v1660_v14 = vadd.f32 %v1525_v19, %v10472_v22  ;;  %v10706_v49 = vadd.f32 %v8828_v20, %v1662_v0  ;;  %9148 = vmatprep.subr.bf16.mxu1 %v9642_v31  ;;  %9195 = vmatpush3.bf16.msra.mxu0 %v9646_v33  ;;  %v10716_v22 = vpack.c.bf16 %v3584_v32, %v3583_v29  ;;  %v9649_v33 = vld [vmem:[%s12145_s3 + $0xc8] sm:$0xff]   ;;  %v3586_v0 = vld [vmem:[%s10558_s18 + $0xe0] sm:$0xff] }
 0x160   : > { %v8781_v24 = vpop.f32.mrf.mxu1  ;;  %v8829_v54 = vpop.f32.mrf.mxu0  ;;  %9196 = vmatprep.subr.bf16.mxu0 %v9647_v52  ;;  %v3954_v29 = vld [vmem:[%s10558_s18 + $0xd9] sm:$0xff]  ;;  %v3955_v19 = vld [vmem:[%s10558_s18 + $0xe1] sm:$0xff] }
 0x161   : > { %v1663_v39 = vadd.f32 %v8781_v24, %v10478_v41  ;;  %v10714_v59 = vadd.f32 %v1895_v63, %v1660_v14  ;;  %v9648_v41 = vld [vmem:[%s12145_s3 + $0x80] sm:$0xff]   ;;  %v3587_v63 = vld [vmem:[%s10558_s18 + $0xf0] sm:$0xff] }
 0x162   : > { %v1528_v9 = vpop.f32.mrf.mxu1  ;;  %v1898_v27 = vpop.f32.mrf.mxu0  ;;  %9149 = vmatpush3.bf16.msra.mxu1 %v9642_v31  ;;  %v3956_v14 = vld [vmem:[%s10558_s18 + $0xf1] sm:$0xff]  ;;  %v3957_v24 = vld [vmem:[%s10558_s18 + $0xf9] sm:$0xff] }
 0x163   : > { %v1661_v20 = vadd.f32 %v1528_v9, %v10489_v61  ;;  %v10722_v50 = vadd.f32 %v8829_v54, %v1663_v39  ;;  %9150 = vmatprep.subr.bf16.mxu1 %v9645_v17  ;;  %9197 = vmatpush3.bf16.msra.mxu0 %v9647_v52  ;;  %v3585_v61 = vld [vmem:[%s10558_s18 + $0xd8] sm:$0xff] }
 0x164   : > { %v8784_v3 = vpop.f32.mrf.mxu1  ;;  %9071 = vmatmul.mubr.bf16.gmra.mxu1 %v10711_v37  ;;  %v8832_v31 = vpop.f32.mrf.mxu0  ;;  %9119 = vmatmul.mubr.bf16.gmra.mxu0 %v3975_v40  ;;  %v10751_v9 = vpack.c.bf16 %v3586_v0, %v3585_v61  ;;  %v10761_v61 = vld [vmem:[%s12145_s3 + $0x178] sm:$0xff]  }
 0x165   : > { %v1666_v52 = vadd.f32 %v8784_v3, %v10498_v60  ;;  %v10734_v58 = vadd.f32 %v1898_v27, %v1661_v20  ;;  %9074 = vmatprep.mubr.bf16.mxu1 %v10716_v22  ;;  %9122 = vmatprep.mubr.bf16.mxu0 %v3976_v53  ;;  %v10749_v60 = vld [vmem:[%s12145_s3 + $0x138] sm:$0xff]   ;;  %v3977_v27 = vpack.c.bf16 %v3955_v19, %v3954_v29  ;;  %v3589_v29 = vld [vmem:[%s10558_s18 + $0x108] sm:$0xff]  ;;  %v3590_v19 = vld [vmem:[%s10558_s18 + $0x110] sm:$0xff] }
 0x166   : > { %v1541_v32 = vpop.f32.mrf.mxu1  ;;  %v1911_v57 = vpop.f32.mrf.mxu0  ;;  %9151 = vmatpush3.bf16.msra.mxu1 %v9645_v17  ;;  %9198 = vmatprep.subr.bf16.mxu0 %v9649_v33 }
 0x167   : > { %v1664_v54 = vadd.f32 %v1541_v32, %v10506_v13  ;;  %v10744_v40 = vadd.f32 %v8832_v31, %v1666_v52  ;;  %9152 = vmatprep.subr.bf16.mxu1 %v9648_v41  ;;  %9199 = vmatpush3.bf16.msra.mxu0 %v9649_v33  ;;  %v10756_v13 = vpack.c.bf16 %v3588_v62, %v3587_v63 }
 0x168   : > { %v8785_v39 = vpop.f32.mrf.mxu1  ;;  %v8833_v53 = vpop.f32.mrf.mxu0  ;;  %9200 = vmatprep.subr.bf16.mxu0 %v9650_v6  ;;  %v3978_v33 = vpack.c.bf16 %v3957_v24, %v3956_v14  ;;  %v3592_v24 = vld [vmem:[%s10558_s18 + $0x128] sm:$0xff] }
 0x169   : > { %v1667_v17 = vadd.f32 %v8785_v39, %v10514_v55  ;;  %v10754_v20 = vadd.f32 %v1911_v57, %v1664_v54  ;;  %12155 = vst [vmem:[#allocation3_spill] sm:$0xff] %v10756_v13  ;;  %v3591_v57 = vld [vmem:[%s10558_s18 + $0x120] sm:$0xff]  ;;  %v3961_v39 = vld [vmem:[%s10558_s18 + $0x129] sm:$0xff] }
 0x16a   : > { %v1544_v3 = vpop.f32.mrf.mxu1  ;;  %v1914_v31 = vpop.f32.mrf.mxu0  ;;  %9153 = vmatpush3.bf16.msra.mxu1 %v9648_v41  ;;  %v3960_v54 = vld [vmem:[%s10558_s18 + $0x121] sm:$0xff] }
 0x16b   : > { %v1665_v0 = vadd.f32 %v1544_v3, %v10520_v47  ;;  %v10764_v55 = vadd.f32 %v8833_v53, %v1667_v17  ;;  %9201 = vmatpush3.bf16.msra.mxu0 %v9650_v6  ;;  %9234 = vmatprep.subr.bf16.mxu1 %v10749_v60  ;;  %v3958_v47 = vld [vmem:[%s10558_s18 + $0x109] sm:$0xff]  ;;  %v3959_v6 = vld [vmem:[%s10558_s18 + $0x111] sm:$0xff]  ;;  %v10784_v3 = vpack.c.bf16 %v3590_v19, %v3589_v29 }
 0x16c   : > { %v8788_v52 = vpop.f32.mrf.mxu1  ;;  %9075 = vmatmul.mubr.bf16.gmra.mxu1 %v10751_v9  ;;  %v8836_v41 = vpop.f32.mrf.mxu0  ;;  %9123 = vmatmul.mubr.bf16.gmra.mxu0 %v3977_v27  ;;  %v3593_v19 = vld [vmem:[%s10558_s18 + $0x138] sm:$0xff] }
 0x16d   : > { %v1670_v63 = vadd.f32 %v8788_v52, %v10530_v7  ;;  %v10771_v32 = vadd.f32 %v1914_v31, %v1665_v0  ;;  %9078 = vmatprep.mubr.bf16.mxu1 %v10756_v13  ;;  %9126 = vmatprep.mubr.bf16.mxu0 %v3978_v33  ;;  %v3979_v33 = vpack.c.bf16 %v3959_v6, %v3958_v47  ;;  %v3594_v47 = vld [vmem:[%s10558_s18 + $0x140] sm:$0xff] }
 0x16e   : > { %v1557_v62 = vpop.f32.mrf.mxu1  ;;  %v1927_v14 = vpop.f32.mrf.mxu0  ;;  %9282 = vmatprep.subr.bf16.mxu0 %v10761_v61  ;;  %v10789_v52 = vpack.c.bf16 %v3592_v24, %v3591_v57  ;;  %v3980_v13 = vpack.c.bf16 %v3961_v39, %v3960_v54  ;;  %v3596_v54 = vld [vmem:[%s10558_s18 + $0x158] sm:$0xff] }
 0x16f   : > { %12156 = vst [vmem:[#allocation4_spill] sm:$0xff] %v10771_v32  ;;  %v1668_v53 = vadd.f32 %v1557_v62, %v10533_v15  ;;  %v10782_v27 = vadd.f32 %v8836_v41, %v1670_v63  ;;  %v3595_v62 = vld [vmem:[%s10558_s18 + $0x150] sm:$0xff] }
 0x170   : > { %v8789_v7 = vpop.f32.mrf.mxu1  ;;  %v8837_v17 = vpop.f32.mrf.mxu0  ;;  %12157 = vst [vmem:[#allocation5_spill] sm:$0xff] %v10789_v52  ;;  %v3964_v39 = vld [vmem:[%s10558_s18 + $0x151] sm:$0xff] }
 0x171   : > { %v1671_v31 = vadd.f32 %v8789_v7, %v10536_v26  ;;  %v10787_v0 = vadd.f32 %v1927_v14, %v1668_v53  ;;  %v3965_v53 = vld [vmem:[%s10558_s18 + $0x159] sm:$0xff] }
 0x172   : > { %v1560_v32 = vpop.f32.mrf.mxu1  ;;  %v1930_v15 = vpop.f32.mrf.mxu0 }
 0x173   : > { %v1669_v41 = vadd.f32 %v1560_v32, %v10540_v46  ;;  %v10792_v63 = vadd.f32 %v8837_v17, %v1671_v31  ;;  %v3962_v46 = vld [vmem:[%s10558_s18 + $0x139] sm:$0xff]  ;;  %v3963_v32 = vld [vmem:[%s10558_s18 + $0x141] sm:$0xff]  ;;  %v10810_v31 = vpack.c.bf16 %v3594_v47, %v3593_v19 }
 0x174   : > { %v8792_v29 = vpop.f32.mrf.mxu1  ;;  %9079 = vmatmul.mubr.bf16.gmra.mxu1 %v10784_v3  ;;  %v8840_v26 = vpop.f32.mrf.mxu0  ;;  %9127 = vmatmul.mubr.bf16.gmra.mxu0 %v3979_v33  ;;  %v3597_v47 = vld [vmem:[%s10558_s18 + $0x168] sm:$0xff] }
 0x175   : > { %v1674_v6 = vadd.f32 %v8792_v29, %v10548_v5  ;;  %v10798_v57 = vadd.f32 %v1930_v15, %v1669_v41  ;;  %9082 = vmatprep.mubr.bf16.mxu1 %v10789_v52  ;;  %9130 = vmatprep.mubr.bf16.mxu0 %v3980_v13  ;;  %v3981_v15 = vpack.c.bf16 %v3963_v32, %v3962_v46 }
 0x176   : > { %v1573_v14 = vpop.f32.mrf.mxu1  ;;  %v1943_v24 = vpop.f32.mrf.mxu0  ;;  %v10815_v29 = vpack.c.bf16 %v3596_v54, %v3595_v62  ;;  %v3982_v52 = vpack.c.bf16 %v3965_v53, %v3964_v39  ;;  %v3598_v62 = vld [vmem:[%s10558_s18 + $0x170] sm:$0xff]  ;;  %v4306_v54 = vld [vmem:[%s10558_s18 + $0x2] sm:$0xff] }
 0x177   : > { %12158 = vst [vmem:[#allocation6_spill] sm:$0xff] %v10798_v57  ;;  %v1672_v7 = vadd.f32 %v1573_v14, %v10551_v48  ;;  %v10808_v17 = vadd.f32 %v8840_v26, %v1674_v6  ;;  %v3966_v14 = vld [vmem:[%s10558_s18 + $0x169] sm:$0xff] }
 0x178   : > { %v8793_v33 = vpop.f32.mrf.mxu1  ;;  %v8841_v5 = vpop.f32.mrf.mxu0  ;;  %v4307_v39 = vld [vmem:[%s10558_s18 + $0xa] sm:$0xff] }
 0x179   : > { %v1675_v13 = vadd.f32 %v8793_v33, %v10561_v21  ;;  %v10813_v41 = vadd.f32 %v1943_v24, %v1672_v7 }
 0x17a   : > { %v1576_v57 = vpop.f32.mrf.mxu1  ;;  %v1946_v48 = vpop.f32.mrf.mxu0 }
 0x17b   : > { %v1673_v26 = vadd.f32 %v1576_v57, %v10566_v45  ;;  %v10818_v6 = vadd.f32 %v8841_v5, %v1675_v13  ;;  %v3967_v45 = vld [vmem:[%s10558_s18 + $0x171] sm:$0xff] }
 0x17c   : > { %v8796_v19 = vpop.f32.mrf.mxu1  ;;  %9083 = vmatmul.mubr.bf16.gmra.mxu1 %v10810_v31  ;;  %v8844_v21 = vpop.f32.mrf.mxu0  ;;  %9131 = vmatmul.mubr.bf16.gmra.mxu0 %v3981_v15  ;;  %v10834_v15 = vpack.c.bf16 %v3598_v62, %v3597_v47 }
 0x17d   : > { %v1678_v46 = vadd.f32 %v8796_v19, %v10576_v10  ;;  %v10823_v32 = vadd.f32 %v1946_v48, %v1673_v26  ;;  %9086 = vmatprep.mubr.bf16.mxu1 %v10815_v29  ;;  %9134 = vmatprep.mubr.bf16.mxu0 %v3982_v52  ;;  %v3983_v10 = vpack.c.bf16 %v3967_v45, %v3966_v14  ;;  %v4309_v45 = vld [vmem:[%s10558_s18 + $0x22] sm:$0xff] }
 0x17e   : > { %v1589_v57 = vpop.f32.mrf.mxu1  ;;  %v1959_v24 = vpop.f32.mrf.mxu0  ;;  %v4338_v48 = vpack.c.bf16 %v4307_v39, %v4306_v54  ;;  %v4310_v54 = vld [vmem:[%s10558_s18 + $0x32] sm:$0xff] }
 0x17f   : > { %v1676_v53 = vadd.f32 %v1589_v57, %v10579_v2  ;;  %v10832_v7 = vadd.f32 %v8844_v21, %v1678_v46 }
 0x180   : > { %v8797_v33 = vpop.f32.mrf.mxu1  ;;  %v8845_v5 = vpop.f32.mrf.mxu0 }
 0x181   : > { %v1679_v13 = vadd.f32 %v8797_v33, %v10582_v42  ;;  %v10837_v52 = vadd.f32 %v1959_v24, %v1676_v53  ;;  %v4308_v42 = vld [vmem:[%s10558_s18 + $0x1a] sm:$0xff] }
 0x182   : > { %v1592_v26 = vpop.f32.mrf.mxu1  ;;  %v1962_v19 = vpop.f32.mrf.mxu0 }
 0x183   : > { %v1677_v2 = vadd.f32 %v1592_v26, %v10586_v11  ;;  %v10840_v21 = vadd.f32 %v8845_v5, %v1679_v13  ;;  %v4311_v11 = vld [vmem:[%s10558_s18 + $0x3a] sm:$0xff] }
 0x184   : > { %v8800_v46 = vpop.f32.mrf.mxu1  ;;  %9087 = vmatmul.mubr.bf16.gmra.mxu1 %v10834_v15  ;;  %v8848_v47 = vpop.f32.mrf.mxu0  ;;  %9135 = vmatmul.mubr.bf16.gmra.mxu0 %v3983_v10  ;;  %v10854_v10 = vpack.c.bf16 %v4309_v45, %v4308_v42  ;;  %v4313_v45 = vld [vmem:[%s10558_s18 + $0x52] sm:$0xff] }
 0x185   : > { %v1682_v62 = vadd.f32 %v8800_v46, %v10594_v44  ;;  %v10844_v14 = vadd.f32 %v1962_v19, %v1677_v2  ;;  %9154 = vmatprep.mubr.bf16.mxu1 %v4338_v48  ;;  %9202 = vmatprep.mubr.bf16.mxu0 %v10598_v4  ;;  %v10859_v48 = vpack.c.bf16 %v4311_v11, %v4310_v54  ;;  %v4315_v54 = vld [vmem:[%s10558_s18 + $0x6a] sm:$0xff] }
 0x186   : > { %v1605_v57 = vpop.f32.mrf.mxu1  ;;  %v1975_v24 = vpop.f32.mrf.mxu0  ;;  %v9653_v11 = vld [vmem:[%s12145_s3 + $0x128] sm:$0xff]  }
 0x187   : > { %v1680_v39 = vadd.f32 %v1605_v57, %v10601_v28  ;;  %v10852_v53 = vadd.f32 %v8848_v47, %v1682_v62  ;;  %v9652_v28 = vld [vmem:[%s12145_s3 + $0x130] sm:$0xff]  }
 0x188   : > { %v8801_v33 = vpop.f32.mrf.mxu1  ;;  %v8849_v5 = vpop.f32.mrf.mxu0  ;;  %v9657_v47 = vld [vmem:[%s12145_s3 + $0x170] sm:$0xff]  }
 0x189   : > { %v1683_v44 = vadd.f32 %v8801_v33, %v10609_v18  ;;  %v10857_v13 = vadd.f32 %v1975_v24, %v1680_v39 }
 0x18a   : > { %v1608_v4 = vpop.f32.mrf.mxu1  ;;  %v1978_v26 = vpop.f32.mrf.mxu0 }
 0x18b   : > { %v1681_v19 = vadd.f32 %v1608_v4, %v10618_v56  ;;  %v10865_v2 = vadd.f32 %v8849_v5, %v1683_v44  ;;  %v4312_v56 = vld [vmem:[%s10558_s18 + $0x4a] sm:$0xff] }
 0x18c   : > { %v8868_v46 = vpop.f32.mrf.mxu1  ;;  %9155 = vmatmul.mubr.bf16.vlgmr.msra.gmra.mxu1 %v10854_v10  ;;  %v8916_v18 = vpop.f32.mrf.mxu0  ;;  %9203 = vmatmul.mubr.bf16.vlgmr.msra.gmra.mxu0 %v10603_v16  ;;  %v4314_v16 = vld [vmem:[%s10558_s18 + $0x62] sm:$0xff]  ;;  %v10889_v5 = vpack.c.bf16 %v4313_v45, %v4312_v56  ;;  %v4316_v45 = vld [vmem:[%s10558_s18 + $0x7a] sm:$0xff] }
 0x18d   : > { %v10872_v62 = vadd.f32 %v1978_v26, %v1681_v19  ;;  %v2394_v42 = vadd.f32 %v8868_v46, %v10632_v35  ;;  %9235 = vmatpush3.bf16.msra.mxu1 %v10749_v60  ;;  %9158 = vmatprep.mubr.bf16.mxu1 %v10859_v48  ;;  %v10894_v4 = vpack.c.bf16 %v4315_v54, %v4314_v16  ;;  %v4318_v16 = vld [vmem:[%s10558_s18 + $0x92] sm:$0xff]  ;;  %v4319_v54 = vld [vmem:[%s10558_s18 + $0x9a] sm:$0xff] }
 0x18e   : > { %v2233_v57 = vpop.f32.mrf.mxu1  ;;  %v2604_v24 = vpop.f32.mrf.mxu0  ;;  %9236 = vmatprep.subr.bf16.mxu1 %v9652_v28  ;;  %9206 = vmatprep.mubr.bf16.mxu0 %v10635_v38 }
 0x18f   : > { %v2392_v39 = vadd.f32 %v2233_v57, %v10638_v23  ;;  %v10886_v35 = vadd.f32 %v8916_v18, %v2394_v42  ;;  %9283 = vmatpush3.bf16.msra.mxu0 %v10761_v61  ;;  %v9659_v23 = vld [vmem:[%s12145_s3 + $0x168] sm:$0xff]   ;;  %v9660_v42 = vld [vmem:[%s12145_s3 + $0x160] sm:$0xff]  }
 0x190   : > { %v8869_v60 = vpop.f32.mrf.mxu1  ;;  %v8917_v33 = vpop.f32.mrf.mxu0  ;;  %9284 = vmatprep.subr.bf16.mxu0 %v9657_v47  ;;  %v4317_v57 = vld [vmem:[%s10558_s18 + $0x82] sm:$0xff] }
 0x191   : > { %v2395_v44 = vadd.f32 %v8869_v60, %v10646_v1  ;;  %v10892_v38 = vadd.f32 %v2604_v24, %v2392_v39  ;;  %9237 = vmatpush3.bf16.msra.mxu1 %v9652_v28  ;;  %v9654_v1 = vld [vmem:[%s12145_s3 + $0x120] sm:$0xff]  }
 0x192   : > { %v2236_v26 = vpop.f32.mrf.mxu1  ;;  %v2607_v19 = vpop.f32.mrf.mxu0  ;;  %9238 = vmatprep.subr.bf16.mxu1 %v9653_v11 }
 0x193   : > { %v2393_v61 = vadd.f32 %v2236_v26, %v10658_v25  ;;  %v10900_v46 = vadd.f32 %v8917_v33, %v2395_v44  ;;  %9285 = vmatpush3.bf16.msra.mxu0 %v9657_v47  ;;  %v10925_v44 = vpack.c.bf16 %v4317_v57, %v4316_v45  ;;  %v10930_v26 = vpack.c.bf16 %v4319_v54, %v4318_v16  ;;  %v4320_v57 = vld [vmem:[%s10558_s18 + $0xaa] sm:$0xff]  ;;  %v4322_v16 = vld [vmem:[%s10558_s18 + $0xc2] sm:$0xff] }
 0x194   : > { %v8872_v28 = vpop.f32.mrf.mxu1  ;;  %9159 = vmatmul.mubr.bf16.gmra.mxu1 %v10889_v5  ;;  %v8920_v18 = vpop.f32.mrf.mxu0  ;;  %9207 = vmatmul.mubr.bf16.gmra.mxu0 %v10640_v12  ;;  %v4323_v54 = vld [vmem:[%s10558_s18 + $0xca] sm:$0xff] }
 0x195   : > { %v2398_v25 = vadd.f32 %v8872_v28, %v10668_v8  ;;  %v10911_v56 = vadd.f32 %v2607_v19, %v2393_v61  ;;  %9162 = vmatprep.mubr.bf16.mxu1 %v10894_v4  ;;  %9210 = vmatprep.mubr.bf16.mxu0 %v10673_v51  ;;  %v9655_v8 = vld [vmem:[%s12145_s3 + $0x118] sm:$0xff]  }
 0x196   : > { %v2249_v47 = vpop.f32.mrf.mxu1  ;;  %v2620_v24 = vpop.f32.mrf.mxu0  ;;  %9239 = vmatpush3.bf16.msra.mxu1 %v9653_v11  ;;  %9286 = vmatprep.subr.bf16.mxu0 %v9659_v23 }
 0x197   : > { %v2396_v12 = vadd.f32 %v2249_v47, %v10676_v34  ;;  %v10920_v39 = vadd.f32 %v8920_v18, %v2398_v25  ;;  %9240 = vmatprep.subr.bf16.mxu1 %v9654_v1  ;;  %9287 = vmatpush3.bf16.msra.mxu0 %v9659_v23  ;;  %v9662_v23 = vld [vmem:[%s12145_s3 + $0x158] sm:$0xff]  }
 0x198   : > { %v8873_v60 = vpop.f32.mrf.mxu1  ;;  %v8921_v33 = vpop.f32.mrf.mxu0  ;;  %9288 = vmatprep.subr.bf16.mxu0 %v9660_v42  ;;  %v4321_v47 = vld [vmem:[%s10558_s18 + $0xb2] sm:$0xff] }
 0x199   : > { %v2399_v51 = vadd.f32 %v8873_v60, %v10684_v43  ;;  %v10928_v11 = vadd.f32 %v2620_v24, %v2396_v12  ;;  %v9658_v43 = vld [vmem:[%s12145_s3 + $0x110] sm:$0xff]  }
 0x19a   : > { %v2252_v34 = vpop.f32.mrf.mxu1  ;;  %v2623_v19 = vpop.f32.mrf.mxu0  ;;  %9241 = vmatpush3.bf16.msra.mxu1 %v9654_v1 }
 0x19b   : > { %v2397_v61 = vadd.f32 %v2252_v34, %v10696_v30  ;;  %v10936_v28 = vadd.f32 %v8921_v33, %v2399_v51  ;;  %9242 = vmatprep.subr.bf16.mxu1 %v9655_v8  ;;  %9289 = vmatpush3.bf16.msra.mxu0 %v9660_v42  ;;  %v9663_v30 = vld [vmem:[%s12145_s3 + $0x150] sm:$0xff]   ;;  %v10961_v51 = vpack.c.bf16 %v4321_v47, %v4320_v57  ;;  %v4325_v47 = vld [vmem:[%s10558_s18 + $0xe2] sm:$0xff] }
 0x19c   : > { %v8876_v18 = vpop.f32.mrf.mxu1  ;;  %9163 = vmatmul.mubr.bf16.gmra.mxu1 %v10925_v44  ;;  %v8924_v1 = vpop.f32.mrf.mxu0  ;;  %9211 = vmatmul.mubr.bf16.gmra.mxu0 %v10678_v36 }
 0x19d   : > { %v2402_v25 = vadd.f32 %v8876_v18, %v10706_v49  ;;  %v10947_v45 = vadd.f32 %v2623_v19, %v2397_v61  ;;  %9166 = vmatprep.mubr.bf16.mxu1 %v10930_v26  ;;  %9214 = vmatprep.mubr.bf16.mxu0 %v10711_v37  ;;  %v9661_v49 = vld [vmem:[%s12145_s3 + $0x108] sm:$0xff]  }
 0x19e   : > { %v2265_v42 = vpop.f32.mrf.mxu1  ;;  %v2636_v24 = vpop.f32.mrf.mxu0  ;;  %9243 = vmatpush3.bf16.msra.mxu1 %v9655_v8  ;;  %9290 = vmatprep.subr.bf16.mxu0 %v9662_v23  ;;  %v10966_v8 = vpack.c.bf16 %v4323_v54, %v4322_v16  ;;  %v4326_v16 = vld [vmem:[%s10558_s18 + $0xf2] sm:$0xff]  ;;  %v4327_v54 = vld [vmem:[%s10558_s18 + $0xfa] sm:$0xff] }
 0x19f   : > { %v2400_v36 = vadd.f32 %v2265_v42, %v10714_v59  ;;  %v10956_v12 = vadd.f32 %v8924_v1, %v2402_v25  ;;  %9244 = vmatprep.subr.bf16.mxu1 %v9658_v43  ;;  %9291 = vmatpush3.bf16.msra.mxu0 %v9662_v23  ;;  %v9665_v23 = vld [vmem:[%s12145_s3 + $0x148] sm:$0xff]  }
 0x1a0   : > { %v8877_v60 = vpop.f32.mrf.mxu1  ;;  %v8925_v33 = vpop.f32.mrf.mxu0  ;;  %9292 = vmatprep.subr.bf16.mxu0 %v9663_v30 }
 0x1a1   : > { %v2403_v37 = vadd.f32 %v8877_v60, %v10722_v50  ;;  %v10964_v34 = vadd.f32 %v2636_v24, %v2400_v36  ;;  %v9664_v50 = vld [vmem:[%s12145_s3 + $0x100] sm:$0xff]  }
 0x1a2   : > { %v2268_v59 = vpop.f32.mrf.mxu1  ;;  %v2639_v19 = vpop.f32.mrf.mxu0  ;;  %9245 = vmatpush3.bf16.msra.mxu1 %v9658_v43 }
 0x1a3   : > { %v2401_v61 = vadd.f32 %v2268_v59, %v10734_v58  ;;  %v10972_v18 = vadd.f32 %v8925_v33, %v2403_v37  ;;  %9246 = vmatprep.subr.bf16.mxu1 %v9661_v49  ;;  %9293 = vmatpush3.bf16.msra.mxu0 %v9663_v30  ;;  %v9666_v58 = vld [vmem:[%s12145_s3 + $0x140] sm:$0xff]   ;;  %v11004_v59 = vpack.c.bf16 %v4327_v54, %v4326_v16 }
 0x1a4   : > { %v8880_v1 = vpop.f32.mrf.mxu1  ;;  %9167 = vmatmul.mubr.bf16.gmra.mxu1 %v10961_v51  ;;  %v8928_v43 = vpop.f32.mrf.mxu0  ;;  %9215 = vmatmul.mubr.bf16.gmra.mxu0 %v10716_v22  ;;  %v4324_v30 = vld [vmem:[%s10558_s18 + $0xda] sm:$0xff]  ;;  %v4330_v54 = vld [vmem:[%s10558_s18 + $0x122] sm:$0xff] }
 0x1a5   : > { %v2406_v25 = vadd.f32 %v8880_v1, %v10744_v40  ;;  %v10983_v57 = vadd.f32 %v2639_v19, %v2401_v61  ;;  %9170 = vmatprep.mubr.bf16.mxu1 %v10966_v8  ;;  %9218 = vmatprep.mubr.bf16.mxu0 %v10751_v9  ;;  %v10997_v40 = vld [vmem:[%s12145_s3 + $0x1b8] sm:$0xff]   ;;  %v10999_v9 = vpack.c.bf16 %v4325_v47, %v4324_v30  ;;  %v12159_v61 = vld [vmem:[#allocation4_spill] sm:$0xff]  ;;  %v12160_v30 = vld [vmem:[#allocation3_spill] sm:$0xff] }
 0x1a6   : > { %v2281_v42 = vpop.f32.mrf.mxu1  ;;  %v2652_v24 = vpop.f32.mrf.mxu0  ;;  %9247 = vmatpush3.bf16.msra.mxu1 %v9661_v49  ;;  %9294 = vmatprep.subr.bf16.mxu0 %v9665_v23 }
 0x1a7   : > { %v2404_v22 = vadd.f32 %v2281_v42, %v10754_v20  ;;  %v10992_v36 = vadd.f32 %v8928_v43, %v2406_v25  ;;  %9248 = vmatprep.subr.bf16.mxu1 %v9664_v50  ;;  %9295 = vmatpush3.bf16.msra.mxu0 %v9665_v23  ;;  %v11009_v23 = vld [vmem:[%s12145_s3 + $0x1f8] sm:$0xff]   ;;  %v4328_v42 = vld [vmem:[%s10558_s18 + $0x10a] sm:$0xff] }
 0x1a8   : > { %v8881_v60 = vpop.f32.mrf.mxu1  ;;  %v8929_v33 = vpop.f32.mrf.mxu0  ;;  %9296 = vmatprep.subr.bf16.mxu0 %v9666_v58 }
 0x1a9   : > { %v2407_v37 = vadd.f32 %v8881_v60, %v10764_v55  ;;  %v11002_v49 = vadd.f32 %v2652_v24, %v2404_v22  ;;  %v4329_v24 = vld [vmem:[%s10558_s18 + $0x112] sm:$0xff]  ;;  %v4331_v22 = vld [vmem:[%s10558_s18 + $0x12a] sm:$0xff] }
 0x1aa   : > { %v2284_v20 = vpop.f32.mrf.mxu1  ;;  %v2655_v19 = vpop.f32.mrf.mxu0  ;;  %9249 = vmatpush3.bf16.msra.mxu1 %v9664_v50 }
 0x1ab   : > { %v2405_v1 = vadd.f32 %v2284_v20, %v12159_v61  ;;  %v11012_v43 = vadd.f32 %v8929_v33, %v2407_v37  ;;  %9297 = vmatpush3.bf16.msra.mxu0 %v9666_v58  ;;  %9330 = vmatprep.subr.bf16.mxu1 %v10997_v40  ;;  %v11030_v20 = vpack.c.bf16 %v4329_v24, %v4328_v42  ;;  %v12163_v24 = vld [vmem:[#allocation5_spill] sm:$0xff] }
 0x1ac   : > { %v8884_v55 = vpop.f32.mrf.mxu1  ;;  %9171 = vmatmul.mubr.bf16.gmra.mxu1 %v10999_v9  ;;  %v8932_v25 = vpop.f32.mrf.mxu0  ;;  %9219 = vmatmul.mubr.bf16.gmra.mxu0 %v12160_v30  ;;  %v12162_v30 = vld [vmem:[#allocation6_spill] sm:$0xff] }
 0x1ad   : > { %v2410_v50 = vadd.f32 %v8884_v55, %v10782_v27  ;;  %v11018_v47 = vadd.f32 %v2655_v19, %v2405_v1  ;;  %9174 = vmatprep.mubr.bf16.mxu1 %v11004_v59  ;;  %9222 = vmatprep.mubr.bf16.mxu0 %v10784_v3  ;;  %v11035_v3 = vpack.c.bf16 %v4331_v22, %v4330_v54  ;;  %v4333_v54 = vld [vmem:[%s10558_s18 + $0x142] sm:$0xff] }
 0x1ae   : > { %v2297_v16 = vpop.f32.mrf.mxu1  ;;  %v2668_v58 = vpop.f32.mrf.mxu0  ;;  %9378 = vmatprep.subr.bf16.mxu0 %v11009_v23 }
 0x1af   : > { %v2408_v60 = vadd.f32 %v2297_v16, %v10787_v0  ;;  %v11028_v33 = vadd.f32 %v8932_v25, %v2410_v50  ;;  %12161 = vst [vmem:[#allocation4_spill] sm:$0xff] %v11035_v3 }
 0x1b0   : > { %v8885_v37 = vpop.f32.mrf.mxu1  ;;  %v8933_v27 = vpop.f32.mrf.mxu0 }
 0x1b1   : > { %v2411_v19 = vadd.f32 %v8885_v37, %v10792_v63  ;;  %v11033_v61 = vadd.f32 %v2668_v58, %v2408_v60  ;;  %v4332_v58 = vld [vmem:[%s10558_s18 + $0x13a] sm:$0xff]  ;;  %v4334_v37 = vld [vmem:[%s10558_s18 + $0x152] sm:$0xff] }
 0x1b2   : > { %v2300_v1 = vpop.f32.mrf.mxu1  ;;  %v2671_v55 = vpop.f32.mrf.mxu0 }
 0x1b3   : > { %v2409_v0 = vadd.f32 %v2300_v1, %v12162_v30  ;;  %v11038_v25 = vadd.f32 %v8933_v27, %v2411_v19  ;;  %v4335_v27 = vld [vmem:[%s10558_s18 + $0x15a] sm:$0xff] }
 0x1b4   : > { %v8888_v50 = vpop.f32.mrf.mxu1  ;;  %9175 = vmatmul.mubr.bf16.gmra.mxu1 %v11030_v20  ;;  %v8936_v42 = vpop.f32.mrf.mxu0  ;;  %9223 = vmatmul.mubr.bf16.gmra.mxu0 %v12163_v24 }
 0x1b5   : > { %v2414_v63 = vadd.f32 %v8888_v50, %v10808_v17  ;;  %v11043_v16 = vadd.f32 %v2671_v55, %v2409_v0  ;;  %9178 = vmatprep.mubr.bf16.mxu1 %v11035_v3  ;;  %9226 = vmatprep.mubr.bf16.mxu0 %v10810_v31  ;;  %v11054_v17 = vpack.c.bf16 %v4333_v54, %v4332_v58 }
 0x1b6   : > { %v2313_v22 = vpop.f32.mrf.mxu1  ;;  %v2684_v60 = vpop.f32.mrf.mxu0  ;;  %v11059_v31 = vpack.c.bf16 %v4335_v27, %v4334_v37  ;;  %v7836_v37 = vld [vmem:[%s10558_s18 + $0x188] sm:$0xff] }
 0x1b7   : > { %v2412_v19 = vadd.f32 %v2313_v22, %v10813_v41  ;;  %v11052_v1 = vadd.f32 %v8936_v42, %v2414_v63 }
 0x1b8   : > { %v8889_v30 = vpop.f32.mrf.mxu1  ;;  %v8937_v24 = vpop.f32.mrf.mxu0  ;;  %12164 = vst [vmem:[#allocation3_spill] sm:$0xff] %v11059_v31 }
 0x1b9   : > { %v2415_v55 = vadd.f32 %v8889_v30, %v10818_v6  ;;  %v11057_v0 = vadd.f32 %v2684_v60, %v2412_v19  ;;  %v4336_v6 = vld [vmem:[%s10558_s18 + $0x16a] sm:$0xff]  ;;  %v4337_v60 = vld [vmem:[%s10558_s18 + $0x172] sm:$0xff] }
 0x1ba   : > { %v2316_v50 = vpop.f32.mrf.mxu1  ;;  %v2687_v3 = vpop.f32.mrf.mxu0  ;;  %v7861_v30 = vld [vmem:[%s10558_s18 + $0x19] sm:$0xff] }
 0x1bb   : > { %v2413_v41 = vadd.f32 %v2316_v50, %v10823_v32  ;;  %v11062_v42 = vadd.f32 %v8937_v24, %v2415_v55  ;;  %v7835_v32 = vld [vmem:[%s10558_s18 + $0x180] sm:$0xff] }
 0x1bc   : > { %v8892_v63 = vpop.f32.mrf.mxu1  ;;  %9179 = vmatmul.mubr.bf16.gmra.mxu1 %v11054_v17  ;;  %v8940_v58 = vpop.f32.mrf.mxu0  ;;  %9227 = vmatmul.mubr.bf16.gmra.mxu0 %v10815_v29  ;;  %v7862_v24 = vld [vmem:[%s10558_s18 + $0x21] sm:$0xff] }
 0x1bd   : > { %12165 = vst [vmem:[#allocation6_spill] sm:$0xff] %v11062_v42  ;;  %v2418_v54 = vadd.f32 %v8892_v63, %v10832_v7  ;;  %v11068_v22 = vadd.f32 %v2687_v3, %v2413_v41  ;;  %9182 = vmatprep.mubr.bf16.mxu1 %v11059_v31  ;;  %9230 = vmatprep.mubr.bf16.mxu0 %v10834_v15 }
 0x1be   : > { %v2329_v27 = vpop.f32.mrf.mxu1  ;;  %v2700_v19 = vpop.f32.mrf.mxu0  ;;  %v11080_v7 = vpack.c.bf16 %v4337_v60, %v4336_v6  ;;  %v4724_v3 = vpack.c.bf16 %v7836_v37, %v7835_v32  ;;  %v5079_v63 = vpack.c.bf16 %v7862_v24, %v7861_v30  ;;  %v7864_v37 = vld [vmem:[%s10558_s18 + $0x39] sm:$0xff]  ;;  %v7865_v30 = vld [vmem:[%s10558_s18 + $0x49] sm:$0xff] }
 0x1bf   : > { %12166 = vst [vmem:[#allocation5_spill] sm:$0xff] %v11068_v22  ;;  %v2416_v55 = vadd.f32 %v2329_v27, %v10837_v52  ;;  %v11078_v50 = vadd.f32 %v8940_v58, %v2418_v54 }
 0x1c0   : > { %v8893_v29 = vpop.f32.mrf.mxu1  ;;  %v8941_v42 = vpop.f32.mrf.mxu0 }
 0x1c1   : > { %v2419_v41 = vadd.f32 %v8893_v29, %v10840_v21  ;;  %v11083_v15 = vadd.f32 %v2700_v19, %v2416_v55  ;;  %v7863_v21 = vld [vmem:[%s10558_s18 + $0x31] sm:$0xff] }
 0x1c2   : > { %v2332_v31 = vpop.f32.mrf.mxu1  ;;  %v2703_v22 = vpop.f32.mrf.mxu0  ;;  %v11100_v29 = vpack.c.bf16 %v7864_v37, %v7863_v21  ;;  %v7868_v37 = vld [vmem:[%s10558_s18 + $0x69] sm:$0xff] }
 0x1c3   : > { %v2417_v52 = vadd.f32 %v2332_v31, %v10844_v14  ;;  %v11086_v58 = vadd.f32 %v8941_v42, %v2419_v41  ;;  %v7866_v14 = vld [vmem:[%s10558_s18 + $0x51] sm:$0xff] }
 0x1c4   : > { %v8896_v54 = vpop.f32.mrf.mxu1  ;;  %9183 = vmatmul.mubr.bf16.gmra.mxu1 %v11080_v7  ;;  %v8944_v6 = vpop.f32.mrf.mxu0  ;;  %9231 = vmatmul.mubr.bf16.gmra.mxu0 %v4724_v3  ;;  %v11105_v3 = vpack.c.bf16 %v7866_v14, %v7865_v30  ;;  %v7870_v30 = vld [vmem:[%s10558_s18 + $0x81] sm:$0xff] }
 0x1c5   : > { %v2422_v60 = vadd.f32 %v8896_v54, %v10852_v53  ;;  %v11090_v32 = vadd.f32 %v2703_v22, %v2417_v52  ;;  %9250 = vmatprep.mubr.bf16.mxu1 %v5079_v63  ;;  %9298 = vmatprep.mubr.bf16.mxu0 %v10854_v10  ;;  %v9669_v14 = vld [vmem:[%s12145_s3 + $0x1a8] sm:$0xff]  }
 0x1c6   : > { %v2345_v27 = vpop.f32.mrf.mxu1  ;;  %v2716_v19 = vpop.f32.mrf.mxu0 }
 0x1c7   : > { %v2420_v31 = vadd.f32 %v2345_v27, %v10857_v13  ;;  %v11098_v42 = vadd.f32 %v8944_v6, %v2422_v60  ;;  %v9668_v13 = vld [vmem:[%s12145_s3 + $0x1b0] sm:$0xff]  }
 0x1c8   : > { %v8897_v24 = vpop.f32.mrf.mxu1  ;;  %v8945_v55 = vpop.f32.mrf.mxu0  ;;  %v9673_v6 = vld [vmem:[%s12145_s3 + $0x1f0] sm:$0xff]  }
 0x1c9   : > { %v2423_v53 = vadd.f32 %v8897_v24, %v10865_v2  ;;  %v11103_v22 = vadd.f32 %v2716_v19, %v2420_v31 }
 0x1ca   : > { %v2348_v10 = vpop.f32.mrf.mxu1  ;;  %v2719_v41 = vpop.f32.mrf.mxu0 }
 0x1cb   : > { %v2421_v63 = vadd.f32 %v2348_v10, %v10872_v62  ;;  %v11111_v52 = vadd.f32 %v8945_v55, %v2423_v53  ;;  %v7867_v62 = vld [vmem:[%s10558_s18 + $0x61] sm:$0xff] }
 0x1cc   : > { %v8964_v54 = vpop.f32.mrf.mxu1  ;;  %9251 = vmatmul.mubr.bf16.vlgmr.msra.gmra.mxu1 %v11100_v29  ;;  %v9012_v2 = vpop.f32.mrf.mxu0  ;;  %9299 = vmatmul.mubr.bf16.vlgmr.msra.gmra.mxu0 %v10859_v48  ;;  %v7869_v48 = vld [vmem:[%s10558_s18 + $0x79] sm:$0xff]  ;;  %v11135_v55 = vpack.c.bf16 %v7868_v37, %v7867_v62  ;;  %v7871_v37 = vld [vmem:[%s10558_s18 + $0x91] sm:$0xff] }
 0x1cd   : > { %v11118_v60 = vadd.f32 %v2719_v41, %v2421_v63  ;;  %v3135_v21 = vadd.f32 %v8964_v54, %v10886_v35  ;;  %9331 = vmatpush3.bf16.msra.mxu1 %v10997_v40  ;;  %9254 = vmatprep.mubr.bf16.mxu1 %v11105_v3  ;;  %v11140_v10 = vpack.c.bf16 %v7870_v30, %v7869_v48  ;;  %v7873_v48 = vld [vmem:[%s10558_s18 + $0xa9] sm:$0xff]  ;;  %v7874_v30 = vld [vmem:[%s10558_s18 + $0xb1] sm:$0xff] }
 0x1ce   : > { %v2974_v27 = vpop.f32.mrf.mxu1  ;;  %v3344_v19 = vpop.f32.mrf.mxu0  ;;  %9332 = vmatprep.subr.bf16.mxu1 %v9668_v13  ;;  %9302 = vmatprep.mubr.bf16.mxu0 %v10889_v5 }
 0x1cf   : > { %v3133_v31 = vadd.f32 %v2974_v27, %v10892_v38  ;;  %v11132_v35 = vadd.f32 %v9012_v2, %v3135_v21  ;;  %9379 = vmatpush3.bf16.msra.mxu0 %v11009_v23  ;;  %v9675_v38 = vld [vmem:[%s12145_s3 + $0x1e8] sm:$0xff]   ;;  %v9676_v21 = vld [vmem:[%s12145_s3 + $0x1e0] sm:$0xff]  }
 0x1d0   : > { %v8965_v40 = vpop.f32.mrf.mxu1  ;;  %v9013_v24 = vpop.f32.mrf.mxu0  ;;  %9380 = vmatprep.subr.bf16.mxu0 %v9673_v6  ;;  %v7872_v27 = vld [vmem:[%s10558_s18 + $0x99] sm:$0xff] }
 0x1d1   : > { %v3136_v53 = vadd.f32 %v8965_v40, %v10900_v46  ;;  %v11138_v5 = vadd.f32 %v3344_v19, %v3133_v31  ;;  %9333 = vmatpush3.bf16.msra.mxu1 %v9668_v13  ;;  %v9670_v46 = vld [vmem:[%s12145_s3 + $0x1a0] sm:$0xff]  }
 0x1d2   : > { %v2977_v41 = vpop.f32.mrf.mxu1  ;;  %v3347_v63 = vpop.f32.mrf.mxu0  ;;  %9334 = vmatprep.subr.bf16.mxu1 %v9669_v14 }
 0x1d3   : > { %v3134_v23 = vadd.f32 %v2977_v41, %v10911_v56  ;;  %v11146_v54 = vadd.f32 %v9013_v24, %v3136_v53  ;;  %9381 = vmatpush3.bf16.msra.mxu0 %v9673_v6  ;;  %v11171_v53 = vpack.c.bf16 %v7872_v27, %v7871_v37  ;;  %v11176_v41 = vpack.c.bf16 %v7874_v30, %v7873_v48  ;;  %v7875_v27 = vld [vmem:[%s10558_s18 + $0xc1] sm:$0xff]  ;;  %v7877_v48 = vld [vmem:[%s10558_s18 + $0xd9] sm:$0xff] }
 0x1d4   : > { %v8968_v13 = vpop.f32.mrf.mxu1  ;;  %9255 = vmatmul.mubr.bf16.gmra.mxu1 %v11135_v55  ;;  %v9016_v2 = vpop.f32.mrf.mxu0  ;;  %9303 = vmatmul.mubr.bf16.gmra.mxu0 %v10894_v4  ;;  %v7878_v30 = vld [vmem:[%s10558_s18 + $0xe1] sm:$0xff] }
 0x1d5   : > { %v3139_v56 = vadd.f32 %v8968_v13, %v10920_v39  ;;  %v11157_v62 = vadd.f32 %v3347_v63, %v3134_v23  ;;  %9258 = vmatprep.mubr.bf16.mxu1 %v11140_v10  ;;  %9306 = vmatprep.mubr.bf16.mxu0 %v10925_v44  ;;  %v9671_v39 = vld [vmem:[%s12145_s3 + $0x198] sm:$0xff]  }
 0x1d6   : > { %v2990_v6 = vpop.f32.mrf.mxu1  ;;  %v3360_v19 = vpop.f32.mrf.mxu0  ;;  %9335 = vmatpush3.bf16.msra.mxu1 %v9669_v14  ;;  %9382 = vmatprep.subr.bf16.mxu0 %v9675_v38 }
 0x1d7   : > { %v3137_v4 = vadd.f32 %v2990_v6, %v10928_v11  ;;  %v11166_v31 = vadd.f32 %v9016_v2, %v3139_v56  ;;  %9336 = vmatprep.subr.bf16.mxu1 %v9670_v46  ;;  %9383 = vmatpush3.bf16.msra.mxu0 %v9675_v38  ;;  %v9678_v38 = vld [vmem:[%s12145_s3 + $0x1d8] sm:$0xff]   ;;  %v7876_v6 = vld [vmem:[%s10558_s18 + $0xc9] sm:$0xff] }
 0x1d8   : > { %v8969_v40 = vpop.f32.mrf.mxu1  ;;  %v9017_v24 = vpop.f32.mrf.mxu0  ;;  %9384 = vmatprep.subr.bf16.mxu0 %v9676_v21 }
 0x1d9   : > { %v3140_v44 = vadd.f32 %v8969_v40, %v10936_v28  ;;  %v11174_v14 = vadd.f32 %v3360_v19, %v3137_v4  ;;  %v9674_v28 = vld [vmem:[%s12145_s3 + $0x190] sm:$0xff]  }
 0x1da   : > { %v2993_v11 = vpop.f32.mrf.mxu1  ;;  %v3363_v63 = vpop.f32.mrf.mxu0  ;;  %9337 = vmatpush3.bf16.msra.mxu1 %v9670_v46 }
 0x1db   : > { %v3138_v23 = vadd.f32 %v2993_v11, %v10947_v45  ;;  %v11182_v13 = vadd.f32 %v9017_v24, %v3140_v44  ;;  %9338 = vmatprep.subr.bf16.mxu1 %v9671_v39  ;;  %9385 = vmatpush3.bf16.msra.mxu0 %v9676_v21  ;;  %v9679_v45 = vld [vmem:[%s12145_s3 + $0x1d0] sm:$0xff]   ;;  %v11207_v44 = vpack.c.bf16 %v7876_v6, %v7875_v27  ;;  %v7880_v6 = vld [vmem:[%s10558_s18 + $0xf9] sm:$0xff] }
 0x1dc   : > { %v8972_v2 = vpop.f32.mrf.mxu1  ;;  %9259 = vmatmul.mubr.bf16.gmra.mxu1 %v11171_v53  ;;  %v9020_v46 = vpop.f32.mrf.mxu0  ;;  %9307 = vmatmul.mubr.bf16.gmra.mxu0 %v10930_v26 }
 0x1dd   : > { %v3143_v56 = vadd.f32 %v8972_v2, %v10956_v12  ;;  %v11193_v37 = vadd.f32 %v3363_v63, %v3138_v23  ;;  %9262 = vmatprep.mubr.bf16.mxu1 %v11176_v41  ;;  %9310 = vmatprep.mubr.bf16.mxu0 %v10961_v51  ;;  %v9677_v12 = vld [vmem:[%s12145_s3 + $0x188] sm:$0xff]  }
 0x1de   : > { %v3006_v21 = vpop.f32.mrf.mxu1  ;;  %v3376_v19 = vpop.f32.mrf.mxu0  ;;  %9339 = vmatpush3.bf16.msra.mxu1 %v9671_v39  ;;  %9386 = vmatprep.subr.bf16.mxu0 %v9678_v38  ;;  %v11212_v39 = vpack.c.bf16 %v7878_v30, %v7877_v48  ;;  %v7881_v48 = vld [vmem:[%s10558_s18 + $0x109] sm:$0xff]  ;;  %v7882_v30 = vld [vmem:[%s10558_s18 + $0x111] sm:$0xff] }
 0x1df   : > { %v3141_v26 = vadd.f32 %v3006_v21, %v10964_v34  ;;  %v11202_v4 = vadd.f32 %v9020_v46, %v3143_v56  ;;  %9340 = vmatprep.subr.bf16.mxu1 %v9674_v28  ;;  %9387 = vmatpush3.bf16.msra.mxu0 %v9678_v38  ;;  %v9681_v38 = vld [vmem:[%s12145_s3 + $0x1c8] sm:$0xff]  }
 0x1e0   : > { %v8973_v40 = vpop.f32.mrf.mxu1  ;;  %v9021_v24 = vpop.f32.mrf.mxu0  ;;  %9388 = vmatprep.subr.bf16.mxu0 %v9679_v45 }
 0x1e1   : > { %v3144_v51 = vadd.f32 %v8973_v40, %v10972_v18  ;;  %v11210_v11 = vadd.f32 %v3376_v19, %v3141_v26  ;;  %v9680_v18 = vld [vmem:[%s12145_s3 + $0x180] sm:$0xff]  }
 0x1e2   : > { %v3009_v34 = vpop.f32.mrf.mxu1  ;;  %v3379_v63 = vpop.f32.mrf.mxu0  ;;  %9341 = vmatpush3.bf16.msra.mxu1 %v9674_v28 }
 0x1e3   : > { %v3142_v23 = vadd.f32 %v3009_v34, %v10983_v57  ;;  %v11218_v2 = vadd.f32 %v9021_v24, %v3144_v51  ;;  %9342 = vmatprep.subr.bf16.mxu1 %v9677_v12  ;;  %9389 = vmatpush3.bf16.msra.mxu0 %v9679_v45  ;;  %v9682_v57 = vld [vmem:[%s12145_s3 + $0x1c0] sm:$0xff]   ;;  %v7879_v45 = vld [vmem:[%s10558_s18 + $0xf1] sm:$0xff] }
 0x1e4   : > { %v8976_v46 = vpop.f32.mrf.mxu1  ;;  %9263 = vmatmul.mubr.bf16.gmra.mxu1 %v11207_v44  ;;  %v9024_v28 = vpop.f32.mrf.mxu0  ;;  %9311 = vmatmul.mubr.bf16.gmra.mxu0 %v10966_v8 }
 0x1e5   : > { %v3147_v56 = vadd.f32 %v8976_v46, %v10992_v36  ;;  %v11229_v27 = vadd.f32 %v3379_v63, %v3142_v23  ;;  %9266 = vmatprep.mubr.bf16.mxu1 %v11212_v39  ;;  %9314 = vmatprep.mubr.bf16.mxu0 %v10999_v9  ;;  %v11243_v36 = vld [vmem:[%s12145_s3 + $0x238] sm:$0xff]   ;;  %v11245_v9 = vpack.c.bf16 %v7880_v6, %v7879_v45 }
 0x1e6   : > { %v3022_v21 = vpop.f32.mrf.mxu1  ;;  %v3392_v19 = vpop.f32.mrf.mxu0  ;;  %9343 = vmatpush3.bf16.msra.mxu1 %v9677_v12  ;;  %9390 = vmatprep.subr.bf16.mxu0 %v9681_v38  ;;  %v7885_v6 = vld [vmem:[%s10558_s18 + $0x139] sm:$0xff] }
 0x1e7   : > { %v3145_v8 = vadd.f32 %v3022_v21, %v11002_v49  ;;  %v11238_v26 = vadd.f32 %v9024_v28, %v3147_v56  ;;  %9344 = vmatprep.subr.bf16.mxu1 %v9680_v18  ;;  %9391 = vmatpush3.bf16.msra.mxu0 %v9681_v38  ;;  %v11250_v49 = vpack.c.bf16 %v7882_v30, %v7881_v48  ;;  %v7886_v21 = vld [vmem:[%s10558_s18 + $0x141] sm:$0xff] }
 0x1e8   : > { %v8977_v40 = vpop.f32.mrf.mxu1  ;;  %v9025_v24 = vpop.f32.mrf.mxu0  ;;  %9392 = vmatprep.subr.bf16.mxu0 %v9682_v57 }
 0x1e9   : > { %v3148_v51 = vadd.f32 %v8977_v40, %v11012_v43  ;;  %v11248_v12 = vadd.f32 %v3392_v19, %v3145_v8 }
 0x1ea   : > { %v3025_v34 = vpop.f32.mrf.mxu1  ;;  %v3395_v63 = vpop.f32.mrf.mxu0  ;;  %9345 = vmatpush3.bf16.msra.mxu1 %v9680_v18  ;;  %v7884_v18 = vld [vmem:[%s10558_s18 + $0x129] sm:$0xff] }
 0x1eb   : > { %v3146_v38 = vadd.f32 %v3025_v34, %v11018_v47  ;;  %v11253_v23 = vadd.f32 %v9025_v24, %v3148_v51  ;;  %9393 = vmatpush3.bf16.msra.mxu0 %v9682_v57  ;;  %9426 = vmatprep.subr.bf16.mxu1 %v11243_v36  ;;  %v7883_v47 = vld [vmem:[%s10558_s18 + $0x121] sm:$0xff]  ;;  %v11275_v24 = vpack.c.bf16 %v7886_v21, %v7885_v6 }
 0x1ec   : > { %v8980_v46 = vpop.f32.mrf.mxu1  ;;  %9267 = vmatmul.mubr.bf16.gmra.mxu1 %v11245_v9  ;;  %v9028_v43 = vpop.f32.mrf.mxu0  ;;  %9315 = vmatmul.mubr.bf16.gmra.mxu0 %v11004_v59 }
 0x1ed   : > { %v3151_v28 = vadd.f32 %v8980_v46, %v11028_v33  ;;  %v11259_v56 = vadd.f32 %v3395_v63, %v3146_v38  ;;  %9270 = vmatprep.mubr.bf16.mxu1 %v11250_v49  ;;  %9318 = vmatprep.mubr.bf16.mxu0 %v11030_v20  ;;  %v11270_v33 = vpack.c.bf16 %v7884_v18, %v7883_v47  ;;  %v12167_v46 = vld [vmem:[#allocation4_spill] sm:$0xff]  ;;  %v7888_v47 = vld [vmem:[%s10558_s18 + $0x159] sm:$0xff] }
 0x1ee   : > { %v3038_v45 = vpop.f32.mrf.mxu1  ;;  %v3408_v57 = vpop.f32.mrf.mxu0 }
 0x1ef   : > { %v3149_v19 = vadd.f32 %v3038_v45, %v11033_v61  ;;  %v11268_v48 = vadd.f32 %v9028_v43, %v3151_v28  ;;  %v7887_v28 = vld [vmem:[%s10558_s18 + $0x151] sm:$0xff]  ;;  %v7889_v45 = vld [vmem:[%s10558_s18 + $0x169] sm:$0xff] }
 0x1f0   : > { %v8981_v30 = vpop.f32.mrf.mxu1  ;;  %v9029_v59 = vpop.f32.mrf.mxu0 }
 0x1f1   : > { %v3152_v8 = vadd.f32 %v8981_v30, %v11038_v25  ;;  %v11273_v40 = vadd.f32 %v3408_v57, %v3149_v19  ;;  %v7890_v57 = vld [vmem:[%s10558_s18 + $0x171] sm:$0xff] }
 0x1f2   : > { %v3041_v20 = vpop.f32.mrf.mxu1  ;;  %v3411_v51 = vpop.f32.mrf.mxu0 }
 0x1f3   : > { %v3150_v61 = vadd.f32 %v3041_v20, %v11043_v16  ;;  %v11278_v34 = vadd.f32 %v9029_v59, %v3152_v8  ;;  %v12168_v59 = vld [vmem:[#allocation6_spill] sm:$0xff] }
 0x1f4   : > { %v8984_v63 = vpop.f32.mrf.mxu1  ;;  %9271 = vmatmul.mubr.bf16.gmra.mxu1 %v11270_v33  ;;  %v9032_v38 = vpop.f32.mrf.mxu0  ;;  %9319 = vmatmul.mubr.bf16.gmra.mxu0 %v12167_v46 }
 0x1f5   : > { %v3155_v25 = vadd.f32 %v8984_v63, %v11052_v1  ;;  %v11283_v43 = vadd.f32 %v3411_v51, %v3150_v61  ;;  %9274 = vmatprep.mubr.bf16.mxu1 %v11275_v24  ;;  %9322 = vmatprep.mubr.bf16.mxu0 %v11054_v17  ;;  %v11294_v1 = vpack.c.bf16 %v7888_v47, %v7887_v28  ;;  %v12170_v63 = vld [vmem:[#allocation5_spill] sm:$0xff]  ;;  %v12172_v28 = vld [vmem:[#allocation3_spill] sm:$0xff] }
 0x1f6   : > { %v3054_v18 = vpop.f32.mrf.mxu1  ;;  %v3424_v16 = vpop.f32.mrf.mxu0  ;;  %v11299_v17 = vpack.c.bf16 %v7890_v57, %v7889_v45  ;;  %v7891_v47 = vld [vmem:[%s10558_s18 + $0x181] sm:$0xff]  ;;  %v7892_v45 = vld [vmem:[%s10558_s18 + $0x189] sm:$0xff] }
 0x1f7   : > { %v3153_v6 = vadd.f32 %v3054_v18, %v11057_v0  ;;  %v11292_v21 = vadd.f32 %v9032_v38, %v3155_v25  ;;  %v7947_v57 = vld [vmem:[%s10558_s18 + $0x182] sm:$0xff] }
 0x1f8   : > { %v8985_v19 = vpop.f32.mrf.mxu1  ;;  %v9033_v30 = vpop.f32.mrf.mxu0  ;;  %12169 = vst [vmem:[#allocation4_spill] sm:$0xff] %v11299_v17 }
 0x1f9   : > { %v3156_v8 = vadd.f32 %v8985_v19, %v12168_v59  ;;  %v11297_v20 = vadd.f32 %v3424_v16, %v3153_v6  ;;  %v7948_v6 = vld [vmem:[%s10558_s18 + $0x18a] sm:$0xff] }
 0x1fa   : > { %v3057_v51 = vpop.f32.mrf.mxu1  ;;  %v3427_v61 = vpop.f32.mrf.mxu0  ;;  %v7973_v59 = vld [vmem:[%s10558_s18 + $0x30] sm:$0xff] }
 0x1fb   : > { %v3154_v0 = vadd.f32 %v3057_v51, %v12170_v63  ;;  %v11302_v38 = vadd.f32 %v9033_v30, %v3156_v8  ;;  %v7974_v8 = vld [vmem:[%s10558_s18 + $0x38] sm:$0xff] }
 0x1fc   : > { %v8988_v46 = vpop.f32.mrf.mxu1  ;;  %9275 = vmatmul.mubr.bf16.gmra.mxu1 %v11294_v1  ;;  %v9036_v25 = vpop.f32.mrf.mxu0  ;;  %9323 = vmatmul.mubr.bf16.gmra.mxu0 %v12172_v28 }
 0x1fd   : > { %12171 = vst [vmem:[#allocation6_spill] sm:$0xff] %v11302_v38  ;;  %v3159_v18 = vadd.f32 %v8988_v46, %v11078_v50  ;;  %v11308_v16 = vadd.f32 %v3427_v61, %v3154_v0  ;;  %9278 = vmatprep.mubr.bf16.mxu1 %v11299_v17  ;;  %9326 = vmatprep.mubr.bf16.mxu0 %v11080_v7 }
 0x1fe   : > { %v3070_v19 = vpop.f32.mrf.mxu1  ;;  %v3440_v30 = vpop.f32.mrf.mxu0  ;;  %v11320_v50 = vpack.c.bf16 %v7892_v45, %v7891_v47  ;;  %v11322_v61 = vpack.c.bf16 %v7948_v6, %v7947_v57  ;;  %v5820_v46 = vpack.c.bf16 %v7974_v8, %v7973_v59  ;;  %v7975_v57 = vld [vmem:[%s10558_s18 + $0x48] sm:$0xff]  ;;  %v7976_v6 = vld [vmem:[%s10558_s18 + $0x50] sm:$0xff] }
 0x1ff   : > { %12173 = vst [vmem:[#allocation5_spill] sm:$0xff] %v11308_v16  ;;  %v3157_v51 = vadd.f32 %v3070_v19, %v11083_v15  ;;  %v11318_v63 = vadd.f32 %v9036_v25, %v3159_v18 }
 0x200   : > { %v8989_v28 = vpop.f32.mrf.mxu1  ;;  %v9037_v38 = vpop.f32.mrf.mxu0 }
 0x201   : > { %v3160_v7 = vadd.f32 %v8989_v28, %v11086_v58  ;;  %v11325_v0 = vadd.f32 %v3440_v30, %v3157_v51  ;;  %v5821_v28 = vpack.c.bf16 %v7976_v6, %v7975_v57  ;;  %v7979_v6 = vld [vmem:[%s10558_s18 + $0x78] sm:$0xff] }
 0x202   : > { %v3073_v17 = vpop.f32.mrf.mxu1  ;;  %v3443_v16 = vpop.f32.mrf.mxu0 }
 0x203   : > { %v3158_v15 = vadd.f32 %v3073_v17, %v11090_v32  ;;  %v11328_v25 = vadd.f32 %v9037_v38, %v3160_v7  ;;  %v7977_v32 = vld [vmem:[%s10558_s18 + $0x60] sm:$0xff]  ;;  %v7978_v17 = vld [vmem:[%s10558_s18 + $0x68] sm:$0xff] }
 0x204   : > { %v8992_v18 = vpop.f32.mrf.mxu1  ;;  %9279 = vmatmul.mubr.bf16.gmra.mxu1 %v11320_v50  ;;  %v9040_v47 = vpop.f32.mrf.mxu0  ;;  %9327 = vmatmul.mubr.bf16.gmra.mxu0 %v11322_v61  ;;  %v5822_v7 = vpack.c.bf16 %v7978_v17, %v7977_v32  ;;  %v7981_v32 = vld [vmem:[%s10558_s18 + $0x90] sm:$0xff]  ;;  %v7982_v17 = vld [vmem:[%s10558_s18 + $0x98] sm:$0xff] }
 0x205   : > { %v3163_v45 = vadd.f32 %v8992_v18, %v11098_v42  ;;  %v11333_v58 = vadd.f32 %v3443_v16, %v3158_v15  ;;  %9346 = vmatprep.mubr.bf16.mxu1 %v5820_v46  ;;  %9394 = vmatprep.mubr.bf16.mxu0 %v11100_v29  ;;  %v9684_v15 = vld [vmem:[%s12145_s3 + $0x230] sm:$0xff]  }
 0x206   : > { %v3086_v19 = vpop.f32.mrf.mxu1  ;;  %v3456_v30 = vpop.f32.mrf.mxu0 }
 0x207   : > { %v3161_v38 = vadd.f32 %v3086_v19, %v11103_v22  ;;  %v11341_v59 = vadd.f32 %v9040_v47, %v3163_v45  ;;  %v7980_v19 = vld [vmem:[%s10558_s18 + $0x80] sm:$0xff] }
 0x208   : > { %v8993_v8 = vpop.f32.mrf.mxu1  ;;  %v9041_v51 = vpop.f32.mrf.mxu0 }
 0x209   : > { %v3164_v42 = vadd.f32 %v8993_v8, %v11111_v52  ;;  %v11344_v16 = vadd.f32 %v3456_v30, %v3161_v38 }
 0x20a   : > { %v3089_v46 = vpop.f32.mrf.mxu1  ;;  %v3459_v29 = vpop.f32.mrf.mxu0 }
 0x20b   : > { %v3162_v22 = vadd.f32 %v3089_v46, %v11118_v60  ;;  %v11350_v18 = vadd.f32 %v9041_v51, %v3164_v42  ;;  %v5823_v51 = vpack.c.bf16 %v7980_v19, %v7979_v6 }
 0x20c   : > { %v9060_v47 = vpop.f32.mrf.mxu1  ;;  %9347 = vmatmul.mubr.bf16.vlgmr.msra.gmra.mxu1 %v5821_v28  ;;  %v9108_v52 = vpop.f32.mrf.mxu0  ;;  %9395 = vmatmul.mubr.bf16.vlgmr.msra.gmra.mxu0 %v11105_v3  ;;  %v9685_v3 = vld [vmem:[%s12145_s3 + $0x228] sm:$0xff]  }
 0x20d   : > { %v11353_v45 = vadd.f32 %v3459_v29, %v3162_v22  ;;  %v3874_v57 = vadd.f32 %v9060_v47, %v11132_v35  ;;  %9427 = vmatpush3.bf16.msra.mxu1 %v11243_v36  ;;  %9350 = vmatprep.mubr.bf16.mxu1 %v5822_v7  ;;  %v9686_v22 = vld [vmem:[%s12145_s3 + $0x220] sm:$0xff]  }
 0x20e   : > { %v3713_v30 = vpop.f32.mrf.mxu1  ;;  %v4083_v60 = vpop.f32.mrf.mxu0  ;;  %9428 = vmatprep.subr.bf16.mxu1 %v9684_v15  ;;  %9398 = vmatprep.mubr.bf16.mxu0 %v11135_v55  ;;  %v5824_v55 = vpack.c.bf16 %v7982_v17, %v7981_v32 }
 0x20f   : > { %v3872_v38 = vadd.f32 %v3713_v30, %v11138_v5  ;;  %v11366_v8 = vadd.f32 %v9108_v52, %v3874_v57  ;;  %v7983_v57 = vld [vmem:[%s10558_s18 + $0xa8] sm:$0xff]  ;;  %v7985_v30 = vld [vmem:[%s10558_s18 + $0xc0] sm:$0xff] }
 0x210   : > { %v9061_v35 = vpop.f32.mrf.mxu1  ;;  %v9109_v36 = vpop.f32.mrf.mxu0 }
 0x211   : > { %v3875_v28 = vadd.f32 %v9061_v35, %v11146_v54  ;;  %v11369_v42 = vadd.f32 %v4083_v60, %v3872_v38  ;;  %9429 = vmatpush3.bf16.msra.mxu1 %v9684_v15  ;;  %v7986_v60 = vld [vmem:[%s10558_s18 + $0xc8] sm:$0xff] }
 0x212   : > { %v3716_v7 = vpop.f32.mrf.mxu1  ;;  %v4086_v46 = vpop.f32.mrf.mxu0  ;;  %9430 = vmatprep.subr.bf16.mxu1 %v9685_v3 }
 0x213   : > { %v3873_v29 = vadd.f32 %v3716_v7, %v11157_v62  ;;  %v11372_v5 = vadd.f32 %v9109_v36, %v3875_v28  ;;  %v7984_v62 = vld [vmem:[%s10558_s18 + $0xb0] sm:$0xff] }
 0x214   : > { %v9064_v54 = vpop.f32.mrf.mxu1  ;;  %9351 = vmatmul.mubr.bf16.gmra.mxu1 %v5823_v51  ;;  %v9112_v47 = vpop.f32.mrf.mxu0  ;;  %9399 = vmatmul.mubr.bf16.gmra.mxu0 %v11140_v10  ;;  %v9687_v10 = vld [vmem:[%s12145_s3 + $0x218] sm:$0xff]   ;;  %v5825_v35 = vpack.c.bf16 %v7984_v62, %v7983_v57  ;;  %v9688_v7 = vld [vmem:[%s12145_s3 + $0x210] sm:$0xff]  }
 0x215   : > { %v3878_v15 = vadd.f32 %v9064_v54, %v11166_v31  ;;  %v11379_v52 = vadd.f32 %v4086_v46, %v3873_v29  ;;  %9354 = vmatprep.mubr.bf16.mxu1 %v5824_v55  ;;  %9402 = vmatprep.mubr.bf16.mxu0 %v11171_v53  ;;  %v7989_v57 = vld [vmem:[%s10558_s18 + $0xf0] sm:$0xff]  ;;  %v7990_v62 = vld [vmem:[%s10558_s18 + $0xf8] sm:$0xff] }
 0x216   : > { %v3729_v6 = vpop.f32.mrf.mxu1  ;;  %v4099_v19 = vpop.f32.mrf.mxu0  ;;  %9431 = vmatpush3.bf16.msra.mxu1 %v9685_v3  ;;  %v5826_v3 = vpack.c.bf16 %v7986_v60, %v7985_v30 }
 0x217   : > { %v3876_v32 = vadd.f32 %v3729_v6, %v11174_v14  ;;  %v11387_v17 = vadd.f32 %v9112_v47, %v3878_v15  ;;  %9432 = vmatprep.subr.bf16.mxu1 %v9686_v22 }
 0x218   : > { %v9065_v31 = vpop.f32.mrf.mxu1  ;;  %v9113_v38 = vpop.f32.mrf.mxu0 }
 0x219   : > { %v3879_v36 = vadd.f32 %v9065_v31, %v11182_v13  ;;  %v11393_v53 = vadd.f32 %v4099_v19, %v3876_v32  ;;  %v5828_v31 = vpack.c.bf16 %v7990_v62, %v7989_v57 }
 0x21a   : > { %v3732_v51 = vpop.f32.mrf.mxu1  ;;  %v4102_v28 = vpop.f32.mrf.mxu0  ;;  %9433 = vmatpush3.bf16.msra.mxu1 %v9686_v22  ;;  %v7988_v22 = vld [vmem:[%s10558_s18 + $0xe0] sm:$0xff] }
 0x21b   : > { %v3877_v14 = vadd.f32 %v3732_v51, %v11193_v37  ;;  %v11396_v55 = vadd.f32 %v9113_v38, %v3879_v36  ;;  %9434 = vmatprep.subr.bf16.mxu1 %v9687_v10  ;;  %v7987_v37 = vld [vmem:[%s10558_s18 + $0xd8] sm:$0xff]  ;;  %v9690_v36 = vld [vmem:[%s12145_s3 + $0x200] sm:$0xff]  }
 0x21c   : > { %v9068_v13 = vpop.f32.mrf.mxu1  ;;  %9355 = vmatmul.mubr.bf16.gmra.mxu1 %v5825_v35  ;;  %v9116_v46 = vpop.f32.mrf.mxu0  ;;  %9403 = vmatmul.mubr.bf16.gmra.mxu0 %v11176_v41  ;;  %v9689_v41 = vld [vmem:[%s12145_s3 + $0x208] sm:$0xff]   ;;  %v5827_v60 = vpack.c.bf16 %v7988_v22, %v7987_v37 }
 0x21d   : > { %v3882_v29 = vadd.f32 %v9068_v13, %v11202_v4  ;;  %v11403_v54 = vadd.f32 %v4102_v28, %v3877_v14  ;;  %9358 = vmatprep.mubr.bf16.mxu1 %v5826_v3  ;;  %9406 = vmatprep.mubr.bf16.mxu0 %v11207_v44  ;;  %v7992_v14 = vld [vmem:[%s10558_s18 + $0x110] sm:$0xff] }
 0x21e   : > { %v3745_v47 = vpop.f32.mrf.mxu1  ;;  %v4115_v15 = vpop.f32.mrf.mxu0  ;;  %9435 = vmatpush3.bf16.msra.mxu1 %v9687_v10 }
 0x21f   : > { %v3880_v6 = vadd.f32 %v3745_v47, %v11210_v11  ;;  %v11411_v19 = vadd.f32 %v9116_v46, %v3882_v29  ;;  %9436 = vmatprep.subr.bf16.mxu1 %v9688_v7  ;;  %v7993_v46 = vld [vmem:[%s10558_s18 + $0x120] sm:$0xff]  ;;  %v7994_v29 = vld [vmem:[%s10558_s18 + $0x128] sm:$0xff] }
 0x220   : > { %v9069_v4 = vpop.f32.mrf.mxu1  ;;  %v9117_v30 = vpop.f32.mrf.mxu0 }
 0x221   : > { %v3883_v32 = vadd.f32 %v9069_v4, %v11218_v2  ;;  %v11417_v44 = vadd.f32 %v4115_v15, %v3880_v6 }
 0x222   : > { %v3748_v10 = vpop.f32.mrf.mxu1  ;;  %v4118_v38 = vpop.f32.mrf.mxu0  ;;  %9437 = vmatpush3.bf16.msra.mxu1 %v9688_v7 }
 0x223   : > { %v3881_v11 = vadd.f32 %v3748_v10, %v11229_v27  ;;  %v11420_v35 = vadd.f32 %v9117_v30, %v3883_v32  ;;  %9438 = vmatprep.subr.bf16.mxu1 %v9689_v41  ;;  %v7991_v27 = vld [vmem:[%s10558_s18 + $0x108] sm:$0xff]  ;;  %v7995_v32 = vld [vmem:[%s10558_s18 + $0x138] sm:$0xff] }
 0x224   : > { %v9072_v2 = vpop.f32.mrf.mxu1  ;;  %9359 = vmatmul.mubr.bf16.gmra.mxu1 %v5827_v60  ;;  %v9120_v3 = vpop.f32.mrf.mxu0  ;;  %9407 = vmatmul.mubr.bf16.gmra.mxu0 %v11212_v39 }
 0x225   : > { %v3886_v51 = vadd.f32 %v9072_v2, %v11238_v26  ;;  %v11427_v28 = vadd.f32 %v4118_v38, %v3881_v11  ;;  %9362 = vmatprep.mubr.bf16.mxu1 %v5828_v31  ;;  %9410 = vmatprep.mubr.bf16.mxu0 %v11245_v9  ;;  %v5829_v26 = vpack.c.bf16 %v7992_v14, %v7991_v27  ;;  %v7996_v31 = vld [vmem:[%s10558_s18 + $0x140] sm:$0xff]  ;;  %v7997_v11 = vld [vmem:[%s10558_s18 + $0x150] sm:$0xff] }
 0x226   : > { %v3761_v7 = vpop.f32.mrf.mxu1  ;;  %v4131_v13 = vpop.f32.mrf.mxu0  ;;  %9439 = vmatpush3.bf16.msra.mxu1 %v9689_v41  ;;  %v5830_v9 = vpack.c.bf16 %v7994_v29, %v7993_v46 }
 0x227   : > { %v3884_v37 = vadd.f32 %v3761_v7, %v11248_v12  ;;  %v11435_v22 = vadd.f32 %v9120_v3, %v3886_v51  ;;  %9440 = vmatprep.subr.bf16.mxu1 %v9690_v36 }
 0x228   : > { %v9073_v39 = vpop.f32.mrf.mxu1  ;;  %v9121_v47 = vpop.f32.mrf.mxu0 }
 0x229   : > { %v3887_v15 = vadd.f32 %v9073_v39, %v11253_v23  ;;  %v11438_v57 = vadd.f32 %v4131_v13, %v3884_v37  ;;  %v7999_v37 = vld [vmem:[%s10558_s18 + $0x168] sm:$0xff]  ;;  %v8000_v39 = vld [vmem:[%s10558_s18 + $0x170] sm:$0xff] }
 0x22a   : > { %v3764_v62 = vpop.f32.mrf.mxu1  ;;  %v4134_v6 = vpop.f32.mrf.mxu0  ;;  %9441 = vmatpush3.bf16.msra.mxu1 %v9690_v36 }
 0x22b   : > { %v3885_v12 = vadd.f32 %v3764_v62, %v11259_v56  ;;  %v11441_v41 = vadd.f32 %v9121_v47, %v3887_v15  ;;  %v7998_v56 = vld [vmem:[%s10558_s18 + $0x158] sm:$0xff]  ;;  %v8001_v15 = vld [vmem:[%s10558_s18 + $0x180] sm:$0xff] }
 0x22c   : > { %v9076_v4 = vpop.f32.mrf.mxu1  ;;  %9363 = vmatmul.mubr.bf16.gmra.mxu1 %v5829_v26  ;;  %v9124_v30 = vpop.f32.mrf.mxu0  ;;  %9411 = vmatmul.mubr.bf16.gmra.mxu0 %v11250_v49  ;;  %v5832_v14 = vpack.c.bf16 %v7998_v56, %v7997_v11  ;;  %v12176_v56 = vld [vmem:[#allocation4_spill] sm:$0xff] }
 0x22d   : > { %v3890_v23 = vadd.f32 %v9076_v4, %v11268_v48  ;;  %v11445_v60 = vadd.f32 %v4134_v6, %v3885_v12  ;;  %9366 = vmatprep.mubr.bf16.mxu1 %v5830_v9  ;;  %9414 = vmatprep.mubr.bf16.mxu0 %v11270_v33  ;;  %v5831_v48 = vpack.c.bf16 %v7996_v31, %v7995_v32  ;;  %v8002_v9 = vld [vmem:[%s10558_s18 + $0x188] sm:$0xff]  ;;  %v12174_v4 = vld [vmem:[#allocation6_spill] sm:$0xff]  ;;  %v12175_v31 = vld [vmem:[#allocation5_spill] sm:$0xff] }
 0x22e   : > { %v3777_v10 = vpop.f32.mrf.mxu1  ;;  %v4147_v38 = vpop.f32.mrf.mxu0 }
 0x22f   : > { %v3888_v36 = vadd.f32 %v3777_v10, %v11273_v40  ;;  %v11453_v2 = vadd.f32 %v9124_v30, %v3890_v23 }
 0x230   : > { %v9077_v3 = vpop.f32.mrf.mxu1  ;;  %v9125_v49 = vpop.f32.mrf.mxu0 }
 0x231   : > { %v3891_v51 = vadd.f32 %v9077_v3, %v11278_v34  ;;  %v11456_v27 = vadd.f32 %v4147_v38, %v3888_v36  ;;  %v8003_v36 = vld [vmem:[%s10558_s18 + $0x198] sm:$0xff] }
 0x232   : > { %v3780_v33 = vpop.f32.mrf.mxu1  ;;  %v11458_v7 = vpop.f32.mrf.mxu0 }
 0x233   : > { %v11461_v13 = vadd.f32 %v3780_v33, %v11283_v43  ;;  %v11463_v40 = vadd.f32 %v9125_v49, %v3891_v51  ;;  %v8004_v49 = vld [vmem:[%s10558_s18 + $0x1a0] sm:$0xff] }
 0x234   : > { %v9080_v46 = vpop.f32.mrf.mxu1  ;;  %9367 = vmatmul.mubr.bf16.gmra.mxu1 %v5831_v48  ;;  %v9128_v29 = vpop.f32.mrf.mxu0  ;;  %9415 = vmatmul.mubr.bf16.gmra.mxu0 %v11275_v24  ;;  %v5833_v24 = vpack.c.bf16 %v8000_v39, %v7999_v37  ;;  %v8059_v48 = vld [vmem:[%s10558_s18 + $0x199] sm:$0xff]  ;;  %v8060_v51 = vld [vmem:[%s10558_s18 + $0x1a1] sm:$0xff] }
 0x235   : > { %v3894_v34 = vadd.f32 %v9080_v46, %v11292_v21  ;;  %9370 = vmatprep.mubr.bf16.mxu1 %v5832_v14  ;;  %9418 = vmatprep.mubr.bf16.mxu0 %v11294_v1  ;;  %v5834_v1 = vpack.c.bf16 %v8002_v9, %v8001_v15  ;;  %v8085_v46 = vld [vmem:[%s10558_s18 + $0x32] sm:$0xff] }
 0x236   : > { %v3793_v47 = vpop.f32.mrf.mxu1  ;;  %v4163_v26 = vpop.f32.mrf.mxu0 }
 0x237   : > { %v3892_v43 = vadd.f32 %v3793_v47, %v11297_v20  ;;  %v11473_v62 = vadd.f32 %v9128_v29, %v3894_v34  ;;  %v8086_v29 = vld [vmem:[%s10558_s18 + $0x3a] sm:$0xff] }
 0x238   : > { %v9081_v6 = vpop.f32.mrf.mxu1  ;;  %v9129_v12 = vpop.f32.mrf.mxu0 }
 0x239   : > { %v3895_v21 = vadd.f32 %v9081_v6, %v12174_v4  ;;  %v11476_v30 = vadd.f32 %v4163_v26, %v3892_v43  ;;  %v5835_v26 = vpack.c.bf16 %v8004_v49, %v8003_v36 }
 0x23a   : > { %v3796_v23 = vpop.f32.mrf.mxu1  ;;  %v11478_v32 = vpop.f32.mrf.mxu0 }
 0x23b   : > { %v11481_v20 = vadd.f32 %v3796_v23, %v12175_v31  ;;  %v11483_v10 = vadd.f32 %v9129_v12, %v3895_v21 }
 0x23c   : > { %v9084_v38 = vpop.f32.mrf.mxu1  ;;  %9371 = vmatmul.mubr.bf16.gmra.mxu1 %v5833_v24  ;;  %v9132_v11 = vpop.f32.mrf.mxu0  ;;  %9419 = vmatmul.mubr.bf16.gmra.mxu0 %v12176_v56 }
 0x23d   : > { %v3898_v3 = vadd.f32 %v9084_v38, %v11318_v63  ;;  %9374 = vmatprep.mubr.bf16.mxu1 %v5834_v1  ;;  %9422 = vmatprep.mubr.bf16.mxu0 %v11320_v50  ;;  %v6205_v63 = vpack.c.bf16 %v8060_v51, %v8059_v48  ;;  %v6560_v50 = vpack.c.bf16 %v8086_v29, %v8085_v46  ;;  %v8088_v1 = vld [vmem:[%s10558_s18 + $0x52] sm:$0xff]  ;;  %v8089_v38 = vld [vmem:[%s10558_s18 + $0x62] sm:$0xff] }
 0x23e   : > { %v3809_v14 = vpop.f32.mrf.mxu1  ;;  %v4179_v33 = vpop.f32.mrf.mxu0 }
 0x23f   : > { %v3896_v34 = vadd.f32 %v3809_v14, %v11325_v0  ;;  %v11495_v37 = vadd.f32 %v9132_v11, %v3898_v3  ;;  %v8090_v11 = vld [vmem:[%s10558_s18 + $0x6a] sm:$0xff] }
 0x240   : > { %v9085_v39 = vpop.f32.mrf.mxu1  ;;  %v9133_v47 = vpop.f32.mrf.mxu0  ;;  %v6562_v51 = vpack.c.bf16 %v8090_v11, %v8089_v38 }
 0x241   : > { %v3899_v15 = vadd.f32 %v9085_v39, %v11328_v25  ;;  %v11498_v9 = vadd.f32 %v4179_v33, %v3896_v34  ;;  %v8087_v25 = vld [vmem:[%s10558_s18 + $0x4a] sm:$0xff] }
 0x242   : > { %v3812_v43 = vpop.f32.mrf.mxu1  ;;  %v11500_v6 = vpop.f32.mrf.mxu0  ;;  %v6561_v49 = vpack.c.bf16 %v8088_v1, %v8087_v25 }
 0x243   : > { %v11503_v0 = vadd.f32 %v3812_v43, %v11333_v58  ;;  %v11505_v12 = vadd.f32 %v9133_v47, %v3899_v15  ;;  %v8092_v47 = vld [vmem:[%s10558_s18 + $0x82] sm:$0xff]  ;;  %v8093_v15 = vld [vmem:[%s10558_s18 + $0x92] sm:$0xff] }
 0x244   : > { %v9088_v24 = vpop.f32.mrf.mxu1  ;;  %9375 = vmatmul.mubr.bf16.gmra.mxu1 %v5835_v26  ;;  %v9136_v4 = vpop.f32.mrf.mxu0  ;;  %9423 = vmatmul.mubr.bf16.gmra.mxu0 %v6205_v63 }
 0x245   : > { %v3902_v21 = vadd.f32 %v9088_v24, %v11341_v59  ;;  %9442 = vmatprep.mubr.bf16.mxu1 %v6560_v50  ;;  %v8094_v50 = vld [vmem:[%s10558_s18 + $0x9a] sm:$0xff] }
 0x246   : > { %v3825_v23 = vpop.f32.mrf.mxu1  ;;  %v4195_v31 = vpop.f32.mrf.mxu0  ;;  %v6564_v1 = vpack.c.bf16 %v8094_v50, %v8093_v15 }
 0x247   : > { %v3900_v56 = vadd.f32 %v3825_v23, %v11344_v16  ;;  %v11513_v36 = vadd.f32 %v9136_v4, %v3902_v21 }
 0x248   : > { %v9089_v58 = vpop.f32.mrf.mxu1  ;;  %v9137_v3 = vpop.f32.mrf.mxu0 }
 0x249   : > { %v3903_v48 = vadd.f32 %v9089_v58, %v11350_v18  ;;  %v11516_v59 = vadd.f32 %v4195_v31, %v3900_v56  ;;  %v8091_v18 = vld [vmem:[%s10558_s18 + $0x7a] sm:$0xff] }
 0x24a   : > { %v3828_v14 = vpop.f32.mrf.mxu1  ;;  %v11518_v33 = vpop.f32.mrf.mxu0  ;;  %v6563_v21 = vpack.c.bf16 %v8092_v47, %v8091_v18 }
 0x24b   : > { %v11521_v46 = vadd.f32 %v3828_v14, %v11353_v45  ;;  %v11523_v16 = vadd.f32 %v9137_v3, %v3903_v48  ;;  %v8096_v3 = vld [vmem:[%s10558_s18 + $0xb2] sm:$0xff]  ;;  %v8098_v14 = vld [vmem:[%s10558_s18 + $0xca] sm:$0xff] }
 0x24c   : > { %v9156_v29 = vpop.f32.mrf.mxu1  ;;  %9443 = vmatmul.mubr.bf16.vlgmr.msra.gmra.mxu1 %v6561_v49  ;;  %v9204_v34 = vpop.f32.mrf.mxu0 }
 0x24d   : > { %v4614_v39 = vadd.f32 %v9156_v29, %v11366_v8  ;;  %9446 = vmatprep.mubr.bf16.mxu1 %v6562_v51  ;;  %v8097_v51 = vld [vmem:[%s10558_s18 + $0xc2] sm:$0xff] }
 0x24e   : > { %v4453_v26 = vpop.f32.mrf.mxu1  ;;  %v4824_v63 = vpop.f32.mrf.mxu0 }
 0x24f   : > { %v4612_v43 = vadd.f32 %v4453_v26, %v11369_v42  ;;  %v11531_v24 = vadd.f32 %v9204_v34, %v4614_v39 }
 0x250   : > { %v9157_v45 = vpop.f32.mrf.mxu1  ;;  %v9205_v4 = vpop.f32.mrf.mxu0 }
 0x251   : > { %v4615_v25 = vadd.f32 %v9157_v45, %v11372_v5  ;;  %v11534_v8 = vadd.f32 %v4824_v63, %v4612_v43  ;;  %v8095_v5 = vld [vmem:[%s10558_s18 + $0xaa] sm:$0xff] }
 0x252   : > { %v4456_v23 = vpop.f32.mrf.mxu1  ;;  %v11536_v31 = vpop.f32.mrf.mxu0  ;;  %v6565_v18 = vpack.c.bf16 %v8096_v3, %v8095_v5 }
 0x253   : > { %v11539_v38 = vadd.f32 %v4456_v23, %v11379_v52  ;;  %v11541_v42 = vadd.f32 %v9205_v4, %v4615_v25  ;;  %v9691_v25 = vld [vmem:[%s12147_s5 + $0x38] sm:$0xff]  }
 0x254   : > { %v9160_v11 = vpop.f32.mrf.mxu1  ;;  %9447 = vmatmul.mubr.bf16.gmra.mxu1 %v6563_v21  ;;  %v9208_v56 = vpop.f32.mrf.mxu0  ;;  %v8100_v21 = vld [vmem:[%s10558_s18 + $0xe2] sm:$0xff]  ;;  %9474 = vmatprep.subr.bf16.mxu0 %v9691_v25 }
 0x255   : > { %v4618_v58 = vadd.f32 %v9160_v11, %v11387_v17  ;;  %9450 = vmatprep.mubr.bf16.mxu1 %v6564_v1  ;;  %v6566_v17 = vpack.c.bf16 %v8098_v14, %v8097_v51  ;;  %v8101_v11 = vld [vmem:[%s10558_s18 + $0xf2] sm:$0xff]  ;;  %9475 = vmatpush3.bf16.msra.mxu0 %v9691_v25 }
 0x256   : > { %v4469_v49 = vpop.f32.mrf.mxu1  ;;  %v4840_v48 = vpop.f32.mrf.mxu0 }
 0x257   : > { %v4616_v29 = vadd.f32 %v4469_v49, %v11393_v53  ;;  %v11549_v34 = vadd.f32 %v9208_v56, %v4618_v58  ;;  %v8102_v56 = vld [vmem:[%s10558_s18 + $0xfa] sm:$0xff] }
 0x258   : > { %v9161_v52 = vpop.f32.mrf.mxu1  ;;  %v9209_v39 = vpop.f32.mrf.mxu0  ;;  %v6568_v51 = vpack.c.bf16 %v8102_v56, %v8101_v11 }
 0x259   : > { %v4619_v47 = vadd.f32 %v9161_v52, %v11396_v55  ;;  %v11552_v26 = vadd.f32 %v4840_v48, %v4616_v29  ;;  %v8099_v55 = vld [vmem:[%s10558_s18 + $0xda] sm:$0xff] }
 0x25a   : > { %v4472_v63 = vpop.f32.mrf.mxu1  ;;  %v11554_v15 = vpop.f32.mrf.mxu0 }
 0x25b   : > { %v11557_v50 = vadd.f32 %v4472_v63, %v11403_v54  ;;  %v11559_v53 = vadd.f32 %v9209_v39, %v4619_v47  ;;  %v9692_v63 = vld [vmem:[%s12147_s5 + $0x30] sm:$0xff]  }
 0x25c   : > { %v9164_v43 = vpop.f32.mrf.mxu1  ;;  %9451 = vmatmul.mubr.bf16.gmra.mxu1 %v6565_v18  ;;  %v9212_v45 = vpop.f32.mrf.mxu0  ;;  %9476 = vmatprep.subr.bf16.mxu0 %v9692_v63 }
 0x25d   : > { %v4622_v4 = vadd.f32 %v9164_v43, %v11411_v19  ;;  %9454 = vmatprep.mubr.bf16.mxu1 %v6566_v17  ;;  %v6567_v19 = vpack.c.bf16 %v8100_v21, %v8099_v55  ;;  %v8104_v17 = vld [vmem:[%s10558_s18 + $0x112] sm:$0xff]  ;;  %v8106_v55 = vld [vmem:[%s10558_s18 + $0x12a] sm:$0xff]  ;;  %9477 = vmatpush3.bf16.msra.mxu0 %v9692_v63 }
 0x25e   : > { %v4485_v1 = vpop.f32.mrf.mxu1  ;;  %v4856_v23 = vpop.f32.mrf.mxu0 }
 0x25f   : > { %v4620_v54 = vadd.f32 %v4485_v1, %v11417_v44  ;;  %v11570_v58 = vadd.f32 %v9212_v45, %v4622_v4  ;;  %v8105_v4 = vld [vmem:[%s10558_s18 + $0x122] sm:$0xff] }
 0x260   : > { %v9165_v5 = vpop.f32.mrf.mxu1  ;;  %v9213_v3 = vpop.f32.mrf.mxu0  ;;  %v6570_v56 = vpack.c.bf16 %v8106_v55, %v8105_v4 }
 0x261   : > { %v4623_v49 = vadd.f32 %v9165_v5, %v11420_v35  ;;  %v11573_v48 = vadd.f32 %v4856_v23, %v4620_v54  ;;  %v8103_v35 = vld [vmem:[%s10558_s18 + $0x10a] sm:$0xff] }
 0x262   : > { %v4488_v14 = vpop.f32.mrf.mxu1  ;;  %v11575_v29 = vpop.f32.mrf.mxu0 }
 0x263   : > { %v11578_v44 = vadd.f32 %v4488_v14, %v11427_v28  ;;  %v11580_v52 = vadd.f32 %v9213_v3, %v4623_v49  ;;  %v8108_v14 = vld [vmem:[%s10558_s18 + $0x142] sm:$0xff] }
 0x264   : > { %v9168_v39 = vpop.f32.mrf.mxu1  ;;  %9455 = vmatmul.mubr.bf16.gmra.mxu1 %v6567_v19  ;;  %v9216_v18 = vpop.f32.mrf.mxu0 }
 0x265   : > { %v4626_v47 = vadd.f32 %v9168_v39, %v11435_v22  ;;  %9458 = vmatprep.mubr.bf16.mxu1 %v6568_v51  ;;  %v6569_v22 = vpack.c.bf16 %v8104_v17, %v8103_v35  ;;  %v9693_v39 = vld [vmem:[%s12147_s5 + $0x28] sm:$0xff]   ;;  %v8109_v35 = vld [vmem:[%s10558_s18 + $0x152] sm:$0xff]  ;;  %v8110_v17 = vld [vmem:[%s10558_s18 + $0x15a] sm:$0xff] }
 0x266   : > { %v4501_v43 = vpop.f32.mrf.mxu1  ;;  %v4872_v45 = vpop.f32.mrf.mxu0  ;;  %9478 = vmatprep.subr.bf16.mxu0 %v9693_v39 }
 0x267   : > { %v4624_v28 = vadd.f32 %v4501_v43, %v11438_v57  ;;  %v11591_v21 = vadd.f32 %v9216_v18, %v4626_v47  ;;  %9479 = vmatpush3.bf16.msra.mxu0 %v9693_v39 }
 0x268   : > { %v9169_v25 = vpop.f32.mrf.mxu1  ;;  %v9217_v1 = vpop.f32.mrf.mxu0 }
 0x269   : > { %v4627_v23 = vadd.f32 %v9169_v25, %v11441_v41  ;;  %v11594_v11 = vadd.f32 %v4872_v45, %v4624_v28  ;;  %v8107_v41 = vld [vmem:[%s10558_s18 + $0x13a] sm:$0xff]  ;;  %v6572_v25 = vpack.c.bf16 %v8110_v17, %v8109_v35  ;;  %v4263_v35 = vadd.f32 %v11478_v32, %v11481_v20  ;;  %v8116_v32 = vld [vmem:[%s10558_s18 + $0x1a2] sm:$0xff] }
 0x26a   : > { %v4504_v54 = vpop.f32.mrf.mxu1  ;;  %v11596_v5 = vpop.f32.mrf.mxu0  ;;  %v6571_v4 = vpack.c.bf16 %v8108_v14, %v8107_v41  ;;  %v9695_v20 = vld [vmem:[%s12147_s5 + $0x18] sm:$0xff]  }
 0x26b   : > { %v11599_v57 = vadd.f32 %v4504_v54, %v11445_v60  ;;  %v11601_v3 = vadd.f32 %v9217_v1, %v4627_v23 }
 0x26c   : > { %v9172_v19 = vpop.f32.mrf.mxu1  ;;  %9459 = vmatmul.mubr.bf16.gmra.mxu1 %v6569_v22  ;;  %v9220_v49 = vpop.f32.mrf.mxu0 }
 0x26d   : > { %v4630_v51 = vadd.f32 %v9172_v19, %v11453_v2  ;;  %9462 = vmatprep.mubr.bf16.mxu1 %v6570_v56  ;;  %v4259_v2 = vadd.f32 %v11458_v7, %v11461_v13  ;;  %v8112_v7 = vld [vmem:[%s10558_s18 + $0x172] sm:$0xff]  ;;  %v9694_v13 = vld [vmem:[%s12147_s5 + $0x20] sm:$0xff]  }
 0x26e   : > { %v4517_v18 = vpop.f32.mrf.mxu1  ;;  %v4888_v47 = vpop.f32.mrf.mxu0  ;;  %9480 = vmatprep.subr.bf16.mxu0 %v9694_v13 }
 0x26f   : > { %v4628_v60 = vadd.f32 %v4517_v18, %v11456_v27  ;;  %v11612_v63 = vadd.f32 %v9220_v49, %v4630_v51  ;;  %v8111_v51 = vld [vmem:[%s10558_s18 + $0x16a] sm:$0xff]  ;;  %9481 = vmatpush3.bf16.msra.mxu0 %v9694_v13 }
 0x270   : > { %v9173_v43 = vpop.f32.mrf.mxu1  ;;  %v9221_v45 = vpop.f32.mrf.mxu0  ;;  %9482 = vmatprep.subr.bf16.mxu0 %v9695_v20 }
 0x271   : > { %v4631_v55 = vadd.f32 %v9173_v43, %v11463_v40  ;;  %v11617_v28 = vadd.f32 %v4888_v47, %v4628_v60 }
 0x272   : > { %v4520_v1 = vpop.f32.mrf.mxu1  ;;  %v4891_v22 = vpop.f32.mrf.mxu0 }
 0x273   : > { %v4629_v27 = vadd.f32 %v4520_v1, %v4259_v2  ;;  %v11619_v23 = vadd.f32 %v9221_v45, %v4631_v55  ;;  %9483 = vmatpush3.bf16.msra.mxu0 %v9695_v20 }
 0x274   : > { %v9176_v56 = vpop.f32.mrf.mxu1  ;;  %9463 = vmatmul.mubr.bf16.gmra.mxu1 %v6571_v4  ;;  %v9224_v54 = vpop.f32.mrf.mxu0 }
 0x275   : > { %v4634_v19 = vadd.f32 %v9176_v56, %v11473_v62  ;;  %v11622_v49 = vadd.f32 %v4891_v22, %v4629_v27  ;;  %9466 = vmatprep.mubr.bf16.mxu1 %v6572_v25  ;;  %v6573_v62 = vpack.c.bf16 %v8112_v7, %v8111_v51  ;;  %v8115_v22 = vld [vmem:[%s10558_s18 + $0x19a] sm:$0xff] }
 0x276   : > { %v4533_v40 = vpop.f32.mrf.mxu1  ;;  %v4904_v41 = vpop.f32.mrf.mxu0 }
 0x277   : > { %v4632_v14 = vadd.f32 %v4533_v40, %v11476_v30  ;;  %v11630_v39 = vadd.f32 %v9224_v54, %v4634_v19 }
 0x278   : > { %v9177_v18 = vpop.f32.mrf.mxu1  ;;  %v9225_v47 = vpop.f32.mrf.mxu0 }
 0x279   : > { %v4635_v17 = vadd.f32 %v9177_v18, %v11483_v10  ;;  %v11635_v60 = vadd.f32 %v4904_v41, %v4632_v14 }
 0x27a   : > { %v4536_v43 = vpop.f32.mrf.mxu1  ;;  %v4907_v45 = vpop.f32.mrf.mxu0 }
 0x27b   : > { %v4633_v4 = vadd.f32 %v4536_v43, %v4263_v35  ;;  %v11637_v30 = vadd.f32 %v9225_v47, %v4635_v17 }
 0x27c   : > { %v9180_v2 = vpop.f32.mrf.mxu1  ;;  %9467 = vmatmul.mubr.bf16.gmra.mxu1 %v6573_v62  ;;  %v9228_v55 = vpop.f32.mrf.mxu0 }
 0x27d   : > { %v4638_v25 = vadd.f32 %v9180_v2, %v11495_v37  ;;  %v11640_v1 = vadd.f32 %v4907_v45, %v4633_v4  ;;  %9470 = vmatprep.mubr.bf16.mxu1 %v11322_v61  ;;  %v6575_v37 = vpack.c.bf16 %v8116_v32, %v8115_v22  ;;  %v4267_v61 = vadd.f32 %v11500_v6, %v11503_v0  ;;  %v9696_v6 = vld [vmem:[%s12147_s5 + $0x10] sm:$0xff]  }
 0x27e   : > { %v4549_v10 = vpop.f32.mrf.mxu1  ;;  %v4920_v27 = vpop.f32.mrf.mxu0  ;;  %9484 = vmatprep.subr.bf16.mxu0 %v9696_v6  ;;  %v4271_v2 = vadd.f32 %v11518_v33, %v11521_v46 }
 0x27f   : > { %v4636_v56 = vadd.f32 %v4549_v10, %v11498_v9  ;;  %v11649_v54 = vadd.f32 %v9228_v55, %v4638_v25  ;;  %9485 = vmatpush3.bf16.msra.mxu0 %v9696_v6 }
 0x280   : > { %v9181_v19 = vpop.f32.mrf.mxu1  ;;  %v9229_v51 = vpop.f32.mrf.mxu0 }
 0x281   : > { %v4639_v7 = vadd.f32 %v9181_v19, %v11505_v12  ;;  %v11654_v13 = vadd.f32 %v4920_v27, %v4636_v56 }
 0x282   : > { %v4552_v40 = vpop.f32.mrf.mxu1  ;;  %v4923_v41 = vpop.f32.mrf.mxu0 }
 0x283   : > { %v4637_v14 = vadd.f32 %v4552_v40, %v4267_v61  ;;  %v11656_v18 = vadd.f32 %v9229_v51, %v4639_v7  ;;  %v4984_v61 = vadd.f32 %v11536_v31, %v11539_v38 }
 0x284   : > { %v9184_v9 = vpop.f32.mrf.mxu1  ;;  %9471 = vmatmul.mubr.bf16.gmra.mxu1 %v6575_v37  ;;  %v9232_v47 = vpop.f32.mrf.mxu0 }
 0x285   : > { %v4642_v62 = vadd.f32 %v9184_v9, %v11513_v36  ;;  %v11659_v35 = vadd.f32 %v4923_v41, %v4637_v14 }
 0x286   : > { %v4565_v0 = vpop.f32.mrf.mxu1  ;;  %v4936_v12 = vpop.f32.mrf.mxu0 }
 0x287   : > { %v4640_v17 = vadd.f32 %v4565_v0, %v11516_v59  ;;  %v11665_v43 = vadd.f32 %v9232_v47, %v4642_v62  ;;  %v9698_v62 = vld [vmem:[%s12147_s5] sm:$0xff]  }
 0x288   : > { %v9185_v45 = vpop.f32.mrf.mxu1  ;;  %v9233_v4 = vpop.f32.mrf.mxu0 }
 0x289   : > { %v4643_v36 = vadd.f32 %v9185_v45, %v11523_v16  ;;  %v11670_v55 = vadd.f32 %v4936_v12, %v4640_v17  ;;  %v4988_v45 = vadd.f32 %v11554_v15, %v11557_v50 }
 0x28a   : > { %v4568_v25 = vpop.f32.mrf.mxu1  ;;  %v4939_v22 = vpop.f32.mrf.mxu0 }
 0x28b   : > { %v4641_v32 = vadd.f32 %v4568_v25, %v4271_v2  ;;  %v11672_v20 = vadd.f32 %v9233_v4, %v4643_v36 }
 0x28c   : > { %v9252_v10 = vpop.f32.mrf.mxu1  ;;  %v9300_v59 = vpop.f32.mrf.mxu0 }
 0x28d   : > { %v11674_v27 = vadd.f32 %v4939_v22, %v4641_v32  ;;  %v5355_v56 = vadd.f32 %v9252_v10, %v11531_v24  ;;  %v9697_v24 = vld [vmem:[%s12147_s5 + $0x8] sm:$0xff]  }
 0x28e   : > { %v5194_v19 = vpop.f32.mrf.mxu1  ;;  %v5564_v51 = vpop.f32.mrf.mxu0  ;;  %9486 = vmatprep.subr.bf16.mxu0 %v9697_v24 }
 0x28f   : > { %v5353_v37 = vadd.f32 %v5194_v19, %v11534_v8  ;;  %v11678_v33 = vadd.f32 %v9300_v59, %v5355_v56  ;;  %9487 = vmatpush3.bf16.msra.mxu0 %v9697_v24  ;;  %v4992_v19 = vadd.f32 %v11575_v29, %v11578_v44 }
 0x290   : > { %v9253_v46 = vpop.f32.mrf.mxu1  ;;  %v11680_v16 = vpop.f32.mrf.mxu0  ;;  %9488 = vmatprep.subr.bf16.mxu0 %v9698_v62 }
 0x291   : > { %v11685_v7 = vadd.f32 %v9253_v46, %v11541_v42  ;;  %v11687_v40 = vadd.f32 %v5564_v51, %v5353_v37 }
 0x292   : > { %v5197_v41 = vpop.f32.mrf.mxu1  ;;  %v11692_v14 = vpop.f32.mrf.mxu0 }
 0x293   : > { %v11694_v8 = vadd.f32 %v5197_v41, %v4984_v61  ;;  %9489 = vmatpush3.bf16.msra.mxu0 %v9698_v62 }
 0x294   : > { %v9256_v9 = vpop.f32.mrf.mxu1  ;;  %v9304_v47 = vpop.f32.mrf.mxu0 }
 0x295   : > { %v5359_v31 = vadd.f32 %v9256_v9, %v11549_v34 }
 0x296   : > { %v5210_v38 = vpop.f32.mrf.mxu1  ;;  %v5580_v42 = vpop.f32.mrf.mxu0 }
 0x297   : > { %v5357_v6 = vadd.f32 %v5210_v38, %v11552_v26  ;;  %v11701_v0 = vadd.f32 %v9304_v47, %v5359_v31 }
 0x298   : > { %v9257_v12 = vpop.f32.mrf.mxu1  ;;  %v11703_v17 = vpop.f32.mrf.mxu0 }
 0x299   : > { %v11708_v4 = vadd.f32 %v9257_v12, %v11559_v53  ;;  %v11710_v34 = vadd.f32 %v5580_v42, %v5357_v6 }
 0x29a   : > { %v5213_v2 = vpop.f32.mrf.mxu1  ;;  %v11712_v36 = vpop.f32.mrf.mxu0 }
 0x29b   : > { %v11714_v25 = vadd.f32 %v5213_v2, %v4988_v45 }
 0x29c   : > { %v9260_v26 = vpop.f32.mrf.mxu1  ;;  %v9308_v22 = vpop.f32.mrf.mxu0 }
 0x29d   : > { %v5363_v32 = vadd.f32 %v9260_v26, %v11570_v58 }
 0x29e   : > { %v5226_v10 = vpop.f32.mrf.mxu1  ;;  %v5596_v59 = vpop.f32.mrf.mxu0 }
 0x29f   : > { %v5361_v56 = vadd.f32 %v5226_v10, %v11573_v48  ;;  %v11718_v15 = vadd.f32 %v9308_v22, %v5363_v32 }
 0x2a0   : > { %v9261_v50 = vpop.f32.mrf.mxu1  ;;  %v11720_v53 = vpop.f32.mrf.mxu0 }
 0x2a1   : > { %v11725_v51 = vadd.f32 %v9261_v50, %v11580_v52  ;;  %v11727_v37 = vadd.f32 %v5596_v59, %v5361_v56  ;;  %v4996_v52 = vadd.f32 %v11596_v5, %v11599_v57 }
 0x2a2   : > { %v5229_v46 = vpop.f32.mrf.mxu1  ;;  %v11729_v61 = vpop.f32.mrf.mxu0 }
 0x2a3   : > { %v11731_v58 = vadd.f32 %v5229_v46, %v4992_v19 }
 0x2a4   : > { %v9264_v24 = vpop.f32.mrf.mxu1  ;;  %v9312_v48 = vpop.f32.mrf.mxu0 }
 0x2a5   : > { %v5367_v41 = vadd.f32 %v9264_v24, %v11591_v21 }
 0x2a6   : > { %v5242_v9 = vpop.f32.mrf.mxu1  ;;  %v5612_v47 = vpop.f32.mrf.mxu0 }
 0x2a7   : > { %v5365_v31 = vadd.f32 %v5242_v9, %v11594_v11  ;;  %v11735_v38 = vadd.f32 %v9312_v48, %v5367_v41 }
 0x2a8   : > { %v9265_v29 = vpop.f32.mrf.mxu1  ;;  %v11737_v44 = vpop.f32.mrf.mxu0 }
 0x2a9   : > { %v11742_v42 = vadd.f32 %v9265_v29, %v11601_v3  ;;  %v11744_v62 = vadd.f32 %v5612_v47, %v5365_v31 }
 0x2aa   : > { %v5245_v6 = vpop.f32.mrf.mxu1  ;;  %v11746_v12 = vpop.f32.mrf.mxu0 }
 0x2ab   : > { %v11748_v21 = vadd.f32 %v5245_v6, %v4996_v52 }
 0x2ac   : > { %v9268_v45 = vpop.f32.mrf.mxu1  ;;  %v9316_v11 = vpop.f32.mrf.mxu0 }
 0x2ad   : > { %v5371_v2 = vadd.f32 %v9268_v45, %v11612_v63 }
 0x2ae   : > { %v5258_v26 = vpop.f32.mrf.mxu1  ;;  %v5628_v22 = vpop.f32.mrf.mxu0 }
 0x2af   : > { %v5369_v32 = vadd.f32 %v5258_v26, %v11617_v28  ;;  %v11752_v10 = vadd.f32 %v9316_v11, %v5371_v2 }
 0x2b0   : > { %v9269_v5 = vpop.f32.mrf.mxu1  ;;  %v11754_v57 = vpop.f32.mrf.mxu0 }
 0x2b1   : > { %v11757_v3 = vadd.f32 %v9269_v5, %v11619_v23  ;;  %v11759_v59 = vadd.f32 %v5628_v22, %v5369_v32 }
 0x2b2   : > { %v5261_v56 = vpop.f32.mrf.mxu1  ;;  %v11761_v50 = vpop.f32.mrf.mxu0 }
 0x2b3   : > { %v11764_v19 = vadd.f32 %v5261_v56, %v11622_v49 }
 0x2b4   : > { %v9272_v63 = vpop.f32.mrf.mxu1  ;;  %v9320_v46 = vpop.f32.mrf.mxu0 }
 0x2b5   : > { %v5375_v28 = vadd.f32 %v9272_v63, %v11630_v39 }
 0x2b6   : > { %v5274_v24 = vpop.f32.mrf.mxu1  ;;  %v5644_v48 = vpop.f32.mrf.mxu0 }
 0x2b7   : > { %v5373_v41 = vadd.f32 %v5274_v24, %v11635_v60  ;;  %v11768_v9 = vadd.f32 %v9320_v46, %v5375_v28 }
 0x2b8   : > { %v9273_v23 = vpop.f32.mrf.mxu1  ;;  %v11770_v47 = vpop.f32.mrf.mxu0 }
 0x2b9   : > { %12177 = vst [vmem:[#allocation3_spill] sm:$0xff] %v11770_v47  ;;  %v11773_v31 = vadd.f32 %v9273_v23, %v11637_v30  ;;  %v11775_v29 = vadd.f32 %v5644_v48, %v5373_v41 }
 0x2ba   : > { %v5277_v49 = vpop.f32.mrf.mxu1  ;;  %v11777_v52 = vpop.f32.mrf.mxu0 }
 0x2bb   : > { %12178 = vst [vmem:[#allocation6_spill] sm:$0xff] %v11773_v31  ;;  %12179 = vst [vmem:[#allocation5_spill] sm:$0xff] %v11777_v52  ;;  %v11780_v6 = vadd.f32 %v5277_v49, %v11640_v1 }
 0x2bc   : > { %v9276_v39 = vpop.f32.mrf.mxu1  ;;  %v9324_v45 = vpop.f32.mrf.mxu0 }
 0x2bd   : > { %12180 = vst [vmem:[#allocation4_spill] sm:$0xff] %v11780_v6  ;;  %v5379_v60 = vadd.f32 %v9276_v39, %v11649_v54 }
 0x2be   : > { %v5290_v11 = vpop.f32.mrf.mxu1  ;;  %v5660_v2 = vpop.f32.mrf.mxu0 }
 0x2bf   : > { %v5377_v26 = vadd.f32 %v5290_v11, %v11654_v13  ;;  %v11784_v22 = vadd.f32 %v9324_v45, %v5379_v60 }
 0x2c0   : > { %v9277_v30 = vpop.f32.mrf.mxu1  ;;  %v11786_v32 = vpop.f32.mrf.mxu0 }
 0x2c1   : > { %12181 = vst [vmem:[#allocation7_spill] sm:$0xff] %v11786_v32  ;;  %v11789_v5 = vadd.f32 %v9277_v30, %v11656_v18  ;;  %v11791_v56 = vadd.f32 %v5660_v2, %v5377_v26 }
 0x2c2   : > { %v5293_v1 = vpop.f32.mrf.mxu1  ;;  %v11793_v63 = vpop.f32.mrf.mxu0 }
 0x2c3   : > { %12182 = vst [vmem:[#allocation8_spill] sm:$0xff] %v11789_v5  ;;  %12183 = vst [vmem:[#allocation9_spill] sm:$0xff] %v11793_v63  ;;  %v11796_v46 = vadd.f32 %v5293_v1, %v11659_v35 }
 0x2c4   : > { %v9280_v54 = vpop.f32.mrf.mxu1  ;;  %v9328_v28 = vpop.f32.mrf.mxu0 }
 0x2c5   : > { %12184 = vst [vmem:[#allocation10_spill] sm:$0xff] %v11796_v46  ;;  %v5383_v13 = vadd.f32 %v9280_v54, %v11665_v43 }
 0x2c6   : > { %v5306_v24 = vpop.f32.mrf.mxu1  ;;  %v5676_v48 = vpop.f32.mrf.mxu0 }
 0x2c7   : > { %v5381_v41 = vadd.f32 %v5306_v24, %v11670_v55  ;;  %v11800_v23 = vadd.f32 %v9328_v28, %v5383_v13 }
 0x2c8   : > { %v9281_v18 = vpop.f32.mrf.mxu1  ;;  %v11802_v49 = vpop.f32.mrf.mxu0 }
 0x2c9   : > { %12185 = vst [vmem:[#allocation11_spill] sm:$0xff] %v11802_v49  ;;  %v11805_v39 = vadd.f32 %v9281_v18, %v11672_v20  ;;  %v11807_v45 = vadd.f32 %v5676_v48, %v5381_v41 }
 0x2ca   : > { %v5309_v35 = vpop.f32.mrf.mxu1  ;;  %v11809_v60 = vpop.f32.mrf.mxu0 }
 0x2cb   : > { %12186 = vst [vmem:[#allocation12_spill] sm:$0xff] %v11805_v39  ;;  %12187 = vst [vmem:[#allocation13_spill] sm:$0xff] %v11809_v60  ;;  %v11812_v11 = vadd.f32 %v5309_v35, %v11674_v27 }
 0x2cc   : > { %v9348_v43 = vpop.f32.mrf.mxu1  ;;  %v11814_v2 = vpop.f32.mrf.mxu0 }
 0x2cd   : > { %12188 = vst [vmem:[#allocation14_spill] sm:$0xff] %v11812_v11  ;;  %v11817_v55 = vadd.f32 %v9348_v43, %v11678_v33 }
 0x2ce   : > { %v5935_v26 = vpop.f32.mrf.mxu1  ;;  %v11819_v30 = vpop.f32.mrf.mxu0 }
 0x2cf   : > { %v11822_v20 = vadd.f32 %v5935_v26, %v11687_v40 }
 0x2d0   : > { %v9349_v1 = vpop.f32.mrf.mxu1  ;;  %v11826_v28 = vpop.f32.mrf.mxu0 }
 0x2d2   : > { %v11824_v54 = vpop.f32.mrf.mxu1  ;;  %v11831_v24 = vpop.f32.mrf.mxu0 }
 0x2d4   : > { %v9352_v13 = vpop.f32.mrf.mxu1  ;;  %v11838_v18 = vpop.f32.mrf.mxu0 }
 0x2d5   : > { %v11829_v27 = vadd.f32 %v9352_v13, %v11701_v0 }
 0x2d6   : > { %v5951_v48 = vpop.f32.mrf.mxu1  ;;  %v11845_v26 = vpop.f32.mrf.mxu0 }
 0x2d7   : > { %v11834_v33 = vadd.f32 %v5951_v48, %v11710_v34 }
 0x2d8   : > { %v11836_v41 = vpop.f32.mrf.mxu1  ;;  %v11852_v34 = vpop.f32.mrf.mxu0 }
 0x2da   : > { %v11840_v40 = vpop.f32.mrf.mxu1  ;;  %v11859_v39 = vpop.f32.mrf.mxu0 }
 0x2dc   : > { %v9356_v35 = vpop.f32.mrf.mxu1 }
 0x2dd   : > { %v11843_v43 = vadd.f32 %v9356_v35, %v11718_v15 }
 0x2de   : > { %v5967_v0 = vpop.f32.mrf.mxu1 }
 0x2df   : > { %v11848_v13 = vadd.f32 %v5967_v0, %v11727_v37  ;;  %v11866_v37 = vpop.f32.mrf.mxu0 }
 0x2e0   : > { %v11850_v60 = vpop.f32.mrf.mxu1 }
 0x2e1   : > { %v11873_v5 = vpop.f32.mrf.mxu0 }
 0x2e2   : > { %v11854_v48 = vpop.f32.mrf.mxu1 }
 0x2e4   : > { %v9360_v11 = vpop.f32.mrf.mxu1 }
 0x2e5   : > { %v11857_v49 = vadd.f32 %v9360_v11, %v11735_v38 }
 0x2e6   : > { %v5983_v15 = vpop.f32.mrf.mxu1 }
 0x2e7   : > { %v11862_v35 = vadd.f32 %v5983_v15, %v11744_v62  ;;  %v11880_v62 = vpop.f32.mrf.mxu0 }
 0x2e8   : > { %v11864_v63 = vpop.f32.mrf.mxu1 }
 0x2e9   : > { %v11887_v31 = vpop.f32.mrf.mxu0 }
 0x2ea   : > { %v11868_v0 = vpop.f32.mrf.mxu1 }
 0x2ec   : > { %v9364_v46 = vpop.f32.mrf.mxu1 }
 0x2ed   : > { %v11871_v32 = vadd.f32 %v9364_v46, %v11752_v10 }
 0x2ee   : > { %v5999_v38 = vpop.f32.mrf.mxu1 }
 0x2ef   : > { %12189 = vst [vmem:[#allocation15_spill] sm:$0xff] %v11871_v32  ;;  %v11876_v11 = vadd.f32 %v5999_v38, %v11759_v59  ;;  %v11894_v59 = vpop.f32.mrf.mxu0 }
 0x2f0   : > { %v11878_v52 = vpop.f32.mrf.mxu1 }
 0x2f1   : > { %12190 = vst [vmem:[#allocation16_spill] sm:$0xff] %v11876_v11  ;;  %12191 = vst [vmem:[#allocation17_spill] sm:$0xff] %v11878_v52 }
 0x2f2   : > { %v11882_v15 = vpop.f32.mrf.mxu1 }
 0x2f3   : > { %12192 = vst [vmem:[#allocation18_spill] sm:$0xff] %v11882_v15  ;;  %v11901_v15 = vpop.f32.mrf.mxu0 }
 0x2f4   : > { %v9368_v6 = vpop.f32.mrf.mxu1 }
 0x2f5   : > { %v11885_v47 = vadd.f32 %v9368_v6, %v11768_v9 }
 0x2f6   : > { %v6015_v10 = vpop.f32.mrf.mxu1 }
 0x2f7   : > { %12193 = vst [vmem:[#allocation19_spill] sm:$0xff] %v11885_v47  ;;  %v11890_v46 = vadd.f32 %v6015_v10, %v11775_v29  ;;  %v11908_v29 = vpop.f32.mrf.mxu0 }
 0x2f8   : > { %v11892_v32 = vpop.f32.mrf.mxu1 }
 0x2f9   : > { %12194 = vst [vmem:[#allocation20_spill] sm:$0xff] %v11890_v46  ;;  %12195 = vst [vmem:[#allocation21_spill] sm:$0xff] %v11892_v32 }
 0x2fa   : > { %v11896_v38 = vpop.f32.mrf.mxu1 }
 0x2fb   : > { %12196 = vst [vmem:[#allocation22_spill] sm:$0xff] %v11896_v38  ;;  %v11915_v38 = vpop.f32.mrf.mxu0 }
 0x2fc   : > { %v9372_v11 = vpop.f32.mrf.mxu1 }
 0x2fd   : > { %v11899_v52 = vadd.f32 %v9372_v11, %v11784_v22 }
 0x2fe   : > { %v6031_v9 = vpop.f32.mrf.mxu1 }
 0x2ff   : > { %12197 = vst [vmem:[#allocation23_spill] sm:$0xff] %v11899_v52  ;;  %v11904_v6 = vadd.f32 %v6031_v9, %v11791_v56  ;;  %v5726_v56 = vadd.f32 %v11680_v16, %v11685_v7  ;;  %v11924_v9 = vpop.f32.mrf.mxu0  ;;  %v11940_v16 = vld [vmem:[%s12146_s4] ss:$0 sm:$0xff] }
 0x300   : > { %v11906_v47 = vpop.f32.mrf.mxu1 }
 0x301   : > { %12198 = vst [vmem:[#allocation24_spill] sm:$0xff] %v11904_v6 }
 0x302   : > { %v11910_v10 = vpop.f32.mrf.mxu1 }
 0x303   : > { %12199 = vst [vmem:[#allocation25_spill] sm:$0xff] %v11910_v10  ;;  %v5724_v10 = vadd.f32 %v11692_v14, %v11694_v8 }
 0x304   : > { %v9376_v46 = vpop.f32.mrf.mxu1 }
 0x305   : > { %v11913_v32 = vadd.f32 %v9376_v46, %v11800_v23  ;;  %v6466_v23 = vadd.f32 %v11814_v2, %v11817_v55  ;;  %v6097_v46 = vadd.f32 %v9349_v1, %v5726_v56  ;;  %v5730_v2 = vadd.f32 %v11703_v17, %v11708_v4 }
 0x306   : > { %v6047_v22 = vpop.f32.mrf.mxu1  ;;  %v5728_v1 = vadd.f32 %v11712_v36, %v11714_v25 }
 0x307   : > { %12200 = vst [vmem:[#allocation26_spill] sm:$0xff] %v11913_v32  ;;  %v11918_v11 = vadd.f32 %v6047_v22, %v11807_v45  ;;  %v6464_v45 = vadd.f32 %v11819_v30, %v11822_v20  ;;  %v6095_v22 = vadd.f32 %v11824_v54, %v5724_v10  ;;  %v6467_v14 = vadd.f32 %v11826_v28, %v6097_v46 }
 0x308   : > { %v11920_v52 = vpop.f32.mrf.mxu1  ;;  %v6101_v54 = vadd.f32 %v11836_v41, %v5730_v2  ;;  %v6470_v28 = vadd.f32 %v11838_v18, %v11829_v27 }
 0x309   : > { %12201 = vst [vmem:[#allocation27_spill] sm:$0xff] %v11918_v11  ;;  %12202 = vst [vmem:[#allocation28_spill] sm:$0xff] %v11920_v52  ;;  %v11935_v52 = vpop.f32.mrf.mxu0  ;;  %v6465_v30 = vadd.f32 %v11831_v24, %v6095_v22  ;;  %v6468_v24 = vadd.f32 %v11845_v26, %v11834_v33  ;;  %v5734_v33 = vadd.f32 %v11720_v53, %v11725_v51 }
 0x30a   : > { %v11926_v6 = vpop.f32.mrf.mxu1  ;;  %v6471_v22 = vadd.f32 %v11852_v34, %v6101_v54  ;;  %v5732_v34 = vadd.f32 %v11729_v61, %v11731_v58 }
 0x30b   : > { %v11950_v10 = vpop.f32.mrf.mxu0 }
 0x30c   : > { %v9444_v32 = vpop.f32.mrf.mxu1 }
 0x30d   : > { %v6836_v11 = vadd.f32 %v9444_v32, %v6466_v23 }
 0x30e   : > { %v6675_v7 = vpop.f32.mrf.mxu1 }
 0x30f   : > { %v6834_v8 = vadd.f32 %v6675_v7, %v6464_v45  ;;  %v6939_v20 = vadd.f32 %v11940_v16, %v6836_v11  ;;  %v6099_v11 = vadd.f32 %v11840_v40, %v5728_v1  ;;  %v11961_v7 = vpop.f32.mrf.mxu0 }
 0x310   : > { %v9445_v55 = vpop.f32.mrf.mxu1 }
 0x311   : > { %v6837_v32 = vadd.f32 %v9445_v55, %v6467_v14  ;;  %v6937_v23 = vadd.f32 %v11940_v16, %v6834_v8  ;;  %v6971_v36 = vmax.f32 %v6939_v20, 0.0  ;;  %v6469_v40 = vadd.f32 %v11859_v39, %v6099_v11  ;;  %v11970_v1 = vpop.f32.mrf.mxu0 }
 0x312   : > { %v6678_v56 = vpop.f32.mrf.mxu1 }
 0x313   : > { %v6940_v17 = vadd.f32 %v11940_v16, %v6837_v32  ;;  %v6835_v4 = vadd.f32 %v6678_v56, %v6465_v30  ;;  %v6969_v18 = vmax.f32 %v6937_v23, 0.0  ;;  %v6105_v32 = vadd.f32 %v11850_v60, %v5734_v33 }
 0x314   : > { %v9448_v46 = vpop.f32.mrf.mxu1  ;;  %v6474_v56 = vadd.f32 %v11866_v37, %v11843_v43  ;;  %v6103_v23 = vadd.f32 %v11854_v48, %v5732_v34  ;;  %v11981_v37 = vpop.f32.mrf.mxu0 }
 0x315   : > { %v6972_v25 = vmax.f32 %v6940_v17, 0.0  ;;  %v6938_v41 = vadd.f32 %v11940_v16, %v6835_v4  ;;  %v6840_v45 = vadd.f32 %v9448_v46, %v6470_v28  ;;  %v6472_v28 = vadd.f32 %v11873_v5, %v11848_v13 }
 0x316   : > { %v6691_v27 = vpop.f32.mrf.mxu1  ;;  %v6475_v43 = vadd.f32 %v11880_v62, %v6105_v32  ;;  %v5738_v5 = vadd.f32 %v11737_v44, %v11742_v42  ;;  %v6473_v48 = vadd.f32 %v11887_v31, %v6103_v23  ;;  %v5736_v62 = vadd.f32 %v11746_v12, %v11748_v21 }
 0x317   : > { %v7002_v14 = vpack.c.bf16 %v6972_v25, %v6971_v36  ;;  %v6970_v8 = vmax.f32 %v6938_v41, 0.0  ;;  %v6838_v2 = vadd.f32 %v6691_v27, %v6468_v24  ;;  %v6943_v55 = vadd.f32 %v11940_v16, %v6840_v45 }
 0x318   : > { %v9449_v26 = vpop.f32.mrf.mxu1  ;;  %v6109_v27 = vadd.f32 %v11864_v63, %v5738_v5  ;;  %v6107_v33 = vadd.f32 %v11868_v0, %v5736_v62 }
 0x319   : > { %v6841_v30 = vadd.f32 %v9449_v26, %v6471_v22  ;;  %v7001_v20 = vpack.c.bf16 %v6970_v8, %v6969_v18  ;;  %v6941_v53 = vadd.f32 %v11940_v16, %v6838_v2  ;;  %v6975_v58 = vmax.f32 %v6943_v55, 0.0  ;;  %v11990_v18 = vpop.f32.mrf.mxu0 }
 0x31a   : > { %v6694_v54 = vpop.f32.mrf.mxu1  ;;  %v6478_v8 = vadd.f32 %v11894_v59, %v11857_v49  ;;  %v6476_v2 = vadd.f32 %v11901_v15, %v11862_v35  ;;  %v6479_v49 = vadd.f32 %v11908_v29, %v6109_v27  ;;  %v5742_v35 = vadd.f32 %v11754_v57, %v11757_v3 }
 0x31b   : > { %v6944_v51 = vadd.f32 %v11940_v16, %v6841_v30  ;;  %v6839_v39 = vadd.f32 %v6694_v54, %v6469_v40  ;;  %9490 = vmatprep.mubr.bf16.mxu0 %v7001_v20  ;;  %v6973_v11 = vmax.f32 %v6941_v53, 0.0  ;;  %v12001_v59 = vpop.f32.mrf.mxu0  ;;  %v6477_v15 = vadd.f32 %v11915_v38, %v6107_v33  ;;  %v12205_v38 = vld [vmem:[#allocation16_spill] sm:$0xff] }
 0x31c   : > { %v9452_v61 = vpop.f32.mrf.mxu1  ;;  %9491 = vmatmul.mubr.bf16.vlgmr.msra.gmra.mxu0 %v7002_v14  ;;  %v5740_v29 = vadd.f32 %v11761_v50, %v11764_v19 }
 0x31d   : > { %v6976_v60 = vmax.f32 %v6944_v51, 0.0  ;;  %v6942_v17 = vadd.f32 %v11940_v16, %v6839_v39  ;;  %v6844_v4 = vadd.f32 %v9452_v61, %v6474_v56  ;;  %v12203_v51 = vld [vmem:[#allocation17_spill] sm:$0xff]  ;;  %v12204_v61 = vld [vmem:[#allocation15_spill] sm:$0xff] }
 0x31e   : > { %v6707_v24 = vpop.f32.mrf.mxu1  ;;  %v6113_v39 = vadd.f32 %v12203_v51, %v5742_v35 }
 0x31f   : > { %v7004_v46 = vpack.c.bf16 %v6976_v60, %v6975_v58  ;;  %v6974_v36 = vmax.f32 %v6942_v17, 0.0  ;;  %v6842_v25 = vadd.f32 %v6707_v24, %v6472_v28  ;;  %v6947_v41 = vadd.f32 %v11940_v16, %v6844_v4  ;;  %v9420_v28 = vpop.f32.mrf.mxu0  ;;  %v12206_v4 = vld [vmem:[#allocation18_spill] sm:$0xff] }
 0x320   : > { %v9453_v13 = vpop.f32.mrf.mxu1  ;;  %v6482_v58 = vadd.f32 %v11924_v9, %v12204_v61  ;;  %v6480_v17 = vadd.f32 %v11935_v52, %v12205_v38  ;;  %v6483_v9 = vadd.f32 %v11950_v10, %v6113_v39  ;;  %v12211_v10 = vld [vmem:[#allocation21_spill] sm:$0xff]  ;;  %v12215_v61 = vld [vmem:[#allocation8_spill] sm:$0xff] }
 0x321   : > { %v6845_v45 = vadd.f32 %v9453_v13, %v6475_v43  ;;  %v7003_v22 = vpack.c.bf16 %v6974_v36, %v6973_v11  ;;  %v6945_v44 = vadd.f32 %v11940_v16, %v6842_v25  ;;  %v6979_v21 = vmax.f32 %v6947_v41, 0.0  ;;  %v6401_v36 = vpop.f32.mrf.mxu0 }
 0x322   : > { %v6710_v14 = vpop.f32.mrf.mxu1  ;;  %v6111_v43 = vadd.f32 %v12206_v4, %v5740_v29  ;;  %v12217_v4 = vld [vmem:[#allocation10_spill] sm:$0xff] }
 0x323   : > { %v6948_v42 = vadd.f32 %v11940_v16, %v6845_v45  ;;  %v6843_v31 = vadd.f32 %v6710_v14, %v6473_v48  ;;  %9494 = vmatprep.mubr.bf16.mxu0 %v7003_v22  ;;  %v6977_v30 = vmax.f32 %v6945_v44, 0.0  ;;  %v12207_v45 = vld [vmem:[#allocation6_spill] sm:$0xff]  ;;  %v12208_v22 = vld [vmem:[#allocation3_spill] sm:$0xff] }
 0x324   : > { %v9456_v12 = vpop.f32.mrf.mxu1  ;;  %9495 = vmatmul.mubr.bf16.gmra.mxu0 %v7004_v46  ;;  %v5746_v52 = vadd.f32 %v12208_v22, %v12207_v45  ;;  %v6481_v27 = vadd.f32 %v11961_v7, %v6111_v43  ;;  %v12213_v7 = vld [vmem:[#allocation20_spill] sm:$0xff]  ;;  %v12218_v43 = vld [vmem:[#allocation9_spill] sm:$0xff] }
 0x325   : > { %v6980_v63 = vmax.f32 %v6948_v42, 0.0  ;;  %v6946_v26 = vadd.f32 %v11940_v16, %v6843_v31  ;;  %v6848_v40 = vadd.f32 %v9456_v12, %v6478_v8  ;;  %v12209_v42 = vld [vmem:[#allocation4_spill] sm:$0xff]  ;;  %v12210_v31 = vld [vmem:[#allocation5_spill] sm:$0xff]  ;;  %v9421_v12 = vpop.f32.mrf.mxu0 }
 0x326   : > { %v6723_v55 = vpop.f32.mrf.mxu1  ;;  %v6117_v33 = vadd.f32 %v12211_v10, %v5746_v52  ;;  %v12223_v10 = vld [vmem:[#allocation11_spill] sm:$0xff] }
 0x327   : > { %v7006_v20 = vpack.c.bf16 %v6980_v63, %v6979_v21  ;;  %v6978_v34 = vmax.f32 %v6946_v26, 0.0  ;;  %v6846_v32 = vadd.f32 %v6723_v55, %v6476_v2  ;;  %v6951_v54 = vadd.f32 %v11940_v16, %v6848_v40  ;;  %v12212_v63 = vld [vmem:[#allocation19_spill] sm:$0xff] }
 0x328   : > { %v9457_v0 = vpop.f32.mrf.mxu1  ;;  %v5744_v2 = vadd.f32 %v12210_v31, %v12209_v42  ;;  %v6486_v26 = vadd.f32 %v11970_v1, %v12212_v63  ;;  %v6487_v1 = vadd.f32 %v11990_v18, %v6117_v33 }
 0x329   : > { %v6849_v56 = vadd.f32 %v9457_v0, %v6479_v49  ;;  %v7005_v53 = vpack.c.bf16 %v6978_v34, %v6977_v30  ;;  %v6949_v60 = vadd.f32 %v11940_v16, %v6846_v32  ;;  %v6983_v50 = vmax.f32 %v6951_v54, 0.0 }
 0x32a   : > { %v6726_v23 = vpop.f32.mrf.mxu1  ;;  %v6484_v30 = vadd.f32 %v11981_v37, %v12213_v7 }
 0x32b   : > { %v6952_v57 = vadd.f32 %v11940_v16, %v6849_v56  ;;  %v6847_v3 = vadd.f32 %v6726_v23, %v6477_v15  ;;  %9498 = vmatprep.mubr.bf16.mxu0 %v7005_v53  ;;  %v6981_v5 = vmax.f32 %v6949_v60, 0.0  ;;  %v6404_v56 = vpop.f32.mrf.mxu0 }
 0x32c   : > { %v9460_v24 = vpop.f32.mrf.mxu1  ;;  %9499 = vmatmul.mubr.bf16.gmra.mxu0 %v7006_v20  ;;  %v12214_v20 = vld [vmem:[#allocation22_spill] sm:$0xff] }
 0x32d   : > { %v6984_v19 = vmax.f32 %v6952_v57, 0.0  ;;  %v6950_v11 = vadd.f32 %v11940_v16, %v6847_v3  ;;  %v6852_v46 = vadd.f32 %v9460_v24, %v6482_v58  ;;  %v6115_v34 = vadd.f32 %v12214_v20, %v5744_v2  ;;  %v12216_v58 = vld [vmem:[#allocation7_spill] sm:$0xff]  ;;  %v12222_v2 = vld [vmem:[#allocation12_spill] sm:$0xff] }
 0x32e   : > { %v6739_v25 = vpop.f32.mrf.mxu1  ;;  %v5750_v37 = vadd.f32 %v12216_v58, %v12215_v61  ;;  %v5748_v24 = vadd.f32 %v12218_v43, %v12217_v4  ;;  %v5754_v33 = vadd.f32 %v12223_v10, %v12222_v2 }
 0x32f   : > { %v7008_v13 = vpack.c.bf16 %v6984_v19, %v6983_v50  ;;  %v6982_v48 = vmax.f32 %v6950_v11, 0.0  ;;  %v6850_v41 = vadd.f32 %v6739_v25, %v6480_v17  ;;  %v6955_v14 = vadd.f32 %v11940_v16, %v6852_v46  ;;  %v9424_v50 = vpop.f32.mrf.mxu0  ;;  %v12219_v11 = vld [vmem:[#allocation23_spill] sm:$0xff] }
 0x330   : > { %v9461_v62 = vpop.f32.mrf.mxu1  ;;  %v6485_v57 = vadd.f32 %v12001_v59, %v6115_v34  ;;  %v6121_v18 = vadd.f32 %v11906_v47, %v5750_v37  ;;  %v6490_v46 = vadd.f32 %v9420_v28, %v12219_v11  ;;  %v12220_v59 = vld [vmem:[#allocation24_spill] sm:$0xff] }
 0x331   : > { %v6853_v8 = vadd.f32 %v9461_v62, %v6483_v9  ;;  %v7007_v44 = vpack.c.bf16 %v6982_v48, %v6981_v5  ;;  %v6953_v40 = vadd.f32 %v11940_v16, %v6850_v41  ;;  %v6987_v35 = vmax.f32 %v6955_v14, 0.0  ;;  %v12221_v48 = vld [vmem:[#allocation25_spill] sm:$0xff]  ;;  %v6417_v14 = vpop.f32.mrf.mxu0 }
 0x332   : > { %v6742_v21 = vpop.f32.mrf.mxu1  ;;  %v6119_v41 = vadd.f32 %v12221_v48, %v5748_v24 }
 0x333   : > { %v6956_v49 = vadd.f32 %v11940_v16, %v6853_v8  ;;  %v6851_v55 = vadd.f32 %v6742_v21, %v6481_v27  ;;  %9502 = vmatprep.mubr.bf16.mxu0 %v7007_v44  ;;  %v6985_v29 = vmax.f32 %v6953_v40, 0.0  ;;  %v6491_v27 = vadd.f32 %v9421_v12, %v6121_v18  ;;  %v9425_v20 = vpop.f32.mrf.mxu0 }
 0x334   : > { %v9464_v32 = vpop.f32.mrf.mxu1  ;;  %9503 = vmatmul.mubr.bf16.gmra.mxu0 %v7008_v13  ;;  %v6488_v13 = vadd.f32 %v6401_v36, %v12220_v59  ;;  %v6489_v21 = vadd.f32 %v6404_v56, %v6119_v41 }
 0x335   : > { %v6988_v0 = vmax.f32 %v6956_v49, 0.0  ;;  %v6954_v15 = vadd.f32 %v11940_v16, %v6851_v55  ;;  %v6856_v54 = vadd.f32 %v9464_v32, %v6486_v26  ;;  %v12224_v49 = vld [vmem:[#allocation14_spill] sm:$0xff]  ;;  %v12225_v55 = vld [vmem:[#allocation13_spill] sm:$0xff]  ;;  %v6420_v37 = vpop.f32.mrf.mxu0 }
 0x336   : > { %v6755_v53 = vpop.f32.mrf.mxu1  ;;  %v5752_v7 = vadd.f32 %v12225_v55, %v12224_v49  ;;  %v12227_v32 = vld [vmem:[#allocation26_spill] sm:$0xff] }
 0x337   : > { %v7010_v51 = vpack.c.bf16 %v6988_v0, %v6987_v35  ;;  %v6986_v39 = vmax.f32 %v6954_v15, 0.0  ;;  %v6854_v23 = vadd.f32 %v6755_v53, %v6484_v30  ;;  %v6959_v3 = vadd.f32 %v11940_v16, %v6856_v54  ;;  %v12226_v30 = vld [vmem:[#allocation28_spill] sm:$0xff] }
 0x338   : > { %v9465_v60 = vpop.f32.mrf.mxu1  ;;  %v6125_v12 = vadd.f32 %v12226_v30, %v5754_v33  ;;  %v6494_v35 = vadd.f32 %v9424_v50, %v12227_v32  ;;  %v6123_v53 = vadd.f32 %v11926_v6, %v5752_v7 }
 0x339   : > { %v6857_v38 = vadd.f32 %v9465_v60, %v6487_v1  ;;  %v7009_v17 = vpack.c.bf16 %v6986_v39, %v6985_v29  ;;  %v6957_v9 = vadd.f32 %v11940_v16, %v6854_v23  ;;  %v6991_v22 = vmax.f32 %v6959_v3, 0.0  ;;  %v12228_v1 = vld [vmem:[#allocation27_spill] sm:$0xff] }
 0x33a   : > { %v6758_v19 = vpop.f32.mrf.mxu1  ;;  %v6492_v56 = vadd.f32 %v6417_v14, %v12228_v1  ;;  %v6495_v58 = vadd.f32 %v9425_v20, %v6125_v12  ;;  %v6493_v43 = vadd.f32 %v6420_v37, %v6123_v53 }
 0x33b   : > { %v6960_v25 = vadd.f32 %v11940_v16, %v6857_v38  ;;  %v6855_v5 = vadd.f32 %v6758_v19, %v6485_v57  ;;  %9506 = vmatprep.mubr.bf16.mxu0 %v7009_v17  ;;  %v6989_v8 = vmax.f32 %v6957_v9, 0.0 }
 0x33c   : > { %v9468_v45 = vpop.f32.mrf.mxu1  ;;  %9507 = vmatmul.mubr.bf16.gmra.mxu0 %v7010_v51 }
 0x33d   : > { %v6992_v52 = vmax.f32 %v6960_v25, 0.0  ;;  %v6958_v47 = vadd.f32 %v11940_v16, %v6855_v5  ;;  %v6860_v62 = vadd.f32 %v9468_v45, %v6490_v46  ;;  %v12068_v45 = vld [vmem:[%s12148_s6] ss:$0 sm:$0xff] }
 0x33e   : > { %v6771_v28 = vpop.f32.mrf.mxu1 }
 0x33f   : > { %v7012_v44 = vpack.c.bf16 %v6992_v52, %v6991_v22  ;;  %v6990_v42 = vmax.f32 %v6958_v47, 0.0  ;;  %v6858_v31 = vadd.f32 %v6771_v28, %v6488_v13  ;;  %v6963_v63 = vadd.f32 %v11940_v16, %v6860_v62 }
 0x340   : > { %v9469_v36 = vpop.f32.mrf.mxu1 }
 0x341   : > { %v6861_v26 = vadd.f32 %v9469_v36, %v6491_v27  ;;  %v7011_v40 = vpack.c.bf16 %v6990_v42, %v6989_v8  ;;  %v6961_v0 = vadd.f32 %v11940_v16, %v6858_v31  ;;  %v6995_v51 = vmax.f32 %v6963_v63, 0.0 }
 0x342   : > { %v6774_v34 = vpop.f32.mrf.mxu1 }
 0x343   : > { %v6964_v15 = vadd.f32 %v11940_v16, %v6861_v26  ;;  %v6859_v54 = vadd.f32 %v6774_v34, %v6489_v21  ;;  %9510 = vmatprep.mubr.bf16.mxu0 %v7011_v40  ;;  %v6993_v57 = vmax.f32 %v6961_v0, 0.0 }
 0x344   : > { %v9472_v29 = vpop.f32.mrf.mxu1  ;;  %9511 = vmatmul.mubr.bf16.gmra.mxu0 %v7012_v44 }
 0x345   : > { %v6996_v39 = vmax.f32 %v6964_v15, 0.0  ;;  %v6962_v23 = vadd.f32 %v11940_v16, %v6859_v54  ;;  %v6864_v61 = vadd.f32 %v9472_v29, %v6494_v35 }
 0x346   : > { %v6787_v60 = vpop.f32.mrf.mxu1 }
 0x347   : > { %v7014_v3 = vpack.c.bf16 %v6996_v39, %v6995_v51  ;;  %v6994_v38 = vmax.f32 %v6962_v23, 0.0  ;;  %v6862_v17 = vadd.f32 %v6787_v60, %v6492_v56  ;;  %v6967_v24 = vadd.f32 %v11940_v16, %v6864_v61 }
 0x348   : > { %v9473_v4 = vpop.f32.mrf.mxu1 }
 0x349   : > { %v6865_v18 = vadd.f32 %v9473_v4, %v6495_v58  ;;  %v7013_v6 = vpack.c.bf16 %v6994_v38, %v6993_v57  ;;  %v6965_v19 = vadd.f32 %v11940_v16, %v6862_v17  ;;  %v6999_v9 = vmax.f32 %v6967_v24, 0.0 }
 0x34a   : > { %v6790_v50 = vpop.f32.mrf.mxu1 }
 0x34b   : > { %v6968_v11 = vadd.f32 %v11940_v16, %v6865_v18  ;;  %v6863_v46 = vadd.f32 %v6790_v50, %v6493_v43  ;;  %9514 = vmatprep.mubr.bf16.mxu0 %v7013_v6  ;;  %v6997_v59 = vmax.f32 %v6965_v19, 0.0 }
 0x34c   : > { %9515 = vmatmul.mubr.bf16.gmra.mxu0 %v7014_v3 }
 0x34d   : > { %v7000_v25 = vmax.f32 %v6968_v11, 0.0  ;;  %v6966_v5 = vadd.f32 %v11940_v16, %v6863_v46 }
 0x34f   : > { %v7016_v13 = vpack.c.bf16 %v7000_v25, %v6999_v9  ;;  %v6998_v48 = vmax.f32 %v6966_v5, 0.0 }
 0x351   : > { %v7015_v41 = vpack.c.bf16 %v6998_v48, %v6997_v59 }
 0x353   : > { %9518 = vmatprep.mubr.bf16.mxu0 %v7015_v41 }
 0x354   : > { %9519 = vmatmul.mubr.bf16.gmra.mxu0 %v7016_v13 }
 0x3dc   : > { %v9492_v16 = vpop.f32.mrf.mxu0 }
 0x3dd   : > { %v7131_v22 = vadd.f32 %v9492_v16, %v12068_v45 }
 0x3de   : > { %v7122_v52 = vpop.f32.mrf.mxu0 }
 0x3df   : > { %7251 = vst [vmem:[%s12073_s29 + $0x10] sm:$0xff] %v7131_v22  ;;  %v7123_v47 = vadd.f32 %v12068_v45, %v7122_v52 }
 0x3e0   : > { %v9493_v62 = vpop.f32.mrf.mxu0 }
 0x3e1   : > { %7249 = vst [vmem:[%s12073_s29] sm:$0xff] %v7123_v47  ;;  %v7134_v27 = vadd.f32 %v9493_v62, %v12068_v45 }
 0x3e2   : > { %v7125_v14 = vpop.f32.mrf.mxu0 }
 0x3e3   : > { %7252 = vst [vmem:[%s12073_s29 + $0x18] sm:$0xff] %v7134_v27  ;;  %v7126_v28 = vadd.f32 %v12068_v45, %v7125_v14 }
 0x3e4   : > { %v9496_v8 = vpop.f32.mrf.mxu0 }
 0x3e5   : > { %7250 = vst [vmem:[%s12073_s29 + $0x8] sm:$0xff] %v7126_v28  ;;  %v7147_v44 = vadd.f32 %v9496_v8, %v12068_v45 }
 0x3e6   : > { %v7138_v42 = vpop.f32.mrf.mxu0 }
 0x3e7   : > { %7255 = vst [vmem:[%s12073_s29 + $0x30] sm:$0xff] %v7147_v44  ;;  %v7139_v31 = vadd.f32 %v12068_v45, %v7138_v42 }
 0x3e8   : > { %v9497_v2 = vpop.f32.mrf.mxu0 }
 0x3e9   : > { %7253 = vst [vmem:[%s12073_s29 + $0x20] sm:$0xff] %v7139_v31  ;;  %v7150_v10 = vadd.f32 %v9497_v2, %v12068_v45 }
 0x3ea   : > { %v7141_v33 = vpop.f32.mrf.mxu0 }
 0x3eb   : > { %7256 = vst [vmem:[%s12073_s29 + $0x38] sm:$0xff] %v7150_v10  ;;  %v7142_v36 = vadd.f32 %v12068_v45, %v7141_v33 }
 0x3ec   : > { %v9500_v21 = vpop.f32.mrf.mxu0 }
 0x3ed   : > { %7254 = vst [vmem:[%s12073_s29 + $0x28] sm:$0xff] %v7142_v36  ;;  %v7163_v63 = vadd.f32 %v9500_v21, %v12068_v45 }
 0x3ee   : > { %v7154_v26 = vpop.f32.mrf.mxu0 }
 0x3ef   : > { %7259 = vst [vmem:[%s12073_s29 + $0x50] sm:$0xff] %v7163_v63  ;;  %v7155_v40 = vadd.f32 %v12068_v45, %v7154_v26 }
 0x3f0   : > { %v9501_v49 = vpop.f32.mrf.mxu0 }
 0x3f1   : > { %7257 = vst [vmem:[%s12073_s29 + $0x40] sm:$0xff] %v7155_v40  ;;  %v7166_v55 = vadd.f32 %v9501_v49, %v12068_v45 }
 0x3f2   : > { %v7157_v7 = vpop.f32.mrf.mxu0 }
 0x3f3   : > { %7260 = vst [vmem:[%s12073_s29 + $0x58] sm:$0xff] %v7166_v55  ;;  %v7158_v30 = vadd.f32 %v12068_v45, %v7157_v7 }
 0x3f4   : > { %v9504_v12 = vpop.f32.mrf.mxu0 }
 0x3f5   : > { %7258 = vst [vmem:[%s12073_s29 + $0x48] sm:$0xff] %v7158_v30  ;;  %v7179_v20 = vadd.f32 %v9504_v12, %v12068_v45 }
 0x3f6   : > { %v7170_v34 = vpop.f32.mrf.mxu0 }
 0x3f7   : > { %7263 = vst [vmem:[%s12073_s29 + $0x70] sm:$0xff] %v7179_v20  ;;  %v7171_v32 = vadd.f32 %v12068_v45, %v7170_v34 }
 0x3f8   : > { %v9505_v35 = vpop.f32.mrf.mxu0 }
 0x3f9   : > { %7261 = vst [vmem:[%s12073_s29 + $0x60] sm:$0xff] %v7171_v32  ;;  %v7182_v0 = vadd.f32 %v9505_v35, %v12068_v45 }
 0x3fa   : > { %v7173_v15 = vpop.f32.mrf.mxu0 }
 0x3fb   : > { %7264 = vst [vmem:[%s12073_s29 + $0x78] sm:$0xff] %v7182_v0  ;;  %v7174_v54 = vadd.f32 %v12068_v45, %v7173_v15 }
 0x3fc   : > { %v9508_v1 = vpop.f32.mrf.mxu0 }
 0x3fd   : > { %7262 = vst [vmem:[%s12073_s29 + $0x68] sm:$0xff] %v7174_v54  ;;  %v7195_v56 = vadd.f32 %v9508_v1, %v12068_v45 }
 0x3fe   : > { %v7186_v53 = vpop.f32.mrf.mxu0 }
 0x3ff   : > { %7267 = vst [vmem:[%s12073_s29 + $0x90] sm:$0xff] %v7195_v56  ;;  %v7187_v29 = vadd.f32 %v12068_v45, %v7186_v53 }
 0x400   : > { %v9509_v51 = vpop.f32.mrf.mxu0 }
 0x401   : > { %7265 = vst [vmem:[%s12073_s29 + $0x80] sm:$0xff] %v7187_v29  ;;  %v7198_v39 = vadd.f32 %v9509_v51, %v12068_v45 }
 0x402   : > { %v7189_v23 = vpop.f32.mrf.mxu0 }
 0x403   : > { %7268 = vst [vmem:[%s12073_s29 + $0x98] sm:$0xff] %v7198_v39  ;;  %v7190_v61 = vadd.f32 %v12068_v45, %v7189_v23 }
 0x404   : > { %v9512_v58 = vpop.f32.mrf.mxu0 }
 0x405   : > { %7266 = vst [vmem:[%s12073_s29 + $0x88] sm:$0xff] %v7190_v61  ;;  %v7211_v37 = vadd.f32 %v9512_v58, %v12068_v45 }
 0x406   : > { %v7202_v60 = vpop.f32.mrf.mxu0 }
 0x407   : > { %7271 = vst [vmem:[%s12073_s29 + $0xb0] sm:$0xff] %v7211_v37  ;;  %v7203_v57 = vadd.f32 %v12068_v45, %v7202_v60 }
 0x408   : > { %v9513_v3 = vpop.f32.mrf.mxu0 }
 0x409   : > { %7269 = vst [vmem:[%s12073_s29 + $0xa0] sm:$0xff] %v7203_v57  ;;  %v7214_v38 = vadd.f32 %v9513_v3, %v12068_v45 }
 0x40a   : > { %v7205_v17 = vpop.f32.mrf.mxu0 }
 0x40b   : > { %7272 = vst [vmem:[%s12073_s29 + $0xb8] sm:$0xff] %v7214_v38  ;;  %v7206_v4 = vadd.f32 %v12068_v45, %v7205_v17 }
 0x40c   : > { %v9516_v43 = vpop.f32.mrf.mxu0 }
 0x40d   : > { %7270 = vst [vmem:[%s12073_s29 + $0xa8] sm:$0xff] %v7206_v4  ;;  %v7227_v24 = vadd.f32 %v9516_v43, %v12068_v45 }
 0x40e   : > { %v7218_v18 = vpop.f32.mrf.mxu0 }
 0x40f   : > { %7275 = vst [vmem:[%s12073_s29 + $0xd0] sm:$0xff] %v7227_v24  ;;  %v7219_v6 = vadd.f32 %v12068_v45, %v7218_v18 }
 0x410   : > { %v9517_v50 = vpop.f32.mrf.mxu0 }
 0x411   : > { %7273 = vst [vmem:[%s12073_s29 + $0xc0] sm:$0xff] %v7219_v6  ;;  %v7230_v19 = vadd.f32 %v9517_v50, %v12068_v45 }
 0x412   : > { %v7221_v11 = vpop.f32.mrf.mxu0 }
 0x413   : > { %7276 = vst [vmem:[%s12073_s29 + $0xd8] sm:$0xff] %v7230_v19  ;;  %v7222_v46 = vadd.f32 %v12068_v45, %v7221_v11 }
 0x414   : > { %v9520_v9 = vpop.f32.mrf.mxu0 }
 0x415   : > { %7274 = vst [vmem:[%s12073_s29 + $0xc8] sm:$0xff] %v7222_v46  ;;  %v7243_v25 = vadd.f32 %v9520_v9, %v12068_v45 }
 0x416   : > { %v7234_v5 = vpop.f32.mrf.mxu0 }
 0x417   : > { %7279 = vst [vmem:[%s12073_s29 + $0xf0] sm:$0xff] %v7243_v25  ;;  %v7235_v59 = vadd.f32 %v12068_v45, %v7234_v5 }
 0x418   : > { %v9521_v13 = vpop.f32.mrf.mxu0 }
 0x419   : > { %7277 = vst [vmem:[%s12073_s29 + $0xe0] sm:$0xff] %v7235_v59  ;;  %v7246_v48 = vadd.f32 %v9521_v13, %v12068_v45 }
 0x41a   : > { %v7237_v41 = vpop.f32.mrf.mxu0 }
 0x41b   : > { %7280 = vst [vmem:[%s12073_s29 + $0xf8] sm:$0xff] %v7246_v48  ;;  %v7238_v16 = vadd.f32 %v12068_v45, %v7237_v41 }
 0x41d   : > { %7278 = vst [vmem:[%s12073_s29 + $0xe8] sm:$0xff] %v7238_v16 }
 0x41e PF: > { %s17_s24 = sadd.s32 1, %s9705_s24  }
 0x41f   : > { %p14_p4 = scmp.ge.s32.totalorder %s17_s24, 4  }
 0x421   :  { %16 = sbr.rel (!%p14_p4) target bundleno = 1 (0x1), region = 101 }

</bundles_post_ra>
